<compile_context>
chip_gen: v6e
topology: v6e:2x2x1
jax: 0.10.0
libtpu: 0.0.40
codegen_flags: <defaults>
</compile_context>

<pallas_src>
import functools

import jax
import jax.numpy as jnp
from jax.experimental import pallas as pl
from jax.experimental.pallas import tpu as pltpu

EPS = 1e-5        # PyTorch BatchNorm default eps
N_CPAD = 128      # classes padded to one full 128-lane tile (unmasked stores)
B_TILE = 8        # samples per grid step (batch-innermost rows everywhere)


def _make_kernel(input_dim, n_classes):
    """Fused forward kernel for a block of B_TILE samples."""
    H = input_dim
    h1 = H - 2                 # conv1 output spatial
    q1 = h1 // 2               # after first 2x2 max-pool
    h2 = q1 - 2                # conv2 output spatial
    p2 = h2 // 2               # after second 2x2 max-pool
    B = B_TILE
    NJ = h1 * B                # conv1 rows: r = j*B + b
    M2 = ((h2 - 1) * (h1 + 2) + 1) * B   # conv2 matmul rows (covers every valid output row)

    def kernel(x_ref, w1_ref, aux1_ref, w2_ref, aux2_ref, wfc1_ref, auxf_ref,
               wfc2_ref, bfc2_ref, out_ref, y1_ref, p1_ref, y2_ref):
        f32 = jnp.float32

        # ---- stage 1: conv1 -> ReLU -> BN2d(eval): one MXU matmul -------------------
        # lhs[j*B+b, kw*H+h] = x[b, 0, h, j+kw];  cols of y1 = i*32 + c
        lhs = x_ref[...].reshape(NJ, 3 * H)
        aux1 = aux1_ref[...]                                   # [3, h1*32] bias/scale/shift
        y1 = jnp.dot(lhs, w1_ref[...], preferred_element_type=f32)       # [NJ, h1*32]
        y1 = jnp.maximum(y1 + aux1[0:1, :], 0.0) * aux1[1:2, :] + aux1[2:3, :]
        y1_ref[pl.ds(0, NJ), :] = y1
        y1_ref[pl.ds(NJ, 8), :] = jnp.zeros((8, h1 * 32), f32)  # pad rows read by pooling

        # ---- stage 2a: 2x2 max-pool fused with relayout -> p1[(pi*h1 + j)*B + b, c] --
        for pi in range(q1):
            a = y1_ref[pl.ds(0, NJ), pl.ds(pi * 64, 64)]       # rows j,   cols i=2pi,2pi+1
            b_ = y1_ref[pl.ds(B, NJ), pl.ds(pi * 64, 64)]      # rows j+1
            m = jnp.maximum(a, b_)                             # pooled over W (j pairs)
            p1_ref[pl.ds(pi * NJ, NJ), :] = jnp.maximum(m[:, 0:32], m[:, 32:64])  # over H

        # ---- stage 2b: conv2 as 9 accumulating MXU matmuls on row-shifted p1 views --
        y2_ref[...] = jnp.dot(p1_ref[pl.ds(0, M2), :], w2_ref[0],
                              preferred_element_type=f32)
        for t in range(1, 9):
            di, dj = t // 3, t % 3
            off = (di * h1 + 2 * dj) * B
            y2_ref[...] += jnp.dot(p1_ref[pl.ds(off, M2), :], w2_ref[t],
                                   preferred_element_type=f32)
        aux2 = aux2_ref[...]                                   # [3, 64] bias/scale/shift
        y2_ref[...] = (jnp.maximum(y2_ref[...] + aux2[0:1, :], 0.0) * aux2[1:2, :]
                       + aux2[2:3, :])

        # ---- stage 3: second 2x2 max-pool + flatten -> f [B, 64*p2*p2] ---------------
        parts = []
        for qi in range(p2):
            for qj in range(p2):
                o = (2 * qi * h1 + 4 * qj) * B
                m = jnp.maximum(
                    jnp.maximum(y2_ref[pl.ds(o, B), :],
                                y2_ref[pl.ds(o + 2 * B, B), :]),
                    jnp.maximum(y2_ref[pl.ds(o + h1 * B, B), :],
                                y2_ref[pl.ds(o + (h1 + 2) * B, B), :]))
                parts.append(m)                                # [B, 64] each
        f = jnp.concatenate(parts, axis=1)                     # [B, 64*p2*p2]

        # ---- stage 4: fc1 -> BN1d -> ReLU -> fc2 -> Softmax -> Softmax ---------------
        auxf = auxf_ref[...]                                   # [3, 128] bias/scale/shift
        h = jnp.dot(f, wfc1_ref[...], preferred_element_type=f32) + auxf[0:1, :]
        h = jnp.maximum(h * auxf[1:2, :] + auxf[2:3, :], 0.0)
        z = jnp.dot(h, wfc2_ref[...], preferred_element_type=f32) + bfc2_ref[...]

        valid = jax.lax.broadcasted_iota(jnp.int32, (1, N_CPAD), 1) < n_classes

        def masked_softmax(v):
            v = jnp.where(valid, v, -1e30)                     # ignore padded lanes
            e = jnp.exp(v - jnp.max(v, axis=-1, keepdims=True))
            return e / jnp.sum(e, axis=-1, keepdims=True)

        sm1 = masked_softmax(z)                # output of nn.Sequential (ends in Softmax)
        out_ref[0, :, :] = sm1
        out_ref[1, :, :] = masked_softmax(sm1)  # extra F.softmax applied in forward()

    return kernel, (h1, q1, NJ, M2)


@functools.partial(jax.jit, static_argnames=("n_classes",))
def network_forward(x_nchw, kp, *, n_classes):
    n, c, hin, win = x_nchw.shape
    assert c == 1 and hin == win and hin % 2 == 0
    H = hin
    h1 = H - 2
    q1 = h1 // 2
    h2 = q1 - 2
    p2 = h2 // 2
    flat = 64 * p2 * p2
    B = B_TILE
    npad = ((n + B - 1) // B) * B
    grid = (npad // B,)

    # Layout-only host prep (tiny): [W, N, H] transpose + 3-tap W-shift concat, so the
    # kernel's conv1 is a single dense matmul with no in-kernel gathers.
    xt = jnp.transpose(x_nchw[:, 0, :, :], (2, 0, 1)).astype(jnp.float32)   # [W, N, H]
    x_lhs = jnp.concatenate([xt[kw:kw + h1] for kw in range(3)], axis=2)    # [h1, N, 3H]
    if npad != n:
        x_lhs = jnp.pad(x_lhs, ((0, 0), (0, npad - n), (0, 0)))

    kernel, (h1_, q1_, NJ, M2) = _make_kernel(H, n_classes)

    cost = pl.CostEstimate(
        flops=grid[0] * 2 * (NJ * 3 * H * 32 * h1 + 9 * M2 * 32 * 64
                             + B * flat * 128 + B * 128 * N_CPAD),
        transcendentals=npad * 2 * N_CPAD,
        bytes_accessed=4 * (h1 * npad * 3 * H + 2 * npad * N_CPAD
                            + 3 * H * 32 * h1 + 9 * 32 * 64 + flat * 128 + 128 * N_CPAD),
    )

    grid_spec = pltpu.PrefetchScalarGridSpec(
        num_scalar_prefetch=0,
        grid=grid,
        in_specs=[
            pl.BlockSpec((h1, B, 3 * H), lambda g: (0, g, 0)),   # conv1 LHS (3-tap input)
            pl.BlockSpec((3 * H, 32 * h1), lambda g: (0, 0)),    # conv1 weight matrix
            pl.BlockSpec((3, 32 * h1), lambda g: (0, 0)),        # conv1 bias / bn s / bn t
            pl.BlockSpec((9, 32, 64), lambda g: (0, 0, 0)),      # conv2 per-tap weights
            pl.BlockSpec((3, 64), lambda g: (0, 0)),             # conv2 bias / bn s / bn t
            pl.BlockSpec((flat, 128), lambda g: (0, 0)),         # fc1 weight (rows permuted)
            pl.BlockSpec((3, 128), lambda g: (0, 0)),            # fc1 bias / bn s / bn t
            pl.BlockSpec((128, N_CPAD), lambda g: (0, 0)),       # fc2 weight (lane padded)
            pl.BlockSpec((1, N_CPAD), lambda g: (0, 0)),         # fc2 bias   (lane padded)
        ],
        out_specs=pl.BlockSpec((2, B, N_CPAD), lambda g: (0, g, 0)),
        scratch_shapes=[
            pltpu.VMEM((NJ + 8, 32 * h1), jnp.float32),          # conv1 activations
            pltpu.VMEM((q1 * NJ, 32), jnp.float32),              # pooled conv1 (relayout)
            pltpu.VMEM((M2, 64), jnp.float32),                   # conv2 activations
        ],
    )

    out = pl.pallas_call(
        kernel,
        grid_spec=grid_spec,
        out_shape=jax.ShapeDtypeStruct((2, npad, N_CPAD), jnp.float32),
        compiler_params=pltpu.CompilerParams(
            dimension_semantics=("parallel",),
            vmem_limit_bytes=8 * 1024 * 1024),
        cost_estimate=cost,
    )(x_lhs, kp["w1cat"], kp["aux1"], kp["w2"], kp["aux2"], kp["wfc1"],
      kp["auxf"], kp["wfc2"], kp["bfc2"])

    logits = out[0, :n, :n_classes]   # softmax(fc2(...)) -> what the module returns
    proba = out[1, :n, :n_classes]    # softmax(softmax(fc2(...)))
    return logits, proba


# ----------------------------------------------------------------------------
# Parameters: synthetic PyTorch-layout params + one-time repack for the kernel
# ----------------------------------------------------------------------------
def init_params(key, input_dim, n_classes):
    """Deterministic synthetic parameters in PyTorch layout (as nn.Module holds them)."""
    h = (input_dim - 2) // 2
    h = (h - 2) // 2
    flat = 64 * h * h
    ks = jax.random.split(key, 20)
    f32 = jnp.float32

    def nrm(k, shape, s):
        return s * jax.random.normal(k, shape, dtype=f32)

    return {
        "conv1_w": nrm(ks[0], (32, 1, 3, 3), 0.30), "conv1_b": nrm(ks[1], (32,), 0.10),
        "bn1_g": 1.0 + nrm(ks[2], (32,), 0.10), "bn1_b": nrm(ks[3], (32,), 0.10),
        "bn1_m": nrm(ks[4], (32,), 0.10), "bn1_v": 1.0 + jnp.abs(nrm(ks[5], (32,), 0.10)),
        "conv2_w": nrm(ks[6], (64, 32, 3, 3), 0.08), "conv2_b": nrm(ks[7], (64,), 0.10),
        "bn2_g": 1.0 + nrm(ks[8], (64,), 0.10), "bn2_b": nrm(ks[9], (64,), 0.10),
        "bn2_m": nrm(ks[10], (64,), 0.10), "bn2_v": 1.0 + jnp.abs(nrm(ks[11], (64,), 0.10)),
        "fc1_w": nrm(ks[12], (128, flat), 0.06), "fc1_b": nrm(ks[13], (128,), 0.10),
        "bnf_g": 1.0 + nrm(ks[14], (128,), 0.10), "bnf_b": nrm(ks[15], (128,), 0.10),
        "bnf_m": nrm(ks[16], (128,), 0.10), "bnf_v": 1.0 + jnp.abs(nrm(ks[17], (128,), 0.10)),
        "fc2_w": nrm(ks[18], (n_classes, 128), 0.10), "fc2_b": nrm(ks[19], (n_classes,), 0.10),
    }


def prepare_params(p, input_dim, n_classes):
    """One-time host repack: fold BN(eval) into scale/shift, build the conv1 matmul
    matrix (3 W-taps folded into K), split conv2 into per-tap [cin,cout] weights,
    permute fc1 rows to match the kernel's (spatial-major, channel-minor) flatten,
    and pad fc2 to a 128-lane tile."""
    H = input_dim
    h1 = H - 2
    q1 = h1 // 2
    h2 = q1 - 2
    p2 = h2 // 2
    flat = 64 * p2 * p2
    assert n_classes <= N_CPAD
    f32 = jnp.float32

    def bn_fold(g, b, m, v):
        s = g * jax.lax.rsqrt(v + EPS)
        return s, b - m * s

    # conv1 -> [3*H, h1*32]: W[kw*H + h_in, i*32 + c] = conv1_w[c, 0, h_in - i, kw]
    w1 = p["conv1_w"][:, 0]                     # [32, kh, kw]
    w1m = jnp.zeros((3, H, h1, 32), f32)
    ii = jnp.arange(h1)
    for kw in range(3):
        for kh in range(3):
            w1m = w1m.at[kw, ii + kh, ii, :].set(
                jnp.broadcast_to(w1[:, kh, kw], (h1, 32)))
    w1cat = w1m.reshape(3 * H, h1 * 32)
    s1, t1 = bn_fold(p["bn1_g"], p["bn1_b"], p["bn1_m"], p["bn1_v"])
    aux1 = jnp.stack([jnp.tile(p["conv1_b"], h1), jnp.tile(s1, h1), jnp.tile(t1, h1)], 0)

    # conv2: per-tap [cin, cout] weights, tap index t = kh*3 + kw.
    w2 = jnp.transpose(p["conv2_w"], (2, 3, 1, 0)).reshape(9, 32, 64)
    s2, t2 = bn_fold(p["bn2_g"], p["bn2_b"], p["bn2_m"], p["bn2_v"])
    aux2 = jnp.stack([p["conv2_b"], s2, t2], axis=0)

    # fc1: kernel flatten index r = (qi*p2+qj)*64 + c  <->  torch flatten q = c*p2*p2 + k
    p2sq = p2 * p2
    perm = jnp.tile(jnp.arange(64), p2sq) * p2sq + jnp.repeat(jnp.arange(p2sq), 64)
    wfc1 = p["fc1_w"].T[perm, :]
    sf, tf = bn_fold(p["bnf_g"], p["bnf_b"], p["bnf_m"], p["bnf_v"])
    auxf = jnp.stack([p["fc1_b"], sf, tf], axis=0)

    # fc2: [n_classes,128] -> [128, N_CPAD] zero-padded (padded lanes masked in-kernel).
    wfc2 = jnp.zeros((128, N_CPAD), f32).at[:, :n_classes].set(p["fc2_w"].T)
    bfc2 = jnp.zeros((1, N_CPAD), f32).at[0, :n_classes].set(p["fc2_b"])

    return {"w1cat": w1cat, "aux1": aux1, "w2": w2, "aux2": aux2,
            "wfc1": wfc1, "auxf": auxf, "wfc2": wfc2, "bfc2": bfc2}


if __name__ == "__main__":
    INPUT_DIM = 16
    N_CLASSES = 10
    BATCH = 2

    key = jax.random.PRNGKey(0)
    kx, kparam = jax.random.split(key)
    x = jax.random.normal(kx, (BATCH, 1, INPUT_DIM, INPUT_DIM), dtype=jnp.float32)
    torch_params = init_params(kparam, INPUT_DIM, N_CLASSES)
    kparams = prepare_params(torch_params, INPUT_DIM, N_CLASSES)

    logits, proba = network_forward(x, kparams, n_classes=N_CLASSES)
    jax.block_until_ready((logits, proba))

    assert logits.shape == (BATCH, N_CLASSES)
    assert proba.shape == (BATCH, N_CLASSES)
    assert bool(jnp.all(jnp.isfinite(logits))) and bool(jnp.all(jnp.isfinite(proba)))
    # both returned tensors are softmax outputs -> each row must sum to ~1
    assert bool(jnp.all(jnp.abs(jnp.sum(logits, axis=-1) - 1.0) < 1e-3))
    assert bool(jnp.all(jnp.abs(jnp.sum(proba, axis=-1) - 1.0) < 1e-3))
    print("KERNEL_OK")
</pallas_src>

<mosaic_0001>
module attributes {stable_mosaic.version = 11 : i64} {
  func.func @kernel(%arg0: i32, %arg1: memref<14x8x48xf32, #tpu.memory_space<vmem>>, %arg2: memref<48x448xf32, #tpu.memory_space<vmem>>, %arg3: memref<3x448xf32, #tpu.memory_space<vmem>>, %arg4: memref<9x32x64xf32, #tpu.memory_space<vmem>>, %arg5: memref<3x64xf32, #tpu.memory_space<vmem>>, %arg6: memref<256x128xf32, #tpu.memory_space<vmem>>, %arg7: memref<3x128xf32, #tpu.memory_space<vmem>>, %arg8: memref<128x128xf32, #tpu.memory_space<vmem>>, %arg9: memref<1x128xf32, #tpu.memory_space<vmem>>, %arg10: memref<2x8x128xf32, #tpu.memory_space<vmem>>, %arg11: memref<120x448xf32, #tpu.memory_space<vmem>>, %arg12: memref<784x32xf32, #tpu.memory_space<vmem>>, %arg13: memref<520x64xf32, #tpu.memory_space<vmem>>) attributes {dimension_semantics = [#tpu.dimension_semantics<parallel>], iteration_bounds = array<i64: 1>, scalar_prefetch = 0 : i64, scratch_operands = 3 : i64, tpu.core_type = #tpu.core_type<tc>, window_params = [{transform_indices = @transform_0, window_bounds = array<i64: 14, 8, 48>}, {pipeline_mode = #tpu.pipeline_mode<synchronous>, transform_indices = @transform_1, window_bounds = array<i64: 48, 448>}, {pipeline_mode = #tpu.pipeline_mode<synchronous>, transform_indices = @transform_2, window_bounds = array<i64: 3, 448>}, {pipeline_mode = #tpu.pipeline_mode<synchronous>, transform_indices = @transform_3, window_bounds = array<i64: 9, 32, 64>}, {pipeline_mode = #tpu.pipeline_mode<synchronous>, transform_indices = @transform_4, window_bounds = array<i64: 3, 64>}, {pipeline_mode = #tpu.pipeline_mode<synchronous>, transform_indices = @transform_5, window_bounds = array<i64: 256, 128>}, {pipeline_mode = #tpu.pipeline_mode<synchronous>, transform_indices = @transform_6, window_bounds = array<i64: 3, 128>}, {pipeline_mode = #tpu.pipeline_mode<synchronous>, transform_indices = @transform_7, window_bounds = array<i64: 128, 128>}, {pipeline_mode = #tpu.pipeline_mode<synchronous>, transform_indices = @transform_8, window_bounds = array<i64: 1, 128>}, {transform_indices = @transform_9, window_bounds = array<i64: 2, 8, 128>}]} {
    %c0 = arith.constant 0 : index
    %c0_0 = arith.constant 0 : index
    %c0_1 = arith.constant 0 : index
    %0 = vector.load %arg1[%c0, %c0_0, %c0_1] : memref<14x8x48xf32, #tpu.memory_space<vmem>>, vector<14x8x48xf32>
    %1 = vector.shape_cast %0 : vector<14x8x48xf32> to vector<112x48xf32>
    %c0_2 = arith.constant 0 : index
    %c0_3 = arith.constant 0 : index
    %2 = vector.load %arg3[%c0_2, %c0_3] : memref<3x448xf32, #tpu.memory_space<vmem>>, vector<3x448xf32>
    %c0_4 = arith.constant 0 : index
    %c0_5 = arith.constant 0 : index
    %3 = vector.load %arg2[%c0_4, %c0_5] : memref<48x448xf32, #tpu.memory_space<vmem>>, vector<48x448xf32>
    %cst = arith.constant dense<0.000000e+00> : vector<112x448xf32>
    %4 = tpu.matmul %1, %3, %cst {dimension_numbers = #tpu.dot_dimension_numbers<[1], [0], [0], [1], [0, 0, 1, 1], [], []>} : vector<112x48xf32>, vector<48x448xf32>, vector<112x448xf32> -> vector<112x448xf32>
    %5 = vector.extract_strided_slice %2 {offsets = [0, 0], sizes = [1, 448], strides = [1, 1]} : vector<3x448xf32> to vector<1x448xf32>
    %6 = vector.broadcast %5 : vector<1x448xf32> to vector<112x448xf32>
    %7 = arith.addf %4, %6 : vector<112x448xf32>
    %cst_6 = arith.constant 0.000000e+00 : f32
    %8 = vector.broadcast %cst_6 : f32 to vector<112x448xf32>
    %9 = arith.maximumf %7, %8 : vector<112x448xf32>
    %10 = vector.extract_strided_slice %2 {offsets = [1, 0], sizes = [1, 448], strides = [1, 1]} : vector<3x448xf32> to vector<1x448xf32>
    %11 = vector.broadcast %10 : vector<1x448xf32> to vector<112x448xf32>
    %12 = arith.mulf %9, %11 : vector<112x448xf32>
    %13 = vector.extract_strided_slice %2 {offsets = [2, 0], sizes = [1, 448], strides = [1, 1]} : vector<3x448xf32> to vector<1x448xf32>
    %14 = vector.broadcast %13 : vector<1x448xf32> to vector<112x448xf32>
    %15 = arith.addf %12, %14 : vector<112x448xf32>
    %c0_7 = arith.constant 0 : index
    %c0_8 = arith.constant 0 : index
    %16 = vector.load %arg11[%c0_7, %c0_8] : memref<120x448xf32, #tpu.memory_space<vmem>>, vector<112x448xf32>
    tpu.vector_store %arg11[%c0_7, %c0_8], %15 {strides = array<i32>} : memref<120x448xf32, #tpu.memory_space<vmem>>, vector<112x448xf32>,
    %cst_9 = arith.constant 0.000000e+00 : f32
    %17 = vector.broadcast %cst_9 : f32 to vector<8x448xf32>
    %c112 = arith.constant 112 : index
    %c0_10 = arith.constant 0 : index
    %18 = vector.load %arg11[%c112, %c0_10] : memref<120x448xf32, #tpu.memory_space<vmem>>, vector<8x448xf32>
    tpu.vector_store %arg11[%c112, %c0_10], %17 {strides = array<i32>} : memref<120x448xf32, #tpu.memory_space<vmem>>, vector<8x448xf32>,
    %c0_11 = arith.constant 0 : index
    %c0_12 = arith.constant 0 : index
    %19 = vector.load %arg11[%c0_11, %c0_12] : memref<120x448xf32, #tpu.memory_space<vmem>>, vector<112x64xf32>
    %c8 = arith.constant 8 : index
    %c0_13 = arith.constant 0 : index
    %20 = vector.load %arg11[%c8, %c0_13] : memref<120x448xf32, #tpu.memory_space<vmem>>, vector<112x64xf32>
    %21 = arith.maximumf %19, %20 : vector<112x64xf32>
    %22 = vector.extract_strided_slice %21 {offsets = [0, 0], sizes = [112, 32], strides = [1, 1]} : vector<112x64xf32> to vector<112x32xf32>
    %23 = vector.extract_strided_slice %21 {offsets = [0, 32], sizes = [112, 32], strides = [1, 1]} : vector<112x64xf32> to vector<112x32xf32>
    %24 = arith.maximumf %22, %23 : vector<112x32xf32>
    %c0_14 = arith.constant 0 : index
    %c0_15 = arith.constant 0 : index
    %25 = vector.load %arg12[%c0_14, %c0_15] : memref<784x32xf32, #tpu.memory_space<vmem>>, vector<112x32xf32>
    tpu.vector_store %arg12[%c0_14, %c0_15], %24 {strides = array<i32>} : memref<784x32xf32, #tpu.memory_space<vmem>>, vector<112x32xf32>,
    %c0_16 = arith.constant 0 : index
    %c64 = arith.constant 64 : index
    %26 = vector.load %arg11[%c0_16, %c64] : memref<120x448xf32, #tpu.memory_space<vmem>>, vector<112x64xf32>
    %c8_17 = arith.constant 8 : index
    %c64_18 = arith.constant 64 : index
    %27 = vector.load %arg11[%c8_17, %c64_18] : memref<120x448xf32, #tpu.memory_space<vmem>>, vector<112x64xf32>
    %28 = arith.maximumf %26, %27 : vector<112x64xf32>
    %29 = vector.extract_strided_slice %28 {offsets = [0, 0], sizes = [112, 32], strides = [1, 1]} : vector<112x64xf32> to vector<112x32xf32>
    %30 = vector.extract_strided_slice %28 {offsets = [0, 32], sizes = [112, 32], strides = [1, 1]} : vector<112x64xf32> to vector<112x32xf32>
    %31 = arith.maximumf %29, %30 : vector<112x32xf32>
    %c112_19 = arith.constant 112 : index
    %c0_20 = arith.constant 0 : index
    %32 = vector.load %arg12[%c112_19, %c0_20] : memref<784x32xf32, #tpu.memory_space<vmem>>, vector<112x32xf32>
    tpu.vector_store %arg12[%c112_19, %c0_20], %31 {strides = array<i32>} : memref<784x32xf32, #tpu.memory_space<vmem>>, vector<112x32xf32>,
    %c0_21 = arith.constant 0 : index
    %c128 = arith.constant 128 : index
    %33 = vector.load %arg11[%c0_21, %c128] : memref<120x448xf32, #tpu.memory_space<vmem>>, vector<112x64xf32>
    %c8_22 = arith.constant 8 : index
    %c128_23 = arith.constant 128 : index
    %34 = vector.load %arg11[%c8_22, %c128_23] : memref<120x448xf32, #tpu.memory_space<vmem>>, vector<112x64xf32>
    %35 = arith.maximumf %33, %34 : vector<112x64xf32>
    %36 = vector.extract_strided_slice %35 {offsets = [0, 0], sizes = [112, 32], strides = [1, 1]} : vector<112x64xf32> to vector<112x32xf32>
    %37 = vector.extract_strided_slice %35 {offsets = [0, 32], sizes = [112, 32], strides = [1, 1]} : vector<112x64xf32> to vector<112x32xf32>
    %38 = arith.maximumf %36, %37 : vector<112x32xf32>
    %c224 = arith.constant 224 : index
    %c0_24 = arith.constant 0 : index
    %39 = vector.load %arg12[%c224, %c0_24] : memref<784x32xf32, #tpu.memory_space<vmem>>, vector<112x32xf32>
    tpu.vector_store %arg12[%c224, %c0_24], %38 {strides = array<i32>} : memref<784x32xf32, #tpu.memory_space<vmem>>, vector<112x32xf32>,
    %c0_25 = arith.constant 0 : index
    %c192 = arith.constant 192 : index
    %40 = vector.load %arg11[%c0_25, %c192] : memref<120x448xf32, #tpu.memory_space<vmem>>, vector<112x64xf32>
    %c8_26 = arith.constant 8 : index
    %c192_27 = arith.constant 192 : index
    %41 = vector.load %arg11[%c8_26, %c192_27] : memref<120x448xf32, #tpu.memory_space<vmem>>, vector<112x64xf32>
    %42 = arith.maximumf %40, %41 : vector<112x64xf32>
    %43 = vector.extract_strided_slice %42 {offsets = [0, 0], sizes = [112, 32], strides = [1, 1]} : vector<112x64xf32> to vector<112x32xf32>
    %44 = vector.extract_strided_slice %42 {offsets = [0, 32], sizes = [112, 32], strides = [1, 1]} : vector<112x64xf32> to vector<112x32xf32>
    %45 = arith.maximumf %43, %44 : vector<112x32xf32>
    %c336 = arith.constant 336 : index
    %c0_28 = arith.constant 0 : index
    %46 = vector.load %arg12[%c336, %c0_28] : memref<784x32xf32, #tpu.memory_space<vmem>>, vector<112x32xf32>
    tpu.vector_store %arg12[%c336, %c0_28], %45 {strides = array<i32>} : memref<784x32xf32, #tpu.memory_space<vmem>>, vector<112x32xf32>,
    %c0_29 = arith.constant 0 : index
    %c256 = arith.constant 256 : index
    %47 = vector.load %arg11[%c0_29, %c256] : memref<120x448xf32, #tpu.memory_space<vmem>>, vector<112x64xf32>
    %c8_30 = arith.constant 8 : index
    %c256_31 = arith.constant 256 : index
    %48 = vector.load %arg11[%c8_30, %c256_31] : memref<120x448xf32, #tpu.memory_space<vmem>>, vector<112x64xf32>
    %49 = arith.maximumf %47, %48 : vector<112x64xf32>
    %50 = vector.extract_strided_slice %49 {offsets = [0, 0], sizes = [112, 32], strides = [1, 1]} : vector<112x64xf32> to vector<112x32xf32>
    %51 = vector.extract_strided_slice %49 {offsets = [0, 32], sizes = [112, 32], strides = [1, 1]} : vector<112x64xf32> to vector<112x32xf32>
    %52 = arith.maximumf %50, %51 : vector<112x32xf32>
    %c448 = arith.constant 448 : index
    %c0_32 = arith.constant 0 : index
    %53 = vector.load %arg12[%c448, %c0_32] : memref<784x32xf32, #tpu.memory_space<vmem>>, vector<112x32xf32>
    tpu.vector_store %arg12[%c448, %c0_32], %52 {strides = array<i32>} : memref<784x32xf32, #tpu.memory_space<vmem>>, vector<112x32xf32>,
    %c0_33 = arith.constant 0 : index
    %c320 = arith.constant 320 : index
    %54 = vector.load %arg11[%c0_33, %c320] : memref<120x448xf32, #tpu.memory_space<vmem>>, vector<112x64xf32>
    %c8_34 = arith.constant 8 : index
    %c320_35 = arith.constant 320 : index
    %55 = vector.load %arg11[%c8_34, %c320_35] : memref<120x448xf32, #tpu.memory_space<vmem>>, vector<112x64xf32>
    %56 = arith.maximumf %54, %55 : vector<112x64xf32>
    %57 = vector.extract_strided_slice %56 {offsets = [0, 0], sizes = [112, 32], strides = [1, 1]} : vector<112x64xf32> to vector<112x32xf32>
    %58 = vector.extract_strided_slice %56 {offsets = [0, 32], sizes = [112, 32], strides = [1, 1]} : vector<112x64xf32> to vector<112x32xf32>
    %59 = arith.maximumf %57, %58 : vector<112x32xf32>
    %c560 = arith.constant 560 : index
    %c0_36 = arith.constant 0 : index
    %60 = vector.load %arg12[%c560, %c0_36] : memref<784x32xf32, #tpu.memory_space<vmem>>, vector<112x32xf32>
    tpu.vector_store %arg12[%c560, %c0_36], %59 {strides = array<i32>} : memref<784x32xf32, #tpu.memory_space<vmem>>, vector<112x32xf32>,
    %c0_37 = arith.constant 0 : index
    %c384 = arith.constant 384 : index
    %61 = vector.load %arg11[%c0_37, %c384] : memref<120x448xf32, #tpu.memory_space<vmem>>, vector<112x64xf32>
    %c8_38 = arith.constant 8 : index
    %c384_39 = arith.constant 384 : index
    %62 = vector.load %arg11[%c8_38, %c384_39] : memref<120x448xf32, #tpu.memory_space<vmem>>, vector<112x64xf32>
    %63 = arith.maximumf %61, %62 : vector<112x64xf32>
    %64 = vector.extract_strided_slice %63 {offsets = [0, 0], sizes = [112, 32], strides = [1, 1]} : vector<112x64xf32> to vector<112x32xf32>
    %65 = vector.extract_strided_slice %63 {offsets = [0, 32], sizes = [112, 32], strides = [1, 1]} : vector<112x64xf32> to vector<112x32xf32>
    %66 = arith.maximumf %64, %65 : vector<112x32xf32>
    %c672 = arith.constant 672 : index
    %c0_40 = arith.constant 0 : index
    %67 = vector.load %arg12[%c672, %c0_40] : memref<784x32xf32, #tpu.memory_space<vmem>>, vector<112x32xf32>
    tpu.vector_store %arg12[%c672, %c0_40], %66 {strides = array<i32>} : memref<784x32xf32, #tpu.memory_space<vmem>>, vector<112x32xf32>,
    %c0_41 = arith.constant 0 : index
    %c0_42 = arith.constant 0 : index
    %68 = vector.load %arg12[%c0_41, %c0_42] : memref<784x32xf32, #tpu.memory_space<vmem>>, vector<520x32xf32>
    %c0_43 = arith.constant 0 : index
    %c0_44 = arith.constant 0 : index
    %c0_45 = arith.constant 0 : index
    %69 = vector.load %arg4[%c0_43, %c0_44, %c0_45] : memref<9x32x64xf32, #tpu.memory_space<vmem>>, vector<1x32x64xf32>
    %70 = vector.shape_cast %69 : vector<1x32x64xf32> to vector<32x64xf32>
    %cst_46 = arith.constant dense<0.000000e+00> : vector<520x64xf32>
    %71 = tpu.matmul %68, %70, %cst_46 {dimension_numbers = #tpu.dot_dimension_numbers<[1], [0], [0], [1], [0, 0, 1, 1], [], []>} : vector<520x32xf32>, vector<32x64xf32>, vector<520x64xf32> -> vector<520x64xf32>
    %c0_47 = arith.constant 0 : index
    %c0_48 = arith.constant 0 : index
    %72 = vector.load %arg13[%c0_47, %c0_48] : memref<520x64xf32, #tpu.memory_space<vmem>>, vector<520x64xf32>
    tpu.vector_store %arg13[%c0_47, %c0_48], %71 {strides = array<i32>} : memref<520x64xf32, #tpu.memory_space<vmem>>, vector<520x64xf32>,
    %c0_49 = arith.constant 0 : index
    %c0_50 = arith.constant 0 : index
    %73 = vector.load %arg13[%c0_49, %c0_50] : memref<520x64xf32, #tpu.memory_space<vmem>>, vector<520x64xf32>
    %c16 = arith.constant 16 : index
    %c0_51 = arith.constant 0 : index
    %74 = vector.load %arg12[%c16, %c0_51] : memref<784x32xf32, #tpu.memory_space<vmem>>, vector<520x32xf32>
    %c1 = arith.constant 1 : index
    %c0_52 = arith.constant 0 : index
    %c0_53 = arith.constant 0 : index
    %75 = vector.load %arg4[%c1, %c0_52, %c0_53] : memref<9x32x64xf32, #tpu.memory_space<vmem>>, vector<1x32x64xf32>
    %76 = vector.shape_cast %75 : vector<1x32x64xf32> to vector<32x64xf32>
    %cst_54 = arith.constant dense<0.000000e+00> : vector<520x64xf32>
    %77 = tpu.matmul %74, %76, %cst_54 {dimension_numbers = #tpu.dot_dimension_numbers<[1], [0], [0], [1], [0, 0, 1, 1], [], []>} : vector<520x32xf32>, vector<32x64xf32>, vector<520x64xf32> -> vector<520x64xf32>
    %78 = arith.addf %73, %77 : vector<520x64xf32>
    %c0_55 = arith.constant 0 : index
    %c0_56 = arith.constant 0 : index
    %79 = vector.load %arg13[%c0_55, %c0_56] : memref<520x64xf32, #tpu.memory_space<vmem>>, vector<520x64xf32>
    tpu.vector_store %arg13[%c0_55, %c0_56], %78 {strides = array<i32>} : memref<520x64xf32, #tpu.memory_space<vmem>>, vector<520x64xf32>,
    %c0_57 = arith.constant 0 : index
    %c0_58 = arith.constant 0 : index
    %80 = vector.load %arg13[%c0_57, %c0_58] : memref<520x64xf32, #tpu.memory_space<vmem>>, vector<520x64xf32>
    %c32 = arith.constant 32 : index
    %c0_59 = arith.constant 0 : index
    %81 = vector.load %arg12[%c32, %c0_59] : memref<784x32xf32, #tpu.memory_space<vmem>>, vector<520x32xf32>
    %c2 = arith.constant 2 : index
    %c0_60 = arith.constant 0 : index
    %c0_61 = arith.constant 0 : index
    %82 = vector.load %arg4[%c2, %c0_60, %c0_61] : memref<9x32x64xf32, #tpu.memory_space<vmem>>, vector<1x32x64xf32>
    %83 = vector.shape_cast %82 : vector<1x32x64xf32> to vector<32x64xf32>
    %cst_62 = arith.constant dense<0.000000e+00> : vector<520x64xf32>
    %84 = tpu.matmul %81, %83, %cst_62 {dimension_numbers = #tpu.dot_dimension_numbers<[1], [0], [0], [1], [0, 0, 1, 1], [], []>} : vector<520x32xf32>, vector<32x64xf32>, vector<520x64xf32> -> vector<520x64xf32>
    %85 = arith.addf %80, %84 : vector<520x64xf32>
    %c0_63 = arith.constant 0 : index
    %c0_64 = arith.constant 0 : index
    %86 = vector.load %arg13[%c0_63, %c0_64] : memref<520x64xf32, #tpu.memory_space<vmem>>, vector<520x64xf32>
    tpu.vector_store %arg13[%c0_63, %c0_64], %85 {strides = array<i32>} : memref<520x64xf32, #tpu.memory_space<vmem>>, vector<520x64xf32>,
    %c0_65 = arith.constant 0 : index
    %c0_66 = arith.constant 0 : index
    %87 = vector.load %arg13[%c0_65, %c0_66] : memref<520x64xf32, #tpu.memory_space<vmem>>, vector<520x64xf32>
    %c112_67 = arith.constant 112 : index
    %c0_68 = arith.constant 0 : index
    %88 = vector.load %arg12[%c112_67, %c0_68] : memref<784x32xf32, #tpu.memory_space<vmem>>, vector<520x32xf32>
    %c3 = arith.constant 3 : index
    %c0_69 = arith.constant 0 : index
    %c0_70 = arith.constant 0 : index
    %89 = vector.load %arg4[%c3, %c0_69, %c0_70] : memref<9x32x64xf32, #tpu.memory_space<vmem>>, vector<1x32x64xf32>
    %90 = vector.shape_cast %89 : vector<1x32x64xf32> to vector<32x64xf32>
    %cst_71 = arith.constant dense<0.000000e+00> : vector<520x64xf32>
    %91 = tpu.matmul %88, %90, %cst_71 {dimension_numbers = #tpu.dot_dimension_numbers<[1], [0], [0], [1], [0, 0, 1, 1], [], []>} : vector<520x32xf32>, vector<32x64xf32>, vector<520x64xf32> -> vector<520x64xf32>
    %92 = arith.addf %87, %91 : vector<520x64xf32>
    %c0_72 = arith.constant 0 : index
    %c0_73 = arith.constant 0 : index
    %93 = vector.load %arg13[%c0_72, %c0_73] : memref<520x64xf32, #tpu.memory_space<vmem>>, vector<520x64xf32>
    tpu.vector_store %arg13[%c0_72, %c0_73], %92 {strides = array<i32>} : memref<520x64xf32, #tpu.memory_space<vmem>>, vector<520x64xf32>,
    %c0_74 = arith.constant 0 : index
    %c0_75 = arith.constant 0 : index
    %94 = vector.load %arg13[%c0_74, %c0_75] : memref<520x64xf32, #tpu.memory_space<vmem>>, vector<520x64xf32>
    %c128_76 = arith.constant 128 : index
    %c0_77 = arith.constant 0 : index
    %95 = vector.load %arg12[%c128_76, %c0_77] : memref<784x32xf32, #tpu.memory_space<vmem>>, vector<520x32xf32>
    %c4 = arith.constant 4 : index
    %c0_78 = arith.constant 0 : index
    %c0_79 = arith.constant 0 : index
    %96 = vector.load %arg4[%c4, %c0_78, %c0_79] : memref<9x32x64xf32, #tpu.memory_space<vmem>>, vector<1x32x64xf32>
    %97 = vector.shape_cast %96 : vector<1x32x64xf32> to vector<32x64xf32>
    %cst_80 = arith.constant dense<0.000000e+00> : vector<520x64xf32>
    %98 = tpu.matmul %95, %97, %cst_80 {dimension_numbers = #tpu.dot_dimension_numbers<[1], [0], [0], [1], [0, 0, 1, 1], [], []>} : vector<520x32xf32>, vector<32x64xf32>, vector<520x64xf32> -> vector<520x64xf32>
    %99 = arith.addf %94, %98 : vector<520x64xf32>
    %c0_81 = arith.constant 0 : index
    %c0_82 = arith.constant 0 : index
    %100 = vector.load %arg13[%c0_81, %c0_82] : memref<520x64xf32, #tpu.memory_space<vmem>>, vector<520x64xf32>
    tpu.vector_store %arg13[%c0_81, %c0_82], %99 {strides = array<i32>} : memref<520x64xf32, #tpu.memory_space<vmem>>, vector<520x64xf32>,
    %c0_83 = arith.constant 0 : index
    %c0_84 = arith.constant 0 : index
    %101 = vector.load %arg13[%c0_83, %c0_84] : memref<520x64xf32, #tpu.memory_space<vmem>>, vector<520x64xf32>
    %c144 = arith.constant 144 : index
    %c0_85 = arith.constant 0 : index
    %102 = vector.load %arg12[%c144, %c0_85] : memref<784x32xf32, #tpu.memory_space<vmem>>, vector<520x32xf32>
    %c5 = arith.constant 5 : index
    %c0_86 = arith.constant 0 : index
    %c0_87 = arith.constant 0 : index
    %103 = vector.load %arg4[%c5, %c0_86, %c0_87] : memref<9x32x64xf32, #tpu.memory_space<vmem>>, vector<1x32x64xf32>
    %104 = vector.shape_cast %103 : vector<1x32x64xf32> to vector<32x64xf32>
    %cst_88 = arith.constant dense<0.000000e+00> : vector<520x64xf32>
    %105 = tpu.matmul %102, %104, %cst_88 {dimension_numbers = #tpu.dot_dimension_numbers<[1], [0], [0], [1], [0, 0, 1, 1], [], []>} : vector<520x32xf32>, vector<32x64xf32>, vector<520x64xf32> -> vector<520x64xf32>
    %106 = arith.addf %101, %105 : vector<520x64xf32>
    %c0_89 = arith.constant 0 : index
    %c0_90 = arith.constant 0 : index
    %107 = vector.load %arg13[%c0_89, %c0_90] : memref<520x64xf32, #tpu.memory_space<vmem>>, vector<520x64xf32>
    tpu.vector_store %arg13[%c0_89, %c0_90], %106 {strides = array<i32>} : memref<520x64xf32, #tpu.memory_space<vmem>>, vector<520x64xf32>,
    %c0_91 = arith.constant 0 : index
    %c0_92 = arith.constant 0 : index
    %108 = vector.load %arg13[%c0_91, %c0_92] : memref<520x64xf32, #tpu.memory_space<vmem>>, vector<520x64xf32>
    %c224_93 = arith.constant 224 : index
    %c0_94 = arith.constant 0 : index
    %109 = vector.load %arg12[%c224_93, %c0_94] : memref<784x32xf32, #tpu.memory_space<vmem>>, vector<520x32xf32>
    %c6 = arith.constant 6 : index
    %c0_95 = arith.constant 0 : index
    %c0_96 = arith.constant 0 : index
    %110 = vector.load %arg4[%c6, %c0_95, %c0_96] : memref<9x32x64xf32, #tpu.memory_space<vmem>>, vector<1x32x64xf32>
    %111 = vector.shape_cast %110 : vector<1x32x64xf32> to vector<32x64xf32>
    %cst_97 = arith.constant dense<0.000000e+00> : vector<520x64xf32>
    %112 = tpu.matmul %109, %111, %cst_97 {dimension_numbers = #tpu.dot_dimension_numbers<[1], [0], [0], [1], [0, 0, 1, 1], [], []>} : vector<520x32xf32>, vector<32x64xf32>, vector<520x64xf32> -> vector<520x64xf32>
    %113 = arith.addf %108, %112 : vector<520x64xf32>
    %c0_98 = arith.constant 0 : index
    %c0_99 = arith.constant 0 : index
    %114 = vector.load %arg13[%c0_98, %c0_99] : memref<520x64xf32, #tpu.memory_space<vmem>>, vector<520x64xf32>
    tpu.vector_store %arg13[%c0_98, %c0_99], %113 {strides = array<i32>} : memref<520x64xf32, #tpu.memory_space<vmem>>, vector<520x64xf32>,
    %c0_100 = arith.constant 0 : index
    %c0_101 = arith.constant 0 : index
    %115 = vector.load %arg13[%c0_100, %c0_101] : memref<520x64xf32, #tpu.memory_space<vmem>>, vector<520x64xf32>
    %c240 = arith.constant 240 : index
    %c0_102 = arith.constant 0 : index
    %116 = vector.load %arg12[%c240, %c0_102] : memref<784x32xf32, #tpu.memory_space<vmem>>, vector<520x32xf32>
    %c7 = arith.constant 7 : index
    %c0_103 = arith.constant 0 : index
    %c0_104 = arith.constant 0 : index
    %117 = vector.load %arg4[%c7, %c0_103, %c0_104] : memref<9x32x64xf32, #tpu.memory_space<vmem>>, vector<1x32x64xf32>
    %118 = vector.shape_cast %117 : vector<1x32x64xf32> to vector<32x64xf32>
    %cst_105 = arith.constant dense<0.000000e+00> : vector<520x64xf32>
    %119 = tpu.matmul %116, %118, %cst_105 {dimension_numbers = #tpu.dot_dimension_numbers<[1], [0], [0], [1], [0, 0, 1, 1], [], []>} : vector<520x32xf32>, vector<32x64xf32>, vector<520x64xf32> -> vector<520x64xf32>
    %120 = arith.addf %115, %119 : vector<520x64xf32>
    %c0_106 = arith.constant 0 : index
    %c0_107 = arith.constant 0 : index
    %121 = vector.load %arg13[%c0_106, %c0_107] : memref<520x64xf32, #tpu.memory_space<vmem>>, vector<520x64xf32>
    tpu.vector_store %arg13[%c0_106, %c0_107], %120 {strides = array<i32>} : memref<520x64xf32, #tpu.memory_space<vmem>>, vector<520x64xf32>,
    %c0_108 = arith.constant 0 : index
    %c0_109 = arith.constant 0 : index
    %122 = vector.load %arg13[%c0_108, %c0_109] : memref<520x64xf32, #tpu.memory_space<vmem>>, vector<520x64xf32>
    %c256_110 = arith.constant 256 : index
    %c0_111 = arith.constant 0 : index
    %123 = vector.load %arg12[%c256_110, %c0_111] : memref<784x32xf32, #tpu.memory_space<vmem>>, vector<520x32xf32>
    %c8_112 = arith.constant 8 : index
    %c0_113 = arith.constant 0 : index
    %c0_114 = arith.constant 0 : index
    %124 = vector.load %arg4[%c8_112, %c0_113, %c0_114] : memref<9x32x64xf32, #tpu.memory_space<vmem>>, vector<1x32x64xf32>
    %125 = vector.shape_cast %124 : vector<1x32x64xf32> to vector<32x64xf32>
    %cst_115 = arith.constant dense<0.000000e+00> : vector<520x64xf32>
    %126 = tpu.matmul %123, %125, %cst_115 {dimension_numbers = #tpu.dot_dimension_numbers<[1], [0], [0], [1], [0, 0, 1, 1], [], []>} : vector<520x32xf32>, vector<32x64xf32>, vector<520x64xf32> -> vector<520x64xf32>
    %127 = arith.addf %122, %126 : vector<520x64xf32>
    %c0_116 = arith.constant 0 : index
    %c0_117 = arith.constant 0 : index
    %128 = vector.load %arg13[%c0_116, %c0_117] : memref<520x64xf32, #tpu.memory_space<vmem>>, vector<520x64xf32>
    tpu.vector_store %arg13[%c0_116, %c0_117], %127 {strides = array<i32>} : memref<520x64xf32, #tpu.memory_space<vmem>>, vector<520x64xf32>,
    %c0_118 = arith.constant 0 : index
    %c0_119 = arith.constant 0 : index
    %129 = vector.load %arg5[%c0_118, %c0_119] : memref<3x64xf32, #tpu.memory_space<vmem>>, vector<3x64xf32>
    %c0_120 = arith.constant 0 : index
    %c0_121 = arith.constant 0 : index
    %130 = vector.load %arg13[%c0_120, %c0_121] : memref<520x64xf32, #tpu.memory_space<vmem>>, vector<520x64xf32>
    %131 = vector.extract_strided_slice %129 {offsets = [0, 0], sizes = [1, 64], strides = [1, 1]} : vector<3x64xf32> to vector<1x64xf32>
    %132 = vector.broadcast %131 : vector<1x64xf32> to vector<520x64xf32>
    %133 = arith.addf %130, %132 : vector<520x64xf32>
    %cst_122 = arith.constant 0.000000e+00 : f32
    %134 = vector.broadcast %cst_122 : f32 to vector<520x64xf32>
    %135 = arith.maximumf %133, %134 : vector<520x64xf32>
    %136 = vector.extract_strided_slice %129 {offsets = [1, 0], sizes = [1, 64], strides = [1, 1]} : vector<3x64xf32> to vector<1x64xf32>
    %137 = vector.broadcast %136 : vector<1x64xf32> to vector<520x64xf32>
    %138 = arith.mulf %135, %137 : vector<520x64xf32>
    %139 = vector.extract_strided_slice %129 {offsets = [2, 0], sizes = [1, 64], strides = [1, 1]} : vector<3x64xf32> to vector<1x64xf32>
    %140 = vector.broadcast %139 : vector<1x64xf32> to vector<520x64xf32>
    %141 = arith.addf %138, %140 : vector<520x64xf32>
    %c0_123 = arith.constant 0 : index
    %c0_124 = arith.constant 0 : index
    %142 = vector.load %arg13[%c0_123, %c0_124] : memref<520x64xf32, #tpu.memory_space<vmem>>, vector<520x64xf32>
    tpu.vector_store %arg13[%c0_123, %c0_124], %141 {strides = array<i32>} : memref<520x64xf32, #tpu.memory_space<vmem>>, vector<520x64xf32>,
    %c0_125 = arith.constant 0 : index
    %c0_126 = arith.constant 0 : index
    %143 = vector.load %arg13[%c0_125, %c0_126] : memref<520x64xf32, #tpu.memory_space<vmem>>, vector<8x64xf32>
    %c16_127 = arith.constant 16 : index
    %c0_128 = arith.constant 0 : index
    %144 = vector.load %arg13[%c16_127, %c0_128] : memref<520x64xf32, #tpu.memory_space<vmem>>, vector<8x64xf32>
    %145 = arith.maximumf %143, %144 : vector<8x64xf32>
    %c112_129 = arith.constant 112 : index
    %c0_130 = arith.constant 0 : index
    %146 = vector.load %arg13[%c112_129, %c0_130] : memref<520x64xf32, #tpu.memory_space<vmem>>, vector<8x64xf32>
    %c128_131 = arith.constant 128 : index
    %c0_132 = arith.constant 0 : index
    %147 = vector.load %arg13[%c128_131, %c0_132] : memref<520x64xf32, #tpu.memory_space<vmem>>, vector<8x64xf32>
    %148 = arith.maximumf %146, %147 : vector<8x64xf32>
    %149 = arith.maximumf %145, %148 : vector<8x64xf32>
    %c32_133 = arith.constant 32 : index
    %c0_134 = arith.constant 0 : index
    %150 = vector.load %arg13[%c32_133, %c0_134] : memref<520x64xf32, #tpu.memory_space<vmem>>, vector<8x64xf32>
    %c48 = arith.constant 48 : index
    %c0_135 = arith.constant 0 : index
    %151 = vector.load %arg13[%c48, %c0_135] : memref<520x64xf32, #tpu.memory_space<vmem>>, vector<8x64xf32>
    %152 = arith.maximumf %150, %151 : vector<8x64xf32>
    %c144_136 = arith.constant 144 : index
    %c0_137 = arith.constant 0 : index
    %153 = vector.load %arg13[%c144_136, %c0_137] : memref<520x64xf32, #tpu.memory_space<vmem>>, vector<8x64xf32>
    %c160 = arith.constant 160 : index
    %c0_138 = arith.constant 0 : index
    %154 = vector.load %arg13[%c160, %c0_138] : memref<520x64xf32, #tpu.memory_space<vmem>>, vector<8x64xf32>
    %155 = arith.maximumf %153, %154 : vector<8x64xf32>
    %156 = arith.maximumf %152, %155 : vector<8x64xf32>
    %c224_139 = arith.constant 224 : index
    %c0_140 = arith.constant 0 : index
    %157 = vector.load %arg13[%c224_139, %c0_140] : memref<520x64xf32, #tpu.memory_space<vmem>>, vector<8x64xf32>
    %c240_141 = arith.constant 240 : index
    %c0_142 = arith.constant 0 : index
    %158 = vector.load %arg13[%c240_141, %c0_142] : memref<520x64xf32, #tpu.memory_space<vmem>>, vector<8x64xf32>
    %159 = arith.maximumf %157, %158 : vector<8x64xf32>
    %c336_143 = arith.constant 336 : index
    %c0_144 = arith.constant 0 : index
    %160 = vector.load %arg13[%c336_143, %c0_144] : memref<520x64xf32, #tpu.memory_space<vmem>>, vector<8x64xf32>
    %c352 = arith.constant 352 : index
    %c0_145 = arith.constant 0 : index
    %161 = vector.load %arg13[%c352, %c0_145] : memref<520x64xf32, #tpu.memory_space<vmem>>, vector<8x64xf32>
    %162 = arith.maximumf %160, %161 : vector<8x64xf32>
    %163 = arith.maximumf %159, %162 : vector<8x64xf32>
    %c256_146 = arith.constant 256 : index
    %c0_147 = arith.constant 0 : index
    %164 = vector.load %arg13[%c256_146, %c0_147] : memref<520x64xf32, #tpu.memory_space<vmem>>, vector<8x64xf32>
    %c272 = arith.constant 272 : index
    %c0_148 = arith.constant 0 : index
    %165 = vector.load %arg13[%c272, %c0_148] : memref<520x64xf32, #tpu.memory_space<vmem>>, vector<8x64xf32>
    %166 = arith.maximumf %164, %165 : vector<8x64xf32>
    %c368 = arith.constant 368 : index
    %c0_149 = arith.constant 0 : index
    %167 = vector.load %arg13[%c368, %c0_149] : memref<520x64xf32, #tpu.memory_space<vmem>>, vector<8x64xf32>
    %c384_150 = arith.constant 384 : index
    %c0_151 = arith.constant 0 : index
    %168 = vector.load %arg13[%c384_150, %c0_151] : memref<520x64xf32, #tpu.memory_space<vmem>>, vector<8x64xf32>
    %169 = arith.maximumf %167, %168 : vector<8x64xf32>
    %170 = arith.maximumf %166, %169 : vector<8x64xf32>
    %171 = tpu.concatenate %149, %156, %163, %170 in 1 : vector<8x64xf32>, vector<8x64xf32>, vector<8x64xf32>, vector<8x64xf32> -> vector<8x256xf32>
    %c0_152 = arith.constant 0 : index
    %c0_153 = arith.constant 0 : index
    %172 = vector.load %arg7[%c0_152, %c0_153] : memref<3x128xf32, #tpu.memory_space<vmem>>, vector<3x128xf32>
    %c0_154 = arith.constant 0 : index
    %c0_155 = arith.constant 0 : index
    %173 = vector.load %arg6[%c0_154, %c0_155] : memref<256x128xf32, #tpu.memory_space<vmem>>, vector<256x128xf32>
    %cst_156 = arith.constant dense<0.000000e+00> : vector<8x128xf32>
    %174 = tpu.matmul %171, %173, %cst_156 {dimension_numbers = #tpu.dot_dimension_numbers<[1], [0], [0], [1], [0, 0, 1, 1], [], []>} : vector<8x256xf32>, vector<256x128xf32>, vector<8x128xf32> -> vector<8x128xf32>
    %175 = vector.extract_strided_slice %172 {offsets = [0, 0], sizes = [1, 128], strides = [1, 1]} : vector<3x128xf32> to vector<1x128xf32>
    %176 = vector.broadcast %175 : vector<1x128xf32> to vector<8x128xf32>
    %177 = arith.addf %174, %176 : vector<8x128xf32>
    %178 = vector.extract_strided_slice %172 {offsets = [1, 0], sizes = [1, 128], strides = [1, 1]} : vector<3x128xf32> to vector<1x128xf32>
    %179 = vector.broadcast %178 : vector<1x128xf32> to vector<8x128xf32>
    %180 = arith.mulf %177, %179 : vector<8x128xf32>
    %181 = vector.extract_strided_slice %172 {offsets = [2, 0], sizes = [1, 128], strides = [1, 1]} : vector<3x128xf32> to vector<1x128xf32>
    %182 = vector.broadcast %181 : vector<1x128xf32> to vector<8x128xf32>
    %183 = arith.addf %180, %182 : vector<8x128xf32>
    %cst_157 = arith.constant 0.000000e+00 : f32
    %184 = vector.broadcast %cst_157 : f32 to vector<8x128xf32>
    %185 = arith.maximumf %183, %184 : vector<8x128xf32>
    %c0_158 = arith.constant 0 : index
    %c0_159 = arith.constant 0 : index
    %186 = vector.load %arg8[%c0_158, %c0_159] : memref<128x128xf32, #tpu.memory_space<vmem>>, vector<128x128xf32>
    %cst_160 = arith.constant dense<0.000000e+00> : vector<8x128xf32>
    %187 = tpu.matmul %185, %186, %cst_160 {dimension_numbers = #tpu.dot_dimension_numbers<[1], [0], [0], [1], [0, 0, 1, 1], [], []>} : vector<8x128xf32>, vector<128x128xf32>, vector<8x128xf32> -> vector<8x128xf32>
    %c0_161 = arith.constant 0 : index
    %c0_162 = arith.constant 0 : index
    %188 = vector.load %arg9[%c0_161, %c0_162] : memref<1x128xf32, #tpu.memory_space<vmem>>, vector<1x128xf32>
    %189 = vector.broadcast %188 : vector<1x128xf32> to vector<8x128xf32>
    %190 = arith.addf %187, %189 : vector<8x128xf32>
    %191 = tpu.iota {dimensions = array<i32: 1>} : vector<1x128xi32>
    %c10_i32 = arith.constant 10 : i32
    %192 = vector.broadcast %c10_i32 : i32 to vector<1x128xi32>
    %193 = arith.cmpi slt, %191, %192 : vector<1x128xi32>
    %cst_163 = arith.constant -1.000000e+30 : f32
    %194 = vector.shape_cast %193 : vector<1x128xi1> to vector<1x128xi1>
    %195 = vector.broadcast %194 : vector<1x128xi1> to vector<8x128xi1>
    %196 = vector.broadcast %cst_163 : f32 to vector<8x128xf32>
    %197 = arith.select %195, %190, %196 : vector<8x128xi1>, vector<8x128xf32>
    %cst_164 = arith.constant dense<0xFF800000> : vector<8xf32>
    %198 = vector.multi_reduction <maximumf>, %197, %cst_164 [1] : vector<8x128xf32> to vector<8xf32>
    %199 = vector.shape_cast %198 : vector<8xf32> to vector<8x1xf32>
    %200 = vector.broadcast %199 : vector<8x1xf32> to vector<8x128xf32>
    %201 = arith.subf %197, %200 : vector<8x128xf32>
    %202 = math.exp %201 : vector<8x128xf32>
    %cst_165 = arith.constant dense<0.000000e+00> : vector<8xf32>
    %203 = vector.multi_reduction <add>, %202, %cst_165 [1] : vector<8x128xf32> to vector<8xf32>
    %204 = vector.shape_cast %203 : vector<8xf32> to vector<8x1xf32>
    %205 = vector.broadcast %204 : vector<8x1xf32> to vector<8x128xf32>
    %206 = arith.divf %202, %205 : vector<8x128xf32>
    %c0_166 = arith.constant 0 : index
    %c0_167 = arith.constant 0 : index
    %c0_168 = arith.constant 0 : index
    %207 = vector.load %arg10[%c0_166, %c0_167, %c0_168] : memref<2x8x128xf32, #tpu.memory_space<vmem>>, vector<1x8x128xf32>
    %208 = vector.shape_cast %207 : vector<1x8x128xf32> to vector<8x128xf32>
    %209 = vector.shape_cast %206 : vector<8x128xf32> to vector<1x8x128xf32>
    tpu.vector_store %arg10[%c0_166, %c0_167, %c0_168], %209 {strides = array<i32>} : memref<2x8x128xf32, #tpu.memory_space<vmem>>, vector<1x8x128xf32>,
    %cst_169 = arith.constant -1.000000e+30 : f32
    %210 = vector.shape_cast %193 : vector<1x128xi1> to vector<1x128xi1>
    %211 = vector.broadcast %210 : vector<1x128xi1> to vector<8x128xi1>
    %212 = vector.broadcast %cst_169 : f32 to vector<8x128xf32>
    %213 = arith.select %211, %206, %212 : vector<8x128xi1>, vector<8x128xf32>
    %cst_170 = arith.constant dense<0xFF800000> : vector<8xf32>
    %214 = vector.multi_reduction <maximumf>, %213, %cst_170 [1] : vector<8x128xf32> to vector<8xf32>
    %215 = vector.shape_cast %214 : vector<8xf32> to vector<8x1xf32>
    %216 = vector.broadcast %215 : vector<8x1xf32> to vector<8x128xf32>
    %217 = arith.subf %213, %216 : vector<8x128xf32>
    %218 = math.exp %217 : vector<8x128xf32>
    %cst_171 = arith.constant dense<0.000000e+00> : vector<8xf32>
    %219 = vector.multi_reduction <add>, %218, %cst_171 [1] : vector<8x128xf32> to vector<8xf32>
    %220 = vector.shape_cast %219 : vector<8xf32> to vector<8x1xf32>
    %221 = vector.broadcast %220 : vector<8x1xf32> to vector<8x128xf32>
    %222 = arith.divf %218, %221 : vector<8x128xf32>
    %c1_172 = arith.constant 1 : index
    %c0_173 = arith.constant 0 : index
    %c0_174 = arith.constant 0 : index
    %223 = vector.load %arg10[%c1_172, %c0_173, %c0_174] : memref<2x8x128xf32, #tpu.memory_space<vmem>>, vector<1x8x128xf32>
    %224 = vector.shape_cast %223 : vector<1x8x128xf32> to vector<8x128xf32>
    %225 = vector.shape_cast %222 : vector<8x128xf32> to vector<1x8x128xf32>
    tpu.vector_store %arg10[%c1_172, %c0_173, %c0_174], %225 {strides = array<i32>} : memref<2x8x128xf32, #tpu.memory_space<vmem>>, vector<1x8x128xf32>,
    return
  }
  func.func @transform_0(%arg0: i32) -> (i32, i32, i32) {
    %c0_i32 = arith.constant 0 : i32
    %c0_i32_0 = arith.constant 0 : i32
    %c0_i32_1 = arith.constant 0 : i32
    return %c0_i32, %arg0, %c0_i32_0 : i32, i32, i32
  }
  func.func @transform_1(%arg0: i32) -> (i32, i32) {
    %c0_i32 = arith.constant 0 : i32
    %c0_i32_0 = arith.constant 0 : i32
    %c0_i32_1 = arith.constant 0 : i32
    return %c0_i32, %c0_i32_0 : i32, i32
  }
  func.func @transform_2(%arg0: i32) -> (i32, i32) {
    %c0_i32 = arith.constant 0 : i32
    %c0_i32_0 = arith.constant 0 : i32
    %c0_i32_1 = arith.constant 0 : i32
    return %c0_i32, %c0_i32_0 : i32, i32
  }
  func.func @transform_3(%arg0: i32) -> (i32, i32, i32) {
    %c0_i32 = arith.constant 0 : i32
    %c0_i32_0 = arith.constant 0 : i32
    %c0_i32_1 = arith.constant 0 : i32
    %c0_i32_2 = arith.constant 0 : i32
    return %c0_i32, %c0_i32_0, %c0_i32_1 : i32, i32, i32
  }
  func.func @transform_4(%arg0: i32) -> (i32, i32) {
    %c0_i32 = arith.constant 0 : i32
    %c0_i32_0 = arith.constant 0 : i32
    %c0_i32_1 = arith.constant 0 : i32
    return %c0_i32, %c0_i32_0 : i32, i32
  }
  func.func @transform_5(%arg0: i32) -> (i32, i32) {
    %c0_i32 = arith.constant 0 : i32
    %c0_i32_0 = arith.constant 0 : i32
    %c0_i32_1 = arith.constant 0 : i32
    return %c0_i32, %c0_i32_0 : i32, i32
  }
  func.func @transform_6(%arg0: i32) -> (i32, i32) {
    %c0_i32 = arith.constant 0 : i32
    %c0_i32_0 = arith.constant 0 : i32
    %c0_i32_1 = arith.constant 0 : i32
    return %c0_i32, %c0_i32_0 : i32, i32
  }
  func.func @transform_7(%arg0: i32) -> (i32, i32) {
    %c0_i32 = arith.constant 0 : i32
    %c0_i32_0 = arith.constant 0 : i32
    %c0_i32_1 = arith.constant 0 : i32
    return %c0_i32, %c0_i32_0 : i32, i32
  }
  func.func @transform_8(%arg0: i32) -> (i32, i32) {
    %c0_i32 = arith.constant 0 : i32
    %c0_i32_0 = arith.constant 0 : i32
    %c0_i32_1 = arith.constant 0 : i32
    return %c0_i32, %c0_i32_0 : i32, i32
  }
  func.func @transform_9(%arg0: i32) -> (i32, i32, i32) {
    %c0_i32 = arith.constant 0 : i32
    %c0_i32_0 = arith.constant 0 : i32
    %c0_i32_1 = arith.constant 0 : i32
    return %c0_i32, %arg0, %c0_i32_0 : i32, i32, i32
  }
}

</mosaic_0001>

<bundles_post_ra>
// kernel: network_forward.1
= control target key start
LH: loop header
LB: loop body
LE: loop exit
PB: predicated region body
PF: predicated region fallthrough
CT: control target
= control target key end

     0   :  { %14 = vsyncpa [#allocation6], 0  ;;  %s17474_s0 = inlined_call_operand.vmem [shape: f32[14,8,48], index: 0, kind: input, shape index: {}]   ;;  %s17475_s1 = inlined_call_operand.hbm [shape: f32[48,448], index: 1, kind: input, shape index: {}]   ;;  %s17476_s2 = inlined_call_operand.vmem [shape: f32[3,448], index: 2, kind: input, shape index: {}]   ;;  %s17477_s3 = inlined_call_operand.vmem [shape: f32[9,32,64], index: 3, kind: input, shape index: {}]   ;;  %s17478_s4 = inlined_call_operand.vmem [shape: f32[3,64], index: 4, kind: input, shape index: {}]   ;;  %s17479_s5 = inlined_call_operand.hbm [shape: f32[256,128], index: 5, kind: input, shape index: {}]   ;;  %s17480_s6 = inlined_call_operand.vmem [shape: f32[3,128], index: 6, kind: input, shape index: {}]   ;;  %s17481_s7 = inlined_call_operand.vmem [shape: f32[128,128], index: 7, kind: input, shape index: {}]   ;;  %s17482_s8 = inlined_call_operand.vmem [shape: f32[1,128], index: 8, kind: input, shape index: {}]   ;;  %s17483_s9 = inlined_call_operand.vmem [shape: f32[2,8,128], index: 9, kind: output, shape index: {}]  }
   0x1   :  { %15 = vsyncpa [#allocation8], 0  ;;  %s13215_s30 = smov [#allocation5]  }
   0x2   :  { %s23_s10 = sshll.u32 %s13215_s30, 4  ;;  %s24_s10 = int_to_ptr.vmem [resolvable:$true] %s23_s10 }
   0x3   :  { %s13179_s11 = scalar_lea.vmem %s24_s10, 3072  ;;  %p13184_p1 = scmp.lt.s32.totalorder %s24_s10, %s24_s10 }
   0x4   :  { %p13180_p0 = scmp.ne.s32.totalorder %s24_s10, %s13179_s11  ;;  %p13185_p2 = scmp.lt.s32.totalorder %s13179_s11, %s13179_s11 }
   0x6   :  { %p13186_p3 = por %p13185_p2, %p13184_p1 }
   0x8   :  { %p13187_p4 = pnand %p13186_p3, %p13180_p0 }
   0xa   :  { %13190 = shalt.err (!%p13187_p4)
}
   0xb   :  { %s13216_s12 = smov 512   ;;  %s13217_s13 = smov 32  }
   0xc   :  { %29 = dma.hbm_to_vmem [thread:$0]  %s17475_s1, 3072, %s24_s10, [#allocation6], %s13216_s12, %s13216_s12, %s13217_s13  }
   0xd   :  { %s13218_s16 = smov [#allocation7]  }
   0xe   :  { %s41_s17 = sshll.u32 %s13218_s16, 4  ;;  %s42_s17 = int_to_ptr.vmem [resolvable:$true] %s41_s17 }
   0xf   :  { %s13199_s18 = scalar_lea.vmem %s42_s17, 4096  ;;  %p13204_p6 = scmp.lt.s32.totalorder %s42_s17, %s42_s17 }
  0x10   :  { %p13200_p5 = scmp.ne.s32.totalorder %s42_s17, %s13199_s18  ;;  %p13205_p7 = scmp.lt.s32.totalorder %s13199_s18, %s13199_s18 }
  0x12   :  { %p13206_p8 = por %p13205_p7, %p13204_p6 }
  0x14   :  { %p13207_p9 = pnand %p13206_p8, %p13200_p5 }
  0x16   :  { %13210 = shalt.err (!%p13207_p9)
}
  0x17   :  { %s13219_s19 = smov 128   ;;  %s13220_s20 = smov 8  }
  0x18   :  { %47 = dma.hbm_to_vmem [thread:$0]  %s17479_s5, 4096, %s42_s17, [#allocation8], %s13219_s19, %s13219_s19, %s13220_s20  }
  0x19   :  { %13211 = dma.done.wait [#allocation6], 3072  }
  0x1a   :  { %13212 = vsyncadd [#allocation6], 4294964224 }
  0x1b   :  { %13213 = dma.done.wait [#allocation8], 4096  }
  0x1c   :  { %13214 = vsyncadd [#allocation8], 4294963200  ;;  %v13221_v0 = vmov 0.0   ;;  %v97_v1 = vld [vmem:[#allocation5 + $0xa8] sm:$0xff]  ;;  %v96_v2 = vld [vmem:[#allocation5 + $0xa0] sm:$0xff]  ;;  %vm138_vm0 = vcmask 392192   ;;  %v17484_v39 = vlaneseq }
  0x1d   :  { %245 = vmatprep.mubr.f32.mxu0 %v13221_v0  ;;  %776 = vst [vmem:[#allocation2 + $0x1c0] sm:$0xff] %v13221_v0  ;;  %394 = vmatprep.mubr.f32.mxu1 %v13221_v0  ;;  %v93_v3 = vld [vmem:[#allocation5 + $0x88] sm:$0xff]  ;;  %v92_v4 = vld [vmem:[#allocation5 + $0x80] sm:$0xff]  ;;  %v99_v13 = vld [vmem:[#allocation5 + $0xb8] sm:$0xff]  ;;  %vm13222_vm1 = vmmov 0   ;;  %s13223_s14 = smov 96  }
  0x1e   :  { %201 = vmatprep.subr.mxu0 %v97_v1  ;;  %v89_v5 = vld [vmem:[#allocation5 + $0x68] sm:$0xff]  ;;  %v88_v6 = vld [vmem:[#allocation5 + $0x60] sm:$0xff]  ;;  %350 = vmatprep.subr.mxu1 %v99_v13  ;;  %v98_v14 = vld [vmem:[#allocation5 + $0xb0] sm:$0xff]  ;;  %v13387_v40 = vshrl.u32 %v17484_v39, 7  ;;  %vm722_vm2 = vcmask 523264   ;;  %vm879_vm3 = vcmask 261120  }
  0x1f   :  { %202 = vmatpush1.msra.mxu0 %v96_v2  ;;  %v85_v7 = vld [vmem:[#allocation5 + $0x48] sm:$0xff]  ;;  %v84_v8 = vld [vmem:[#allocation5 + $0x40] sm:$0xff]  ;;  %v95_v15 = vld [vmem:[#allocation5 + $0x98] sm:$0xff]  ;;  %351 = vmatpush1.msra.mxu1 %v98_v14  ;;  %779 = vst.msk [vmem:[#allocation2 + $0x1d8] sm:$0xff] %vm722_vm2, %v13221_v0 }
  0x20   :  { %203 = vmatprep.subr.mxu0 %v93_v3  ;;  %v81_v9 = vld [vmem:[#allocation5 + $0x28] sm:$0xff]  ;;  %v80_v10 = vld [vmem:[#allocation5 + $0x20] sm:$0xff]  ;;  %v94_v16 = vld [vmem:[#allocation5 + $0x90] sm:$0xff]  ;;  %352 = vmatprep.subr.mxu1 %v95_v15  ;;  %v13390_v41 = vsub.s32 0, %v13387_v40  ;;  %v108_v43 = vsub.s32 4, %v13387_v40  ;;  %v13398_v45 = vsub.s32 1, %v13387_v40 }
  0x21   :  { %204 = vmatpush1.msra.mxu0 %v92_v4  ;;  %v77_v11 = vld [vmem:[#allocation5 + $0x8] sm:$0xff]  ;;  %v76_v12 = vld [vmem:[#allocation5] sm:$0xff]  ;;  %v91_v18 = vld [vmem:[#allocation5 + $0x78] sm:$0xff]  ;;  %353 = vmatpush1.msra.mxu1 %v94_v16  ;;  %v13401_v46 = vsub.s32 2, %v13387_v40  ;;  %v541_v48 = vsub.s32 5, %v13387_v40  ;;  %v633_v51 = vsub.s32 6, %v13387_v40 }
  0x22   :  { %205 = vmatprep.subr.mxu0 %v89_v5  ;;  %v13287_v17 = vld [vmem:[%s17474_s0] sm:$0xff]  ;;  %v90_v19 = vld [vmem:[#allocation5 + $0x70] sm:$0xff]  ;;  %v87_v20 = vld [vmem:[#allocation5 + $0x58] sm:$0xff]  ;;  %354 = vmatprep.subr.mxu1 %v91_v18 }
  0x23   :  { %206 = vmatpush1.msra.mxu0 %v88_v6  ;;  %v61_v21 = vld [vmem:[%s17474_s0 + $0x8] sm:$0xff]  ;;  %355 = vmatpush1.msra.mxu1 %v90_v19  ;;  %v62_v22 = vld [vmem:[%s17474_s0 + $0x10] sm:$0xff]  ;;  %v63_v23 = vld [vmem:[%s17474_s0 + $0x18] sm:$0xff]  ;;  %17487 = vst [vmem:[#allocation11_spill] sm:$0xff] %v13401_v46 }
  0x24   :  { %207 = vmatprep.subr.mxu0 %v85_v7  ;;  %356 = vmatprep.subr.mxu1 %v87_v20  ;;  %v64_v24 = vld [vmem:[%s17474_s0 + $0x20] sm:$0xff]  ;;  %v65_v25 = vld [vmem:[%s17474_s0 + $0x28] sm:$0xff]  ;;  %v66_v26 = vld [vmem:[%s17474_s0 + $0x30] sm:$0xff] }
  0x25   :  { %208 = vmatpush1.msra.mxu0 %v84_v8  ;;  %v67_v27 = vld [vmem:[%s17474_s0 + $0x38] sm:$0xff]  ;;  %v68_v28 = vld [vmem:[%s17474_s0 + $0x40] sm:$0xff]  ;;  %v69_v29 = vld [vmem:[%s17474_s0 + $0x48] sm:$0xff] }
  0x26   :  { %209 = vmatprep.subr.mxu0 %v81_v9  ;;  %v70_v30 = vld [vmem:[%s17474_s0 + $0x50] sm:$0xff]  ;;  %v71_v31 = vld [vmem:[%s17474_s0 + $0x58] sm:$0xff]  ;;  %v72_v32 = vld [vmem:[%s17474_s0 + $0x60] sm:$0xff] }
  0x27   :  { %210 = vmatpush1.msra.mxu0 %v80_v10  ;;  %v73_v33 = vld [vmem:[%s17474_s0 + $0x68] sm:$0xff]  ;;  %v83_v35 = vld [vmem:[#allocation5 + $0x38] sm:$0xff]  ;;  %v74_v42 = vld [vmem:[%s17476_s2] sm:$0x77] }
  0x28   :  { %211 = vmatprep.subr.mxu0 %v77_v11  ;;  %v86_v34 = vld [vmem:[#allocation5 + $0x50] sm:$0xff]  ;;  %v79_v37 = vld [vmem:[#allocation5 + $0x18] sm:$0xff]  ;;  %v105_v44 = vrot.slane %v74_v42, %v13390_v41  ;;  %v109_v47 = vrot.slane %v74_v42, %v108_v43  ;;  %v538_v50 = vrot.slane %v74_v42, %v13398_v45  ;;  %v630_v52 = vrot.slane %v74_v42, %v13401_v46  ;;  %v1808_v6 = vld [vmem:[%s17477_s3 + $0x18] sm:$0xff] }
  0x29   :  { %212 = vmatpush1.msra.mxu0 %v76_v12  ;;  %357 = vmatpush1.msra.mxu1 %v86_v34  ;;  %v82_v36 = vld [vmem:[#allocation5 + $0x30] sm:$0xff]  ;;  %v542_v54 = vrot.slane %v74_v42, %v541_v48  ;;  %v634_v58 = vrot.slane %v74_v42, %v633_v51  ;;  %v1807_v12 = vld [vmem:[%s17477_s3 + $0x10] sm:$0xff] }
  0x2a   :  { %9945 = vmatmul.mubr.msk.f32.vlgmr.msra.gmra.mxu0 %vm138_vm0, %v13287_v17  ;;  %11265 = vmatprep.subr.mxu0 %v13221_v0  ;;  %v78_v38 = vld [vmem:[#allocation5 + $0x10] sm:$0xff]  ;;  %v13407_v49 = vrot.slane %v105_v44, %v13390_v41  ;;  %v13413_v53 = vrot.slane %v109_v47, %v13390_v41  ;;  %v13419_v57 = vrot.slane %v538_v50, %v13398_v45 }
  0x2b   :  { %251 = vmatprep.mubr.f32.mxu0 %v13221_v0  ;;  %358 = vmatprep.subr.mxu1 %v83_v35  ;;  %v13424_v61 = vrot.slane %v630_v52, %v13401_v46  ;;  %v13428_v63 = vrot.slane %v542_v54, %v13398_v45  ;;  %v13432_v4 = vrot.slane %v634_v58, %v13401_v46  ;;  %v1806_v18 = vld [vmem:[%s17477_s3 + $0x8] sm:$0xff] }
  0x2c   :  { %359 = vmatpush1.msra.mxu1 %v82_v36  ;;  %11266 = vmatpush3.msra.mxu0 %v1808_v6 }
  0x2d   :  { %360 = vmatprep.subr.mxu1 %v79_v37  ;;  %11267 = vmatprep.subr.mxu0 %v13221_v0 }
  0x2e   :  { %9946 = vmatmul.mubr.msk.f32.gmra.mxu0 %vm138_vm0, %v61_v21  ;;  %361 = vmatpush1.msra.mxu1 %v78_v38 }
  0x2f   :  { %257 = vmatprep.mubr.f32.mxu0 %v13221_v0  ;;  %9959 = vmatmul.mubr.msk.f32.vlgmr.msra.gmra.mxu1 %vm138_vm0, %v13287_v17 }
  0x30   :  { %13127 = vmatprep.subr.mxu1 %v13221_v0  ;;  %400 = vmatprep.mubr.f32.mxu1 %v13221_v0 }
  0x31   :  { %13131 = vmatpush3.msra.mxu1 %v1808_v6  ;;  %11268 = vmatpush3.msra.mxu0 %v1807_v12 }
  0x32   :  { %9947 = vmatmul.mubr.msk.f32.gmra.mxu0 %vm138_vm0, %v62_v22  ;;  %13128 = vmatprep.subr.mxu1 %v13221_v0 }
  0x33   :  { %263 = vmatprep.mubr.f32.mxu0 %v13221_v0  ;;  %9960 = vmatmul.mubr.msk.f32.gmra.mxu1 %vm138_vm0, %v61_v21 }
  0x34   :  { %406 = vmatprep.mubr.f32.mxu1 %v13221_v0  ;;  %13132 = vmatpush3.msra.mxu1 %v1807_v12 }
  0x35   :  { %11269 = vmatprep.subr.mxu0 %v13221_v0  ;;  %13129 = vmatprep.subr.mxu1 %v13221_v0 }
  0x36   :  { %9948 = vmatmul.mubr.msk.f32.gmra.mxu0 %vm138_vm0, %v63_v23  ;;  %13133 = vmatpush3.msra.mxu1 %v1806_v18 }
  0x37   :  { %269 = vmatprep.mubr.f32.mxu0 %v13221_v0  ;;  %9961 = vmatmul.mubr.msk.f32.gmra.mxu1 %vm138_vm0, %v62_v22 }
  0x38   :  { %412 = vmatprep.mubr.f32.mxu1 %v13221_v0  ;;  %11270 = vmatpush3.msra.mxu0 %v1806_v18 }
  0x39   :  { %11271 = vmatprep.subr.mxu0 %v13221_v0  ;;  %13130 = vmatprep.subr.mxu1 %v13221_v0 }
  0x3a   :  { %9949 = vmatmul.mubr.msk.f32.gmra.mxu0 %vm138_vm0, %v64_v24 }
  0x3b   :  { %275 = vmatprep.mubr.f32.mxu0 %v13221_v0  ;;  %9962 = vmatmul.mubr.msk.f32.gmra.mxu1 %vm138_vm0, %v63_v23 }
  0x3c   :  { %418 = vmatprep.mubr.f32.mxu1 %v13221_v0 }
  0x3e   :  { %9950 = vmatmul.mubr.msk.f32.gmra.mxu0 %vm138_vm0, %v65_v25 }
  0x3f   :  { %281 = vmatprep.mubr.f32.mxu0 %v13221_v0  ;;  %9963 = vmatmul.mubr.msk.f32.gmra.mxu1 %vm138_vm0, %v64_v24  ;;  %v1805_v24 = vld [vmem:[%s17477_s3] sm:$0xff] }
  0x40   :  { %424 = vmatprep.mubr.f32.mxu1 %v13221_v0  ;;  %11272 = vmatpush3.msra.mxu0 %v1805_v24 }
  0x41   :  { %13134 = vmatpush3.msra.mxu1 %v1805_v24  ;;  %11671 = vmatprep.subr.mxu0 %v13221_v0 }
  0x42   :  { %9951 = vmatmul.mubr.msk.f32.gmra.mxu0 %vm138_vm0, %v66_v26  ;;  %11468 = vmatprep.subr.mxu1 %v13221_v0 }
  0x43   :  { %287 = vmatprep.mubr.f32.mxu0 %v13221_v0  ;;  %9964 = vmatmul.mubr.msk.f32.gmra.mxu1 %vm138_vm0, %v65_v25 }
  0x44   :  { %430 = vmatprep.mubr.f32.mxu1 %v13221_v0 }
  0x46   :  { %9952 = vmatmul.mubr.msk.f32.gmra.mxu0 %vm138_vm0, %v67_v27 }
  0x47   :  { %293 = vmatprep.mubr.f32.mxu0 %v13221_v0  ;;  %9965 = vmatmul.mubr.msk.f32.gmra.mxu1 %vm138_vm0, %v66_v26 }
  0x48   :  { %436 = vmatprep.mubr.f32.mxu1 %v13221_v0 }
  0x4a   :  { %9953 = vmatmul.mubr.msk.f32.gmra.mxu0 %vm138_vm0, %v68_v28 }
  0x4b   :  { %299 = vmatprep.mubr.f32.mxu0 %v13221_v0  ;;  %9966 = vmatmul.mubr.msk.f32.gmra.mxu1 %vm138_vm0, %v67_v27 }
  0x4c   :  { %442 = vmatprep.mubr.f32.mxu1 %v13221_v0 }
  0x4e   :  { %9954 = vmatmul.mubr.msk.f32.gmra.mxu0 %vm138_vm0, %v69_v29 }
  0x4f   :  { %305 = vmatprep.mubr.f32.mxu0 %v13221_v0  ;;  %9967 = vmatmul.mubr.msk.f32.gmra.mxu1 %vm138_vm0, %v68_v28 }
  0x50   :  { %448 = vmatprep.mubr.f32.mxu1 %v13221_v0 }
  0x52   :  { %9955 = vmatmul.mubr.msk.f32.gmra.mxu0 %vm138_vm0, %v70_v30 }
  0x53   :  { %311 = vmatprep.mubr.f32.mxu0 %v13221_v0  ;;  %9968 = vmatmul.mubr.msk.f32.gmra.mxu1 %vm138_vm0, %v69_v29 }
  0x54   :  { %454 = vmatprep.mubr.f32.mxu1 %v13221_v0 }
  0x56   :  { %9956 = vmatmul.mubr.msk.f32.gmra.mxu0 %vm138_vm0, %v71_v31 }
  0x57   :  { %317 = vmatprep.mubr.f32.mxu0 %v13221_v0  ;;  %9969 = vmatmul.mubr.msk.f32.gmra.mxu1 %vm138_vm0, %v70_v30 }
  0x58   :  { %460 = vmatprep.mubr.f32.mxu1 %v13221_v0 }
  0x5a   :  { %9957 = vmatmul.mubr.msk.f32.gmra.mxu0 %vm138_vm0, %v72_v32 }
  0x5b   :  { %323 = vmatprep.mubr.f32.mxu0 %v13221_v0  ;;  %9970 = vmatmul.mubr.msk.f32.gmra.mxu1 %vm138_vm0, %v71_v31 }
  0x5c   :  { %466 = vmatprep.mubr.f32.mxu1 %v13221_v0 }
  0x5e   :  { %9958 = vmatmul.mubr.msk.f32.gmra.mxu0 %vm138_vm0, %v73_v33 }
  0x5f   :  { %9971 = vmatmul.mubr.msk.f32.gmra.mxu1 %vm138_vm0, %v72_v32  ;;  %11273 = vmatprep.mubr.msk.f32.mxu0 %vm13222_vm1, %v13221_v0 }
  0x60   :  { %472 = vmatprep.mubr.f32.mxu1 %v13221_v0 }
  0x63   :  { %9972 = vmatmul.mubr.msk.f32.gmra.mxu1 %vm138_vm0, %v73_v33 }
  0x64   :  { %11384 = vmatprep.mubr.msk.f32.mxu1 %vm13222_vm1, %v13221_v0 }
  0xea   :  { %v247_v55 = vpop.f32.mrf.mxu0 }
  0xeb   :  { %v248_v56 = vadd.f32 %v247_v55, %v13407_v49 }
  0xec   :  { %v249_v59 = vpop.f32.mrf.mxu0 }
  0xed   :  { %v479_v60 = vmax.f32 %v248_v56, 0.0  ;;  %v250_v62 = vadd.f32 %v249_v59, %v13413_v53 }
  0xee   :  { %v253_v1 = vpop.f32.mrf.mxu0 }
  0xef   :  { %v571_v2 = vmul.f32 %v13419_v57, %v479_v60  ;;  %v480_v3 = vmax.f32 %v250_v62, 0.0  ;;  %v254_v5 = vadd.f32 %v253_v1, %v13407_v49 }
  0xf0   :  { %v255_v7 = vpop.f32.mrf.mxu0 }
  0xf1   :  { %v663_v8 = vadd.f32 %v13424_v61, %v571_v2  ;;  %v572_v9 = vmul.f32 %v13428_v63, %v480_v3  ;;  %v483_v10 = vmax.f32 %v254_v5, 0.0  ;;  %v256_v11 = vadd.f32 %v255_v7, %v13413_v53 }
  0xf2   :  { %v259_v13 = vpop.f32.mrf.mxu0 }
  0xf3   :  { %v664_v14 = vadd.f32 %v13432_v4, %v572_v9  ;;  %v575_v15 = vmul.f32 %v13419_v57, %v483_v10  ;;  %v484_v16 = vmax.f32 %v256_v11, 0.0  ;;  %v260_v17 = vadd.f32 %v259_v13, %v13407_v49 }
  0xf4   :  { %v261_v19 = vpop.f32.mrf.mxu0 }
  0xf5   :  { %720 = vst [vmem:[#allocation2 + $0x8] sm:$0xff] %v664_v14  ;;  %v667_v20 = vadd.f32 %v13424_v61, %v575_v15  ;;  %v576_v21 = vmul.f32 %v13428_v63, %v484_v16  ;;  %v487_v22 = vmax.f32 %v260_v17, 0.0  ;;  %v262_v23 = vadd.f32 %v261_v19, %v13413_v53 }
  0xf6   :  { %v265_v25 = vpop.f32.mrf.mxu0 }
  0xf7   :  { %v668_v26 = vadd.f32 %v13432_v4, %v576_v21  ;;  %v579_v27 = vmul.f32 %v13419_v57, %v487_v22  ;;  %v488_v28 = vmax.f32 %v262_v23, 0.0  ;;  %v266_v29 = vadd.f32 %v265_v25, %v13407_v49 }
  0xf8   :  { %v267_v30 = vpop.f32.mrf.mxu0  ;;  %v13469_v31 = vmax.f32 %v663_v8, %v667_v20 }
  0xf9   :  { %725 = vst [vmem:[#allocation2 + $0x28] sm:$0xff] %v668_v26  ;;  %v671_v32 = vadd.f32 %v13424_v61, %v579_v27  ;;  %v580_v33 = vmul.f32 %v13428_v63, %v488_v28  ;;  %v491_v34 = vmax.f32 %v266_v29, 0.0  ;;  %v268_v35 = vadd.f32 %v267_v30, %v13413_v53 }
  0xfa   :  { %v271_v36 = vpop.f32.mrf.mxu0  ;;  %937 = vrot.lane.b32.xlu1 %v13469_v31, %s13223_s14  ;;  %823 = vrot.lane.b32.xlu0 %v13469_v31, %s13223_s14  ;;  %v13485_v52 = vmax.f32 %v664_v14, %v668_v26 }
  0xfb   :  { %v672_v37 = vadd.f32 %v13432_v4, %v580_v33  ;;  %v583_v38 = vmul.f32 %v13419_v57, %v491_v34  ;;  %v492_v42 = vmax.f32 %v268_v35, 0.0  ;;  %v272_v44 = vadd.f32 %v271_v36, %v13407_v49 }
  0xfc   :  { %v273_v47 = vpop.f32.mrf.mxu0  ;;  %v13483_v50 = vmax.f32 %v667_v20, %v671_v32 }
  0xfd   :  { %729 = vst [vmem:[#allocation2 + $0x48] sm:$0xff] %v672_v37  ;;  %v675_v54 = vadd.f32 %v13424_v61, %v583_v38  ;;  %v584_v55 = vmul.f32 %v13428_v63, %v492_v42  ;;  %v495_v56 = vmax.f32 %v272_v44, 0.0  ;;  %v274_v58 = vadd.f32 %v273_v47, %v13413_v53 }
  0xfe   :  { %v277_v59 = vpop.f32.mrf.mxu0  ;;  %825 = vrot.lane.b32.xlu1 %v13483_v50, %s13223_s14  ;;  %1219 = vrot.lane.b32.xlu0 %v13485_v52, %s13223_s14  ;;  %v13513_v17 = vmax.f32 %v668_v26, %v672_v37 }
  0xff   :  { %v676_v60 = vadd.f32 %v13432_v4, %v584_v55  ;;  %v587_v62 = vmul.f32 %v13419_v57, %v495_v56  ;;  %v496_v1 = vmax.f32 %v274_v58, 0.0  ;;  %v278_v2 = vadd.f32 %v277_v59, %v13407_v49 }
 0x100   :  { %v279_v3 = vpop.f32.mrf.mxu0  ;;  %v13497_v5 = vmax.f32 %v671_v32, %v675_v54 }
 0x101   :  { %733 = vst [vmem:[#allocation2 + $0x68] sm:$0xff] %v676_v60  ;;  %v679_v6 = vadd.f32 %v13424_v61, %v587_v62  ;;  %v588_v7 = vmul.f32 %v13428_v63, %v496_v1  ;;  %v499_v8 = vmax.f32 %v278_v2, 0.0  ;;  %v280_v9 = vadd.f32 %v279_v3, %v13413_v53 }
 0x102   :  { %v283_v10 = vpop.f32.mrf.mxu0  ;;  %941 = vrot.lane.b32.xlu1 %v13497_v5, %s13223_s14  ;;  %939 = vrot.lane.b32.xlu0 %v13483_v50, %s13223_s14  ;;  %v13511_v16 = vmax.f32 %v672_v37, %v676_v60 }
 0x103   :  { %v13507_v11 = vadd.f32 %v13432_v4, %v588_v7  ;;  %v591_v12 = vmul.f32 %v13419_v57, %v499_v8  ;;  %v500_v13 = vmax.f32 %v280_v9, 0.0  ;;  %v284_v14 = vadd.f32 %v283_v10, %v13407_v49 }
 0x104   :  { %v285_v15 = vpop.f32.mrf.mxu0  ;;  %v13526_v28 = vmax.f32 %v675_v54, %v679_v6 }
 0x105   :  { %737 = vst [vmem:[#allocation2 + $0x88] sm:$0xff] %v13507_v11  ;;  %v683_v18 = vadd.f32 %v13424_v61, %v591_v12  ;;  %v592_v19 = vmul.f32 %v13428_v63, %v500_v13  ;;  %v503_v20 = vmax.f32 %v284_v14, 0.0  ;;  %v286_v21 = vadd.f32 %v285_v15, %v13413_v53 }
 0x106   :  { %v289_v22 = vpop.f32.mrf.mxu0  ;;  %1223 = vrot.lane.b32.xlu1 %v13511_v16, %s13223_s14  ;;  %1221 = vrot.lane.b32.xlu0 %v13513_v17, %s13223_s14  ;;  %v13543_v44 = vmax.f32 %v676_v60, %v13507_v11 }
 0x107   :  { %v684_v23 = vadd.f32 %v13432_v4, %v592_v19  ;;  %v595_v24 = vmul.f32 %v13419_v57, %v503_v20  ;;  %v504_v25 = vmax.f32 %v286_v21, 0.0  ;;  %v290_v26 = vadd.f32 %v289_v22, %v13407_v49 }
 0x108   :  { %v291_v27 = vpop.f32.mrf.mxu0  ;;  %v13558_v3 = vmax.f32 %v679_v6, %v683_v18 }
 0x109   :  { %741 = vst [vmem:[#allocation2 + $0xa8] sm:$0xff] %v684_v23  ;;  %v13529_v29 = vadd.f32 %v13424_v61, %v595_v24  ;;  %v596_v30 = vmul.f32 %v13428_v63, %v504_v25  ;;  %v507_v32 = vmax.f32 %v290_v26, 0.0  ;;  %v292_v33 = vadd.f32 %v291_v27, %v13413_v53 }
 0x10a   :  { %v295_v34 = vpop.f32.mrf.mxu0  ;;  %829 = vrot.lane.b32.xlu1 %v13526_v28, %s13223_s14  ;;  %827 = vrot.lane.b32.xlu0 %v13497_v5, %s13223_s14  ;;  %v13578_v21 = vmax.f32 %v13507_v11, %v684_v23 }
 0x10b   :  { %v13538_v35 = vadd.f32 %v13432_v4, %v596_v30  ;;  %v599_v36 = vmul.f32 %v13419_v57, %v507_v32  ;;  %v508_v37 = vmax.f32 %v292_v33, 0.0  ;;  %v296_v38 = vadd.f32 %v295_v34, %v13407_v49 }
 0x10c   :  { %v297_v42 = vpop.f32.mrf.mxu0  ;;  %v13575_v20 = vmax.f32 %v683_v18, %v13529_v29 }
 0x10d   :  { %745 = vst [vmem:[#allocation2 + $0xc8] sm:$0xff] %v13538_v35  ;;  %v13547_v47 = vadd.f32 %v13424_v61, %v599_v36  ;;  %v600_v54 = vmul.f32 %v13428_v63, %v508_v37  ;;  %v511_v55 = vmax.f32 %v296_v38, 0.0  ;;  %v298_v56 = vadd.f32 %v297_v42, %v13413_v53 }
 0x10e   :  { %v301_v58 = vpop.f32.mrf.mxu0  ;;  %1225 = vrot.lane.b32.xlu1 %v13543_v44, %s13223_s14  ;;  %943 = vrot.lane.b32.xlu0 %v13526_v28, %s13223_s14  ;;  %v13596_v34 = vmax.f32 %v684_v23, %v13538_v35 }
 0x10f   :  { %v692_v59 = vadd.f32 %v13432_v4, %v600_v54  ;;  %v603_v60 = vmul.f32 %v13419_v57, %v511_v55  ;;  %v512_v62 = vmax.f32 %v298_v56, 0.0  ;;  %v302_v1 = vadd.f32 %v301_v58, %v13407_v49 }
 0x110   :  { %v303_v2 = vpop.f32.mrf.mxu0 }
 0x111   :  { %749 = vst [vmem:[#allocation2 + $0xe8] sm:$0xff] %v692_v59  ;;  %v13561_v7 = vadd.f32 %v13424_v61, %v603_v60  ;;  %v604_v8 = vmul.f32 %v13428_v63, %v512_v62  ;;  %v515_v9 = vmax.f32 %v302_v1, 0.0  ;;  %v304_v10 = vadd.f32 %v303_v2, %v13413_v53 }
 0x112   :  { %v307_v12 = vpop.f32.mrf.mxu0  ;;  %945 = vrot.lane.b32.xlu1 %v13558_v3, %s13223_s14  ;;  %831 = vrot.lane.b32.xlu0 %v13558_v3, %s13223_s14  ;;  %v13613_v62 = vmax.f32 %v13529_v29, %v13547_v47 }
 0x113   :  { %v13570_v13 = vadd.f32 %v13432_v4, %v604_v8  ;;  %v607_v6 = vmul.f32 %v13419_v57, %v515_v9  ;;  %v516_v14 = vmax.f32 %v304_v10, 0.0  ;;  %v308_v15 = vadd.f32 %v307_v12, %v13407_v49 }
 0x114   :  { %v309_v19 = vpop.f32.mrf.mxu0 }
 0x115   :  { %753 = vst [vmem:[#allocation2 + $0x108] sm:$0xff] %v13570_v13  ;;  %v13582_v22 = vadd.f32 %v13424_v61, %v607_v6  ;;  %v608_v24 = vmul.f32 %v13428_v63, %v516_v14  ;;  %v519_v25 = vmax.f32 %v308_v15, 0.0  ;;  %v310_v26 = vadd.f32 %v309_v19, %v13413_v53 }
 0x116   :  { %v313_v27 = vpop.f32.mrf.mxu0  ;;  %833 = vrot.lane.b32.xlu1 %v13575_v20, %s13223_s14  ;;  %1227 = vrot.lane.b32.xlu0 %v13578_v21, %s13223_s14  ;;  %v13628_v15 = vmax.f32 %v692_v59, %v13570_v13  ;;  %v13631_v19 = vmax.f32 %v13538_v35, %v692_v59 }
 0x117   :  { %v13591_v11 = vadd.f32 %v13432_v4, %v608_v24  ;;  %v611_v18 = vmul.f32 %v13419_v57, %v519_v25  ;;  %v520_v30 = vmax.f32 %v310_v26, 0.0  ;;  %v314_v32 = vadd.f32 %v313_v27, %v13407_v49 }
 0x118   :  { %v315_v33 = vpop.f32.mrf.mxu0 }
 0x119   :  { %757 = vst [vmem:[#allocation2 + $0x128] sm:$0xff] %v13591_v11  ;;  %v13600_v36 = vadd.f32 %v13424_v61, %v611_v18  ;;  %v612_v37 = vmul.f32 %v13428_v63, %v520_v30  ;;  %v523_v38 = vmax.f32 %v314_v32, 0.0  ;;  %v316_v42 = vadd.f32 %v315_v33, %v13413_v53 }
 0x11a   :  { %v319_v54 = vpop.f32.mrf.mxu0  ;;  %1229 = vrot.lane.b32.xlu1 %v13596_v34, %s13223_s14  ;;  %947 = vrot.lane.b32.xlu0 %v13575_v20, %s13223_s14  ;;  %v13651_v32 = vmax.f32 %v13547_v47, %v13561_v7  ;;  %v13718_v40 = vmax.f32 %v13570_v13, %v13591_v11 }
 0x11b   :  { %v704_v23 = vadd.f32 %v13432_v4, %v612_v37  ;;  %v615_v55 = vmul.f32 %v13419_v57, %v523_v38  ;;  %v524_v56 = vmax.f32 %v316_v42, 0.0  ;;  %v320_v58 = vadd.f32 %v319_v54, %v13407_v49  ;;  %v75_v37 = vld [vmem:[%s17476_s2 + $0x8] sm:$0x77]  ;;  %v396_v54 = vpop.f32.mrf.mxu1  ;;  %s13224_s2 = smov 64  }
 0x11c   :  { %v321_v60 = vpop.f32.mrf.mxu0  ;;  %v113_v47 = vrot.slane %v75_v37, %v13390_v41  ;;  %v546_v42 = vrot.slane %v75_v37, %v13398_v45 }
 0x11d   :  { %v13616_v1 = vadd.f32 %v13424_v61, %v615_v55  ;;  %v616_v2 = vmul.f32 %v13428_v63, %v524_v56  ;;  %v527_v8 = vmax.f32 %v320_v58, 0.0  ;;  %v322_v9 = vadd.f32 %v321_v60, %v13413_v53  ;;  %v398_v58 = vpop.f32.mrf.mxu1 }
 0x11e   :  { %949 = vrot.lane.b32.xlu1 %v13613_v62, %s13223_s14  ;;  %835 = vrot.lane.b32.xlu0 %v13613_v62, %s13223_s14  ;;  %v325_v10 = vpop.f32.mrf.mxu0  ;;  %v13647_v30 = vmax.f32 %v13591_v11, %v704_v23  ;;  %v13683_v38 = vrot.slane %v113_v47, %v13390_v41  ;;  %v13698_v55 = vrot.slane %v546_v42, %v13398_v45 }
 0x11f   :  { %v708_v12 = vadd.f32 %v13432_v4, %v616_v2  ;;  %v619_v29 = vmul.f32 %v13419_v57, %v527_v8  ;;  %v528_v6 = vmax.f32 %v322_v9, 0.0  ;;  %v326_v14 = vadd.f32 %v325_v10, %v13407_v49 }
 0x120   :  { %v327_v24 = vpop.f32.mrf.mxu0  ;;  %v642_v56 = vrot.slane %v75_v37, %v633_v51  ;;  %v402_v51 = vpop.f32.mrf.mxu1 }
 0x121   :  { %v13634_v25 = vadd.f32 %v13424_v61, %v619_v29  ;;  %v620_v26 = vmul.f32 %v13428_v63, %v528_v6  ;;  %v531_v27 = vmax.f32 %v326_v14, 0.0  ;;  %v328_v18 = vadd.f32 %v327_v24, %v13413_v53 }
 0x122   :  { %1233 = vrot.lane.b32.xlu1 %v13628_v15, %s13223_s14  ;;  %1231 = vrot.lane.b32.xlu0 %v13631_v19, %s13223_s14  ;;  %v13722_v6 = vrot.slane %v642_v56, %v13401_v46  ;;  %v403_v14 = vadd.f32 %v402_v51, %v13683_v38  ;;  %v404_v24 = vpop.f32.mrf.mxu1 }
 0x123   :  { %v13643_v49 = vadd.f32 %v13432_v4, %v620_v26  ;;  %v623_v35 = vmul.f32 %v13419_v57, %v531_v27  ;;  %v532_v59 = vmax.f32 %v328_v18, 0.0  ;;  %v13734_v27 = vmax.f32 %v13582_v22, %v13600_v36 }
 0x124   :  { %v485_v11 = vmax.f32 %v403_v14, 0.0  ;;  %v408_v18 = vpop.f32.mrf.mxu1 }
 0x125   :  { %v13654_v53 = vadd.f32 %v13424_v61, %v623_v35  ;;  %v624_v33 = vmul.f32 %v13428_v63, %v532_v59  ;;  %v117_v61 = vrot.slane %v75_v37, %v108_v43  ;;  %v13676_v63 = vmax.f32 %v704_v23, %v708_v12 }
 0x126   :  { %1237 = vrot.lane.b32.xlu1 %v13647_v30, %s13223_s14  ;;  %951 = vrot.lane.b32.xlu0 %v13651_v32, %s13223_s14  ;;  %v638_v43 = vrot.slane %v75_v37, %v13401_v46  ;;  %v397_v23 = vadd.f32 %v396_v54, %v13683_v38  ;;  %v13714_v9 = vmax.f32 %v708_v12, %v13643_v49  ;;  %v410_v47 = vpop.f32.mrf.mxu1 }
 0x127   :  { %v13662_v57 = vadd.f32 %v13432_v4, %v624_v33  ;;  %v13680_v4 = vmax.f32 %v13561_v7, %v13582_v22  ;;  %v13692_v0 = vrot.slane %v117_v61, %v13390_v41  ;;  %v550_v7 = vrot.slane %v75_v37, %v541_v48 }
 0x128   :  { %v481_v60 = vmax.f32 %v397_v23, 0.0  ;;  %v13707_v2 = vrot.slane %v638_v43, %v13401_v46  ;;  %v577_v59 = vmul.f32 %v13698_v55, %v485_v11  ;;  %v409_v37 = vadd.f32 %v408_v18, %v13683_v38  ;;  %v414_v54 = vpop.f32.mrf.mxu1 }
 0x129   :  { %v399_v48 = vadd.f32 %v398_v58, %v13692_v0  ;;  %v13711_v8 = vrot.slane %v550_v7, %v13398_v45  ;;  %v405_v26 = vadd.f32 %v404_v24, %v13692_v0  ;;  %v411_v43 = vadd.f32 %v410_v47, %v13692_v0 }
 0x12a   :  { %1124 = vrot.lane.b32.xlu1 %v13647_v30, %s13223_s14  ;;  %837 = vrot.lane.b32.xlu0 %v13651_v32, %s13223_s14  ;;  %v573_v10 = vmul.f32 %v13698_v55, %v481_v60  ;;  %v669_v22 = vadd.f32 %v13707_v2, %v577_v59  ;;  %v489_v42 = vmax.f32 %v409_v37, 0.0  ;;  %v13749_v7 = vmax.f32 %v13634_v25, %v13654_v53 }
 0x12b   :  { %v482_v29 = vmax.f32 %v399_v48, 0.0  ;;  %v486_v33 = vmax.f32 %v405_v26, 0.0  ;;  %v490_v58 = vmax.f32 %v411_v43, 0.0  ;;  %v415_v60 = vadd.f32 %v414_v54, %v13683_v38  ;;  %v416_v48 = vpop.f32.mrf.mxu1 }
 0x12c   :  { %v665_v12 = vadd.f32 %v13707_v2, %v573_v10  ;;  %v581_v56 = vmul.f32 %v13698_v55, %v489_v42  ;;  %v417_v14 = vadd.f32 %v416_v48, %v13692_v0  ;;  %v13764_v24 = vmax.f32 %v13643_v49, %v13662_v57 }
 0x12d   :  { %v574_v13 = vmul.f32 %v13711_v8, %v482_v29  ;;  %v578_v61 = vmul.f32 %v13711_v8, %v486_v33  ;;  %v582_v10 = vmul.f32 %v13711_v8, %v490_v58  ;;  %v493_v29 = vmax.f32 %v415_v60, 0.0  ;;  %v420_v11 = vpop.f32.mrf.mxu1 }
 0x12e   :  { %1239 = vrot.lane.b32.xlu1 %v13676_v63, %s13223_s14  ;;  %953 = vrot.lane.b32.xlu0 %v13680_v4, %s13223_s14  ;;  %v673_v51 = vadd.f32 %v13707_v2, %v581_v56  ;;  %v421_v59 = vadd.f32 %v420_v11, %v13683_v38  ;;  %v13773_v37 = vmax.f32 %v665_v12, %v669_v22 }
 0x12f   :  { %v666_v35 = vadd.f32 %v13722_v6, %v574_v13  ;;  %v670_v23 = vadd.f32 %v13722_v6, %v578_v61  ;;  %v13768_v13 = vmax.f32 %v13600_v36, %v13616_v1  ;;  %v674_v26 = vadd.f32 %v13722_v6, %v582_v10  ;;  %v422_v33 = vpop.f32.mrf.mxu1 }
 0x130   :  { %v585_v18 = vmul.f32 %v13698_v55, %v493_v29  ;;  %v497_v47 = vmax.f32 %v421_v59, 0.0  ;;  %v423_v61 = vadd.f32 %v422_v33, %v13692_v0  ;;  %v13786_v58 = vmax.f32 %v669_v22, %v673_v51 }
 0x131   :  { %723 = vst.msk [vmem:[#allocation2 + $0x18] sm:$0xff] %vm722_vm2, %v666_v35  ;;  %727 = vst.msk [vmem:[#allocation2 + $0x38] sm:$0xff] %vm722_vm2, %v670_v23  ;;  %v494_v35 = vmax.f32 %v417_v14, 0.0  ;;  %v426_v42 = vpop.f32.mrf.mxu1  ;;  %v13797_v14 = vmax.f32 %v13662_v57, 0.0  ;;  %v13801_v22 = vmax.f32 %v13616_v1, %v13634_v25 }
 0x132   :  { %1126 = vrot.lane.b32.xlu1 %v13676_v63, %s13223_s14  ;;  %839 = vrot.lane.b32.xlu0 %v13680_v4, %s13223_s14  ;;  %731 = vst.msk [vmem:[#allocation2 + $0x58] sm:$0xff] %vm722_vm2, %v674_v26  ;;  %v677_v36 = vadd.f32 %v13707_v2, %v585_v18  ;;  %v589_v12 = vmul.f32 %v13698_v55, %v497_v47  ;;  %v498_v54 = vmax.f32 %v423_v61, 0.0 }
 0x133   :  { %v586_v49 = vmul.f32 %v13711_v8, %v494_v35  ;;  %v427_v23 = vadd.f32 %v426_v42, %v13683_v38  ;;  %v428_v56 = vpop.f32.mrf.mxu1 }
 0x134   :  { %v681_v60 = vadd.f32 %v13707_v2, %v589_v12  ;;  %v590_v48 = vmul.f32 %v13711_v8, %v498_v54  ;;  %v429_v29 = vadd.f32 %v428_v56, %v13692_v0 }
 0x135   :  { %v678_v43 = vadd.f32 %v13722_v6, %v586_v49  ;;  %v501_v10 = vmax.f32 %v427_v23, 0.0  ;;  %v432_v11 = vpop.f32.mrf.mxu1  ;;  %v13806_v49 = vmax.f32 %v673_v51, %v677_v36 }
 0x136   :  { %1241 = vrot.lane.b32.xlu1 %v13714_v9, %s13223_s14  ;;  %1235 = vrot.lane.b32.xlu0 %v13718_v40, %s13223_s14  ;;  %v682_v26 = vadd.f32 %v13722_v6, %v590_v48  ;;  %v502_v35 = vmax.f32 %v429_v29, 0.0  ;;  %v433_v59 = vadd.f32 %v432_v11, %v13683_v38  ;;  %v13819_v23 = vmax.f32 %v677_v36, %v681_v60 }
 0x137   :  { %735 = vst.msk [vmem:[#allocation2 + $0x78] sm:$0xff] %vm722_vm2, %v678_v43  ;;  %v593_v18 = vmul.f32 %v13698_v55, %v501_v10  ;;  %v434_v33 = vpop.f32.mrf.mxu1 }
 0x138   :  { %739 = vst.msk [vmem:[#allocation2 + $0x98] sm:$0xff] %vm722_vm2, %v682_v26  ;;  %v594_v25 = vmul.f32 %v13711_v8, %v502_v35  ;;  %v505_v57 = vmax.f32 %v433_v59, 0.0  ;;  %v435_v47 = vadd.f32 %v434_v33, %v13692_v0 }
 0x139   :  { %v685_v1 = vadd.f32 %v13707_v2, %v593_v18  ;;  %v438_v61 = vpop.f32.mrf.mxu1 }
 0x13a   :  { %1128 = vrot.lane.b32.xlu1 %v13714_v9, %s13223_s14  ;;  %955 = vrot.lane.b32.xlu0 %v13734_v27, %s13223_s14  ;;  %v686_v42 = vadd.f32 %v13722_v6, %v594_v25  ;;  %v597_v51 = vmul.f32 %v13698_v55, %v505_v57  ;;  %v506_v43 = vmax.f32 %v435_v47, 0.0  ;;  %v439_v12 = vadd.f32 %v438_v61, %v13683_v38 }
 0x13b   :  { %v440_v54 = vpop.f32.mrf.mxu1  ;;  %v13832_v33 = vmax.f32 %v681_v60, %v685_v1 }
 0x13c   :  { %743 = vst.msk [vmem:[#allocation2 + $0xb8] sm:$0xff] %vm722_vm2, %v686_v42  ;;  %v689_v56 = vadd.f32 %v13707_v2, %v597_v51  ;;  %v598_v48 = vmul.f32 %v13711_v8, %v506_v43  ;;  %v509_v10 = vmax.f32 %v439_v12, 0.0  ;;  %v441_v29 = vadd.f32 %v440_v54, %v13692_v0  ;;  %v13840_v42 = vld [vmem:[#allocation2 + $0x1c0] sm:$0xff] }
 0x13d   :  { %v444_v11 = vpop.f32.mrf.mxu1  ;;  %v13844_v51 = vmax.f32 %v13654_v53, %v13840_v42 }
 0x13e   :  { %961 = vrot.lane.b32.xlu1 %v13749_v7, %s13223_s14  ;;  %841 = vrot.lane.b32.xlu0 %v13734_v27, %s13223_s14  ;;  %v690_v26 = vadd.f32 %v13722_v6, %v598_v48  ;;  %v601_v36 = vmul.f32 %v13698_v55, %v509_v10  ;;  %v510_v18 = vmax.f32 %v441_v29, 0.0  ;;  %v445_v35 = vadd.f32 %v444_v11, %v13683_v38 }
 0x13f   :  { %v446_v59 = vpop.f32.mrf.mxu1  ;;  %v13849_v29 = vmax.f32 %v685_v1, %v689_v56 }
 0x140   :  { %747 = vst.msk [vmem:[#allocation2 + $0xd8] sm:$0xff] %vm722_vm2, %v690_v26  ;;  %v693_v25 = vadd.f32 %v13707_v2, %v601_v36  ;;  %v602_v57 = vmul.f32 %v13711_v8, %v510_v18  ;;  %v513_v47 = vmax.f32 %v445_v35, 0.0  ;;  %v447_v61 = vadd.f32 %v446_v59, %v13692_v0 }
 0x141   :  { %v450_v60 = vpop.f32.mrf.mxu1 }
 0x142   :  { %1243 = vrot.lane.b32.xlu1 %v13764_v24, %s13223_s14  ;;  %957 = vrot.lane.b32.xlu0 %v13768_v13, %s13223_s14  ;;  %v694_v43 = vadd.f32 %v13722_v6, %v602_v57  ;;  %v605_v12 = vmul.f32 %v13698_v55, %v513_v47  ;;  %v514_v54 = vmax.f32 %v447_v61, 0.0  ;;  %v451_v48 = vadd.f32 %v450_v60, %v13683_v38 }
 0x143   :  { %v452_v10 = vpop.f32.mrf.mxu1  ;;  %v13860_v61 = vmax.f32 %v689_v56, %v693_v25 }
 0x144   :  { %751 = vst.msk [vmem:[#allocation2 + $0xf8] sm:$0xff] %vm722_vm2, %v694_v43  ;;  %v697_v11 = vadd.f32 %v13707_v2, %v605_v12  ;;  %v606_v53 = vmul.f32 %v13711_v8, %v514_v54  ;;  %v517_v26 = vmax.f32 %v451_v48, 0.0  ;;  %v453_v36 = vadd.f32 %v452_v10, %v13692_v0 }
 0x145   :  { %v456_v18 = vpop.f32.mrf.mxu1 }
 0x146   :  { %1130 = vrot.lane.b32.xlu1 %v13764_v24, %s13223_s14  ;;  %843 = vrot.lane.b32.xlu0 %v13768_v13, %s13223_s14  ;;  %v698_v35 = vadd.f32 %v13722_v6, %v606_v53  ;;  %v609_v59 = vmul.f32 %v13698_v55, %v517_v26  ;;  %v518_v57 = vmax.f32 %v453_v36, 0.0  ;;  %v457_v1 = vadd.f32 %v456_v18, %v13683_v38 }
 0x147   :  { %v458_v47 = vpop.f32.mrf.mxu1  ;;  %v13869_v56 = vmax.f32 %v693_v25, %v697_v11 }
 0x148   :  { %755 = vst.msk [vmem:[#allocation2 + $0x118] sm:$0xff] %vm722_vm2, %v698_v35  ;;  %v701_v60 = vadd.f32 %v13707_v2, %v609_v59  ;;  %v610_v43 = vmul.f32 %v13711_v8, %v518_v57  ;;  %v521_v12 = vmax.f32 %v457_v1, 0.0  ;;  %v459_v54 = vadd.f32 %v458_v47, %v13692_v0 }
 0x149   :  { %v462_v48 = vpop.f32.mrf.mxu1 }
 0x14a   :  { %1245 = vrot.lane.b32.xlu1 %v13797_v14, %s13223_s14  ;;  %959 = vrot.lane.b32.xlu0 %v13801_v22, %s13223_s14  ;;  %v702_v10 = vadd.f32 %v13722_v6, %v610_v43  ;;  %v613_v53 = vmul.f32 %v13698_v55, %v521_v12  ;;  %v522_v26 = vmax.f32 %v459_v54, 0.0  ;;  %v463_v36 = vadd.f32 %v462_v48, %v13683_v38 }
 0x14b   :  { %v464_v18 = vpop.f32.mrf.mxu1  ;;  %v13878_v25 = vmax.f32 %v697_v11, %v701_v60 }
 0x14c   :  { %759 = vst.msk [vmem:[#allocation2 + $0x138] sm:$0xff] %vm722_vm2, %v702_v10  ;;  %v705_v35 = vadd.f32 %v13707_v2, %v613_v53  ;;  %v614_v59 = vmul.f32 %v13711_v8, %v522_v26  ;;  %v525_v57 = vmax.f32 %v463_v36, 0.0  ;;  %v465_v1 = vadd.f32 %v464_v18, %v13692_v0 }
 0x14d   :  { %v468_v47 = vpop.f32.mrf.mxu1 }
 0x14e   :  { %1132 = vrot.lane.b32.xlu1 %v13797_v14, %s13223_s14  ;;  %845 = vrot.lane.b32.xlu0 %v13801_v22, %s13223_s14  ;;  %v706_v43 = vadd.f32 %v13722_v6, %v614_v59  ;;  %v617_v12 = vmul.f32 %v13698_v55, %v525_v57  ;;  %v526_v54 = vmax.f32 %v465_v1, 0.0  ;;  %v469_v48 = vadd.f32 %v468_v47, %v13683_v38 }
 0x14f   :  { %v470_v39 = vpop.f32.mrf.mxu1  ;;  %v13887_v46 = vmax.f32 %v701_v60, %v705_v35 }
 0x150   :  { %763 = vst.msk [vmem:[#allocation2 + $0x158] sm:$0xff] %vm722_vm2, %v706_v43  ;;  %v709_v10 = vadd.f32 %v13707_v2, %v617_v12  ;;  %v618_v53 = vmul.f32 %v13711_v8, %v526_v54  ;;  %v529_v26 = vmax.f32 %v469_v48, 0.0  ;;  %v471_v36 = vadd.f32 %v470_v39, %v13692_v0 }
 0x151   :  { %v474_v18 = vpop.f32.mrf.mxu1 }
 0x152   :  { %847 = vrot.lane.b32.xlu0 %v13749_v7, %s13223_s14  ;;  %v710_v59 = vadd.f32 %v13722_v6, %v618_v53  ;;  %v621_v57 = vmul.f32 %v13698_v55, %v529_v26  ;;  %v530_v1 = vmax.f32 %v471_v36, 0.0  ;;  %v475_v47 = vadd.f32 %v474_v18, %v13683_v38 }
 0x153   :  { %v13901_v36 = vmax.f32 %v705_v35, %v709_v10  ;;  %v10110_v35 = vld [vmem:[%s17477_s3 + $0x58] sm:$0xff] }
 0x154   :  { %767 = vst.msk [vmem:[#allocation2 + $0x178] sm:$0xff] %vm722_vm2, %v710_v59  ;;  %v713_v11 = vadd.f32 %v13707_v2, %v621_v57  ;;  %v622_v43 = vmul.f32 %v13711_v8, %v530_v1  ;;  %v533_v12 = vmax.f32 %v475_v47, 0.0 }
 0x156   :  { %963 = vrot.lane.b32.xlu0 %v13844_v51, %s13223_s14  ;;  %v714_v54 = vadd.f32 %v13722_v6, %v622_v43  ;;  %v625_v39 = vmul.f32 %v13698_v55, %v533_v12  ;;  %v13899_v26 = vmax.f32 %v709_v10, %v713_v11 }
 0x158   :  { %771 = vst.msk [vmem:[#allocation2 + $0x198] sm:$0xff] %vm722_vm2, %v714_v54  ;;  %v13896_v48 = vadd.f32 %v13707_v2, %v625_v39 }
 0x15a   :  { %v13907_v2 = vmax.f32 %v713_v11, %v13896_v48 }
 0x16c   :  { %v938_v53 = vpop.permute.xlu1 %937  ;;  %v824_v38 = vpop.permute.xlu0 %823 }
 0x16d   :  { %v865_v60 = vmax.f32 %v13469_v31, %v824_v38 }
 0x16f   :  { %880 = vst.msk [vmem:[#allocation3] sm:$0xff] %vm879_vm3, %v865_v60 }
 0x170   :  { %v826_v18 = vpop.permute.xlu1 %825  ;;  %v1220_v59 = vpop.permute.xlu0 %1219 }
 0x171   :  { %v866_v55 = vmax.f32 %v13483_v50, %v826_v18  ;;  %v1261_v57 = vmax.f32 %v13485_v52, %v1220_v59 }
 0x173   :  { %881 = vst.msk [vmem:[#allocation3 + $0x8] sm:$0xff] %vm879_vm3, %v866_v55  ;;  %1289 = vrot.lane.b32.xlu1 %v1261_v57, %s13224_s2  ;;  %v10109_v55 = vld [vmem:[%s17477_s3 + $0x50] sm:$0xff] }
 0x174   :  { %v942_v1 = vpop.permute.xlu1 %941  ;;  %v940_v47 = vpop.permute.xlu0 %939 }
 0x176   :  { %v1740_v10 = vld [vmem:[#allocation3] sm:$0xff] }
 0x177   :  { %11274 = vmatmul.mubr.msk.f32.vlgmr.msra.gmra.mxu0 %vm879_vm3, %v1740_v10  ;;  %849 = vrot.lane.b32.xlu1 %v13844_v51, %s13223_s14 }
 0x178   :  { %v1224_v52 = vpop.permute.xlu1 %1223  ;;  %v1222_v11 = vpop.permute.xlu0 %1221  ;;  %11276 = vmatprep.mubr.msk.f32.mxu0 %vm13222_vm1, %v13840_v42  ;;  %11672 = vmatpush3.msra.mxu0 %v10110_v35  ;;  %v980_v35 = vmax.f32 %v13483_v50, %v940_v47 }
 0x179   :  { %v1263_v43 = vmax.f32 %v13511_v16, %v1224_v52  ;;  %v1262_v12 = vmax.f32 %v13513_v17, %v1222_v11  ;;  %11673 = vmatprep.subr.mxu0 %v13840_v42  ;;  %v979_v17 = vmax.f32 %v13469_v31, %v938_v53  ;;  %v981_v52 = vmax.f32 %v13497_v5, %v942_v1 }
 0x17a   :  { %v1741_v54 = vld [vmem:[#allocation3 + $0x8] sm:$0xff]  ;;  %11674 = vmatpush3.msra.mxu0 %v10109_v55 }
 0x17b   :  { %11277 = vmatmul.mubr.msk.f32.gmra.mxu0 %vm879_vm3, %v1741_v54  ;;  %1293 = vrot.lane.b32.xlu1 %v1263_v43, %s13224_s2 }
 0x17c   :  { %1291 = vrot.lane.b32.xlu0 %v1262_v12, %s13224_s2  ;;  %v830_v39 = vpop.permute.xlu1 %829  ;;  %v828_v38 = vpop.permute.xlu0 %827  ;;  %11279 = vmatprep.mubr.msk.f32.mxu0 %vm13222_vm1, %v13840_v42 }
 0x17d   :  { %v868_v60 = vmax.f32 %v13526_v28, %v830_v39  ;;  %v867_v16 = vmax.f32 %v13497_v5, %v828_v38  ;;  %11675 = vmatprep.subr.mxu0 %v13840_v42 }
 0x17f   :  { %883 = vst.msk [vmem:[#allocation3 + $0x18] sm:$0xff] %vm879_vm3, %v868_v60  ;;  %882 = vst.msk [vmem:[#allocation3 + $0x10] sm:$0xff] %vm879_vm3, %v867_v16 }
 0x180   :  { %1007 = vrot.lane.b32.xlu0 %v979_v17, %s13224_s2  ;;  %v1226_v18 = vpop.permute.xlu1 %1225  ;;  %v944_v59 = vpop.permute.xlu0 %943 }
 0x181   :  { %v1264_v57 = vmax.f32 %v13543_v44, %v1226_v18  ;;  %v982_v12 = vmax.f32 %v13526_v28, %v944_v59 }
 0x183   :  { %1295 = vrot.lane.b32.xlu1 %v1264_v57, %s13224_s2 }
 0x184   :  { %1009 = vrot.lane.b32.xlu0 %v980_v35, %s13224_s2  ;;  %v946_v31 = vpop.permute.xlu1 %945  ;;  %v832_v53 = vpop.permute.xlu0 %831 }
 0x185   :  { %v869_v10 = vmax.f32 %v13558_v3, %v832_v53 }
 0x186   :  { %v1742_v11 = vld [vmem:[#allocation3 + $0x10] sm:$0xff]  ;;  %v1743_v54 = vld [vmem:[#allocation3 + $0x18] sm:$0xff] }
 0x187   :  { %884 = vst.msk [vmem:[#allocation3 + $0x20] sm:$0xff] %vm879_vm3, %v869_v10  ;;  %11280 = vmatmul.mubr.msk.f32.gmra.mxu0 %vm879_vm3, %v1742_v11 }
 0x188   :  { %1011 = vrot.lane.b32.xlu0 %v981_v52, %s13224_s2  ;;  %v834_v50 = vpop.permute.xlu1 %833  ;;  %v1228_v44 = vpop.permute.xlu0 %1227  ;;  %11282 = vmatprep.mubr.msk.f32.mxu0 %vm13222_vm1, %v13840_v42 }
 0x189   :  { %v870_v47 = vmax.f32 %v13575_v20, %v834_v50  ;;  %v1265_v43 = vmax.f32 %v13578_v21, %v1228_v44  ;;  %v983_v21 = vmax.f32 %v13558_v3, %v946_v31 }
 0x18b   :  { %885 = vst.msk [vmem:[#allocation3 + $0x28] sm:$0xff] %vm879_vm3, %v870_v47  ;;  %11283 = vmatmul.mubr.msk.f32.gmra.mxu0 %vm879_vm3, %v1743_v54  ;;  %1297 = vrot.lane.b32.xlu1 %v1265_v43, %s13224_s2 }
 0x18c   :  { %1013 = vrot.lane.b32.xlu0 %v982_v12, %s13224_s2  ;;  %v1230_v5 = vpop.permute.xlu1 %1229  ;;  %v948_v1 = vpop.permute.xlu0 %947  ;;  %11285 = vmatprep.mubr.msk.f32.mxu0 %vm13222_vm1, %v13840_v42 }
 0x18d   :  { %v1266_v39 = vmax.f32 %v13596_v34, %v1230_v5  ;;  %v984_v17 = vmax.f32 %v13575_v20, %v948_v1  ;;  %v10108_v1 = vld [vmem:[%s17477_s3 + $0x48] sm:$0xff] }
 0x18e   :  { %v1744_v38 = vld [vmem:[#allocation3 + $0x20] sm:$0xff]  ;;  %11676 = vmatpush3.msra.mxu0 %v10108_v1 }
 0x18f   :  { %11286 = vmatmul.mubr.msk.f32.gmra.mxu0 %vm879_vm3, %v1744_v38  ;;  %1299 = vrot.lane.b32.xlu1 %v1266_v39, %s13224_s2 }
 0x190   :  { %1015 = vrot.lane.b32.xlu0 %v983_v21, %s13224_s2  ;;  %v950_v28 = vpop.permute.xlu1 %949  ;;  %v836_v60 = vpop.permute.xlu0 %835  ;;  %11288 = vmatprep.mubr.msk.f32.mxu0 %vm13222_vm1, %v13840_v42  ;;  %v10040_v21 = vld [vmem:[%s17477_s3 + $0x30] sm:$0xff] }
 0x191   :  { %v871_v16 = vmax.f32 %v13613_v62, %v836_v60  ;;  %v985_v55 = vmax.f32 %v13613_v62, %v950_v28  ;;  %11677 = vmatprep.subr.mxu0 %v13840_v42 }
 0x192   :  { %v1745_v18 = vld [vmem:[#allocation3 + $0x28] sm:$0xff] }
 0x193   :  { %886 = vst.msk [vmem:[#allocation3 + $0x30] sm:$0xff] %vm879_vm3, %v871_v16  ;;  %11289 = vmatmul.mubr.msk.f32.gmra.mxu0 %vm879_vm3, %v1745_v18 }
 0x194   :  { %1017 = vrot.lane.b32.xlu0 %v984_v17, %s13224_s2  ;;  %v1234_v3 = vpop.permute.xlu1 %1233  ;;  %v1232_v34 = vpop.permute.xlu0 %1231  ;;  %11291 = vmatprep.mubr.msk.f32.mxu0 %vm13222_vm1, %v13840_v42 }
 0x195   :  { %v1267_v59 = vmax.f32 %v13631_v19, %v1232_v34  ;;  %v1268_v35 = vmax.f32 %v13628_v15, %v1234_v3  ;;  %v10039_v34 = vld [vmem:[%s17477_s3 + $0x28] sm:$0xff] }
 0x197   :  { %1301 = vrot.lane.b32.xlu1 %v1267_v59, %s13224_s2 }
 0x198   :  { %1019 = vrot.lane.b32.xlu0 %v985_v55, %s13224_s2  ;;  %v1238_v20 = vpop.permute.xlu1 %1237  ;;  %v952_v57 = vpop.permute.xlu0 %951 }
 0x199   :  { %v986_v31 = vmax.f32 %v13651_v32, %v952_v57  ;;  %v1270_v18 = vmax.f32 %v13647_v30, %v1238_v20 }
 0x19a   :  { %v1746_v53 = vld [vmem:[#allocation3 + $0x30] sm:$0xff] }
 0x19b   :  { %11292 = vmatmul.mubr.msk.f32.gmra.mxu0 %vm879_vm3, %v1746_v53  ;;  %1303 = vrot.lane.b32.xlu1 %v1268_v35, %s13224_s2 }
 0x19c   :  { %1021 = vrot.lane.b32.xlu0 %v986_v31, %s13224_s2  ;;  %v1125_v19 = vpop.permute.xlu1 %1124  ;;  %v838_v10 = vpop.permute.xlu0 %837  ;;  %11294 = vmatprep.mubr.msk.f32.mxu0 %vm13222_vm1, %v13840_v42 }
 0x19d   :  { %v1157_v62 = vmax.f32 %v13647_v30, %v1125_v19  ;;  %v872_v52 = vmax.f32 %v13651_v32, %v838_v10  ;;  %v10041_v32 = vld [vmem:[%s17477_s3 + $0x38] sm:$0xff] }
 0x19f   :  { %1171 = vst.msk [vmem:[#allocation3 + $0x128] sm:$0xff] %vm879_vm3, %v1157_v62  ;;  %887 = vst.msk [vmem:[#allocation3 + $0x38] sm:$0xff] %vm879_vm3, %v872_v52 }
 0x1a0   :  { %v1240_v15 = vpop.permute.xlu1 %1239  ;;  %v954_v11 = vpop.permute.xlu0 %953 }
 0x1a1   :  { %v987_v50 = vmax.f32 %v13680_v4, %v954_v11  ;;  %v1271_v20 = vmax.f32 %v13676_v63, %v1240_v15 }
 0x1a3   :  { %1023 = vrot.lane.b32.xlu0 %v987_v50, %s13224_s2 }
 0x1a4   :  { %v1127_v44 = vpop.permute.xlu1 %1126  ;;  %v840_v47 = vpop.permute.xlu0 %839 }
 0x1a5   :  { %v1158_v43 = vmax.f32 %v13676_v63, %v1127_v44  ;;  %v873_v12 = vmax.f32 %v13680_v4, %v840_v47 }
 0x1a6   :  { %v1747_v54 = vld [vmem:[#allocation3 + $0x38] sm:$0xff]  ;;  %v1777_v5 = vld [vmem:[#allocation3 + $0x128] sm:$0xff] }
 0x1a7   :  { %1172 = vst.msk [vmem:[#allocation3 + $0x130] sm:$0xff] %vm879_vm3, %v1158_v43  ;;  %888 = vst.msk [vmem:[#allocation3 + $0x40] sm:$0xff] %vm879_vm3, %v873_v12  ;;  %11295 = vmatmul.mubr.msk.f32.gmra.mxu0 %vm879_vm3, %v1747_v54  ;;  %11385 = vmatmul.mubr.msk.f32.vlgmr.msra.gmra.mxu1 %vm879_vm3, %v1777_v5 }
 0x1a8   :  { %v1242_v39 = vpop.permute.xlu1 %1241  ;;  %v1236_v4 = vpop.permute.xlu0 %1235  ;;  %11297 = vmatprep.mubr.msk.f32.mxu0 %vm13222_vm1, %v13840_v42  ;;  %11387 = vmatprep.mubr.msk.f32.mxu1 %vm13222_vm1, %v13840_v42 }
 0x1a9   :  { %v1269_v38 = vmax.f32 %v13718_v40, %v1236_v4  ;;  %11469 = vmatpush3.msra.mxu1 %v10041_v32 }
 0x1aa   :  { %11470 = vmatprep.subr.mxu1 %v13840_v42 }
 0x1ab   :  { %1305 = vrot.lane.b32.xlu1 %v1269_v38, %s13224_s2  ;;  %11471 = vmatpush3.msra.mxu1 %v10040_v21  ;;  %v1063_v21 = vld [vmem:[#allocation2 + $0x8] sm:$0xff]  ;;  %v10038_v38 = vld [vmem:[%s17477_s3 + $0x20] sm:$0xff] }
 0x1ac   :  { %v1129_v28 = vpop.permute.xlu1 %1128  ;;  %v956_v60 = vpop.permute.xlu0 %955  ;;  %11472 = vmatprep.subr.mxu1 %v13840_v42 }
 0x1ad   :  { %v1159_v16 = vmax.f32 %v13714_v9, %v1129_v28  ;;  %v988_v17 = vmax.f32 %v13734_v27, %v956_v60  ;;  %11473 = vmatpush3.msra.mxu1 %v10039_v34  ;;  %v10107_v28 = vld [vmem:[%s17477_s3 + $0x40] sm:$0xff]  ;;  %v1067_v34 = vld [vmem:[#allocation2 + $0x88] sm:$0xff] }
 0x1ae   :  { %v1748_v40 = vld [vmem:[#allocation3 + $0x40] sm:$0xff]  ;;  %v1778_v3 = vld [vmem:[#allocation3 + $0x130] sm:$0xff]  ;;  %11474 = vmatprep.subr.mxu1 %v13840_v42  ;;  %11678 = vmatpush3.msra.mxu0 %v10107_v28 }
 0x1af   :  { %1173 = vst.msk [vmem:[#allocation3 + $0x138] sm:$0xff] %vm879_vm3, %v1159_v16  ;;  %11298 = vmatmul.mubr.msk.f32.gmra.mxu0 %vm879_vm3, %v1748_v40  ;;  %11388 = vmatmul.mubr.msk.f32.gmra.mxu1 %vm879_vm3, %v1778_v3  ;;  %v1066_v40 = vld [vmem:[#allocation2 + $0x68] sm:$0xff] }
 0x1b0   :  { %1307 = vrot.lane.b32.xlu1 %v1270_v18, %s13224_s2  ;;  %1025 = vrot.lane.b32.xlu0 %v988_v17, %s13224_s2  ;;  %v962_v59 = vpop.permute.xlu1 %961  ;;  %v842_v55 = vpop.permute.xlu0 %841  ;;  %v1065_v17 = vld [vmem:[#allocation2 + $0x48] sm:$0xff] }
 0x1b1   :  { %v874_v30 = vmax.f32 %v13734_v27, %v842_v55  ;;  %11390 = vmatprep.mubr.msk.f32.mxu1 %vm13222_vm1, %v13840_v42  ;;  %11300 = vmatprep.mubr.msk.f32.mxu0 %vm13222_vm1, %v13840_v42  ;;  %v1272_v27 = vmax.f32 %v13714_v9, %v1242_v39  ;;  %v991_v12 = vmax.f32 %v13749_v7, %v962_v59  ;;  %v1068_v55 = vld [vmem:[#allocation2 + $0xa8] sm:$0xff] }
 0x1b2   :  { %11475 = vmatpush3.msra.mxu1 %v10038_v38  ;;  %12077 = vmatprep.subr.mxu0 %v13840_v42  ;;  %v14103_v3 = vmax.f32 %v1065_v17, %v1066_v40  ;;  %v14109_v59 = vmax.f32 %v1066_v40, %v1067_v34 }
 0x1b3   :  { %889 = vst.msk [vmem:[#allocation3 + $0x48] sm:$0xff] %vm879_vm3, %v874_v30  ;;  %11874 = vmatprep.subr.mxu1 %v13840_v42  ;;  %v14115_v30 = vmax.f32 %v1067_v34, %v1068_v55 }
 0x1b4   :  { %1309 = vrot.lane.b32.xlu1 %v1271_v20, %s13224_s2  ;;  %v1244_v57 = vpop.permute.xlu1 %1243  ;;  %v958_v35 = vpop.permute.xlu0 %957  ;;  %v1069_v20 = vld [vmem:[#allocation2 + $0xc8] sm:$0xff] }
 0x1b5   :  { %v989_v31 = vmax.f32 %v13768_v13, %v958_v35  ;;  %v1273_v52 = vmax.f32 %v13764_v24, %v1244_v57  ;;  %v14121_v57 = vmax.f32 %v1068_v55, %v1069_v20  ;;  %v1070_v35 = vld [vmem:[#allocation2 + $0xe8] sm:$0xff] }
 0x1b6   :  { %v1779_v53 = vld [vmem:[#allocation3 + $0x138] sm:$0xff] }
 0x1b7   :  { %11391 = vmatmul.mubr.msk.f32.gmra.mxu1 %vm879_vm3, %v1779_v53  ;;  %1027 = vrot.lane.b32.xlu0 %v989_v31, %s13224_s2  ;;  %v1071_v31 = vld [vmem:[#allocation2 + $0x108] sm:$0xff]  ;;  %v476_v53 = vpop.f32.mrf.mxu1 }
 0x1b8   :  { %1311 = vrot.lane.b32.xlu1 %v1272_v27, %s13224_s2  ;;  %v1131_v63 = vpop.permute.xlu1 %1130  ;;  %v844_v19 = vpop.permute.xlu0 %843  ;;  %11393 = vmatprep.mubr.msk.f32.mxu1 %vm13222_vm1, %v13840_v42 }
 0x1b9   :  { %v1160_v10 = vmax.f32 %v13764_v24, %v1131_v63  ;;  %v875_v62 = vmax.f32 %v13768_v13, %v844_v19  ;;  %v14128_v63 = vmax.f32 %v1070_v35, %v1071_v31  ;;  %v14130_v19 = vmax.f32 %v1069_v20, %v1070_v35 }
 0x1ba   :  { %v1749_v15 = vld [vmem:[#allocation3 + $0x48] sm:$0xff] }
 0x1bb   :  { %1174 = vst.msk [vmem:[#allocation3 + $0x140] sm:$0xff] %vm879_vm3, %v1160_v10  ;;  %890 = vst.msk [vmem:[#allocation3 + $0x50] sm:$0xff] %vm879_vm3, %v875_v62  ;;  %11301 = vmatmul.mubr.msk.f32.gmra.mxu0 %vm879_vm3, %v1749_v15  ;;  %v477_v10 = vadd.f32 %v476_v53, %v13692_v0 }
 0x1bc   :  { %1313 = vrot.lane.b32.xlu1 %v1273_v52, %s13224_s2  ;;  %v1246_v9 = vpop.permute.xlu1 %1245  ;;  %v960_v11 = vpop.permute.xlu0 %959  ;;  %11303 = vmatprep.mubr.msk.f32.mxu0 %vm13222_vm1, %v13840_v42 }
 0x1bd   :  { %v1274_v50 = vmax.f32 %v13797_v14, %v1246_v9  ;;  %v990_v13 = vmax.f32 %v13801_v22, %v960_v11  ;;  %v534_v62 = vmax.f32 %v477_v10, 0.0  ;;  %v13159_v9 = vld [vmem:[#allocation2 + $0x128] sm:$0xff] }
 0x1be   :  { %v14138_v11 = vmax.f32 %v1071_v31, %v13159_v9 }
 0x1bf   :  { %1029 = vrot.lane.b32.xlu0 %v990_v13, %s13224_s2 }
 0x1c0   :  { %1315 = vrot.lane.b32.xlu1 %v1274_v50, %s13224_s2  ;;  %v1133_v24 = vpop.permute.xlu1 %1132  ;;  %v846_v44 = vpop.permute.xlu0 %845  ;;  %v626_v50 = vmul.f32 %v13711_v8, %v534_v62 }
 0x1c1   :  { %v1161_v47 = vmax.f32 %v13797_v14, %v1133_v24  ;;  %v876_v43 = vmax.f32 %v13801_v22, %v846_v44 }
 0x1c2   :  { %v1780_v54 = vld [vmem:[#allocation3 + $0x140] sm:$0xff]  ;;  %v1750_v5 = vld [vmem:[#allocation3 + $0x50] sm:$0xff]  ;;  %v718_v0 = vadd.f32 %v13722_v6, %v626_v50 }
 0x1c3   :  { %1175 = vst.msk [vmem:[#allocation3 + $0x148] sm:$0xff] %vm879_vm3, %v1161_v47  ;;  %891 = vst.msk [vmem:[#allocation3 + $0x58] sm:$0xff] %vm879_vm3, %v876_v43  ;;  %11394 = vmatmul.mubr.msk.f32.gmra.mxu1 %vm879_vm3, %v1780_v54  ;;  %11304 = vmatmul.mubr.msk.f32.gmra.mxu0 %vm879_vm3, %v1750_v5 }
 0x1c4   :  { %1388 = vrot.lane.b32.xlu1 %v13773_v37, %s13223_s14  ;;  %1031 = vrot.lane.b32.xlu0 %v991_v12, %s13224_s2  ;;  %v848_v14 = vpop.permute.xlu0 %847  ;;  %775 = vst.msk [vmem:[#allocation2 + $0x1b8] sm:$0xff] %vm722_vm2, %v718_v0 }
 0x1c5   :  { %v877_v22 = vmax.f32 %v13749_v7, %v848_v14  ;;  %11306 = vmatprep.mubr.msk.f32.mxu0 %vm13222_vm1, %v13840_v42  ;;  %11396 = vmatprep.mubr.msk.f32.mxu1 %vm13222_vm1, %v13840_v42  ;;  %v1064_v7 = vld [vmem:[#allocation2 + $0x28] sm:$0xff] }
 0x1c6   :  { %v14086_v16 = vmax.f32 %v1063_v21, %v1064_v7  ;;  %v14097_v18 = vmax.f32 %v1064_v7, %v1065_v17 }
 0x1c7   :  { %892 = vst.msk [vmem:[#allocation3 + $0x60] sm:$0xff] %vm879_vm3, %v877_v22 }
 0x1c8   :  { %1390 = vrot.lane.b32.xlu1 %v13786_v58, %s13223_s14  ;;  %v964_v32 = vpop.permute.xlu0 %963 }
 0x1c9   :  { %v992_v1 = vmax.f32 %v13844_v51, %v964_v32 }
 0x1ca   :  { %v1781_v39 = vld [vmem:[#allocation3 + $0x148] sm:$0xff]  ;;  %v1751_v4 = vld [vmem:[#allocation3 + $0x58] sm:$0xff] }
 0x1cb   :  { %11397 = vmatmul.mubr.msk.f32.gmra.mxu1 %vm879_vm3, %v1781_v39  ;;  %11307 = vmatmul.mubr.msk.f32.gmra.mxu0 %vm879_vm3, %v1751_v4 }
 0x1cc   :  { %1392 = vrot.lane.b32.xlu1 %v13806_v49, %s13223_s14  ;;  %1033 = vrot.lane.b32.xlu0 %v992_v1, %s13224_s2 }
 0x1cd   :  { %11309 = vmatprep.mubr.msk.f32.mxu0 %vm13222_vm1, %v13840_v42  ;;  %11399 = vmatprep.mubr.msk.f32.mxu1 %vm13222_vm1, %v13840_v42 }
 0x1ce   :  { %v1752_v60 = vld [vmem:[#allocation3 + $0x60] sm:$0xff] }
 0x1cf   :  { %11310 = vmatmul.mubr.msk.f32.gmra.mxu0 %vm879_vm3, %v1752_v60  ;;  %v14228_v60 = vmax.f32 %v13896_v48, %v13840_v42 }
 0x1d0   :  { %1394 = vrot.lane.b32.xlu1 %v13819_v23, %s13223_s14  ;;  %1106 = vrot.lane.b32.xlu0 %v14086_v16, %s13223_s14 }
 0x1d1   :  { %11312 = vmatprep.mubr.msk.f32.mxu0 %vm13222_vm1, %v13840_v42 }
 0x1d4   :  { %1396 = vrot.lane.b32.xlu1 %v13832_v33, %s13223_s14  ;;  %1108 = vrot.lane.b32.xlu0 %v14097_v18, %s13223_s14 }
 0x1d8   :  { %1398 = vrot.lane.b32.xlu1 %v13849_v29, %s13223_s14  ;;  %1110 = vrot.lane.b32.xlu0 %v14103_v3, %s13223_s14 }
 0x1dc   :  { %1400 = vrot.lane.b32.xlu1 %v13860_v61, %s13223_s14  ;;  %1112 = vrot.lane.b32.xlu0 %v14109_v59, %s13223_s14 }
 0x1e0   :  { %1402 = vrot.lane.b32.xlu1 %v13869_v56, %s13223_s14  ;;  %1114 = vrot.lane.b32.xlu0 %v14115_v30, %s13223_s14 }
 0x1e4   :  { %1404 = vrot.lane.b32.xlu1 %v13878_v25, %s13223_s14  ;;  %1116 = vrot.lane.b32.xlu0 %v14121_v57, %s13223_s14 }
 0x1e5   :  { %v1290_v27 = vpop.permute.xlu1 %1289 }
 0x1e6   :  { %1331 = vst.msk [vmem:[#allocation3 + $0x150] sm:$0xff] %vm879_vm3, %v1290_v27 }
 0x1e8   :  { %1120 = vrot.lane.b32.xlu1 %v14128_v63, %s13223_s14  ;;  %1118 = vrot.lane.b32.xlu0 %v14130_v19, %s13223_s14 }
 0x1e9   :  { %v850_v52 = vpop.permute.xlu1 %849 }
 0x1ea   :  { %v878_v15 = vmax.f32 %v13844_v51, %v850_v52 }
 0x1ec   :  { %893 = vst.msk [vmem:[#allocation3 + $0x68] sm:$0xff] %vm879_vm3, %v878_v15  ;;  %1406 = vrot.lane.b32.xlu1 %v13887_v46, %s13223_s14  ;;  %1122 = vrot.lane.b32.xlu0 %v14138_v11, %s13223_s14 }
 0x1ed   :  { %v1294_v13 = vpop.permute.xlu1 %1293  ;;  %v1782_v24 = vld [vmem:[#allocation3 + $0x150] sm:$0xff] }
 0x1ee   :  { %1333 = vst.msk [vmem:[#allocation3 + $0x160] sm:$0xff] %vm879_vm3, %v1294_v13  ;;  %v1292_v51 = vpop.permute.xlu0 %1291  ;;  %11400 = vmatmul.mubr.msk.f32.gmra.mxu1 %vm879_vm3, %v1782_v24 }
 0x1ef   :  { %1332 = vst.msk [vmem:[#allocation3 + $0x158] sm:$0xff] %vm879_vm3, %v1292_v51  ;;  %11402 = vmatprep.mubr.msk.f32.mxu1 %vm13222_vm1, %v13840_v42 }
 0x1f0   :  { %1410 = vrot.lane.b32.xlu1 %v13899_v26, %s13223_s14  ;;  %1408 = vrot.lane.b32.xlu0 %v13901_v36, %s13223_s14 }
 0x1f2   :  { %v1008_v8 = vpop.permute.xlu0 %1007 }
 0x1f3   :  { %1049 = vst.msk [vmem:[#allocation3 + $0x70] sm:$0xff] %vm879_vm3, %v1008_v8  ;;  %v14158_v6 = vld [vmem:[#allocation3 + $0x68] sm:$0xff] }
 0x1f4   :  { %1501 = vrot.lane.b32.xlu1 %v13773_v37, %s13223_s14  ;;  %1412 = vrot.lane.b32.xlu0 %v13907_v2, %s13223_s14 }
 0x1f5   :  { %11313 = vmatmul.mubr.msk.f32.gmra.mxu0 %vm879_vm3, %v14158_v6  ;;  %v1296_v44 = vpop.permute.xlu1 %1295  ;;  %v1784_v5 = vld [vmem:[#allocation3 + $0x160] sm:$0xff] }
 0x1f6   :  { %1334 = vst.msk [vmem:[#allocation3 + $0x168] sm:$0xff] %vm879_vm3, %v1296_v44  ;;  %v1010_v47 = vpop.permute.xlu0 %1009  ;;  %v1783_v43 = vld [vmem:[#allocation3 + $0x158] sm:$0xff]  ;;  %11315 = vmatprep.mubr.msk.f32.mxu0 %vm13222_vm1, %v13840_v42 }
 0x1f7   :  { %1050 = vst.msk [vmem:[#allocation3 + $0x78] sm:$0xff] %vm879_vm3, %v1010_v47  ;;  %11403 = vmatmul.mubr.msk.f32.gmra.mxu1 %vm879_vm3, %v1783_v43 }
 0x1f8   :  { %1505 = vrot.lane.b32.xlu1 %v13806_v49, %s13223_s14  ;;  %1503 = vrot.lane.b32.xlu0 %v13786_v58, %s13223_s14 }
 0x1f9   :  { %11405 = vmatprep.mubr.msk.f32.mxu1 %vm13222_vm1, %v13840_v42 }
 0x1fa   :  { %v1012_v12 = vpop.permute.xlu0 %1011  ;;  %v14177_v54 = vld [vmem:[#allocation3 + $0x70] sm:$0xff] }
 0x1fb   :  { %1051 = vst.msk [vmem:[#allocation3 + $0x80] sm:$0xff] %vm879_vm3, %v1012_v12  ;;  %11316 = vmatmul.mubr.msk.f32.gmra.mxu0 %vm879_vm3, %v14177_v54  ;;  %11406 = vmatmul.mubr.msk.f32.gmra.mxu1 %vm879_vm3, %v1784_v5 }
 0x1fc   :  { %1509 = vrot.lane.b32.xlu1 %v13832_v33, %s13223_s14  ;;  %1507 = vrot.lane.b32.xlu0 %v13819_v23, %s13223_s14 }
 0x1fd   :  { %v1298_v14 = vpop.permute.xlu1 %1297  ;;  %11318 = vmatprep.mubr.msk.f32.mxu0 %vm13222_vm1, %v13840_v42  ;;  %11408 = vmatprep.mubr.msk.f32.mxu1 %vm13222_vm1, %v13840_v42  ;;  %v1785_v22 = vld [vmem:[#allocation3 + $0x168] sm:$0xff] }
 0x1fe   :  { %1335 = vst.msk [vmem:[#allocation3 + $0x170] sm:$0xff] %vm879_vm3, %v1298_v14  ;;  %v1014_v32 = vpop.permute.xlu0 %1013  ;;  %v14192_v1 = vld [vmem:[#allocation3 + $0x78] sm:$0xff] }
 0x1ff   :  { %1052 = vst.msk [vmem:[#allocation3 + $0x88] sm:$0xff] %vm879_vm3, %v1014_v32  ;;  %11319 = vmatmul.mubr.msk.f32.gmra.mxu0 %vm879_vm3, %v14192_v1  ;;  %11409 = vmatmul.mubr.msk.f32.gmra.mxu1 %vm879_vm3, %v1785_v22 }
 0x200   :  { %1513 = vrot.lane.b32.xlu1 %v13860_v61, %s13223_s14  ;;  %1511 = vrot.lane.b32.xlu0 %v13849_v29, %s13223_s14 }
 0x201   :  { %v1300_v39 = vpop.permute.xlu1 %1299  ;;  %11321 = vmatprep.mubr.msk.f32.mxu0 %vm13222_vm1, %v13840_v42  ;;  %11411 = vmatprep.mubr.msk.f32.mxu1 %vm13222_vm1, %v13840_v42 }
 0x202   :  { %1336 = vst.msk [vmem:[#allocation3 + $0x178] sm:$0xff] %vm879_vm3, %v1300_v39  ;;  %v1016_v4 = vpop.permute.xlu0 %1015  ;;  %v14207_v7 = vld [vmem:[#allocation3 + $0x80] sm:$0xff] }
 0x203   :  { %1053 = vst.msk [vmem:[#allocation3 + $0x90] sm:$0xff] %vm879_vm3, %v1016_v4  ;;  %11322 = vmatmul.mubr.msk.f32.gmra.mxu0 %vm879_vm3, %v14207_v7 }
 0x204   :  { %1517 = vrot.lane.b32.xlu1 %v13878_v25, %s13223_s14  ;;  %1515 = vrot.lane.b32.xlu0 %v13869_v56, %s13223_s14 }
 0x205   :  { %11324 = vmatprep.mubr.msk.f32.mxu0 %vm13222_vm1, %v13840_v42  ;;  %v1786_v21 = vld [vmem:[#allocation3 + $0x170] sm:$0xff] }
 0x206   :  { %v1018_v38 = vpop.permute.xlu0 %1017  ;;  %v14218_v28 = vld [vmem:[#allocation3 + $0x88] sm:$0xff]  ;;  %11412 = vmatmul.mubr.msk.f32.gmra.mxu1 %vm879_vm3, %v1786_v21 }
 0x207   :  { %1054 = vst.msk [vmem:[#allocation3 + $0x98] sm:$0xff] %vm879_vm3, %v1018_v38  ;;  %11325 = vmatmul.mubr.msk.f32.gmra.mxu0 %vm879_vm3, %v14218_v28  ;;  %11414 = vmatprep.mubr.msk.f32.mxu1 %vm13222_vm1, %v13840_v42 }
 0x208   :  { %1521 = vrot.lane.b32.xlu1 %v13901_v36, %s13223_s14  ;;  %1519 = vrot.lane.b32.xlu0 %v13887_v46, %s13223_s14 }
 0x209   :  { %v1302_v17 = vpop.permute.xlu1 %1301  ;;  %11327 = vmatprep.mubr.msk.f32.mxu0 %vm13222_vm1, %v13840_v42  ;;  %v1787_v40 = vld [vmem:[#allocation3 + $0x178] sm:$0xff] }
 0x20a   :  { %1337 = vst.msk [vmem:[#allocation3 + $0x180] sm:$0xff] %vm879_vm3, %v1302_v17  ;;  %v1020_v34 = vpop.permute.xlu0 %1019  ;;  %v14237_v55 = vld [vmem:[#allocation3 + $0x90] sm:$0xff]  ;;  %11415 = vmatmul.mubr.msk.f32.gmra.mxu1 %vm879_vm3, %v1787_v40 }
 0x20b   :  { %1055 = vst.msk [vmem:[#allocation3 + $0xa0] sm:$0xff] %vm879_vm3, %v1020_v34  ;;  %11328 = vmatmul.mubr.msk.f32.gmra.mxu0 %vm879_vm3, %v14237_v55  ;;  %11417 = vmatprep.mubr.msk.f32.mxu1 %vm13222_vm1, %v13840_v42 }
 0x20c   :  { %11330 = vmatprep.mubr.msk.f32.mxu0 %vm13222_vm1, %v13840_v42  ;;  %1414 = vrot.lane.b32.xlu0 %v14228_v60, %s13223_s14 }
 0x20d   :  { %v1304_v48 = vpop.permute.xlu1 %1303 }
 0x20e   :  { %1338 = vst.msk [vmem:[#allocation3 + $0x188] sm:$0xff] %vm879_vm3, %v1304_v48  ;;  %v1022_v20 = vpop.permute.xlu0 %1021  ;;  %v14250_v35 = vld [vmem:[#allocation3 + $0x98] sm:$0xff] }
 0x20f   :  { %1056 = vst.msk [vmem:[#allocation3 + $0xa8] sm:$0xff] %vm879_vm3, %v1022_v20  ;;  %11331 = vmatmul.mubr.msk.f32.gmra.mxu0 %vm879_vm3, %v14250_v35 }
 0x210   :  { %11333 = vmatprep.mubr.msk.f32.mxu0 %vm13222_vm1, %v13840_v42 }
 0x211   :  { %v1788_v31 = vld [vmem:[#allocation3 + $0x180] sm:$0xff] }
 0x212   :  { %v14257_v27 = vld [vmem:[#allocation3 + $0xa0] sm:$0xff]  ;;  %11418 = vmatmul.mubr.msk.f32.gmra.mxu1 %vm879_vm3, %v1788_v31 }
 0x213   :  { %11334 = vmatmul.mubr.msk.f32.gmra.mxu0 %vm879_vm3, %v14257_v27  ;;  %11420 = vmatprep.mubr.msk.f32.mxu1 %vm13222_vm1, %v13840_v42 }
 0x214   :  { %11336 = vmatprep.mubr.msk.f32.mxu0 %vm13222_vm1, %v13840_v42 }
 0x215   :  { %v1024_v53 = vpop.permute.xlu0 %1023  ;;  %v1789_v10 = vld [vmem:[#allocation3 + $0x188] sm:$0xff] }
 0x216   :  { %1057 = vst.msk [vmem:[#allocation3 + $0xb0] sm:$0xff] %vm879_vm3, %v1024_v53  ;;  %v14267_v62 = vld [vmem:[#allocation3 + $0xa8] sm:$0xff]  ;;  %11421 = vmatmul.mubr.msk.f32.gmra.mxu1 %vm879_vm3, %v1789_v10 }
 0x217   :  { %11337 = vmatmul.mubr.msk.f32.gmra.mxu0 %vm879_vm3, %v14267_v62  ;;  %11423 = vmatprep.mubr.msk.f32.mxu1 %vm13222_vm1, %v13840_v42 }
 0x218   :  { %11339 = vmatprep.mubr.msk.f32.mxu0 %vm13222_vm1, %v13840_v42 }
 0x21d   :  { %v1306_v52 = vpop.permute.xlu1 %1305  ;;  %v14276_v15 = vld [vmem:[#allocation3 + $0xb0] sm:$0xff] }
 0x21e   :  { %1339 = vst.msk [vmem:[#allocation3 + $0x190] sm:$0xff] %vm879_vm3, %v1306_v52  ;;  %11340 = vmatmul.mubr.msk.f32.gmra.mxu0 %vm879_vm3, %v14276_v15 }
 0x21f   :  { %11342 = vmatprep.mubr.msk.f32.mxu0 %vm13222_vm1, %v13840_v42 }
 0x222   :  { %v1308_v9 = vpop.permute.xlu1 %1307  ;;  %v1026_v50 = vpop.permute.xlu0 %1025 }
 0x223   :  { %1340 = vst.msk [vmem:[#allocation3 + $0x198] sm:$0xff] %vm879_vm3, %v1308_v9  ;;  %1058 = vst.msk [vmem:[#allocation3 + $0xb8] sm:$0xff] %vm879_vm3, %v1026_v50 }
 0x225   :  { %v1790_v0 = vld [vmem:[#allocation3 + $0x190] sm:$0xff] }
 0x226   :  { %v1310_v13 = vpop.permute.xlu1 %1309  ;;  %11424 = vmatmul.mubr.msk.f32.gmra.mxu1 %vm879_vm3, %v1790_v0 }
 0x227   :  { %1341 = vst.msk [vmem:[#allocation3 + $0x1a0] sm:$0xff] %vm879_vm3, %v1310_v13  ;;  %11426 = vmatprep.mubr.msk.f32.mxu1 %vm13222_vm1, %v13840_v42 }
 0x229   :  { %v1028_v24 = vpop.permute.xlu0 %1027 }
 0x22a   :  { %v1312_v51 = vpop.permute.xlu1 %1311  ;;  %1059 = vst.msk [vmem:[#allocation3 + $0xc0] sm:$0xff] %vm879_vm3, %v1028_v24  ;;  %v14290_v8 = vld [vmem:[#allocation3 + $0xb8] sm:$0xff] }
 0x22b   :  { %v1791_v44 = vld [vmem:[#allocation3 + $0x198] sm:$0xff]  ;;  %1342 = vst.msk [vmem:[#allocation3 + $0x1a8] sm:$0xff] %vm879_vm3, %v1312_v51  ;;  %11343 = vmatmul.mubr.msk.f32.gmra.mxu0 %vm879_vm3, %v14290_v8  ;;  %v14344_v51 = vld [vmem:[#allocation2 + $0x1c0] sm:$0xff] }
 0x22c   :  { %11427 = vmatmul.mubr.msk.f32.gmra.mxu1 %vm879_vm3, %v1791_v44  ;;  %11345 = vmatprep.mubr.msk.f32.mxu0 %vm13222_vm1, %v13840_v42 }
 0x22d   :  { %11429 = vmatprep.mubr.msk.f32.mxu1 %vm13222_vm1, %v13840_v42 }
 0x22e   :  { %v1314_v47 = vpop.permute.xlu1 %1313  ;;  %v1792_v43 = vld [vmem:[#allocation3 + $0x1a0] sm:$0xff] }
 0x22f   :  { %1343 = vst.msk [vmem:[#allocation3 + $0x1b0] sm:$0xff] %vm879_vm3, %v1314_v47 }
 0x230   :  { %11430 = vmatmul.mubr.msk.f32.gmra.mxu1 %vm879_vm3, %v1792_v43 }
 0x231   :  { %11432 = vmatprep.mubr.msk.f32.mxu1 %vm13222_vm1, %v13840_v42  ;;  %v1030_v12 = vpop.permute.xlu0 %1029  ;;  %v14304_v5 = vld [vmem:[#allocation3 + $0xc0] sm:$0xff] }
 0x232   :  { %v1316_v14 = vpop.permute.xlu1 %1315  ;;  %1060 = vst.msk [vmem:[#allocation3 + $0xc8] sm:$0xff] %vm879_vm3, %v1030_v12  ;;  %11346 = vmatmul.mubr.msk.f32.gmra.mxu0 %vm879_vm3, %v14304_v5  ;;  %v1793_v22 = vld [vmem:[#allocation3 + $0x1a8] sm:$0xff] }
 0x233   :  { %1344 = vst.msk [vmem:[#allocation3 + $0x1b8] sm:$0xff] %vm879_vm3, %v1316_v14  ;;  %11348 = vmatprep.mubr.msk.f32.mxu0 %vm13222_vm1, %v13840_v42 }
 0x234   :  { %11433 = vmatmul.mubr.msk.f32.gmra.mxu1 %vm879_vm3, %v1793_v22 }
 0x235   :  { %11435 = vmatprep.mubr.msk.f32.mxu1 %vm13222_vm1, %v13840_v42 }
 0x236   :  { %v1389_v32 = vpop.permute.xlu1 %1388  ;;  %v1032_v39 = vpop.permute.xlu0 %1031  ;;  %v1794_v4 = vld [vmem:[#allocation3 + $0x1b0] sm:$0xff] }
 0x237   :  { %v1430_v21 = vmax.f32 %v13773_v37, %v1389_v32  ;;  %1061 = vst.msk [vmem:[#allocation3 + $0xd0] sm:$0xff] %vm879_vm3, %v1032_v39  ;;  %v2070_v38 = vpop.f32.mrf.mxu0 }
 0x238   :  { %11436 = vmatmul.mubr.msk.f32.gmra.mxu1 %vm879_vm3, %v1794_v4  ;;  %2394 = vst.msk [vmem:[#allocation4] sm:$0xff] %vm722_vm2, %v2070_v38 }
 0x239   :  { %11438 = vmatprep.mubr.msk.f32.mxu1 %vm13222_vm1, %v13840_v42  ;;  %1444 = vst.msk [vmem:[#allocation3 + $0x1c0] sm:$0xff] %vm879_vm3, %v1430_v21  ;;  %v11275_v17 = vpop.f32.mrf.mxu0  ;;  %v14322_v40 = vld [vmem:[#allocation3 + $0xc8] sm:$0xff] }
 0x23a   :  { %v1391_v34 = vpop.permute.xlu1 %1390  ;;  %11349 = vmatmul.mubr.msk.f32.gmra.mxu0 %vm879_vm3, %v14322_v40  ;;  %v1795_v48 = vld [vmem:[#allocation3 + $0x1b8] sm:$0xff] }
 0x23b   :  { %v1431_v20 = vmax.f32 %v13786_v58, %v1391_v34  ;;  %v2075_v31 = vpop.f32.mrf.mxu0  ;;  %11351 = vmatprep.mubr.msk.f32.mxu0 %vm13222_vm1, %v13840_v42 }
 0x23c   :  { %11439 = vmatmul.mubr.msk.f32.gmra.mxu1 %vm879_vm3, %v1795_v48  ;;  %2395 = vst.msk [vmem:[#allocation4 + $0x8] sm:$0xff] %vm722_vm2, %v2075_v31 }
 0x23d   :  { %11441 = vmatprep.mubr.msk.f32.mxu1 %vm13222_vm1, %v13840_v42  ;;  %1445 = vst.msk [vmem:[#allocation3 + $0x1c8] sm:$0xff] %vm879_vm3, %v1431_v20  ;;  %v11278_v53 = vpop.f32.mrf.mxu0 }
 0x23e   :  { %v1393_v10 = vpop.permute.xlu1 %1392  ;;  %v1034_v52 = vpop.permute.xlu0 %1033  ;;  %v14334_v9 = vld [vmem:[#allocation3 + $0xd0] sm:$0xff] }
 0x23f   :  { %v1432_v50 = vmax.f32 %v13806_v49, %v1393_v10  ;;  %1062 = vst.msk [vmem:[#allocation3 + $0xd8] sm:$0xff] %vm879_vm3, %v1034_v52  ;;  %11352 = vmatmul.mubr.msk.f32.gmra.mxu0 %vm879_vm3, %v14334_v9 }
 0x240   :  { %v1796_v0 = vld [vmem:[#allocation3 + $0x1c0] sm:$0xff]  ;;  %11354 = vmatprep.mubr.msk.f32.mxu0 %vm13222_vm1, %v13840_v42 }
 0x241   :  { %1446 = vst.msk [vmem:[#allocation3 + $0x1d0] sm:$0xff] %vm879_vm3, %v1432_v50  ;;  %11442 = vmatmul.mubr.msk.f32.gmra.mxu1 %vm879_vm3, %v1796_v0 }
 0x242   :  { %v1395_v13 = vpop.permute.xlu1 %1394  ;;  %v1107_v24 = vpop.permute.xlu0 %1106  ;;  %11444 = vmatprep.mubr.msk.f32.mxu1 %vm13222_vm1, %v14344_v51 }
 0x243   :  { %v1433_v44 = vmax.f32 %v13819_v23, %v1395_v13  ;;  %v1148_v47 = vmax.f32 %v14086_v16, %v1107_v24 }
 0x244   :  { %v1797_v43 = vld [vmem:[#allocation3 + $0x1c8] sm:$0xff] }
 0x245   :  { %1447 = vst.msk [vmem:[#allocation3 + $0x1d8] sm:$0xff] %vm879_vm3, %v1433_v44  ;;  %1162 = vst.msk [vmem:[#allocation3 + $0xe0] sm:$0xff] %vm879_vm3, %v1148_v47  ;;  %11445 = vmatmul.mubr.msk.f32.gmra.mxu1 %vm879_vm3, %v1797_v43 }
 0x246   :  { %v1397_v42 = vpop.permute.xlu1 %1396  ;;  %v1109_v12 = vpop.permute.xlu0 %1108  ;;  %v14353_v14 = vld [vmem:[#allocation3 + $0xd8] sm:$0xff]  ;;  %11447 = vmatprep.mubr.msk.f32.mxu1 %vm13222_vm1, %v14344_v51 }
 0x247   :  { %v1434_v22 = vmax.f32 %v13832_v33, %v1397_v42  ;;  %v1149_v32 = vmax.f32 %v14097_v18, %v1109_v12  ;;  %11355 = vmatmul.mubr.msk.f32.gmra.mxu0 %vm879_vm3, %v14353_v14  ;;  %v2080_v16 = vpop.f32.mrf.mxu0 }
 0x248   :  { %2396 = vst.msk [vmem:[#allocation4 + $0x10] sm:$0xff] %vm722_vm2, %v2080_v16  ;;  %v1798_v39 = vld [vmem:[#allocation3 + $0x1d0] sm:$0xff]  ;;  %11357 = vmatprep.mubr.msk.f32.mxu0 %vm13222_vm1, %v14344_v51 }
 0x249   :  { %1448 = vst.msk [vmem:[#allocation3 + $0x1e0] sm:$0xff] %vm879_vm3, %v1434_v22  ;;  %1163 = vst.msk [vmem:[#allocation3 + $0xe8] sm:$0xff] %vm879_vm3, %v1149_v32  ;;  %11448 = vmatmul.mubr.msk.f32.gmra.mxu1 %vm879_vm3, %v1798_v39  ;;  %v11281_v4 = vpop.f32.mrf.mxu0 }
 0x24a   :  { %v1399_v21 = vpop.permute.xlu1 %1398  ;;  %v1111_v38 = vpop.permute.xlu0 %1110  ;;  %11450 = vmatprep.mubr.msk.f32.mxu1 %vm13222_vm1, %v14344_v51 }
 0x24b   :  { %v1435_v18 = vmax.f32 %v13849_v29, %v1399_v21  ;;  %v1150_v17 = vmax.f32 %v14103_v3, %v1111_v38  ;;  %v2085_v34 = vpop.f32.mrf.mxu0 }
 0x24c   :  { %2397 = vst.msk [vmem:[#allocation4 + $0x18] sm:$0xff] %vm722_vm2, %v2085_v34  ;;  %v14372_v48 = vld [vmem:[#allocation3 + $0xe0] sm:$0xff]  ;;  %v1799_v20 = vld [vmem:[#allocation3 + $0x1d8] sm:$0xff] }
 0x24d   :  { %1449 = vst.msk [vmem:[#allocation3 + $0x1e8] sm:$0xff] %vm879_vm3, %v1435_v18  ;;  %1164 = vst.msk [vmem:[#allocation3 + $0xf0] sm:$0xff] %vm879_vm3, %v1150_v17  ;;  %11358 = vmatmul.mubr.msk.f32.gmra.mxu0 %vm879_vm3, %v14372_v48  ;;  %11451 = vmatmul.mubr.msk.f32.gmra.mxu1 %vm879_vm3, %v1799_v20  ;;  %v11284_v31 = vpop.f32.mrf.mxu0 }
 0x24e   :  { %v1401_v53 = vpop.permute.xlu1 %1400  ;;  %v1113_v10 = vpop.permute.xlu0 %1112  ;;  %11360 = vmatprep.mubr.msk.f32.mxu0 %vm13222_vm1, %v14344_v51  ;;  %11453 = vmatprep.mubr.msk.f32.mxu1 %vm13222_vm1, %v14344_v51 }
 0x24f   :  { %v1436_v3 = vmax.f32 %v13860_v61, %v1401_v53  ;;  %v1151_v52 = vmax.f32 %v14109_v59, %v1113_v10  ;;  %v2090_v50 = vpop.f32.mrf.mxu0 }
 0x250   :  { %2398 = vst.msk [vmem:[#allocation4 + $0x20] sm:$0xff] %vm722_vm2, %v2090_v50  ;;  %v14386_v0 = vld [vmem:[#allocation3 + $0xe8] sm:$0xff]  ;;  %v1800_v13 = vld [vmem:[#allocation3 + $0x1e0] sm:$0xff] }
 0x251   :  { %1450 = vst.msk [vmem:[#allocation3 + $0x1f0] sm:$0xff] %vm879_vm3, %v1436_v3  ;;  %1165 = vst.msk [vmem:[#allocation3 + $0xf8] sm:$0xff] %vm879_vm3, %v1151_v52  ;;  %11361 = vmatmul.mubr.msk.f32.gmra.mxu0 %vm879_vm3, %v14386_v0  ;;  %11454 = vmatmul.mubr.msk.f32.gmra.mxu1 %vm879_vm3, %v1800_v13  ;;  %v11287_v24 = vpop.f32.mrf.mxu0 }
 0x252   :  { %v1403_v44 = vpop.permute.xlu1 %1402  ;;  %v1115_v47 = vpop.permute.xlu0 %1114  ;;  %11363 = vmatprep.mubr.msk.f32.mxu0 %vm13222_vm1, %v14344_v51  ;;  %11456 = vmatprep.mubr.msk.f32.mxu1 %vm13222_vm1, %v14344_v51 }
 0x253   :  { %v1437_v59 = vmax.f32 %v13869_v56, %v1403_v44  ;;  %v1152_v43 = vmax.f32 %v14115_v30, %v1115_v47  ;;  %v2095_v42 = vpop.f32.mrf.mxu0 }
 0x254   :  { %2399 = vst.msk [vmem:[#allocation4 + $0x28] sm:$0xff] %vm722_vm2, %v2095_v42  ;;  %v14400_v12 = vld [vmem:[#allocation3 + $0xf0] sm:$0xff]  ;;  %v1801_v22 = vld [vmem:[#allocation3 + $0x1e8] sm:$0xff] }
 0x255   :  { %1451 = vst.msk [vmem:[#allocation3 + $0x1f8] sm:$0xff] %vm879_vm3, %v1437_v59  ;;  %1166 = vst.msk [vmem:[#allocation3 + $0x100] sm:$0xff] %vm879_vm3, %v1152_v43  ;;  %11364 = vmatmul.mubr.msk.f32.gmra.mxu0 %vm879_vm3, %v14400_v12  ;;  %11457 = vmatmul.mubr.msk.f32.gmra.mxu1 %vm879_vm3, %v1801_v22  ;;  %v11290_v32 = vpop.f32.mrf.mxu0  ;;  %v10179_v59 = vld [vmem:[%s17477_s3 + $0x78] sm:$0xff]  ;;  %v2524_v42 = vld [vmem:[#allocation3 + $0x10] sm:$0xff] }
 0x256   :  { %v1405_v16 = vpop.permute.xlu1 %1404  ;;  %v1117_v39 = vpop.permute.xlu0 %1116  ;;  %11366 = vmatprep.mubr.msk.f32.mxu0 %vm13222_vm1, %v14344_v51  ;;  %11459 = vmatprep.mubr.msk.f32.mxu1 %vm13222_vm1, %v14344_v51  ;;  %v10178_v22 = vld [vmem:[%s17477_s3 + $0x70] sm:$0xff] }
 0x257   :  { %v1438_v30 = vmax.f32 %v13878_v25, %v1405_v16  ;;  %v1153_v4 = vmax.f32 %v14121_v57, %v1117_v39 }
 0x258   :  { %v14413_v21 = vld [vmem:[#allocation3 + $0xf8] sm:$0xff]  ;;  %v1802_v38 = vld [vmem:[#allocation3 + $0x1f0] sm:$0xff] }
 0x259   :  { %1452 = vst.msk [vmem:[#allocation3 + $0x200] sm:$0xff] %vm879_vm3, %v1438_v30  ;;  %1167 = vst.msk [vmem:[#allocation3 + $0x108] sm:$0xff] %vm879_vm3, %v1153_v4  ;;  %11367 = vmatmul.mubr.msk.f32.gmra.mxu0 %vm879_vm3, %v14413_v21  ;;  %11460 = vmatmul.mubr.msk.f32.gmra.mxu1 %vm879_vm3, %v1802_v38 }
 0x25a   :  { %v1121_v18 = vpop.permute.xlu1 %1120  ;;  %v1119_v17 = vpop.permute.xlu0 %1118  ;;  %11369 = vmatprep.mubr.msk.f32.mxu0 %vm13222_vm1, %v14344_v51  ;;  %11462 = vmatprep.mubr.msk.f32.mxu1 %vm13222_vm1, %v14344_v51 }
 0x25b   :  { %v1155_v57 = vmax.f32 %v14128_v63, %v1121_v18  ;;  %v1154_v34 = vmax.f32 %v14130_v19, %v1119_v17  ;;  %v2100_v20 = vpop.f32.mrf.mxu0 }
 0x25c   :  { %2400 = vst.msk [vmem:[#allocation4 + $0x30] sm:$0xff] %vm722_vm2, %v2100_v20  ;;  %v14427_v31 = vld [vmem:[#allocation3 + $0x100] sm:$0xff]  ;;  %v1803_v53 = vld [vmem:[#allocation3 + $0x1f8] sm:$0xff] }
 0x25d   :  { %1169 = vst.msk [vmem:[#allocation3 + $0x118] sm:$0xff] %vm879_vm3, %v1155_v57  ;;  %1168 = vst.msk [vmem:[#allocation3 + $0x110] sm:$0xff] %vm879_vm3, %v1154_v34  ;;  %11370 = vmatmul.mubr.msk.f32.gmra.mxu0 %vm879_vm3, %v14427_v31  ;;  %11463 = vmatmul.mubr.msk.f32.gmra.mxu1 %vm879_vm3, %v1803_v53  ;;  %v11293_v10 = vpop.f32.mrf.mxu0  ;;  %v10177_v53 = vld [vmem:[%s17477_s3 + $0x68] sm:$0xff] }
 0x25e   :  { %v1407_v3 = vpop.permute.xlu1 %1406  ;;  %v1123_v63 = vpop.permute.xlu0 %1122  ;;  %11372 = vmatprep.mubr.msk.f32.mxu0 %vm13222_vm1, %v14344_v51  ;;  %11465 = vmatprep.mubr.msk.f32.mxu1 %vm13222_vm1, %v14344_v51 }
 0x25f   :  { %v1439_v19 = vmax.f32 %v13887_v46, %v1407_v3  ;;  %v1156_v52 = vmax.f32 %v14138_v11, %v1123_v63 }
 0x260   :  { %v14440_v50 = vld [vmem:[#allocation3 + $0x108] sm:$0xff]  ;;  %v1804_v13 = vld [vmem:[#allocation3 + $0x200] sm:$0xff] }
 0x261   :  { %1453 = vst.msk [vmem:[#allocation3 + $0x208] sm:$0xff] %vm879_vm3, %v1439_v19  ;;  %1170 = vst.msk [vmem:[#allocation3 + $0x120] sm:$0xff] %vm879_vm3, %v1156_v52  ;;  %11373 = vmatmul.mubr.msk.f32.gmra.mxu0 %vm879_vm3, %v14440_v50  ;;  %11466 = vmatmul.mubr.msk.f32.gmra.mxu1 %vm879_vm3, %v1804_v13  ;;  %v2526_v19 = vld [vmem:[#allocation3 + $0x20] sm:$0xff] }
 0x262   :  { %v1411_v24 = vpop.permute.xlu1 %1410  ;;  %v1409_v44 = vpop.permute.xlu0 %1408  ;;  %11375 = vmatprep.mubr.msk.f32.mxu0 %vm13222_vm1, %v14344_v51  ;;  %11476 = vmatprep.mubr.msk.f32.mxu1 %vm13222_vm1, %v14344_v51 }
 0x263   :  { %v1441_v11 = vmax.f32 %v13899_v26, %v1411_v24  ;;  %v1440_v47 = vmax.f32 %v13901_v36, %v1409_v44 }
 0x264   :  { %v14456_v43 = vld [vmem:[#allocation3 + $0x110] sm:$0xff]  ;;  %v14475_v18 = vld [vmem:[#allocation3 + $0x118] sm:$0xff] }
 0x265   :  { %1455 = vst.msk [vmem:[#allocation3 + $0x218] sm:$0xff] %vm879_vm3, %v1441_v11  ;;  %1454 = vst.msk [vmem:[#allocation3 + $0x210] sm:$0xff] %vm879_vm3, %v1440_v47  ;;  %11376 = vmatmul.mubr.msk.f32.gmra.mxu0 %vm879_vm3, %v14456_v43  ;;  %11477 = vmatmul.mubr.msk.f32.vlgmr.msra.gmra.mxu1 %vm879_vm3, %v2524_v42  ;;  %v10248_v11 = vld [vmem:[%s17477_s3 + $0x98] sm:$0xff] }
 0x266   :  { %v1502_v32 = vpop.permute.xlu1 %1501  ;;  %v1413_v16 = vpop.permute.xlu0 %1412  ;;  %11875 = vmatpush3.msra.mxu1 %v10179_v59  ;;  %11378 = vmatprep.mubr.msk.f32.mxu0 %vm13222_vm1, %v14344_v51 }
 0x267   :  { %v1543_v39 = vmax.f32 %v13773_v37, %v1502_v32  ;;  %v1442_v30 = vmax.f32 %v13907_v2, %v1413_v16  ;;  %v2105_v4 = vpop.f32.mrf.mxu0  ;;  %v2255_v38 = vpop.f32.mrf.mxu1  ;;  %11479 = vmatprep.mubr.msk.f32.mxu1 %vm13222_vm1, %v14344_v51  ;;  %11876 = vmatprep.subr.mxu1 %v14344_v51  ;;  %v2525_v37 = vld [vmem:[#allocation3 + $0x18] sm:$0xff]  ;;  %v2528_v16 = vld [vmem:[#allocation3 + $0x30] sm:$0xff] }
 0x268   :  { %2401 = vst.msk [vmem:[#allocation4 + $0x38] sm:$0xff] %vm722_vm2, %v2105_v4  ;;  %2431 = vst.msk [vmem:[#allocation4 + $0x128] sm:$0xff] %vm722_vm2, %v2255_v38  ;;  %11877 = vmatpush3.msra.mxu1 %v10178_v22  ;;  %v14492_v63 = vld [vmem:[#allocation3 + $0x120] sm:$0xff] }
 0x269   :  { %1456 = vst.msk [vmem:[#allocation3 + $0x220] sm:$0xff] %vm879_vm3, %v1442_v30  ;;  %1571 = vrot.lane.b32.xlu1 %v1543_v39, %s13224_s2  ;;  %11379 = vmatmul.mubr.msk.f32.gmra.mxu0 %vm879_vm3, %v14475_v18  ;;  %v11296_v17 = vpop.f32.mrf.mxu0  ;;  %v11386_v57 = vpop.f32.mrf.mxu1  ;;  %v10247_v39 = vld [vmem:[%s17477_s3 + $0x90] sm:$0xff] }
 0x26a   :  { %11480 = vmatmul.mubr.msk.f32.gmra.mxu1 %vm879_vm3, %v2525_v37  ;;  %v1506_v34 = vpop.permute.xlu1 %1505  ;;  %v1504_v20 = vpop.permute.xlu0 %1503  ;;  %11381 = vmatprep.mubr.msk.f32.mxu0 %vm13222_vm1, %v14344_v51  ;;  %v2529_v37 = vld [vmem:[#allocation3 + $0x38] sm:$0xff] }
 0x26b   :  { %v1545_v10 = vmax.f32 %v13806_v49, %v1506_v34  ;;  %v1544_v3 = vmax.f32 %v13786_v58, %v1504_v20  ;;  %11482 = vmatprep.mubr.msk.f32.mxu1 %vm13222_vm1, %v14344_v51  ;;  %11878 = vmatprep.subr.mxu1 %v14344_v51 }
 0x26c   :  { %11879 = vmatpush3.msra.mxu1 %v10177_v53  ;;  %v2530_v53 = vld [vmem:[#allocation3 + $0x40] sm:$0xff] }
 0x26d   :  { %1575 = vrot.lane.b32.xlu1 %v1545_v10, %s13224_s2  ;;  %11382 = vmatmul.mubr.msk.f32.gmra.mxu0 %vm879_vm3, %v14492_v63 }
 0x26e   :  { %11483 = vmatmul.mubr.msk.f32.gmra.mxu1 %vm879_vm3, %v2526_v19  ;;  %1573 = vrot.lane.b32.xlu0 %v1544_v3, %s13224_s2  ;;  %v1510_v49 = vpop.permute.xlu1 %1509  ;;  %v1508_v58 = vpop.permute.xlu0 %1507 }
 0x26f   :  { %v1547_v52 = vmax.f32 %v13832_v33, %v1510_v49  ;;  %v1546_v13 = vmax.f32 %v13819_v23, %v1508_v58  ;;  %v2110_v24 = vpop.f32.mrf.mxu0  ;;  %v2260_v44 = vpop.f32.mrf.mxu1  ;;  %11485 = vmatprep.mubr.msk.f32.mxu1 %vm13222_vm1, %v14344_v51  ;;  %11679 = vmatprep.mubr.msk.f32.mxu0 %vm13222_vm1, %v14344_v51  ;;  %v2527_v23 = vld [vmem:[#allocation3 + $0x28] sm:$0xff] }
 0x270   :  { %2402 = vst.msk [vmem:[#allocation4 + $0x40] sm:$0xff] %vm722_vm2, %v2110_v24  ;;  %2432 = vst.msk [vmem:[#allocation4 + $0x130] sm:$0xff] %vm722_vm2, %v2260_v44  ;;  %11880 = vmatprep.subr.mxu1 %v14344_v51  ;;  %v2533_v44 = vld [vmem:[#allocation3 + $0x58] sm:$0xff] }
 0x271   :  { %1579 = vrot.lane.b32.xlu1 %v1547_v52, %s13224_s2  ;;  %11680 = vmatmul.mubr.msk.f32.vlgmr.msra.gmra.mxu0 %vm879_vm3, %v2526_v19  ;;  %v11299_v33 = vpop.f32.mrf.mxu0  ;;  %v11389_v47 = vpop.f32.mrf.mxu1  ;;  %v2531_v19 = vld [vmem:[#allocation3 + $0x48] sm:$0xff]  ;;  %v2532_v52 = vld [vmem:[#allocation3 + $0x50] sm:$0xff] }
 0x272   :  { %11486 = vmatmul.mubr.msk.f32.gmra.mxu1 %vm879_vm3, %v2527_v23  ;;  %12078 = vmatpush3.msra.mxu0 %v10248_v11  ;;  %v1514_v59 = vpop.permute.xlu1 %1513  ;;  %v1512_v42 = vpop.permute.xlu0 %1511  ;;  %v2534_v33 = vld [vmem:[#allocation3 + $0x60] sm:$0xff] }
 0x273   :  { %1577 = vrot.lane.b32.xlu0 %v1546_v13, %s13224_s2  ;;  %v1549_v22 = vmax.f32 %v13860_v61, %v1514_v59  ;;  %v1548_v32 = vmax.f32 %v13849_v29, %v1512_v42  ;;  %11488 = vmatprep.mubr.msk.f32.mxu1 %vm13222_vm1, %v14344_v51 }
 0x274   :  { %11682 = vmatprep.mubr.msk.f32.mxu0 %vm13222_vm1, %v14344_v51  ;;  %12079 = vmatprep.subr.mxu0 %v14344_v51 }
 0x275   :  { %1583 = vrot.lane.b32.xlu1 %v1549_v22, %s13224_s2  ;;  %11683 = vmatmul.mubr.msk.f32.gmra.mxu0 %vm879_vm3, %v2527_v23 }
 0x276   :  { %11489 = vmatmul.mubr.msk.f32.gmra.mxu1 %vm879_vm3, %v2528_v16  ;;  %v1518_v29 = vpop.permute.xlu1 %1517  ;;  %v1516_v61 = vpop.permute.xlu0 %1515  ;;  %11685 = vmatprep.mubr.msk.f32.mxu0 %vm13222_vm1, %v14344_v51 }
 0x277   :  { %1581 = vrot.lane.b32.xlu0 %v1548_v32, %s13224_s2  ;;  %v1551_v30 = vmax.f32 %v13878_v25, %v1518_v29  ;;  %v1550_v4 = vmax.f32 %v13869_v56, %v1516_v61  ;;  %v2265_v38 = vpop.f32.mrf.mxu1  ;;  %11491 = vmatprep.mubr.msk.f32.mxu1 %vm13222_vm1, %v14344_v51 }
 0x278   :  { %2433 = vst.msk [vmem:[#allocation4 + $0x138] sm:$0xff] %vm722_vm2, %v2265_v38  ;;  %12080 = vmatpush3.msra.mxu0 %v10247_v39 }
 0x279   :  { %1587 = vrot.lane.b32.xlu1 %v1551_v30, %s13224_s2  ;;  %11686 = vmatmul.mubr.msk.f32.gmra.mxu0 %vm879_vm3, %v2528_v16  ;;  %v11392_v17 = vpop.f32.mrf.mxu1 }
 0x27a   :  { %11492 = vmatmul.mubr.msk.f32.gmra.mxu1 %vm879_vm3, %v2529_v37  ;;  %v1522_v57 = vpop.permute.xlu1 %1521  ;;  %v1520_v34 = vpop.permute.xlu0 %1519  ;;  %11688 = vmatprep.mubr.msk.f32.mxu0 %vm13222_vm1, %v14344_v51 }
 0x27b   :  { %1585 = vrot.lane.b32.xlu0 %v1550_v4, %s13224_s2  ;;  %v1553_v56 = vmax.f32 %v13901_v36, %v1522_v57  ;;  %v1552_v25 = vmax.f32 %v13887_v46, %v1520_v34  ;;  %v2115_v20 = vpop.f32.mrf.mxu0  ;;  %11494 = vmatprep.mubr.msk.f32.mxu1 %vm13222_vm1, %v14344_v51  ;;  %v10246_v36 = vld [vmem:[%s17477_s3 + $0x88] sm:$0xff] }
 0x27c   :  { %2403 = vst.msk [vmem:[#allocation4 + $0x48] sm:$0xff] %vm722_vm2, %v2115_v20  ;;  %12081 = vmatprep.subr.mxu0 %v14344_v51 }
 0x27d   :  { %1591 = vrot.lane.b32.xlu1 %v1553_v56, %s13224_s2  ;;  %11689 = vmatmul.mubr.msk.f32.gmra.mxu0 %vm879_vm3, %v2529_v37  ;;  %v11302_v10 = vpop.f32.mrf.mxu0 }
 0x27e   :  { %11495 = vmatmul.mubr.msk.f32.gmra.mxu1 %vm879_vm3, %v2530_v53  ;;  %11691 = vmatprep.mubr.msk.f32.mxu0 %vm13222_vm1, %v14344_v51  ;;  %v1415_v46 = vpop.permute.xlu0 %1414 }
 0x27f   :  { %1589 = vrot.lane.b32.xlu0 %v1552_v25, %s13224_s2  ;;  %11497 = vmatprep.mubr.msk.f32.mxu1 %vm13222_vm1, %v14344_v51  ;;  %v1443_v3 = vmax.f32 %v14228_v60, %v1415_v46 }
 0x280   :  { %12082 = vmatpush3.msra.mxu0 %v10246_v36 }
 0x281   :  { %1525 = vrot.lane.b32.xlu1 %v13907_v2, %s13223_s14  ;;  %11692 = vmatmul.mubr.msk.f32.gmra.mxu0 %vm879_vm3, %v2530_v53  ;;  %1457 = vst.msk [vmem:[#allocation3 + $0x228] sm:$0xff] %vm879_vm3, %v1443_v3 }
 0x282   :  { %11498 = vmatmul.mubr.msk.f32.gmra.mxu1 %vm879_vm3, %v2531_v19  ;;  %11694 = vmatprep.mubr.msk.f32.mxu0 %vm13222_vm1, %v14344_v51 }
 0x283   :  { %1523 = vrot.lane.b32.xlu0 %v13899_v26, %s13223_s14  ;;  %v2120_v49 = vpop.f32.mrf.mxu0  ;;  %v2270_v58 = vpop.f32.mrf.mxu1  ;;  %11500 = vmatprep.mubr.msk.f32.mxu1 %vm13222_vm1, %v14344_v51 }
 0x284   :  { %2404 = vst.msk [vmem:[#allocation4 + $0x50] sm:$0xff] %vm722_vm2, %v2120_v49  ;;  %2434 = vst.msk [vmem:[#allocation4 + $0x140] sm:$0xff] %vm722_vm2, %v2270_v58  ;;  %12083 = vmatprep.subr.mxu0 %v14344_v51 }
 0x285   :  { %11695 = vmatmul.mubr.msk.f32.gmra.mxu0 %vm879_vm3, %v2531_v19  ;;  %v11305_v13 = vpop.f32.mrf.mxu0  ;;  %v11395_v24 = vpop.f32.mrf.mxu1 }
 0x286   :  { %11501 = vmatmul.mubr.msk.f32.gmra.mxu1 %vm879_vm3, %v2532_v52  ;;  %11697 = vmatprep.mubr.msk.f32.mxu0 %vm13222_vm1, %v14344_v51 }
 0x287   :  { %1527 = vrot.lane.b32.xlu0 %v14228_v60, %s13223_s14  ;;  %11503 = vmatprep.mubr.msk.f32.mxu1 %vm13222_vm1, %v14344_v51 }
 0x289   :  { %11698 = vmatmul.mubr.msk.f32.gmra.mxu0 %vm879_vm3, %v2532_v52 }
 0x28a   :  { %11504 = vmatmul.mubr.msk.f32.gmra.mxu1 %vm879_vm3, %v2533_v44  ;;  %11700 = vmatprep.mubr.msk.f32.mxu0 %vm13222_vm1, %v14344_v51 }
 0x28b   :  { %v2125_v11 = vpop.f32.mrf.mxu0  ;;  %v2275_v23 = vpop.f32.mrf.mxu1  ;;  %11506 = vmatprep.mubr.msk.f32.mxu1 %vm13222_vm1, %v14344_v51 }
 0x28c   :  { %2405 = vst.msk [vmem:[#allocation4 + $0x58] sm:$0xff] %vm722_vm2, %v2125_v11  ;;  %2435 = vst.msk [vmem:[#allocation4 + $0x148] sm:$0xff] %vm722_vm2, %v2275_v23 }
 0x28d   :  { %11701 = vmatmul.mubr.msk.f32.gmra.mxu0 %vm879_vm3, %v2533_v44  ;;  %v11308_v47 = vpop.f32.mrf.mxu0  ;;  %v11398_v59 = vpop.f32.mrf.mxu1 }
 0x28e   :  { %11507 = vmatmul.mubr.msk.f32.gmra.mxu1 %vm879_vm3, %v2534_v33  ;;  %11703 = vmatprep.mubr.msk.f32.mxu0 %vm13222_vm1, %v14344_v51 }
 0x28f   :  { %v2130_v42 = vpop.f32.mrf.mxu0  ;;  %11509 = vmatprep.mubr.msk.f32.mxu1 %vm13222_vm1, %v14344_v51 }
 0x290   :  { %2406 = vst.msk [vmem:[#allocation4 + $0x60] sm:$0xff] %vm722_vm2, %v2130_v42 }
 0x291   :  { %11704 = vmatmul.mubr.msk.f32.gmra.mxu0 %vm879_vm3, %v2534_v33  ;;  %v11311_v22 = vpop.f32.mrf.mxu0 }
 0x292   :  { %11510 = vmatmul.mubr.msk.f32.gmra.mxu1 %vm879_vm3, %v14158_v6  ;;  %11706 = vmatprep.mubr.msk.f32.mxu0 %vm13222_vm1, %v14344_v51 }
 0x293   :  { %11512 = vmatprep.mubr.msk.f32.mxu1 %vm13222_vm1, %v14344_v51 }
 0x295   :  { %11707 = vmatmul.mubr.msk.f32.gmra.mxu0 %vm879_vm3, %v14158_v6  ;;  %v10176_v6 = vld [vmem:[%s17477_s3 + $0x60] sm:$0xff] }
 0x296   :  { %11513 = vmatmul.mubr.msk.f32.gmra.mxu1 %vm879_vm3, %v14177_v54  ;;  %11709 = vmatprep.mubr.msk.f32.mxu0 %vm13222_vm1, %v14344_v51 }
 0x297   :  { %11515 = vmatprep.mubr.msk.f32.mxu1 %vm13222_vm1, %v14344_v51  ;;  %11881 = vmatpush3.msra.mxu1 %v10176_v6 }
 0x298   :  { %12280 = vmatprep.subr.mxu1 %v14344_v51 }
 0x299   :  { %11710 = vmatmul.mubr.msk.f32.gmra.mxu0 %vm879_vm3, %v14177_v54 }
 0x29a   :  { %11516 = vmatmul.mubr.msk.f32.gmra.mxu1 %vm879_vm3, %v14192_v1  ;;  %11712 = vmatprep.mubr.msk.f32.mxu0 %vm13222_vm1, %v14344_v51 }
 0x29b   :  { %11518 = vmatprep.mubr.msk.f32.mxu1 %vm13222_vm1, %v14344_v51 }
 0x29d   :  { %11713 = vmatmul.mubr.msk.f32.gmra.mxu0 %vm879_vm3, %v14192_v1 }
 0x29e   :  { %11519 = vmatmul.mubr.msk.f32.gmra.mxu1 %vm879_vm3, %v14207_v7  ;;  %11715 = vmatprep.mubr.msk.f32.mxu0 %vm13222_vm1, %v14344_v51 }
 0x29f   :  { %11521 = vmatprep.mubr.msk.f32.mxu1 %vm13222_vm1, %v14344_v51 }
 0x2a1   :  { %11716 = vmatmul.mubr.msk.f32.gmra.mxu0 %vm879_vm3, %v14207_v7 }
 0x2a2   :  { %11522 = vmatmul.mubr.msk.f32.gmra.mxu1 %vm879_vm3, %v14218_v28  ;;  %11718 = vmatprep.mubr.msk.f32.mxu0 %vm13222_vm1, %v14344_v51 }
 0x2a3   :  { %11524 = vmatprep.mubr.msk.f32.mxu1 %vm13222_vm1, %v14344_v51 }
 0x2a5   :  { %11719 = vmatmul.mubr.msk.f32.gmra.mxu0 %vm879_vm3, %v14218_v28  ;;  %v10245_v28 = vld [vmem:[%s17477_s3 + $0x80] sm:$0xff] }
 0x2a6   :  { %11525 = vmatmul.mubr.msk.f32.gmra.mxu1 %vm879_vm3, %v14237_v55  ;;  %11721 = vmatprep.mubr.msk.f32.mxu0 %vm13222_vm1, %v14344_v51 }
 0x2a7   :  { %11527 = vmatprep.mubr.msk.f32.mxu1 %vm13222_vm1, %v14344_v51  ;;  %12084 = vmatpush3.msra.mxu0 %v10245_v28 }
 0x2a8   :  { %12483 = vmatprep.subr.mxu0 %v14344_v51 }
 0x2a9   :  { %11722 = vmatmul.mubr.msk.f32.gmra.mxu0 %vm879_vm3, %v14237_v55 }
 0x2aa   :  { %11528 = vmatmul.mubr.msk.f32.gmra.mxu1 %vm879_vm3, %v14250_v35  ;;  %11724 = vmatprep.mubr.msk.f32.mxu0 %vm13222_vm1, %v14344_v51 }
 0x2ab   :  { %11530 = vmatprep.mubr.msk.f32.mxu1 %vm13222_vm1, %v14344_v51 }
 0x2ad   :  { %11725 = vmatmul.mubr.msk.f32.gmra.mxu0 %vm879_vm3, %v14250_v35 }
 0x2ae   :  { %11531 = vmatmul.mubr.msk.f32.gmra.mxu1 %vm879_vm3, %v14257_v27  ;;  %v2280_v54 = vpop.f32.mrf.mxu1  ;;  %11727 = vmatprep.mubr.msk.f32.mxu0 %vm13222_vm1, %v14344_v51 }
 0x2af   :  { %2436 = vst.msk [vmem:[#allocation4 + $0x150] sm:$0xff] %vm722_vm2, %v2280_v54  ;;  %11533 = vmatprep.mubr.msk.f32.mxu1 %vm13222_vm1, %v14344_v51 }
 0x2b0   :  { %v11401_v1 = vpop.f32.mrf.mxu1 }
 0x2b1   :  { %11728 = vmatmul.mubr.msk.f32.gmra.mxu0 %vm879_vm3, %v14257_v27 }
 0x2b2   :  { %11534 = vmatmul.mubr.msk.f32.gmra.mxu1 %vm879_vm3, %v14267_v62  ;;  %11730 = vmatprep.mubr.msk.f32.mxu0 %vm13222_vm1, %v14344_v51 }
 0x2b3   :  { %11536 = vmatprep.mubr.msk.f32.mxu1 %vm13222_vm1, %v14344_v51 }
 0x2b5   :  { %v2135_v7 = vpop.f32.mrf.mxu0  ;;  %11731 = vmatmul.mubr.msk.f32.gmra.mxu0 %vm879_vm3, %v14267_v62 }
 0x2b6   :  { %2407 = vst.msk [vmem:[#allocation4 + $0x68] sm:$0xff] %vm722_vm2, %v2135_v7  ;;  %11537 = vmatmul.mubr.msk.f32.gmra.mxu1 %vm879_vm3, %v14276_v15  ;;  %11733 = vmatprep.mubr.msk.f32.mxu0 %vm13222_vm1, %v14344_v51 }
 0x2b7   :  { %v11314_v55 = vpop.f32.mrf.mxu0  ;;  %v2285_v35 = vpop.f32.mrf.mxu1  ;;  %11539 = vmatprep.mubr.msk.f32.mxu1 %vm13222_vm1, %v14344_v51 }
 0x2b8   :  { %2437 = vst.msk [vmem:[#allocation4 + $0x158] sm:$0xff] %vm722_vm2, %v2285_v35  ;;  %v2560_v35 = vld [vmem:[#allocation3 + $0x130] sm:$0xff] }
 0x2b9   :  { %v11404_v27 = vpop.f32.mrf.mxu1  ;;  %11734 = vmatmul.mubr.msk.f32.gmra.mxu0 %vm879_vm3, %v14276_v15 }
 0x2ba   :  { %11540 = vmatmul.mubr.msk.f32.gmra.mxu1 %vm879_vm3, %v14290_v8  ;;  %11736 = vmatprep.mubr.msk.f32.mxu0 %vm13222_vm1, %v14344_v51  ;;  %v1627_v27 = vld [vmem:[#allocation2 + $0x18] sm:$0xff] }
 0x2bb   :  { %v2140_v62 = vpop.f32.mrf.mxu0  ;;  %v2290_v32 = vpop.f32.mrf.mxu1  ;;  %11542 = vmatprep.mubr.msk.f32.mxu1 %vm13222_vm1, %v14344_v51 }
 0x2bc   :  { %2408 = vst.msk [vmem:[#allocation4 + $0x70] sm:$0xff] %vm722_vm2, %v2140_v62  ;;  %2438 = vst.msk [vmem:[#allocation4 + $0x160] sm:$0xff] %vm722_vm2, %v2290_v32  ;;  %v1628_v62 = vld [vmem:[#allocation2 + $0x38] sm:$0xff] }
 0x2bd   :  { %v11317_v16 = vpop.f32.mrf.mxu0  ;;  %v11407_v39 = vpop.f32.mrf.mxu1  ;;  %11737 = vmatmul.mubr.msk.f32.gmra.mxu0 %vm879_vm3, %v14290_v8 }
 0x2be   :  { %11543 = vmatmul.mubr.msk.f32.gmra.mxu1 %vm879_vm3, %v14304_v5  ;;  %11739 = vmatprep.mubr.msk.f32.mxu0 %vm13222_vm1, %v14344_v51  ;;  %v14848_v39 = vmax.f32 %v1627_v27, %v1628_v62 }
 0x2bf   :  { %v2145_v15 = vpop.f32.mrf.mxu0  ;;  %v2295_v29 = vpop.f32.mrf.mxu1  ;;  %11545 = vmatprep.mubr.msk.f32.mxu1 %vm13222_vm1, %v14344_v51 }
 0x2c0   :  { %2409 = vst.msk [vmem:[#allocation4 + $0x78] sm:$0xff] %vm722_vm2, %v2145_v15  ;;  %2439 = vst.msk [vmem:[#allocation4 + $0x168] sm:$0xff] %vm722_vm2, %v2295_v29  ;;  %v1630_v29 = vld [vmem:[#allocation2 + $0x78] sm:$0xff] }
 0x2c1   :  { %v11320_v61 = vpop.f32.mrf.mxu0  ;;  %v11410_v30 = vpop.f32.mrf.mxu1  ;;  %11740 = vmatmul.mubr.msk.f32.gmra.mxu0 %vm879_vm3, %v14304_v5 }
 0x2c2   :  { %11546 = vmatmul.mubr.msk.f32.gmra.mxu1 %vm879_vm3, %v14322_v40  ;;  %11742 = vmatprep.mubr.msk.f32.mxu0 %vm13222_vm1, %v14344_v51 }
 0x2c3   :  { %v2150_v8 = vpop.f32.mrf.mxu0  ;;  %11548 = vmatprep.mubr.msk.f32.mxu1 %vm13222_vm1, %v14344_v51 }
 0x2c4   :  { %2410 = vst.msk [vmem:[#allocation4 + $0x80] sm:$0xff] %vm722_vm2, %v2150_v8 }
 0x2c5   :  { %v11323_v4 = vpop.f32.mrf.mxu0  ;;  %11743 = vmatmul.mubr.msk.f32.gmra.mxu0 %vm879_vm3, %v14322_v40 }
 0x2c6   :  { %11549 = vmatmul.mubr.msk.f32.gmra.mxu1 %vm879_vm3, %v14334_v9  ;;  %v2300_v5 = vpop.f32.mrf.mxu1  ;;  %11745 = vmatprep.mubr.msk.f32.mxu0 %vm13222_vm1, %v14344_v51  ;;  %v1629_v4 = vld [vmem:[#allocation2 + $0x58] sm:$0xff] }
 0x2c7   :  { %v2155_v38 = vpop.f32.mrf.mxu0  ;;  %2440 = vst.msk [vmem:[#allocation4 + $0x170] sm:$0xff] %vm722_vm2, %v2300_v5  ;;  %11551 = vmatprep.mubr.msk.f32.mxu1 %vm13222_vm1, %v14344_v51 }
 0x2c8   :  { %2411 = vst.msk [vmem:[#allocation4 + $0x88] sm:$0xff] %vm722_vm2, %v2155_v38  ;;  %v11413_v37 = vpop.f32.mrf.mxu1  ;;  %v14862_v38 = vmax.f32 %v1629_v4, %v1630_v29 }
 0x2c9   :  { %v11326_v17 = vpop.f32.mrf.mxu0  ;;  %11746 = vmatmul.mubr.msk.f32.gmra.mxu0 %vm879_vm3, %v14334_v9  ;;  %v2562_v37 = vld [vmem:[#allocation3 + $0x140] sm:$0xff] }
 0x2ca   :  { %11552 = vmatmul.mubr.msk.f32.gmra.mxu1 %vm879_vm3, %v14353_v14  ;;  %v2305_v40 = vpop.f32.mrf.mxu1  ;;  %11748 = vmatprep.mubr.msk.f32.mxu0 %vm13222_vm1, %v14344_v51  ;;  %v1632_v17 = vld [vmem:[#allocation2 + $0xb8] sm:$0xff] }
 0x2cb   :  { %v2160_v57 = vpop.f32.mrf.mxu0  ;;  %2441 = vst.msk [vmem:[#allocation4 + $0x178] sm:$0xff] %vm722_vm2, %v2305_v40  ;;  %11554 = vmatprep.mubr.msk.f32.mxu1 %vm13222_vm1, %v14344_v51 }
 0x2cc   :  { %2412 = vst.msk [vmem:[#allocation4 + $0x90] sm:$0xff] %vm722_vm2, %v2160_v57  ;;  %v11416_v34 = vpop.f32.mrf.mxu1  ;;  %v14869_v57 = vmax.f32 %v1628_v62, %v1629_v4 }
 0x2cd   :  { %v11329_v56 = vpop.f32.mrf.mxu0  ;;  %11749 = vmatmul.mubr.msk.f32.gmra.mxu0 %vm879_vm3, %v14353_v14 }
 0x2ce   :  { %11555 = vmatmul.mubr.msk.f32.gmra.mxu1 %vm879_vm3, %v14372_v48  ;;  %11751 = vmatprep.mubr.msk.f32.mxu0 %vm13222_vm1, %v14344_v51  ;;  %v1631_v56 = vld [vmem:[#allocation2 + $0x98] sm:$0xff] }
 0x2cf   :  { %v2165_v9 = vpop.f32.mrf.mxu0  ;;  %11557 = vmatprep.mubr.msk.f32.mxu1 %vm13222_vm1, %v14344_v51 }
 0x2d0   :  { %2413 = vst.msk [vmem:[#allocation4 + $0x98] sm:$0xff] %vm722_vm2, %v2165_v9  ;;  %v14878_v9 = vmax.f32 %v1631_v56, %v1632_v17 }
 0x2d1   :  { %v11332_v25 = vpop.f32.mrf.mxu0  ;;  %11752 = vmatmul.mubr.msk.f32.gmra.mxu0 %vm879_vm3, %v14372_v48 }
 0x2d2   :  { %11558 = vmatmul.mubr.msk.f32.gmra.mxu1 %vm879_vm3, %v14386_v0  ;;  %v2310_v14 = vpop.f32.mrf.mxu1  ;;  %11754 = vmatprep.mubr.msk.f32.mxu0 %vm13222_vm1, %v14344_v51 }
 0x2d3   :  { %v2170_v20 = vpop.f32.mrf.mxu0  ;;  %2442 = vst.msk [vmem:[#allocation4 + $0x180] sm:$0xff] %vm722_vm2, %v2310_v14  ;;  %11560 = vmatprep.mubr.msk.f32.mxu1 %vm13222_vm1, %v14344_v51 }
 0x2d4   :  { %2414 = vst.msk [vmem:[#allocation4 + $0xa0] sm:$0xff] %vm722_vm2, %v2170_v20  ;;  %v11419_v53 = vpop.f32.mrf.mxu1  ;;  %v2563_v20 = vld [vmem:[#allocation3 + $0x148] sm:$0xff] }
 0x2d5   :  { %v11335_v10 = vpop.f32.mrf.mxu0  ;;  %11755 = vmatmul.mubr.msk.f32.gmra.mxu0 %vm879_vm3, %v14386_v0  ;;  %v1634_v53 = vld [vmem:[#allocation2 + $0xf8] sm:$0xff] }
 0x2d6   :  { %11561 = vmatmul.mubr.msk.f32.gmra.mxu1 %vm879_vm3, %v14400_v12  ;;  %v2315_v48 = vpop.f32.mrf.mxu1  ;;  %11757 = vmatprep.mubr.msk.f32.mxu0 %vm13222_vm1, %v14344_v51 }
 0x2d7   :  { %v2175_v36 = vpop.f32.mrf.mxu0  ;;  %2443 = vst.msk [vmem:[#allocation4 + $0x188] sm:$0xff] %vm722_vm2, %v2315_v48  ;;  %11563 = vmatprep.mubr.msk.f32.mxu1 %vm13222_vm1, %v14344_v51  ;;  %v14887_v48 = vld [vmem:[#allocation2 + $0x1c0] sm:$0xff] }
 0x2d8   :  { %2415 = vst.msk [vmem:[#allocation4 + $0xa8] sm:$0xff] %vm722_vm2, %v2175_v36  ;;  %v11422_v46 = vpop.f32.mrf.mxu1  ;;  %v1633_v36 = vld [vmem:[#allocation2 + $0xd8] sm:$0xff] }
 0x2d9   :  { %v11338_v3 = vpop.f32.mrf.mxu0  ;;  %11758 = vmatmul.mubr.msk.f32.gmra.mxu0 %vm879_vm3, %v14400_v12  ;;  %v14895_v46 = vmax.f32 %v1633_v36, %v1634_v53 }
 0x2da   :  { %11564 = vmatmul.mubr.msk.f32.gmra.mxu1 %vm879_vm3, %v14413_v21  ;;  %11760 = vmatprep.mubr.msk.f32.mxu0 %vm13222_vm1, %v14344_v51 }
 0x2db   :  { %v1572_v0 = vpop.permute.xlu1 %1571  ;;  %11566 = vmatprep.mubr.msk.f32.mxu1 %vm13222_vm1, %v14344_v51 }
 0x2dc   :  { %1613 = vst.msk [vmem:[#allocation3 + $0x230] sm:$0xff] %vm879_vm3, %v1572_v0  ;;  %v2564_v0 = vld [vmem:[#allocation3 + $0x150] sm:$0xff] }
 0x2dd   :  { %11761 = vmatmul.mubr.msk.f32.gmra.mxu0 %vm879_vm3, %v14413_v21 }
 0x2de   :  { %11567 = vmatmul.mubr.msk.f32.gmra.mxu1 %vm879_vm3, %v14427_v31  ;;  %v2180_v19 = vpop.f32.mrf.mxu0  ;;  %11763 = vmatprep.mubr.msk.f32.mxu0 %vm13222_vm1, %v14344_v51 }
 0x2df   :  { %v1576_v12 = vpop.permute.xlu1 %1575  ;;  %2416 = vst.msk [vmem:[#allocation4 + $0xb0] sm:$0xff] %vm722_vm2, %v2180_v19  ;;  %11569 = vmatprep.mubr.msk.f32.mxu1 %vm13222_vm1, %v14344_v51  ;;  %v1636_v19 = vld [vmem:[#allocation2 + $0x138] sm:$0xff] }
 0x2e0   :  { %1615 = vst.msk [vmem:[#allocation3 + $0x240] sm:$0xff] %vm879_vm3, %v1576_v12  ;;  %v1574_v49 = vpop.permute.xlu0 %1573  ;;  %v11341_v58 = vpop.f32.mrf.mxu0  ;;  %v14902_v12 = vmax.f32 %v1632_v17, %v1633_v36 }
 0x2e1   :  { %1614 = vst.msk [vmem:[#allocation3 + $0x238] sm:$0xff] %vm879_vm3, %v1574_v49  ;;  %11764 = vmatmul.mubr.msk.f32.gmra.mxu0 %vm879_vm3, %v14427_v31 }
 0x2e2   :  { %11570 = vmatmul.mubr.msk.f32.gmra.mxu1 %vm879_vm3, %v14440_v50  ;;  %11766 = vmatprep.mubr.msk.f32.mxu0 %vm13222_vm1, %v14344_v51 }
 0x2e3   :  { %v1580_v21 = vpop.permute.xlu1 %1579  ;;  %11572 = vmatprep.mubr.msk.f32.mxu1 %vm13222_vm1, %v14344_v51 }
 0x2e4   :  { %1617 = vst.msk [vmem:[#allocation3 + $0x250] sm:$0xff] %vm879_vm3, %v1580_v21  ;;  %v1635_v21 = vld [vmem:[#allocation2 + $0x118] sm:$0xff] }
 0x2e5   :  { %v1578_v52 = vpop.permute.xlu0 %1577  ;;  %11767 = vmatmul.mubr.msk.f32.gmra.mxu0 %vm879_vm3, %v14440_v50 }
 0x2e6   :  { %1616 = vst.msk [vmem:[#allocation3 + $0x248] sm:$0xff] %vm879_vm3, %v1578_v52  ;;  %11573 = vmatmul.mubr.msk.f32.gmra.mxu1 %vm879_vm3, %v14456_v43  ;;  %v2320_v31 = vpop.f32.mrf.mxu1  ;;  %11769 = vmatprep.mubr.msk.f32.mxu0 %vm13222_vm1, %v14344_v51  ;;  %v14911_v52 = vmax.f32 %v1635_v21, %v1636_v19 }
 0x2e7   :  { %v1584_v13 = vpop.permute.xlu1 %1583  ;;  %2444 = vst.msk [vmem:[#allocation4 + $0x190] sm:$0xff] %vm722_vm2, %v2320_v31  ;;  %11575 = vmatprep.mubr.msk.f32.mxu1 %vm13222_vm1, %v14344_v51 }
 0x2e8   :  { %1619 = vst.msk [vmem:[#allocation3 + $0x260] sm:$0xff] %vm879_vm3, %v1584_v13  ;;  %v11425_v24 = vpop.f32.mrf.mxu1 }
 0x2e9   :  { %v1582_v44 = vpop.permute.xlu0 %1581  ;;  %11770 = vmatmul.mubr.msk.f32.gmra.mxu0 %vm879_vm3, %v14456_v43  ;;  %v2565_v24 = vld [vmem:[#allocation3 + $0x158] sm:$0xff] }
 0x2ea   :  { %1618 = vst.msk [vmem:[#allocation3 + $0x258] sm:$0xff] %vm879_vm3, %v1582_v44  ;;  %11576 = vmatmul.mubr.msk.f32.gmra.mxu1 %vm879_vm3, %v14475_v18  ;;  %11772 = vmatprep.mubr.msk.f32.mxu0 %vm13222_vm1, %v14344_v51  ;;  %v1638_v44 = vld [vmem:[#allocation2 + $0x178] sm:$0xff] }
 0x2eb   :  { %v1588_v50 = vpop.permute.xlu1 %1587  ;;  %v2185_v11 = vpop.f32.mrf.mxu0  ;;  %11578 = vmatprep.mubr.msk.f32.mxu1 %vm13222_vm1, %v14344_v51 }
 0x2ec   :  { %1621 = vst.msk [vmem:[#allocation3 + $0x270] sm:$0xff] %vm879_vm3, %v1588_v50  ;;  %v2325_v23 = vpop.f32.mrf.mxu1  ;;  %v14918_v50 = vmax.f32 %v1634_v53, %v1635_v21 }
 0x2ed   :  { %2417 = vst.msk [vmem:[#allocation4 + $0xb8] sm:$0xff] %vm722_vm2, %v2185_v11  ;;  %2445 = vst.msk [vmem:[#allocation4 + $0x198] sm:$0xff] %vm722_vm2, %v2325_v23  ;;  %v1586_v43 = vpop.permute.xlu0 %1585  ;;  %v11344_v33 = vpop.f32.mrf.mxu0  ;;  %11773 = vmatmul.mubr.msk.f32.gmra.mxu0 %vm879_vm3, %v14475_v18  ;;  %v2559_v18 = vld [vmem:[#allocation3 + $0x128] sm:$0xff]  ;;  %v1637_v23 = vld [vmem:[#allocation2 + $0x158] sm:$0xff] }
 0x2ee   :  { %1620 = vst.msk [vmem:[#allocation3 + $0x268] sm:$0xff] %vm879_vm3, %v1586_v43  ;;  %v11428_v47 = vpop.f32.mrf.mxu1  ;;  %11579 = vmatmul.mubr.msk.f32.gmra.mxu1 %vm879_vm3, %v14492_v63  ;;  %11775 = vmatprep.mubr.msk.f32.mxu0 %vm13222_vm1, %v14344_v51  ;;  %v14926_v43 = vmax.f32 %v1637_v23, %v1638_v44 }
 0x2ef   :  { %v1592_v59 = vpop.permute.xlu1 %1591  ;;  %11581 = vmatprep.mubr.msk.f32.mxu1 %vm13222_vm1, %v14344_v51 }
 0x2f0   :  { %1623 = vst.msk [vmem:[#allocation3 + $0x280] sm:$0xff] %vm879_vm3, %v1592_v59  ;;  %v2330_v42 = vpop.f32.mrf.mxu1  ;;  %v2566_v59 = vld [vmem:[#allocation3 + $0x160] sm:$0xff] }
 0x2f1   :  { %2446 = vst.msk [vmem:[#allocation4 + $0x1a0] sm:$0xff] %vm722_vm2, %v2330_v42  ;;  %v1590_v22 = vpop.permute.xlu0 %1589  ;;  %11776 = vmatmul.mubr.msk.f32.gmra.mxu0 %vm879_vm3, %v14492_v63  ;;  %v14934_v42 = vmax.f32 %v1636_v19, %v1637_v23 }
 0x2f2   :  { %1622 = vst.msk [vmem:[#allocation3 + $0x278] sm:$0xff] %vm879_vm3, %v1590_v22  ;;  %v11431_v6 = vpop.f32.mrf.mxu1  ;;  %11582 = vmatmul.mubr.msk.f32.gmra.mxu1 %vm879_vm3, %v2559_v18  ;;  %v2190_v54 = vpop.f32.mrf.mxu0  ;;  %11778 = vmatprep.mubr.msk.f32.mxu0 %vm13222_vm1, %v14344_v51 }
 0x2f3   :  { %v1526_v1 = vpop.permute.xlu1 %1525  ;;  %2418 = vst.msk [vmem:[#allocation4 + $0xc0] sm:$0xff] %vm722_vm2, %v2190_v54  ;;  %11584 = vmatprep.mubr.msk.f32.mxu1 %vm13222_vm1, %v14344_v51 }
 0x2f4   :  { %v1555_v7 = vmax.f32 %v13907_v2, %v1526_v1  ;;  %v2335_v28 = vpop.f32.mrf.mxu1  ;;  %v11347_v55 = vpop.f32.mrf.mxu0  ;;  %v2567_v1 = vld [vmem:[#allocation3 + $0x168] sm:$0xff] }
 0x2f5   :  { %2447 = vst.msk [vmem:[#allocation4 + $0x1a8] sm:$0xff] %vm722_vm2, %v2335_v28  ;;  %v1524_v63 = vpop.permute.xlu0 %1523  ;;  %11779 = vmatmul.mubr.msk.f32.gmra.mxu0 %vm879_vm3, %v2559_v18 }
 0x2f6   :  { %v1554_v32 = vmax.f32 %v13899_v26, %v1524_v63  ;;  %v11434_v16 = vpop.f32.mrf.mxu1  ;;  %11585 = vmatmul.mubr.msk.f32.gmra.mxu1 %vm879_vm3, %v2560_v35  ;;  %1595 = vrot.lane.b32.xlu0 %v1555_v7, %s13224_s2  ;;  %v2561_v26 = vld [vmem:[#allocation3 + $0x138] sm:$0xff] }
 0x2f7   :  { %11587 = vmatprep.mubr.msk.f32.mxu1 %vm13222_vm1, %v14344_v51  ;;  %11781 = vmatprep.mubr.msk.f32.mxu0 %vm13222_vm1, %v14344_v51 }
 0x2f8   :  { %1593 = vrot.lane.b32.xlu1 %v1554_v32, %s13224_s2  ;;  %v2340_v2 = vpop.f32.mrf.mxu1 }
 0x2f9   :  { %2448 = vst.msk [vmem:[#allocation4 + $0x1b0] sm:$0xff] %vm722_vm2, %v2340_v2  ;;  %v1528_v15 = vpop.permute.xlu0 %1527  ;;  %11782 = vmatmul.mubr.msk.f32.gmra.mxu0 %vm879_vm3, %v2560_v35  ;;  %v2568_v35 = vld [vmem:[#allocation3 + $0x170] sm:$0xff]  ;;  %v2569_v2 = vld [vmem:[#allocation3 + $0x178] sm:$0xff] }
 0x2fa   :  { %v1556_v61 = vmax.f32 %v14228_v60, %v1528_v15  ;;  %v11437_v30 = vpop.f32.mrf.mxu1  ;;  %11588 = vmatmul.mubr.msk.f32.gmra.mxu1 %vm879_vm3, %v2561_v26  ;;  %1670 = vrot.lane.b32.xlu0 %v14848_v39, %s13223_s14  ;;  %v2195_v8 = vpop.f32.mrf.mxu0 }
 0x2fb   :  { %2419 = vst.msk [vmem:[#allocation4 + $0xc8] sm:$0xff] %vm722_vm2, %v2195_v8  ;;  %11590 = vmatprep.mubr.msk.f32.mxu1 %vm13222_vm1, %v14344_v51  ;;  %11784 = vmatprep.mubr.msk.f32.mxu0 %vm13222_vm1, %v14344_v51  ;;  %v2570_v30 = vld [vmem:[#allocation3 + $0x180] sm:$0xff] }
 0x2fc   :  { %1597 = vrot.lane.b32.xlu1 %v1556_v61, %s13224_s2  ;;  %v2345_v5 = vpop.f32.mrf.mxu1  ;;  %v11350_v60 = vpop.f32.mrf.mxu0 }
 0x2fd   :  { %2449 = vst.msk [vmem:[#allocation4 + $0x1b8] sm:$0xff] %vm722_vm2, %v2345_v5  ;;  %11785 = vmatmul.mubr.msk.f32.gmra.mxu0 %vm879_vm3, %v2561_v26 }
 0x2fe   :  { %v11440_v40 = vpop.f32.mrf.mxu1  ;;  %11591 = vmatmul.mubr.msk.f32.gmra.mxu1 %vm879_vm3, %v2562_v37  ;;  %1674 = vrot.lane.b32.xlu0 %v14862_v38, %s13223_s14 }
 0x2ff   :  { %v2200_v34 = vpop.f32.mrf.mxu0  ;;  %11593 = vmatprep.mubr.msk.f32.mxu1 %vm13222_vm1, %v14344_v51  ;;  %11787 = vmatprep.mubr.msk.f32.mxu0 %vm13222_vm1, %v14344_v51  ;;  %v14885_v51 = vmax.f32 %v1630_v29, %v1631_v56  ;;  %v2459_v56 = vld [vmem:[#allocation4] sm:$0xff] }
 0x300   :  { %1672 = vrot.lane.b32.xlu1 %v14869_v57, %s13223_s14  ;;  %2420 = vst.msk [vmem:[#allocation4 + $0xd0] sm:$0xff] %vm722_vm2, %v2200_v34 }
 0x301   :  { %v11353_v25 = vpop.f32.mrf.mxu0  ;;  %v2350_v14 = vpop.f32.mrf.mxu1  ;;  %11788 = vmatmul.mubr.msk.f32.gmra.mxu0 %vm879_vm3, %v2562_v37  ;;  %v2571_v37 = vld [vmem:[#allocation3 + $0x188] sm:$0xff] }
 0x302   :  { %2450 = vst.msk [vmem:[#allocation4 + $0x1c0] sm:$0xff] %vm722_vm2, %v2350_v14  ;;  %11594 = vmatmul.mubr.msk.f32.gmra.mxu1 %vm879_vm3, %v2563_v20  ;;  %1678 = vrot.lane.b32.xlu0 %v14878_v9, %s13223_s14  ;;  %v2572_v14 = vld [vmem:[#allocation3 + $0x190] sm:$0xff] }
 0x303   :  { %v11443_v10 = vpop.f32.mrf.mxu1  ;;  %11596 = vmatprep.mubr.msk.f32.mxu1 %vm13222_vm1, %v14887_v48  ;;  %11790 = vmatprep.mubr.msk.f32.mxu0 %vm13222_vm1, %v14887_v48 }
 0x304   :  { %1676 = vrot.lane.b32.xlu1 %v14885_v51, %s13223_s14 }
 0x305   :  { %v2355_v3 = vpop.f32.mrf.mxu1  ;;  %11791 = vmatmul.mubr.msk.f32.gmra.mxu0 %vm879_vm3, %v2563_v20 }
 0x306   :  { %2451 = vst.msk [vmem:[#allocation4 + $0x1c8] sm:$0xff] %vm722_vm2, %v2355_v3  ;;  %11597 = vmatmul.mubr.msk.f32.gmra.mxu1 %vm879_vm3, %v2564_v0  ;;  %1682 = vrot.lane.b32.xlu0 %v14895_v46, %s13223_s14  ;;  %v2573_v3 = vld [vmem:[#allocation3 + $0x198] sm:$0xff] }
 0x307   :  { %v2205_v49 = vpop.f32.mrf.mxu0  ;;  %v11446_v58 = vpop.f32.mrf.mxu1  ;;  %11599 = vmatprep.mubr.msk.f32.mxu1 %vm13222_vm1, %v14887_v48  ;;  %11793 = vmatprep.mubr.msk.f32.mxu0 %vm13222_vm1, %v14887_v48 }
 0x308   :  { %1680 = vrot.lane.b32.xlu1 %v14902_v12, %s13223_s14  ;;  %2421 = vst.msk [vmem:[#allocation4 + $0xd8] sm:$0xff] %vm722_vm2, %v2205_v49 }
 0x309   :  { %v11356_v31 = vpop.f32.mrf.mxu0  ;;  %v2360_v13 = vpop.f32.mrf.mxu1  ;;  %11794 = vmatmul.mubr.msk.f32.gmra.mxu0 %vm879_vm3, %v2564_v0  ;;  %v2460_v0 = vld [vmem:[#allocation4 + $0x8] sm:$0xff] }
 0x30a   :  { %2452 = vst.msk [vmem:[#allocation4 + $0x1d0] sm:$0xff] %vm722_vm2, %v2360_v13  ;;  %11600 = vmatmul.mubr.msk.f32.gmra.mxu1 %vm879_vm3, %v2565_v24  ;;  %1686 = vrot.lane.b32.xlu0 %v14911_v52, %s13223_s14  ;;  %v2574_v13 = vld [vmem:[#allocation3 + $0x1a0] sm:$0xff] }
 0x30b   :  { %v11449_v11 = vpop.f32.mrf.mxu1  ;;  %11602 = vmatprep.mubr.msk.f32.mxu1 %vm13222_vm1, %v14887_v48  ;;  %11796 = vmatprep.mubr.msk.f32.mxu0 %vm13222_vm1, %v14887_v48 }
 0x30c   :  { %1684 = vrot.lane.b32.xlu1 %v14918_v50, %s13223_s14 }
 0x30d   :  { %v2210_v33 = vpop.f32.mrf.mxu0  ;;  %v2365_v47 = vpop.f32.mrf.mxu1  ;;  %11797 = vmatmul.mubr.msk.f32.gmra.mxu0 %vm879_vm3, %v2565_v24  ;;  %v2461_v24 = vld [vmem:[#allocation4 + $0x10] sm:$0xff] }
 0x30e   :  { %2422 = vst.msk [vmem:[#allocation4 + $0xe0] sm:$0xff] %vm722_vm2, %v2210_v33  ;;  %2453 = vst.msk [vmem:[#allocation4 + $0x1d8] sm:$0xff] %vm722_vm2, %v2365_v47  ;;  %11603 = vmatmul.mubr.msk.f32.gmra.mxu1 %vm879_vm3, %v2566_v59  ;;  %1690 = vrot.lane.b32.xlu0 %v14926_v43, %s13223_s14  ;;  %v2575_v47 = vld [vmem:[#allocation3 + $0x1a8] sm:$0xff] }
 0x30f   :  { %v11359_v22 = vpop.f32.mrf.mxu0  ;;  %v11452_v18 = vpop.f32.mrf.mxu1  ;;  %11605 = vmatprep.mubr.msk.f32.mxu1 %vm13222_vm1, %v14887_v48  ;;  %11799 = vmatprep.mubr.msk.f32.mxu0 %vm13222_vm1, %v14887_v48 }
 0x310   :  { %1688 = vrot.lane.b32.xlu1 %v14934_v42, %s13223_s14  ;;  %v2462_v18 = vld [vmem:[#allocation4 + $0x18] sm:$0xff] }
 0x311   :  { %v2215_v6 = vpop.f32.mrf.mxu0  ;;  %v2370_v54 = vpop.f32.mrf.mxu1  ;;  %11800 = vmatmul.mubr.msk.f32.gmra.mxu0 %vm879_vm3, %v2566_v59 }
 0x312   :  { %2423 = vst.msk [vmem:[#allocation4 + $0xe8] sm:$0xff] %vm722_vm2, %v2215_v6  ;;  %2454 = vst.msk [vmem:[#allocation4 + $0x1e0] sm:$0xff] %vm722_vm2, %v2370_v54  ;;  %11606 = vmatmul.mubr.msk.f32.gmra.mxu1 %vm879_vm3, %v2567_v1  ;;  %11802 = vmatprep.mubr.msk.f32.mxu0 %vm13222_vm1, %v14887_v48 }
 0x313   :  { %v11362_v7 = vpop.f32.mrf.mxu0  ;;  %v11455_v28 = vpop.f32.mrf.mxu1  ;;  %11608 = vmatprep.mubr.msk.f32.mxu1 %vm13222_vm1, %v14887_v48 }
 0x315   :  { %v2220_v55 = vpop.f32.mrf.mxu0  ;;  %v2375_v63 = vpop.f32.mrf.mxu1  ;;  %11803 = vmatmul.mubr.msk.f32.gmra.mxu0 %vm879_vm3, %v2567_v1 }
 0x316   :  { %2424 = vst.msk [vmem:[#allocation4 + $0xf0] sm:$0xff] %vm722_vm2, %v2220_v55  ;;  %2455 = vst.msk [vmem:[#allocation4 + $0x1e8] sm:$0xff] %vm722_vm2, %v2375_v63  ;;  %11609 = vmatmul.mubr.msk.f32.gmra.mxu1 %vm879_vm3, %v2568_v35  ;;  %11805 = vmatprep.mubr.msk.f32.mxu0 %vm13222_vm1, %v14887_v48  ;;  %v2576_v55 = vld [vmem:[#allocation3 + $0x1b0] sm:$0xff] }
 0x317   :  { %v11365_v27 = vpop.f32.mrf.mxu0  ;;  %v11458_v62 = vpop.f32.mrf.mxu1  ;;  %11611 = vmatprep.mubr.msk.f32.mxu1 %vm13222_vm1, %v14887_v48 }
 0x318   :  { %v2463_v27 = vld [vmem:[#allocation4 + $0x20] sm:$0xff] }
 0x319   :  { %v2225_v32 = vpop.f32.mrf.mxu0  ;;  %v2380_v16 = vpop.f32.mrf.mxu1  ;;  %11806 = vmatmul.mubr.msk.f32.gmra.mxu0 %vm879_vm3, %v2568_v35 }
 0x31a   :  { %2425 = vst.msk [vmem:[#allocation4 + $0xf8] sm:$0xff] %vm722_vm2, %v2225_v32  ;;  %2456 = vst.msk [vmem:[#allocation4 + $0x1f0] sm:$0xff] %vm722_vm2, %v2380_v16  ;;  %11612 = vmatmul.mubr.msk.f32.gmra.mxu1 %vm879_vm3, %v2569_v2  ;;  %11808 = vmatprep.mubr.msk.f32.mxu0 %vm13222_vm1, %v14887_v48 }
 0x31b   :  { %v11368_v15 = vpop.f32.mrf.mxu0  ;;  %v11461_v26 = vpop.f32.mrf.mxu1  ;;  %11614 = vmatprep.mubr.msk.f32.mxu1 %vm13222_vm1, %v14887_v48 }
 0x31c   :  { %v2577_v26 = vld [vmem:[#allocation3 + $0x1b8] sm:$0xff] }
 0x31d   :  { %v2230_v29 = vpop.f32.mrf.mxu0  ;;  %v2385_v61 = vpop.f32.mrf.mxu1  ;;  %11809 = vmatmul.mubr.msk.f32.gmra.mxu0 %vm879_vm3, %v2569_v2 }
 0x31e   :  { %2426 = vst.msk [vmem:[#allocation4 + $0x100] sm:$0xff] %vm722_vm2, %v2230_v29  ;;  %2457 = vst.msk [vmem:[#allocation4 + $0x1f8] sm:$0xff] %vm722_vm2, %v2385_v61  ;;  %11615 = vmatmul.mubr.msk.f32.gmra.mxu1 %vm879_vm3, %v2570_v30  ;;  %11811 = vmatprep.mubr.msk.f32.mxu0 %vm13222_vm1, %v14887_v48 }
 0x31f   :  { %v11371_v8 = vpop.f32.mrf.mxu0  ;;  %v11464_v4 = vpop.f32.mrf.mxu1  ;;  %11617 = vmatprep.mubr.msk.f32.mxu1 %vm13222_vm1, %v14887_v48 }
 0x321   :  { %v2235_v5 = vpop.f32.mrf.mxu0  ;;  %v2390_v60 = vpop.f32.mrf.mxu1  ;;  %11812 = vmatmul.mubr.msk.f32.gmra.mxu0 %vm879_vm3, %v2570_v30  ;;  %v2464_v30 = vld [vmem:[#allocation4 + $0x28] sm:$0xff] }
 0x322   :  { %2427 = vst.msk [vmem:[#allocation4 + $0x108] sm:$0xff] %vm722_vm2, %v2235_v5  ;;  %2458 = vst.msk [vmem:[#allocation4 + $0x200] sm:$0xff] %vm722_vm2, %v2390_v60  ;;  %11618 = vmatmul.mubr.msk.f32.gmra.mxu1 %vm879_vm3, %v2571_v37  ;;  %11814 = vmatprep.mubr.msk.f32.mxu0 %vm13222_vm1, %v14887_v48 }
 0x323   :  { %v11374_v17 = vpop.f32.mrf.mxu0  ;;  %v11467_v40 = vpop.f32.mrf.mxu1  ;;  %11620 = vmatprep.mubr.msk.f32.mxu1 %vm13222_vm1, %v14887_v48 }
 0x324   :  { %v2578_v17 = vld [vmem:[#allocation3 + $0x1c0] sm:$0xff] }
 0x325   :  { %v2240_v34 = vpop.f32.mrf.mxu0  ;;  %v2855_v25 = vpop.f32.mrf.mxu1  ;;  %11815 = vmatmul.mubr.msk.f32.gmra.mxu0 %vm879_vm3, %v2571_v37 }
 0x326   :  { %2428 = vst.msk [vmem:[#allocation4 + $0x110] sm:$0xff] %vm722_vm2, %v2240_v34  ;;  %v3179_v20 = vadd.f32 %v2855_v25, %v2459_v56  ;;  %11621 = vmatmul.mubr.msk.f32.gmra.mxu1 %vm879_vm3, %v2572_v14  ;;  %11817 = vmatprep.mubr.msk.f32.mxu0 %vm13222_vm1, %v14887_v48  ;;  %v2465_v56 = vld [vmem:[#allocation4 + $0x30] sm:$0xff] }
 0x327   :  { %v11377_v53 = vpop.f32.mrf.mxu0  ;;  %v11478_v10 = vpop.f32.mrf.mxu1  ;;  %11623 = vmatprep.mubr.msk.f32.mxu1 %vm13222_vm1, %v14887_v48 }
 0x328   :  { %3244 = vst.msk [vmem:[#allocation4] sm:$0xff] %vm722_vm2, %v3179_v20 }
 0x329   :  { %v2245_v36 = vpop.f32.mrf.mxu0  ;;  %11818 = vmatmul.mubr.msk.f32.gmra.mxu0 %vm879_vm3, %v2572_v14 }
 0x32a   :  { %2429 = vst.msk [vmem:[#allocation4 + $0x118] sm:$0xff] %vm722_vm2, %v2245_v36  ;;  %v2860_v19 = vpop.f32.mrf.mxu1  ;;  %11624 = vmatmul.mubr.msk.f32.gmra.mxu1 %vm879_vm3, %v2573_v3  ;;  %11820 = vmatprep.mubr.msk.f32.mxu0 %vm13222_vm1, %v14887_v48  ;;  %v2579_v36 = vld [vmem:[#allocation3 + $0x1c8] sm:$0xff] }
 0x32b   :  { %v3180_v49 = vadd.f32 %v2860_v19, %v2460_v0  ;;  %v11380_v58 = vpop.f32.mrf.mxu0  ;;  %11626 = vmatprep.mubr.msk.f32.mxu1 %vm13222_vm1, %v14887_v48  ;;  %v2466_v19 = vld [vmem:[#allocation4 + $0x38] sm:$0xff] }
 0x32c   :  { %v11481_v21 = vpop.f32.mrf.mxu1 }
 0x32d   :  { %3245 = vst.msk [vmem:[#allocation4 + $0x8] sm:$0xff] %vm722_vm2, %v3180_v49  ;;  %v2250_v31 = vpop.f32.mrf.mxu0  ;;  %11821 = vmatmul.mubr.msk.f32.gmra.mxu0 %vm879_vm3, %v2573_v3 }
 0x32e   :  { %2430 = vst.msk [vmem:[#allocation4 + $0x120] sm:$0xff] %vm722_vm2, %v2250_v31  ;;  %v2865_v44 = vpop.f32.mrf.mxu1  ;;  %11627 = vmatmul.mubr.msk.f32.gmra.mxu1 %vm879_vm3, %v2574_v13  ;;  %11823 = vmatprep.mubr.msk.f32.mxu0 %vm13222_vm1, %v14887_v48 }
 0x32f   :  { %v3181_v11 = vadd.f32 %v2865_v44, %v2461_v24  ;;  %v11383_v23 = vpop.f32.mrf.mxu0  ;;  %11629 = vmatprep.mubr.msk.f32.mxu1 %vm13222_vm1, %v14887_v48  ;;  %v3309_v59 = vld [vmem:[#allocation4] sm:$0xff] }
 0x330   :  { %v11484_v33 = vpop.f32.mrf.mxu1  ;;  %v2580_v24 = vld [vmem:[#allocation3 + $0x1d0] sm:$0xff] }
 0x331   :  { %3246 = vst.msk [vmem:[#allocation4 + $0x10] sm:$0xff] %vm722_vm2, %v3181_v11  ;;  %v3705_v22 = vpop.f32.mrf.mxu0  ;;  %11824 = vmatmul.mubr.msk.f32.gmra.mxu0 %vm879_vm3, %v2574_v13  ;;  %v2467_v23 = vld [vmem:[#allocation4 + $0x40] sm:$0xff] }
 0x332   :  { %v2870_v6 = vpop.f32.mrf.mxu1  ;;  %11630 = vmatmul.mubr.msk.f32.gmra.mxu1 %vm879_vm3, %v2575_v47  ;;  %v4029_v54 = vadd.f32 %v3705_v22, %v3309_v59  ;;  %11826 = vmatprep.mubr.msk.f32.mxu0 %vm13222_vm1, %v14887_v48 }
 0x333   :  { %v3182_v1 = vadd.f32 %v2870_v6, %v2462_v18  ;;  %v11681_v7 = vpop.f32.mrf.mxu0  ;;  %11632 = vmatprep.mubr.msk.f32.mxu1 %vm13222_vm1, %v14887_v48  ;;  %v2581_v6 = vld [vmem:[#allocation3 + $0x1d8] sm:$0xff] }
 0x334   :  { %4094 = vst.msk [vmem:[#allocation4] sm:$0xff] %vm722_vm2, %v4029_v54  ;;  %v11487_v28 = vpop.f32.mrf.mxu1  ;;  %v3310_v63 = vld [vmem:[#allocation4 + $0x8] sm:$0xff] }
 0x335   :  { %3247 = vst.msk [vmem:[#allocation4 + $0x18] sm:$0xff] %vm722_vm2, %v3182_v1  ;;  %v3710_v35 = vpop.f32.mrf.mxu0  ;;  %11827 = vmatmul.mubr.msk.f32.gmra.mxu0 %vm879_vm3, %v2575_v47  ;;  %v2468_v7 = vld [vmem:[#allocation4 + $0x48] sm:$0xff] }
 0x336   :  { %v2875_v62 = vpop.f32.mrf.mxu1  ;;  %11633 = vmatmul.mubr.msk.f32.gmra.mxu1 %vm879_vm3, %v2576_v55  ;;  %v4030_v32 = vadd.f32 %v3710_v35, %v3310_v63  ;;  %11829 = vmatprep.mubr.msk.f32.mxu0 %vm13222_vm1, %v14887_v48 }
 0x337   :  { %v3183_v16 = vadd.f32 %v2875_v62, %v2463_v27  ;;  %v11684_v2 = vpop.f32.mrf.mxu0  ;;  %11635 = vmatprep.mubr.msk.f32.mxu1 %vm13222_vm1, %v14887_v48  ;;  %v2582_v62 = vld [vmem:[#allocation3 + $0x1e0] sm:$0xff] }
 0x338   :  { %4095 = vst.msk [vmem:[#allocation4 + $0x8] sm:$0xff] %vm722_vm2, %v4030_v32  ;;  %v11490_v15 = vpop.f32.mrf.mxu1  ;;  %v3311_v29 = vld [vmem:[#allocation4 + $0x10] sm:$0xff] }
 0x339   :  { %3248 = vst.msk [vmem:[#allocation4 + $0x20] sm:$0xff] %vm722_vm2, %v3183_v16  ;;  %v3715_v61 = vpop.f32.mrf.mxu0  ;;  %11830 = vmatmul.mubr.msk.f32.gmra.mxu0 %vm879_vm3, %v2576_v55  ;;  %v2469_v2 = vld [vmem:[#allocation4 + $0x50] sm:$0xff] }
 0x33a   :  { %v2880_v8 = vpop.f32.mrf.mxu1  ;;  %11636 = vmatmul.mubr.msk.f32.gmra.mxu1 %vm879_vm3, %v2577_v26  ;;  %v4031_v4 = vadd.f32 %v3715_v61, %v3311_v29  ;;  %11832 = vmatprep.mubr.msk.f32.mxu0 %vm13222_vm1, %v14887_v48 }
 0x33b   :  { %v3184_v5 = vadd.f32 %v2880_v8, %v2464_v30  ;;  %v11687_v60 = vpop.f32.mrf.mxu0  ;;  %11638 = vmatprep.mubr.msk.f32.mxu1 %vm13222_vm1, %v14887_v48  ;;  %v2583_v8 = vld [vmem:[#allocation3 + $0x1e8] sm:$0xff] }
 0x33c   :  { %4096 = vst.msk [vmem:[#allocation4 + $0x10] sm:$0xff] %vm722_vm2, %v4031_v4  ;;  %v11493_v37 = vpop.f32.mrf.mxu1  ;;  %v3312_v40 = vld [vmem:[#allocation4 + $0x18] sm:$0xff] }
 0x33d   :  { %3249 = vst.msk [vmem:[#allocation4 + $0x28] sm:$0xff] %vm722_vm2, %v3184_v5  ;;  %v3720_v34 = vpop.f32.mrf.mxu0  ;;  %11833 = vmatmul.mubr.msk.f32.gmra.mxu0 %vm879_vm3, %v2577_v26  ;;  %v2470_v60 = vld [vmem:[#allocation4 + $0x58] sm:$0xff] }
 0x33e   :  { %v2885_v25 = vpop.f32.mrf.mxu1  ;;  %11639 = vmatmul.mubr.msk.f32.gmra.mxu1 %vm879_vm3, %v2578_v17  ;;  %v4032_v14 = vadd.f32 %v3720_v34, %v3312_v40  ;;  %11835 = vmatprep.mubr.msk.f32.mxu0 %vm13222_vm1, %v14887_v48 }
 0x33f   :  { %v3185_v20 = vadd.f32 %v2885_v25, %v2465_v56  ;;  %v11690_v53 = vpop.f32.mrf.mxu0  ;;  %11641 = vmatprep.mubr.msk.f32.mxu1 %vm13222_vm1, %v14887_v48  ;;  %v2584_v25 = vld [vmem:[#allocation3 + $0x1f0] sm:$0xff] }
 0x340   :  { %4097 = vst.msk [vmem:[#allocation4 + $0x18] sm:$0xff] %vm722_vm2, %v4032_v14  ;;  %v11496_v10 = vpop.f32.mrf.mxu1  ;;  %v3313_v3 = vld [vmem:[#allocation4 + $0x20] sm:$0xff] }
 0x341   :  { %3250 = vst.msk [vmem:[#allocation4 + $0x30] sm:$0xff] %vm722_vm2, %v3185_v20  ;;  %v3725_v0 = vpop.f32.mrf.mxu0  ;;  %11836 = vmatmul.mubr.msk.f32.gmra.mxu0 %vm879_vm3, %v2578_v17  ;;  %v2471_v53 = vld [vmem:[#allocation4 + $0x60] sm:$0xff] }
 0x342   :  { %v2890_v49 = vpop.f32.mrf.mxu1  ;;  %11642 = vmatmul.mubr.msk.f32.gmra.mxu1 %vm879_vm3, %v2579_v36  ;;  %v4033_v58 = vadd.f32 %v3725_v0, %v3313_v3  ;;  %11838 = vmatprep.mubr.msk.f32.mxu0 %vm13222_vm1, %v14887_v48 }
 0x343   :  { %v3186_v21 = vadd.f32 %v2890_v49, %v2466_v19  ;;  %v11693_v31 = vpop.f32.mrf.mxu0  ;;  %11644 = vmatprep.mubr.msk.f32.mxu1 %vm13222_vm1, %v14887_v48  ;;  %v2585_v49 = vld [vmem:[#allocation3 + $0x1f8] sm:$0xff] }
 0x344   :  { %4098 = vst.msk [vmem:[#allocation4 + $0x20] sm:$0xff] %vm722_vm2, %v4033_v58  ;;  %v11499_v13 = vpop.f32.mrf.mxu1  ;;  %v3314_v44 = vld [vmem:[#allocation4 + $0x28] sm:$0xff] }
 0x345   :  { %3251 = vst.msk [vmem:[#allocation4 + $0x38] sm:$0xff] %vm722_vm2, %v3186_v21  ;;  %v3730_v11 = vpop.f32.mrf.mxu0  ;;  %11839 = vmatmul.mubr.msk.f32.gmra.mxu0 %vm879_vm3, %v2579_v36  ;;  %v2472_v31 = vld [vmem:[#allocation4 + $0x68] sm:$0xff] }
 0x346   :  { %v2895_v33 = vpop.f32.mrf.mxu1  ;;  %11645 = vmatmul.mubr.msk.f32.gmra.mxu1 %vm879_vm3, %v2580_v24  ;;  %v4034_v47 = vadd.f32 %v3730_v11, %v3314_v44  ;;  %11841 = vmatprep.mubr.msk.f32.mxu0 %vm13222_vm1, %v14887_v48 }
 0x347   :  { %v3187_v59 = vadd.f32 %v2895_v33, %v2467_v23  ;;  %v11696_v22 = vpop.f32.mrf.mxu0  ;;  %11647 = vmatprep.mubr.msk.f32.mxu1 %vm13222_vm1, %v14887_v48  ;;  %v2586_v33 = vld [vmem:[#allocation3 + $0x200] sm:$0xff] }
 0x348   :  { %4099 = vst.msk [vmem:[#allocation4 + $0x28] sm:$0xff] %vm722_vm2, %v4034_v47  ;;  %v11502_v18 = vpop.f32.mrf.mxu1  ;;  %v3315_v54 = vld [vmem:[#allocation4 + $0x30] sm:$0xff] }
 0x349   :  { %3252 = vst.msk [vmem:[#allocation4 + $0x40] sm:$0xff] %vm722_vm2, %v3187_v59  ;;  %v3735_v1 = vpop.f32.mrf.mxu0  ;;  %11842 = vmatmul.mubr.msk.f32.gmra.mxu0 %vm879_vm3, %v2580_v24  ;;  %v2473_v22 = vld [vmem:[#allocation4 + $0x70] sm:$0xff] }
 0x34a   :  { %v2900_v28 = vpop.f32.mrf.mxu1  ;;  %11648 = vmatmul.mubr.msk.f32.gmra.mxu1 %vm879_vm3, %v2581_v6  ;;  %v4035_v55 = vadd.f32 %v3735_v1, %v3315_v54  ;;  %11844 = vmatprep.mubr.msk.f32.mxu0 %vm13222_vm1, %v14887_v48 }
 0x34b   :  { %v3188_v63 = vadd.f32 %v2900_v28, %v2468_v7  ;;  %v11699_v35 = vpop.f32.mrf.mxu0  ;;  %11650 = vmatprep.mubr.msk.f32.mxu1 %vm13222_vm1, %v14887_v48  ;;  %v2587_v28 = vld [vmem:[#allocation3 + $0x208] sm:$0xff] }
 0x34c   :  { %4100 = vst.msk [vmem:[#allocation4 + $0x30] sm:$0xff] %vm722_vm2, %v4035_v55  ;;  %v11505_v27 = vpop.f32.mrf.mxu1  ;;  %v3316_v32 = vld [vmem:[#allocation4 + $0x38] sm:$0xff] }
 0x34d   :  { %3253 = vst.msk [vmem:[#allocation4 + $0x48] sm:$0xff] %vm722_vm2, %v3188_v63  ;;  %v3740_v16 = vpop.f32.mrf.mxu0  ;;  %11845 = vmatmul.mubr.msk.f32.gmra.mxu0 %vm879_vm3, %v2581_v6  ;;  %v2474_v35 = vld [vmem:[#allocation4 + $0x78] sm:$0xff] }
 0x34e   :  { %v2905_v15 = vpop.f32.mrf.mxu1  ;;  %11651 = vmatmul.mubr.msk.f32.gmra.mxu1 %vm879_vm3, %v2582_v62  ;;  %v4036_v26 = vadd.f32 %v3740_v16, %v3316_v32  ;;  %11847 = vmatprep.mubr.msk.f32.mxu0 %vm13222_vm1, %v14887_v48 }
 0x34f   :  { %v3189_v29 = vadd.f32 %v2905_v15, %v2469_v2  ;;  %v11702_v61 = vpop.f32.mrf.mxu0  ;;  %11653 = vmatprep.mubr.msk.f32.mxu1 %vm13222_vm1, %v14887_v48  ;;  %v2588_v15 = vld [vmem:[#allocation3 + $0x210] sm:$0xff] }
 0x350   :  { %4101 = vst.msk [vmem:[#allocation4 + $0x38] sm:$0xff] %vm722_vm2, %v4036_v26  ;;  %v11508_v30 = vpop.f32.mrf.mxu1  ;;  %v3317_v4 = vld [vmem:[#allocation4 + $0x40] sm:$0xff] }
 0x351   :  { %3254 = vst.msk [vmem:[#allocation4 + $0x50] sm:$0xff] %vm722_vm2, %v3189_v29  ;;  %v3745_v5 = vpop.f32.mrf.mxu0  ;;  %11848 = vmatmul.mubr.msk.f32.gmra.mxu0 %vm879_vm3, %v2582_v62  ;;  %v2475_v61 = vld [vmem:[#allocation4 + $0x80] sm:$0xff] }
 0x352   :  { %v2910_v37 = vpop.f32.mrf.mxu1  ;;  %11654 = vmatmul.mubr.msk.f32.gmra.mxu1 %vm879_vm3, %v2583_v8  ;;  %v4037_v17 = vadd.f32 %v3745_v5, %v3317_v4  ;;  %11850 = vmatprep.mubr.msk.f32.mxu0 %vm13222_vm1, %v14887_v48 }
 0x353   :  { %v3190_v40 = vadd.f32 %v2910_v37, %v2470_v60  ;;  %v11705_v34 = vpop.f32.mrf.mxu0  ;;  %11656 = vmatprep.mubr.msk.f32.mxu1 %vm13222_vm1, %v14887_v48 }
 0x354   :  { %4102 = vst.msk [vmem:[#allocation4 + $0x40] sm:$0xff] %vm722_vm2, %v4037_v17  ;;  %v11511_v56 = vpop.f32.mrf.mxu1  ;;  %v3318_v14 = vld [vmem:[#allocation4 + $0x48] sm:$0xff] }
 0x355   :  { %3255 = vst.msk [vmem:[#allocation4 + $0x58] sm:$0xff] %vm722_vm2, %v3190_v40  ;;  %v3750_v20 = vpop.f32.mrf.mxu0  ;;  %11851 = vmatmul.mubr.msk.f32.gmra.mxu0 %vm879_vm3, %v2583_v8  ;;  %v10317_v17 = vld [vmem:[%s17477_s3 + $0xb8] sm:$0xff]  ;;  %v4224_v56 = vld [vmem:[#allocation3 + $0x70] sm:$0xff] }
 0x356   :  { %v2915_v10 = vpop.f32.mrf.mxu1  ;;  %11657 = vmatmul.mubr.msk.f32.gmra.mxu1 %vm879_vm3, %v2584_v25  ;;  %v4038_v36 = vadd.f32 %v3750_v20, %v3318_v14  ;;  %11853 = vmatprep.mubr.msk.f32.mxu0 %vm13222_vm1, %v14887_v48  ;;  %v2476_v14 = vld [vmem:[#allocation4 + $0x88] sm:$0xff] }
 0x357   :  { %v3191_v3 = vadd.f32 %v2915_v10, %v2471_v53  ;;  %v11708_v0 = vpop.f32.mrf.mxu0  ;;  %11659 = vmatprep.mubr.msk.f32.mxu1 %vm13222_vm1, %v14887_v48  ;;  %v10316_v10 = vld [vmem:[%s17477_s3 + $0xb0] sm:$0xff] }
 0x358   :  { %4103 = vst.msk [vmem:[#allocation4 + $0x48] sm:$0xff] %vm722_vm2, %v4038_v36  ;;  %v11514_v19 = vpop.f32.mrf.mxu1  ;;  %v3319_v58 = vld [vmem:[#allocation4 + $0x50] sm:$0xff] }
 0x359   :  { %3256 = vst.msk [vmem:[#allocation4 + $0x60] sm:$0xff] %vm722_vm2, %v3191_v3  ;;  %v3755_v21 = vpop.f32.mrf.mxu0  ;;  %11854 = vmatmul.mubr.msk.f32.gmra.mxu0 %vm879_vm3, %v2584_v25 }
 0x35a   :  { %v2920_v13 = vpop.f32.mrf.mxu1  ;;  %11660 = vmatmul.mubr.msk.f32.gmra.mxu1 %vm879_vm3, %v2585_v49  ;;  %v4039_v24 = vadd.f32 %v3755_v21, %v3319_v58  ;;  %11856 = vmatprep.mubr.msk.f32.mxu0 %vm13222_vm1, %v14887_v48 }
 0x35b   :  { %v3192_v44 = vadd.f32 %v2920_v13, %v2472_v31  ;;  %v11711_v11 = vpop.f32.mrf.mxu0  ;;  %11662 = vmatprep.mubr.msk.f32.mxu1 %vm13222_vm1, %v14887_v48  ;;  %v4225_v13 = vld [vmem:[#allocation3 + $0x78] sm:$0xff] }
 0x35c   :  { %4104 = vst.msk [vmem:[#allocation4 + $0x50] sm:$0xff] %vm722_vm2, %v4039_v24  ;;  %v11517_v23 = vpop.f32.mrf.mxu1  ;;  %v3320_v47 = vld [vmem:[#allocation4 + $0x58] sm:$0xff] }
 0x35d   :  { %3257 = vst.msk [vmem:[#allocation4 + $0x68] sm:$0xff] %vm722_vm2, %v3192_v44  ;;  %v3760_v59 = vpop.f32.mrf.mxu0  ;;  %11857 = vmatmul.mubr.msk.f32.gmra.mxu0 %vm879_vm3, %v2585_v49  ;;  %v3437_v49 = vld [vmem:[#allocation3 + $0x218] sm:$0xff]  ;;  %v2477_v44 = vld [vmem:[#allocation4 + $0x90] sm:$0xff] }
 0x35e   :  { %v2925_v18 = vpop.f32.mrf.mxu1  ;;  %11663 = vmatmul.mubr.msk.f32.gmra.mxu1 %vm879_vm3, %v2586_v33  ;;  %v4040_v6 = vadd.f32 %v3760_v59, %v3320_v47  ;;  %11859 = vmatprep.mubr.msk.f32.mxu0 %vm13222_vm1, %v14887_v48 }
 0x35f   :  { %v3193_v54 = vadd.f32 %v2925_v18, %v2473_v22  ;;  %v11714_v1 = vpop.f32.mrf.mxu0  ;;  %11665 = vmatprep.mubr.msk.f32.mxu1 %vm13222_vm1, %v14887_v48  ;;  %v3438_v22 = vld [vmem:[#allocation3 + $0x220] sm:$0xff] }
 0x360   :  { %4105 = vst.msk [vmem:[#allocation4 + $0x58] sm:$0xff] %vm722_vm2, %v4040_v6  ;;  %v11520_v7 = vpop.f32.mrf.mxu1  ;;  %v3321_v55 = vld [vmem:[#allocation4 + $0x60] sm:$0xff]  ;;  %v4226_v1 = vld [vmem:[#allocation3 + $0x80] sm:$0xff] }
 0x361   :  { %3258 = vst.msk [vmem:[#allocation4 + $0x70] sm:$0xff] %vm722_vm2, %v3193_v54  ;;  %v3765_v63 = vpop.f32.mrf.mxu0  ;;  %11860 = vmatmul.mubr.msk.f32.gmra.mxu0 %vm879_vm3, %v2586_v33  ;;  %v10315_v7 = vld [vmem:[%s17477_s3 + $0xa8] sm:$0xff] }
 0x362   :  { %v2930_v27 = vpop.f32.mrf.mxu1  ;;  %11666 = vmatmul.mubr.msk.f32.gmra.mxu1 %vm879_vm3, %v2587_v28  ;;  %v4041_v62 = vadd.f32 %v3765_v63, %v3321_v55  ;;  %11862 = vmatprep.mubr.msk.f32.mxu0 %vm13222_vm1, %v14887_v48  ;;  %v2478_v55 = vld [vmem:[#allocation4 + $0x98] sm:$0xff] }
 0x363   :  { %v3194_v32 = vadd.f32 %v2930_v27, %v2474_v35  ;;  %v11717_v16 = vpop.f32.mrf.mxu0  ;;  %11668 = vmatprep.mubr.msk.f32.mxu1 %vm13222_vm1, %v14887_v48 }
 0x364   :  { %4106 = vst.msk [vmem:[#allocation4 + $0x60] sm:$0xff] %vm722_vm2, %v4041_v62  ;;  %v11523_v2 = vpop.f32.mrf.mxu1  ;;  %v3322_v26 = vld [vmem:[#allocation4 + $0x68] sm:$0xff] }
 0x365   :  { %3259 = vst.msk [vmem:[#allocation4 + $0x78] sm:$0xff] %vm722_vm2, %v3194_v32  ;;  %v3770_v29 = vpop.f32.mrf.mxu0  ;;  %11863 = vmatmul.mubr.msk.f32.gmra.mxu0 %vm879_vm3, %v2587_v28  ;;  %v10386_v32 = vld [vmem:[%s17477_s3 + $0xd8] sm:$0xff] }
 0x366   :  { %v2935_v30 = vpop.f32.mrf.mxu1  ;;  %11669 = vmatmul.mubr.msk.f32.gmra.mxu1 %vm879_vm3, %v2588_v15  ;;  %v4042_v8 = vadd.f32 %v3770_v29, %v3322_v26  ;;  %11865 = vmatprep.mubr.msk.f32.mxu0 %vm13222_vm1, %v14887_v48  ;;  %v4227_v29 = vld [vmem:[#allocation3 + $0x88] sm:$0xff] }
 0x367   :  { %v3195_v4 = vadd.f32 %v2935_v30, %v2475_v61  ;;  %v11720_v5 = vpop.f32.mrf.mxu0  ;;  %11882 = vmatprep.mubr.msk.f32.mxu1 %vm13222_vm1, %v14887_v48  ;;  %v2479_v30 = vld [vmem:[#allocation4 + $0xa0] sm:$0xff] }
 0x368   :  { %4107 = vst.msk [vmem:[#allocation4 + $0x68] sm:$0xff] %vm722_vm2, %v4042_v8  ;;  %v11526_v60 = vpop.f32.mrf.mxu1  ;;  %v1596_v37 = vpop.permute.xlu0 %1595  ;;  %v3323_v40 = vld [vmem:[#allocation4 + $0x70] sm:$0xff] }
 0x369   :  { %3260 = vst.msk [vmem:[#allocation4 + $0x80] sm:$0xff] %vm722_vm2, %v3195_v4  ;;  %v3775_v34 = vpop.f32.mrf.mxu0  ;;  %11866 = vmatmul.mubr.msk.f32.gmra.mxu0 %vm879_vm3, %v2588_v15 }
 0x36a   :  { %1625 = vst.msk [vmem:[#allocation3 + $0x290] sm:$0xff] %vm879_vm3, %v1596_v37  ;;  %v1594_v25 = vpop.permute.xlu1 %1593  ;;  %v2940_v20 = vpop.f32.mrf.mxu1  ;;  %v4043_v53 = vadd.f32 %v3775_v34, %v3323_v40  ;;  %11883 = vmatmul.mubr.msk.f32.vlgmr.msra.gmra.mxu1 %vm879_vm3, %v4224_v56  ;;  %11868 = vmatprep.mubr.msk.f32.mxu0 %vm13222_vm1, %v14887_v48 }
 0x36b   :  { %1624 = vst.msk [vmem:[#allocation3 + $0x288] sm:$0xff] %vm879_vm3, %v1594_v25  ;;  %v3196_v36 = vadd.f32 %v2940_v20, %v2476_v14  ;;  %v11723_v3 = vpop.f32.mrf.mxu0  ;;  %12281 = vmatpush3.msra.mxu1 %v10317_v17  ;;  %11885 = vmatprep.mubr.msk.f32.mxu1 %vm13222_vm1, %v14887_v48  ;;  %v4228_v25 = vld [vmem:[#allocation3 + $0x90] sm:$0xff]  ;;  %v2480_v20 = vld [vmem:[#allocation4 + $0xa8] sm:$0xff] }
 0x36c   :  { %4108 = vst.msk [vmem:[#allocation4 + $0x70] sm:$0xff] %vm722_vm2, %v4043_v53  ;;  %v11529_v0 = vpop.f32.mrf.mxu1  ;;  %v1671_v19 = vpop.permute.xlu0 %1670  ;;  %12282 = vmatprep.subr.mxu1 %v14887_v48  ;;  %v3324_v21 = vld [vmem:[#allocation4 + $0x78] sm:$0xff] }
 0x36d   :  { %3261 = vst.msk [vmem:[#allocation4 + $0x88] sm:$0xff] %vm722_vm2, %v3196_v36  ;;  %v1712_v58 = vmax.f32 %v14848_v39, %v1671_v19  ;;  %v3780_v31 = vpop.f32.mrf.mxu0  ;;  %11869 = vmatmul.mubr.msk.f32.gmra.mxu0 %vm879_vm3, %v3437_v49  ;;  %12283 = vmatpush3.msra.mxu1 %v10316_v10  ;;  %v10384_v49 = vld [vmem:[%s17477_s3 + $0xc8] sm:$0xff] }
 0x36e   :  { %v1598_v24 = vpop.permute.xlu1 %1597  ;;  %v2945_v11 = vpop.f32.mrf.mxu1  ;;  %v4044_v23 = vadd.f32 %v3780_v31, %v3324_v21  ;;  %11886 = vmatmul.mubr.msk.f32.gmra.mxu1 %vm879_vm3, %v4225_v13  ;;  %11871 = vmatprep.mubr.msk.f32.mxu0 %vm13222_vm1, %v14887_v48  ;;  %v4229_v31 = vld [vmem:[#allocation3 + $0x98] sm:$0xff] }
 0x36f   :  { %1626 = vst.msk [vmem:[#allocation3 + $0x298] sm:$0xff] %vm879_vm3, %v1598_v24  ;;  %1726 = vst.msk [vmem:[#allocation3 + $0x2a0] sm:$0xff] %vm879_vm3, %v1712_v58  ;;  %v3197_v39 = vadd.f32 %v2945_v11, %v2477_v44  ;;  %v11726_v33 = vpop.f32.mrf.mxu0  ;;  %11888 = vmatprep.mubr.msk.f32.mxu1 %vm13222_vm1, %v14887_v48  ;;  %12284 = vmatprep.subr.mxu1 %v14887_v48  ;;  %v2481_v24 = vld [vmem:[#allocation4 + $0xb0] sm:$0xff] }
 0x370   :  { %4109 = vst.msk [vmem:[#allocation4 + $0x78] sm:$0xff] %vm722_vm2, %v4044_v23  ;;  %v11532_v47 = vpop.f32.mrf.mxu1  ;;  %v1675_v59 = vpop.permute.xlu0 %1674  ;;  %v3325_v6 = vld [vmem:[#allocation4 + $0x80] sm:$0xff]  ;;  %12285 = vmatpush3.msra.mxu1 %v10315_v7 }
 0x371   :  { %3262 = vst.msk [vmem:[#allocation4 + $0x90] sm:$0xff] %vm722_vm2, %v3197_v39  ;;  %v1714_v18 = vmax.f32 %v14862_v38, %v1675_v59  ;;  %v3785_v54 = vpop.f32.mrf.mxu0  ;;  %11872 = vmatmul.mubr.msk.f32.gmra.mxu0 %vm879_vm3, %v3438_v22  ;;  %12286 = vmatprep.subr.mxu1 %v14887_v48 }
 0x372   :  { %v1673_v28 = vpop.permute.xlu1 %1672  ;;  %v2950_v63 = vpop.f32.mrf.mxu1  ;;  %v4045_v35 = vadd.f32 %v3785_v54, %v3325_v6  ;;  %11889 = vmatmul.mubr.msk.f32.gmra.mxu1 %vm879_vm3, %v4226_v1  ;;  %12085 = vmatprep.mubr.msk.f32.mxu0 %vm13222_vm1, %v14887_v48  ;;  %v2482_v54 = vld [vmem:[#allocation4 + $0xb8] sm:$0xff] }
 0x373   :  { %v1713_v38 = vmax.f32 %v14869_v57, %v1673_v28  ;;  %1728 = vst.msk [vmem:[#allocation3 + $0x2b0] sm:$0xff] %vm879_vm3, %v1714_v18  ;;  %v3198_v27 = vadd.f32 %v2950_v63, %v2478_v55  ;;  %v11729_v62 = vpop.f32.mrf.mxu0  ;;  %11891 = vmatprep.mubr.msk.f32.mxu1 %vm13222_vm1, %v14887_v48  ;;  %v4230_v18 = vld [vmem:[#allocation3 + $0xa0] sm:$0xff] }
 0x374   :  { %4110 = vst.msk [vmem:[#allocation4 + $0x80] sm:$0xff] %vm722_vm2, %v4045_v35  ;;  %v11535_v16 = vpop.f32.mrf.mxu1  ;;  %v1679_v2 = vpop.permute.xlu0 %1678  ;;  %v3326_v15 = vld [vmem:[#allocation4 + $0x88] sm:$0xff]  ;;  %v15218_v63 = vld [vmem:[#allocation2 + $0x1c0] sm:$0xff] }
 0x375   :  { %1727 = vst.msk [vmem:[#allocation3 + $0x2a8] sm:$0xff] %vm879_vm3, %v1713_v38  ;;  %v1716_v57 = vmax.f32 %v14878_v9, %v1679_v2  ;;  %v3790_v26 = vpop.f32.mrf.mxu0  ;;  %12086 = vmatmul.mubr.msk.f32.vlgmr.msra.gmra.mxu0 %vm879_vm3, %v4226_v1 }
 0x376   :  { %3263 = vst.msk [vmem:[#allocation4 + $0x98] sm:$0xff] %vm722_vm2, %v3198_v27  ;;  %v1677_v61 = vpop.permute.xlu1 %1676  ;;  %v2955_v8 = vpop.f32.mrf.mxu1  ;;  %v4046_v4 = vadd.f32 %v3790_v26, %v3326_v15  ;;  %11892 = vmatmul.mubr.msk.f32.gmra.mxu1 %vm879_vm3, %v4227_v29  ;;  %12484 = vmatpush3.msra.mxu0 %v10386_v32  ;;  %v4231_v27 = vld [vmem:[#allocation3 + $0xa8] sm:$0xff] }
 0x377   :  { %v1715_v5 = vmax.f32 %v14885_v51, %v1677_v61  ;;  %1730 = vst.msk [vmem:[#allocation3 + $0x2c0] sm:$0xff] %vm879_vm3, %v1716_v57  ;;  %v3199_v60 = vadd.f32 %v2955_v8, %v2479_v30  ;;  %v11732_v37 = vpop.f32.mrf.mxu0  ;;  %11894 = vmatprep.mubr.msk.f32.mxu1 %vm13222_vm1, %v14887_v48  ;;  %12088 = vmatprep.mubr.msk.f32.mxu0 %vm13222_vm1, %v14887_v48  ;;  %v10385_v51 = vld [vmem:[%s17477_s3 + $0xd0] sm:$0xff]  ;;  %v2484_v61 = vld [vmem:[#allocation4 + $0xc8] sm:$0xff] }
 0x378   :  { %4111 = vst.msk [vmem:[#allocation4 + $0x88] sm:$0xff] %vm722_vm2, %v4046_v4  ;;  %v11538_v9 = vpop.f32.mrf.mxu1  ;;  %v1683_v17 = vpop.permute.xlu0 %1682  ;;  %12485 = vmatprep.subr.mxu0 %v14887_v48  ;;  %v3327_v34 = vld [vmem:[#allocation4 + $0x90] sm:$0xff] }
 0x379   :  { %1729 = vst.msk [vmem:[#allocation3 + $0x2b8] sm:$0xff] %vm879_vm3, %v1715_v5  ;;  %v1718_v40 = vmax.f32 %v14895_v46, %v1683_v17  ;;  %v3795_v56 = vpop.f32.mrf.mxu0  ;;  %12089 = vmatmul.mubr.msk.f32.gmra.mxu0 %vm879_vm3, %v4227_v29  ;;  %v4232_v29 = vld [vmem:[#allocation3 + $0xb0] sm:$0xff]  ;;  %v4233_v17 = vld [vmem:[#allocation3 + $0xb8] sm:$0xff] }
 0x37a   :  { %3264 = vst.msk [vmem:[#allocation4 + $0xa0] sm:$0xff] %vm722_vm2, %v3199_v60  ;;  %v1681_v14 = vpop.permute.xlu1 %1680  ;;  %v2960_v53 = vpop.f32.mrf.mxu1  ;;  %v4047_v10 = vadd.f32 %v3795_v56, %v3327_v34  ;;  %11895 = vmatmul.mubr.msk.f32.gmra.mxu1 %vm879_vm3, %v4228_v25  ;;  %12091 = vmatprep.mubr.msk.f32.mxu0 %vm13222_vm1, %v14887_v48 }
 0x37b   :  { %v1717_v36 = vmax.f32 %v14902_v12, %v1681_v14  ;;  %1732 = vst.msk [vmem:[#allocation3 + $0x2d0] sm:$0xff] %vm879_vm3, %v1718_v40  ;;  %v3200_v3 = vadd.f32 %v2960_v53, %v2480_v20  ;;  %v11735_v46 = vpop.f32.mrf.mxu0  ;;  %11897 = vmatprep.mubr.msk.f32.mxu1 %vm13222_vm1, %v14887_v48  ;;  %12486 = vmatpush3.msra.mxu0 %v10385_v51  ;;  %v2485_v51 = vld [vmem:[#allocation4 + $0xd0] sm:$0xff] }
 0x37c   :  { %4112 = vst.msk [vmem:[#allocation4 + $0x90] sm:$0xff] %vm722_vm2, %v4047_v10  ;;  %v11541_v0 = vpop.f32.mrf.mxu1  ;;  %v1687_v19 = vpop.permute.xlu0 %1686  ;;  %12487 = vmatprep.subr.mxu0 %v14887_v48  ;;  %v4234_v10 = vld [vmem:[#allocation3 + $0xc0] sm:$0xff] }
 0x37d   :  { %1731 = vst.msk [vmem:[#allocation3 + $0x2c8] sm:$0xff] %vm879_vm3, %v1717_v36  ;;  %v1720_v12 = vmax.f32 %v14911_v52, %v1687_v19  ;;  %v3328_v58 = vld [vmem:[#allocation4 + $0x98] sm:$0xff]  ;;  %v3800_v21 = vpop.f32.mrf.mxu0  ;;  %12092 = vmatmul.mubr.msk.f32.gmra.mxu0 %vm879_vm3, %v4228_v25 }
 0x37e   :  { %3265 = vst.msk [vmem:[#allocation4 + $0xa8] sm:$0xff] %vm722_vm2, %v3200_v3  ;;  %v1685_v13 = vpop.permute.xlu1 %1684  ;;  %v2965_v44 = vpop.f32.mrf.mxu1  ;;  %v4048_v11 = vadd.f32 %v3800_v21, %v3328_v58  ;;  %11898 = vmatmul.mubr.msk.f32.gmra.mxu1 %vm879_vm3, %v4229_v31  ;;  %12094 = vmatprep.mubr.msk.f32.mxu0 %vm13222_vm1, %v14887_v48  ;;  %v2486_v36 = vld [vmem:[#allocation4 + $0xd8] sm:$0xff] }
 0x37f   :  { %v1719_v23 = vmax.f32 %v14918_v50, %v1685_v13  ;;  %1734 = vst.msk [vmem:[#allocation3 + $0x2e0] sm:$0xff] %vm879_vm3, %v1720_v12  ;;  %v3201_v39 = vadd.f32 %v2965_v44, %v2481_v24  ;;  %v11738_v52 = vpop.f32.mrf.mxu0  ;;  %11900 = vmatprep.mubr.msk.f32.mxu1 %vm13222_vm1, %v14887_v48  ;;  %12488 = vmatpush3.msra.mxu0 %v10384_v49  ;;  %v4235_v21 = vld [vmem:[#allocation3 + $0xc8] sm:$0xff] }
 0x380   :  { %4113 = vst.msk [vmem:[#allocation4 + $0x98] sm:$0xff] %vm722_vm2, %v4048_v11  ;;  %v11544_v33 = vpop.f32.mrf.mxu1  ;;  %v1691_v47 = vpop.permute.xlu0 %1690  ;;  %12489 = vmatprep.subr.mxu0 %v14887_v48 }
 0x381   :  { %1733 = vst.msk [vmem:[#allocation3 + $0x2d8] sm:$0xff] %vm879_vm3, %v1719_v23  ;;  %v1722_v50 = vmax.f32 %v14926_v43, %v1691_v47  ;;  %v3329_v59 = vld [vmem:[#allocation4 + $0xa0] sm:$0xff]  ;;  %v3805_v22 = vpop.f32.mrf.mxu0  ;;  %12095 = vmatmul.mubr.msk.f32.gmra.mxu0 %vm879_vm3, %v4229_v31  ;;  %v2488_v47 = vld [vmem:[#allocation4 + $0xe8] sm:$0xff] }
 0x382   :  { %3266 = vst.msk [vmem:[#allocation4 + $0xb0] sm:$0xff] %vm722_vm2, %v3201_v39  ;;  %v1689_v6 = vpop.permute.xlu1 %1688  ;;  %v2970_v1 = vpop.f32.mrf.mxu1  ;;  %v4049_v7 = vadd.f32 %v3805_v22, %v3329_v59  ;;  %11901 = vmatmul.mubr.msk.f32.gmra.mxu1 %vm879_vm3, %v4230_v18  ;;  %12097 = vmatprep.mubr.msk.f32.mxu0 %vm13222_vm1, %v14887_v48  ;;  %v2487_v31 = vld [vmem:[#allocation4 + $0xe0] sm:$0xff] }
 0x383   :  { %v1721_v28 = vmax.f32 %v14934_v42, %v1689_v6  ;;  %1736 = vst.msk [vmem:[#allocation3 + $0x2f0] sm:$0xff] %vm879_vm3, %v1722_v50  ;;  %v3202_v55 = vadd.f32 %v2970_v1, %v2482_v54  ;;  %v11741_v43 = vpop.f32.mrf.mxu0  ;;  %11903 = vmatprep.mubr.msk.f32.mxu1 %vm13222_vm1, %v15218_v63  ;;  %v2483_v42 = vld [vmem:[#allocation4 + $0xc0] sm:$0xff] }
 0x384   :  { %4114 = vst.msk [vmem:[#allocation4 + $0xa0] sm:$0xff] %vm722_vm2, %v4049_v7  ;;  %v11547_v35 = vpop.f32.mrf.mxu1  ;;  %v4236_v33 = vld [vmem:[#allocation3 + $0xd0] sm:$0xff]  ;;  %v4237_v7 = vld [vmem:[#allocation3 + $0xd8] sm:$0xff] }
 0x385   :  { %1735 = vst.msk [vmem:[#allocation3 + $0x2e8] sm:$0xff] %vm879_vm3, %v1721_v28  ;;  %v3330_v38 = vld [vmem:[#allocation4 + $0xa8] sm:$0xff]  ;;  %v3810_v48 = vpop.f32.mrf.mxu0  ;;  %12098 = vmatmul.mubr.msk.f32.gmra.mxu0 %vm879_vm3, %v4230_v18  ;;  %v2489_v28 = vld [vmem:[#allocation4 + $0xf0] sm:$0xff] }
 0x386   :  { %3267 = vst.msk [vmem:[#allocation4 + $0xb8] sm:$0xff] %vm722_vm2, %v3202_v55  ;;  %v2975_v62 = vpop.f32.mrf.mxu1  ;;  %v4050_v32 = vadd.f32 %v3810_v48, %v3330_v38  ;;  %11904 = vmatmul.mubr.msk.f32.gmra.mxu1 %vm879_vm3, %v4231_v27  ;;  %12100 = vmatprep.mubr.msk.f32.mxu0 %vm13222_vm1, %v15218_v63 }
 0x387   :  { %v3203_v16 = vadd.f32 %v2975_v62, %v2483_v42  ;;  %v11744_v2 = vpop.f32.mrf.mxu0  ;;  %11906 = vmatprep.mubr.msk.f32.mxu1 %vm13222_vm1, %v15218_v63  ;;  %v4238_v62 = vld [vmem:[#allocation3 + $0xe0] sm:$0xff] }
 0x388   :  { %4115 = vst.msk [vmem:[#allocation4 + $0xa8] sm:$0xff] %vm722_vm2, %v4050_v32  ;;  %v11550_v57 = vpop.f32.mrf.mxu1  ;;  %v2490_v32 = vld [vmem:[#allocation4 + $0xf8] sm:$0xff] }
 0x389   :  { %3268 = vst.msk [vmem:[#allocation4 + $0xc0] sm:$0xff] %vm722_vm2, %v3203_v16  ;;  %v3331_v15 = vld [vmem:[#allocation4 + $0xb0] sm:$0xff]  ;;  %v3815_v26 = vpop.f32.mrf.mxu0  ;;  %12101 = vmatmul.mubr.msk.f32.gmra.mxu0 %vm879_vm3, %v4231_v27 }
 0x38a   :  { %v2980_v30 = vpop.f32.mrf.mxu1  ;;  %v4051_v8 = vadd.f32 %v3815_v26, %v3331_v15  ;;  %11907 = vmatmul.mubr.msk.f32.gmra.mxu1 %vm879_vm3, %v4232_v29  ;;  %12103 = vmatprep.mubr.msk.f32.mxu0 %vm13222_vm1, %v15218_v63 }
 0x38b   :  { %v3204_v4 = vadd.f32 %v2980_v30, %v2484_v61  ;;  %v11747_v5 = vpop.f32.mrf.mxu0  ;;  %11909 = vmatprep.mubr.msk.f32.mxu1 %vm13222_vm1, %v15218_v63  ;;  %v4239_v30 = vld [vmem:[#allocation3 + $0xe8] sm:$0xff] }
 0x38c   :  { %4116 = vst.msk [vmem:[#allocation4 + $0xb0] sm:$0xff] %vm722_vm2, %v4051_v8  ;;  %v11553_v60 = vpop.f32.mrf.mxu1  ;;  %v2491_v8 = vld [vmem:[#allocation4 + $0x100] sm:$0xff] }
 0x38d   :  { %3269 = vst.msk [vmem:[#allocation4 + $0xc8] sm:$0xff] %vm722_vm2, %v3204_v4  ;;  %v3332_v37 = vld [vmem:[#allocation4 + $0xb8] sm:$0xff]  ;;  %v3820_v9 = vpop.f32.mrf.mxu0  ;;  %12104 = vmatmul.mubr.msk.f32.gmra.mxu0 %vm879_vm3, %v4232_v29 }
 0x38e   :  { %v2985_v40 = vpop.f32.mrf.mxu1  ;;  %v4052_v34 = vadd.f32 %v3820_v9, %v3332_v37  ;;  %11910 = vmatmul.mubr.msk.f32.gmra.mxu1 %vm879_vm3, %v4233_v17  ;;  %12106 = vmatprep.mubr.msk.f32.mxu0 %vm13222_vm1, %v15218_v63 }
 0x38f   :  { %v3205_v56 = vadd.f32 %v2985_v40, %v2485_v51  ;;  %v11750_v25 = vpop.f32.mrf.mxu0  ;;  %11912 = vmatprep.mubr.msk.f32.mxu1 %vm13222_vm1, %v15218_v63  ;;  %v4240_v40 = vld [vmem:[#allocation3 + $0xf0] sm:$0xff] }
 0x390   :  { %4117 = vst.msk [vmem:[#allocation4 + $0xb8] sm:$0xff] %vm722_vm2, %v4052_v34  ;;  %v11556_v14 = vpop.f32.mrf.mxu1  ;;  %v3333_v20 = vld [vmem:[#allocation4 + $0xc0] sm:$0xff]  ;;  %v2492_v34 = vld [vmem:[#allocation4 + $0x108] sm:$0xff] }
 0x391   :  { %3270 = vst.msk [vmem:[#allocation4 + $0xd0] sm:$0xff] %vm722_vm2, %v3205_v56  ;;  %v3825_v53 = vpop.f32.mrf.mxu0  ;;  %12107 = vmatmul.mubr.msk.f32.gmra.mxu0 %vm879_vm3, %v4233_v17 }
 0x392   :  { %v2990_v3 = vpop.f32.mrf.mxu1  ;;  %v4053_v46 = vadd.f32 %v3825_v53, %v3333_v20  ;;  %11913 = vmatmul.mubr.msk.f32.gmra.mxu1 %vm879_vm3, %v4234_v10  ;;  %12109 = vmatprep.mubr.msk.f32.mxu0 %vm13222_vm1, %v15218_v63 }
 0x393   :  { %v3206_v0 = vadd.f32 %v2990_v3, %v2486_v36  ;;  %v11753_v19 = vpop.f32.mrf.mxu0  ;;  %11915 = vmatprep.mubr.msk.f32.mxu1 %vm13222_vm1, %v15218_v63  ;;  %v4241_v3 = vld [vmem:[#allocation3 + $0xf8] sm:$0xff] }
 0x394   :  { %4118 = vst.msk [vmem:[#allocation4 + $0xc0] sm:$0xff] %vm722_vm2, %v4053_v46  ;;  %v11559_v49 = vpop.f32.mrf.mxu1  ;;  %v3334_v12 = vld [vmem:[#allocation4 + $0xc8] sm:$0xff]  ;;  %v2493_v46 = vld [vmem:[#allocation4 + $0x110] sm:$0xff] }
 0x395   :  { %3271 = vst.msk [vmem:[#allocation4 + $0xd8] sm:$0xff] %vm722_vm2, %v3206_v0  ;;  %v3830_v58 = vpop.f32.mrf.mxu0  ;;  %12110 = vmatmul.mubr.msk.f32.gmra.mxu0 %vm879_vm3, %v4234_v10 }
 0x396   :  { %v2995_v13 = vpop.f32.mrf.mxu1  ;;  %v4054_v24 = vadd.f32 %v3830_v58, %v3334_v12  ;;  %11916 = vmatmul.mubr.msk.f32.gmra.mxu1 %vm879_vm3, %v4235_v21  ;;  %12112 = vmatprep.mubr.msk.f32.mxu0 %vm13222_vm1, %v15218_v63 }
 0x397   :  { %v3207_v44 = vadd.f32 %v2995_v13, %v2487_v31  ;;  %v11756_v11 = vpop.f32.mrf.mxu0  ;;  %11918 = vmatprep.mubr.msk.f32.mxu1 %vm13222_vm1, %v15218_v63  ;;  %v4242_v13 = vld [vmem:[#allocation3 + $0x100] sm:$0xff] }
 0x398   :  { %4119 = vst.msk [vmem:[#allocation4 + $0xc8] sm:$0xff] %vm722_vm2, %v4054_v24  ;;  %v11562_v23 = vpop.f32.mrf.mxu1  ;;  %v3335_v39 = vld [vmem:[#allocation4 + $0xd0] sm:$0xff] }
 0x399   :  { %3272 = vst.msk [vmem:[#allocation4 + $0xe0] sm:$0xff] %vm722_vm2, %v3207_v44  ;;  %v3835_v52 = vpop.f32.mrf.mxu0  ;;  %12113 = vmatmul.mubr.msk.f32.gmra.mxu0 %vm879_vm3, %v4235_v21  ;;  %v10314_v24 = vld [vmem:[%s17477_s3 + $0xa0] sm:$0xff]  ;;  %v2494_v44 = vld [vmem:[#allocation4 + $0x118] sm:$0xff] }
 0x39a   :  { %v3000_v50 = vpop.f32.mrf.mxu1  ;;  %v4055_v59 = vadd.f32 %v3835_v52, %v3335_v39  ;;  %11919 = vmatmul.mubr.msk.f32.gmra.mxu1 %vm879_vm3, %v4236_v33  ;;  %12115 = vmatprep.mubr.msk.f32.mxu0 %vm13222_vm1, %v15218_v63 }
 0x39b   :  { %v3208_v22 = vadd.f32 %v3000_v50, %v2488_v47  ;;  %v11759_v18 = vpop.f32.mrf.mxu0  ;;  %11921 = vmatprep.mubr.msk.f32.mxu1 %vm13222_vm1, %v15218_v63  ;;  %12287 = vmatpush3.msra.mxu1 %v10314_v24 }
 0x39c   :  { %4120 = vst.msk [vmem:[#allocation4 + $0xd0] sm:$0xff] %vm722_vm2, %v4055_v59  ;;  %v11565_v6 = vpop.f32.mrf.mxu1  ;;  %v3336_v54 = vld [vmem:[#allocation4 + $0xd8] sm:$0xff]  ;;  %12686 = vmatprep.subr.mxu1 %v15218_v63 }
 0x39d   :  { %3273 = vst.msk [vmem:[#allocation4 + $0xe8] sm:$0xff] %vm722_vm2, %v3208_v22  ;;  %v3840_v1 = vpop.f32.mrf.mxu0  ;;  %12116 = vmatmul.mubr.msk.f32.gmra.mxu0 %vm879_vm3, %v4236_v33  ;;  %v4243_v59 = vld [vmem:[#allocation3 + $0x108] sm:$0xff]  ;;  %v2495_v22 = vld [vmem:[#allocation4 + $0x120] sm:$0xff] }
 0x39e   :  { %v3005_v55 = vpop.f32.mrf.mxu1  ;;  %v4056_v43 = vadd.f32 %v3840_v1, %v3336_v54  ;;  %11922 = vmatmul.mubr.msk.f32.gmra.mxu1 %vm879_vm3, %v4237_v7  ;;  %12118 = vmatprep.mubr.msk.f32.mxu0 %vm13222_vm1, %v15218_v63 }
 0x39f   :  { %v3209_v35 = vadd.f32 %v3005_v55, %v2489_v28  ;;  %v11762_v38 = vpop.f32.mrf.mxu0  ;;  %11924 = vmatprep.mubr.msk.f32.mxu1 %vm13222_vm1, %v15218_v63 }
 0x3a0   :  { %4121 = vst.msk [vmem:[#allocation4 + $0xd8] sm:$0xff] %vm722_vm2, %v4056_v43  ;;  %v11568_v48 = vpop.f32.mrf.mxu1  ;;  %v3337_v27 = vld [vmem:[#allocation4 + $0xe0] sm:$0xff]  ;;  %v2496_v38 = vld [vmem:[#allocation4 + $0x128] sm:$0xff] }
 0x3a1   :  { %3274 = vst.msk [vmem:[#allocation4 + $0xf0] sm:$0xff] %vm722_vm2, %v3209_v35  ;;  %v3845_v42 = vpop.f32.mrf.mxu0  ;;  %12119 = vmatmul.mubr.msk.f32.gmra.mxu0 %vm879_vm3, %v4237_v7  ;;  %v4244_v43 = vld [vmem:[#allocation3 + $0x110] sm:$0xff]  ;;  %v10383_v35 = vld [vmem:[%s17477_s3 + $0xc0] sm:$0xff] }
 0x3a2   :  { %v3010_v16 = vpop.f32.mrf.mxu1  ;;  %v4057_v2 = vadd.f32 %v3845_v42, %v3337_v27  ;;  %11925 = vmatmul.mubr.msk.f32.gmra.mxu1 %vm879_vm3, %v4238_v62  ;;  %12121 = vmatprep.mubr.msk.f32.mxu0 %vm13222_vm1, %v15218_v63 }
 0x3a3   :  { %v3210_v57 = vadd.f32 %v3010_v16, %v2490_v32  ;;  %v11765_v15 = vpop.f32.mrf.mxu0  ;;  %11927 = vmatprep.mubr.msk.f32.mxu1 %vm13222_vm1, %v15218_v63  ;;  %12490 = vmatpush3.msra.mxu0 %v10383_v35 }
 0x3a4   :  { %4122 = vst.msk [vmem:[#allocation4 + $0xe0] sm:$0xff] %vm722_vm2, %v4057_v2  ;;  %v11571_v26 = vpop.f32.mrf.mxu1  ;;  %v3338_v29 = vld [vmem:[#allocation4 + $0xe8] sm:$0xff]  ;;  %12889 = vmatprep.subr.mxu0 %v15218_v63  ;;  %v2497_v15 = vld [vmem:[#allocation4 + $0x130] sm:$0xff] }
 0x3a5   :  { %3275 = vst.msk [vmem:[#allocation4 + $0xf8] sm:$0xff] %vm722_vm2, %v3210_v57  ;;  %v3850_v61 = vpop.f32.mrf.mxu0  ;;  %12122 = vmatmul.mubr.msk.f32.gmra.mxu0 %vm879_vm3, %v4238_v62  ;;  %v4245_v57 = vld [vmem:[#allocation3 + $0x118] sm:$0xff] }
 0x3a6   :  { %v3015_v4 = vpop.f32.mrf.mxu1  ;;  %v4058_v5 = vadd.f32 %v3850_v61, %v3338_v29  ;;  %11928 = vmatmul.mubr.msk.f32.gmra.mxu1 %vm879_vm3, %v4239_v30  ;;  %12124 = vmatprep.mubr.msk.f32.mxu0 %vm13222_vm1, %v15218_v63 }
 0x3a7   :  { %v3211_v60 = vadd.f32 %v3015_v4, %v2491_v8  ;;  %v11768_v37 = vpop.f32.mrf.mxu0  ;;  %11930 = vmatprep.mubr.msk.f32.mxu1 %vm13222_vm1, %v15218_v63 }
 0x3a8   :  { %4123 = vst.msk [vmem:[#allocation4 + $0xe8] sm:$0xff] %vm722_vm2, %v4058_v5  ;;  %v11574_v9 = vpop.f32.mrf.mxu1  ;;  %v3339_v17 = vld [vmem:[#allocation4 + $0xf0] sm:$0xff]  ;;  %v2498_v37 = vld [vmem:[#allocation4 + $0x138] sm:$0xff] }
 0x3a9   :  { %3276 = vst.msk [vmem:[#allocation4 + $0x100] sm:$0xff] %vm722_vm2, %v3211_v60  ;;  %v3855_v51 = vpop.f32.mrf.mxu0  ;;  %12125 = vmatmul.mubr.msk.f32.gmra.mxu0 %vm879_vm3, %v4239_v30  ;;  %v4246_v60 = vld [vmem:[#allocation3 + $0x120] sm:$0xff] }
 0x3aa   :  { %v3020_v56 = vpop.f32.mrf.mxu1  ;;  %v4059_v25 = vadd.f32 %v3855_v51, %v3339_v17  ;;  %11931 = vmatmul.mubr.msk.f32.gmra.mxu1 %vm879_vm3, %v4240_v40  ;;  %12127 = vmatprep.mubr.msk.f32.mxu0 %vm13222_vm1, %v15218_v63 }
 0x3ab   :  { %v3212_v14 = vadd.f32 %v3020_v56, %v2492_v34  ;;  %v11771_v20 = vpop.f32.mrf.mxu0  ;;  %11933 = vmatprep.mubr.msk.f32.mxu1 %vm13222_vm1, %v15218_v63 }
 0x3ac   :  { %4124 = vst.msk [vmem:[#allocation4 + $0xf0] sm:$0xff] %vm722_vm2, %v4059_v25  ;;  %v11577_v53 = vpop.f32.mrf.mxu1  ;;  %v3340_v10 = vld [vmem:[#allocation4 + $0xf8] sm:$0xff]  ;;  %v2499_v20 = vld [vmem:[#allocation4 + $0x140] sm:$0xff] }
 0x3ad   :  { %3277 = vst.msk [vmem:[#allocation4 + $0x108] sm:$0xff] %vm722_vm2, %v3212_v14  ;;  %v3860_v36 = vpop.f32.mrf.mxu0  ;;  %12128 = vmatmul.mubr.msk.f32.gmra.mxu0 %vm879_vm3, %v4240_v40  ;;  %v4247_v14 = vld [vmem:[#allocation3 + $0x128] sm:$0xff] }
 0x3ae   :  { %v3025_v0 = vpop.f32.mrf.mxu1  ;;  %v4060_v19 = vadd.f32 %v3860_v36, %v3340_v10  ;;  %11934 = vmatmul.mubr.msk.f32.gmra.mxu1 %vm879_vm3, %v4241_v3  ;;  %12130 = vmatprep.mubr.msk.f32.mxu0 %vm13222_vm1, %v15218_v63 }
 0x3af   :  { %v3213_v49 = vadd.f32 %v3025_v0, %v2493_v46  ;;  %v11774_v12 = vpop.f32.mrf.mxu0  ;;  %11936 = vmatprep.mubr.msk.f32.mxu1 %vm13222_vm1, %v15218_v63 }
 0x3b0   :  { %4125 = vst.msk [vmem:[#allocation4 + $0xf8] sm:$0xff] %vm722_vm2, %v4060_v19  ;;  %v11580_v58 = vpop.f32.mrf.mxu1  ;;  %v3341_v21 = vld [vmem:[#allocation4 + $0x100] sm:$0xff]  ;;  %v2500_v12 = vld [vmem:[#allocation4 + $0x148] sm:$0xff] }
 0x3b1   :  { %3278 = vst.msk [vmem:[#allocation4 + $0x110] sm:$0xff] %vm722_vm2, %v3213_v49  ;;  %v3865_v31 = vpop.f32.mrf.mxu0  ;;  %12131 = vmatmul.mubr.msk.f32.gmra.mxu0 %vm879_vm3, %v4241_v3  ;;  %v4248_v49 = vld [vmem:[#allocation3 + $0x130] sm:$0xff] }
 0x3b2   :  { %v3030_v11 = vpop.f32.mrf.mxu1  ;;  %v4061_v23 = vadd.f32 %v3865_v31, %v3341_v21  ;;  %11937 = vmatmul.mubr.msk.f32.gmra.mxu1 %vm879_vm3, %v4242_v13  ;;  %12133 = vmatprep.mubr.msk.f32.mxu0 %vm13222_vm1, %v15218_v63 }
 0x3b3   :  { %v3214_v39 = vadd.f32 %v3030_v11, %v2494_v44  ;;  %v11777_v52 = vpop.f32.mrf.mxu0  ;;  %11939 = vmatprep.mubr.msk.f32.mxu1 %vm13222_vm1, %v15218_v63 }
 0x3b4   :  { %4126 = vst.msk [vmem:[#allocation4 + $0x100] sm:$0xff] %vm722_vm2, %v4061_v23  ;;  %v11583_v33 = vpop.f32.mrf.mxu1  ;;  %v3342_v47 = vld [vmem:[#allocation4 + $0x108] sm:$0xff] }
 0x3b5   :  { %3279 = vst.msk [vmem:[#allocation4 + $0x118] sm:$0xff] %vm722_vm2, %v3214_v39  ;;  %v3870_v50 = vpop.f32.mrf.mxu0  ;;  %12134 = vmatmul.mubr.msk.f32.gmra.mxu0 %vm879_vm3, %v4242_v13  ;;  %v4249_v23 = vld [vmem:[#allocation3 + $0x138] sm:$0xff]  ;;  %v2501_v39 = vld [vmem:[#allocation4 + $0x150] sm:$0xff] }
 0x3b6   :  { %v3035_v18 = vpop.f32.mrf.mxu1  ;;  %v4062_v6 = vadd.f32 %v3870_v50, %v3342_v47  ;;  %11940 = vmatmul.mubr.msk.f32.gmra.mxu1 %vm879_vm3, %v4243_v59  ;;  %12136 = vmatprep.mubr.msk.f32.mxu0 %vm13222_vm1, %v15218_v63 }
 0x3b7   :  { %v3215_v54 = vadd.f32 %v3035_v18, %v2495_v22  ;;  %v11780_v1 = vpop.f32.mrf.mxu0  ;;  %11942 = vmatprep.mubr.msk.f32.mxu1 %vm13222_vm1, %v15218_v63 }
 0x3b8   :  { %4127 = vst.msk [vmem:[#allocation4 + $0x108] sm:$0xff] %vm722_vm2, %v4062_v6  ;;  %v11586_v7 = vpop.f32.mrf.mxu1  ;;  %v3343_v28 = vld [vmem:[#allocation4 + $0x110] sm:$0xff] }
 0x3b9   :  { %3280 = vst.msk [vmem:[#allocation4 + $0x120] sm:$0xff] %vm722_vm2, %v3215_v54  ;;  %v3875_v55 = vpop.f32.mrf.mxu0  ;;  %12137 = vmatmul.mubr.msk.f32.gmra.mxu0 %vm879_vm3, %v4243_v59  ;;  %v4250_v6 = vld [vmem:[#allocation3 + $0x140] sm:$0xff]  ;;  %v2502_v54 = vld [vmem:[#allocation4 + $0x158] sm:$0xff] }
 0x3ba   :  { %v3040_v48 = vpop.f32.mrf.mxu1  ;;  %v4063_v27 = vadd.f32 %v3875_v55, %v3343_v28  ;;  %11943 = vmatmul.mubr.msk.f32.gmra.mxu1 %vm879_vm3, %v4244_v43  ;;  %12139 = vmatprep.mubr.msk.f32.mxu0 %vm13222_vm1, %v15218_v63 }
 0x3bb   :  { %v3216_v42 = vadd.f32 %v3040_v48, %v2496_v38  ;;  %v11783_v62 = vpop.f32.mrf.mxu0  ;;  %11945 = vmatprep.mubr.msk.f32.mxu1 %vm13222_vm1, %v15218_v63  ;;  %v4251_v48 = vld [vmem:[#allocation3 + $0x148] sm:$0xff] }
 0x3bc   :  { %4128 = vst.msk [vmem:[#allocation4 + $0x110] sm:$0xff] %vm722_vm2, %v4063_v27  ;;  %v11589_v32 = vpop.f32.mrf.mxu1  ;;  %v3344_v16 = vld [vmem:[#allocation4 + $0x118] sm:$0xff]  ;;  %v2503_v27 = vld [vmem:[#allocation4 + $0x160] sm:$0xff] }
 0x3bd   :  { %3281 = vst.msk [vmem:[#allocation4 + $0x128] sm:$0xff] %vm722_vm2, %v3216_v42  ;;  %v3880_v2 = vpop.f32.mrf.mxu0  ;;  %12140 = vmatmul.mubr.msk.f32.gmra.mxu0 %vm879_vm3, %v4244_v43 }
 0x3be   :  { %v3045_v26 = vpop.f32.mrf.mxu1  ;;  %v4064_v29 = vadd.f32 %v3880_v2, %v3344_v16  ;;  %11946 = vmatmul.mubr.msk.f32.gmra.mxu1 %vm879_vm3, %v4245_v57  ;;  %12142 = vmatprep.mubr.msk.f32.mxu0 %vm13222_vm1, %v15218_v63 }
 0x3bf   :  { %v3217_v61 = vadd.f32 %v3045_v26, %v2497_v15  ;;  %v11786_v30 = vpop.f32.mrf.mxu0  ;;  %11948 = vmatprep.mubr.msk.f32.mxu1 %vm13222_vm1, %v15218_v63  ;;  %v4252_v26 = vld [vmem:[#allocation3 + $0x150] sm:$0xff] }
 0x3c0   :  { %4129 = vst.msk [vmem:[#allocation4 + $0x118] sm:$0xff] %vm722_vm2, %v4064_v29  ;;  %v11592_v8 = vpop.f32.mrf.mxu1  ;;  %v3345_v4 = vld [vmem:[#allocation4 + $0x120] sm:$0xff]  ;;  %v2504_v29 = vld [vmem:[#allocation4 + $0x168] sm:$0xff] }
 0x3c1   :  { %3282 = vst.msk [vmem:[#allocation4 + $0x130] sm:$0xff] %vm722_vm2, %v3217_v61  ;;  %v3885_v5 = vpop.f32.mrf.mxu0  ;;  %12143 = vmatmul.mubr.msk.f32.gmra.mxu0 %vm879_vm3, %v4245_v57 }
 0x3c2   :  { %v3050_v9 = vpop.f32.mrf.mxu1  ;;  %v4065_v17 = vadd.f32 %v3885_v5, %v3345_v4  ;;  %11949 = vmatmul.mubr.msk.f32.gmra.mxu1 %vm879_vm3, %v4246_v60  ;;  %12145 = vmatprep.mubr.msk.f32.mxu0 %vm13222_vm1, %v15218_v63 }
 0x3c3   :  { %v3218_v51 = vadd.f32 %v3050_v9, %v2498_v37  ;;  %v11789_v40 = vpop.f32.mrf.mxu0  ;;  %11951 = vmatprep.mubr.msk.f32.mxu1 %vm13222_vm1, %v15218_v63  ;;  %v4253_v9 = vld [vmem:[#allocation3 + $0x158] sm:$0xff] }
 0x3c4   :  { %4130 = vst.msk [vmem:[#allocation4 + $0x120] sm:$0xff] %vm722_vm2, %v4065_v17  ;;  %v11595_v34 = vpop.f32.mrf.mxu1  ;;  %v3346_v56 = vld [vmem:[#allocation4 + $0x128] sm:$0xff]  ;;  %v2505_v17 = vld [vmem:[#allocation4 + $0x170] sm:$0xff] }
 0x3c5   :  { %3283 = vst.msk [vmem:[#allocation4 + $0x138] sm:$0xff] %vm722_vm2, %v3218_v51  ;;  %v3890_v25 = vpop.f32.mrf.mxu0  ;;  %12146 = vmatmul.mubr.msk.f32.gmra.mxu0 %vm879_vm3, %v4246_v60 }
 0x3c6   :  { %v3055_v53 = vpop.f32.mrf.mxu1  ;;  %v4066_v10 = vadd.f32 %v3890_v25, %v3346_v56  ;;  %11952 = vmatmul.mubr.msk.f32.gmra.mxu1 %vm879_vm3, %v4247_v14  ;;  %12148 = vmatprep.mubr.msk.f32.mxu0 %vm13222_vm1, %v15218_v63 }
 0x3c7   :  { %v3219_v36 = vadd.f32 %v3055_v53, %v2499_v20  ;;  %v11792_v3 = vpop.f32.mrf.mxu0  ;;  %11954 = vmatprep.mubr.msk.f32.mxu1 %vm13222_vm1, %v15218_v63  ;;  %v4254_v53 = vld [vmem:[#allocation3 + $0x160] sm:$0xff] }
 0x3c8   :  { %4131 = vst.msk [vmem:[#allocation4 + $0x128] sm:$0xff] %vm722_vm2, %v4066_v10  ;;  %v11598_v46 = vpop.f32.mrf.mxu1  ;;  %v3347_v0 = vld [vmem:[#allocation4 + $0x130] sm:$0xff]  ;;  %v2506_v10 = vld [vmem:[#allocation4 + $0x178] sm:$0xff] }
 0x3c9   :  { %3284 = vst.msk [vmem:[#allocation4 + $0x140] sm:$0xff] %vm722_vm2, %v3219_v36  ;;  %v3895_v19 = vpop.f32.mrf.mxu0  ;;  %12149 = vmatmul.mubr.msk.f32.gmra.mxu0 %vm879_vm3, %v4247_v14 }
 0x3ca   :  { %v3060_v58 = vpop.f32.mrf.mxu1  ;;  %v4067_v21 = vadd.f32 %v3895_v19, %v3347_v0  ;;  %11955 = vmatmul.mubr.msk.f32.gmra.mxu1 %vm879_vm3, %v4248_v49  ;;  %12151 = vmatprep.mubr.msk.f32.mxu0 %vm13222_vm1, %v15218_v63 }
 0x3cb   :  { %v3220_v31 = vadd.f32 %v3060_v58, %v2500_v12  ;;  %v11795_v13 = vpop.f32.mrf.mxu0  ;;  %11957 = vmatprep.mubr.msk.f32.mxu1 %vm13222_vm1, %v15218_v63  ;;  %v4255_v58 = vld [vmem:[#allocation3 + $0x168] sm:$0xff] }
 0x3cc   :  { %4132 = vst.msk [vmem:[#allocation4 + $0x130] sm:$0xff] %vm722_vm2, %v4067_v21  ;;  %v11601_v24 = vpop.f32.mrf.mxu1  ;;  %v3348_v44 = vld [vmem:[#allocation4 + $0x138] sm:$0xff]  ;;  %v2507_v21 = vld [vmem:[#allocation4 + $0x180] sm:$0xff] }
 0x3cd   :  { %3285 = vst.msk [vmem:[#allocation4 + $0x148] sm:$0xff] %vm722_vm2, %v3220_v31  ;;  %v3900_v11 = vpop.f32.mrf.mxu0  ;;  %12152 = vmatmul.mubr.msk.f32.gmra.mxu0 %vm879_vm3, %v4248_v49 }
 0x3ce   :  { %v3065_v52 = vpop.f32.mrf.mxu1  ;;  %v4068_v33 = vadd.f32 %v3900_v11, %v3348_v44  ;;  %11958 = vmatmul.mubr.msk.f32.gmra.mxu1 %vm879_vm3, %v4249_v23  ;;  %12154 = vmatprep.mubr.msk.f32.mxu0 %vm13222_vm1, %v15218_v63 }
 0x3cf   :  { %v3221_v47 = vadd.f32 %v3065_v52, %v2501_v39  ;;  %v11798_v50 = vpop.f32.mrf.mxu0  ;;  %11960 = vmatprep.mubr.msk.f32.mxu1 %vm13222_vm1, %v15218_v63  ;;  %v4256_v52 = vld [vmem:[#allocation3 + $0x170] sm:$0xff] }
 0x3d0   :  { %4133 = vst.msk [vmem:[#allocation4 + $0x138] sm:$0xff] %vm722_vm2, %v4068_v33  ;;  %v11604_v59 = vpop.f32.mrf.mxu1  ;;  %v3349_v22 = vld [vmem:[#allocation4 + $0x140] sm:$0xff]  ;;  %v2508_v33 = vld [vmem:[#allocation4 + $0x188] sm:$0xff] }
 0x3d1   :  { %3286 = vst.msk [vmem:[#allocation4 + $0x150] sm:$0xff] %vm722_vm2, %v3221_v47  ;;  %v3905_v18 = vpop.f32.mrf.mxu0  ;;  %12155 = vmatmul.mubr.msk.f32.gmra.mxu0 %vm879_vm3, %v4249_v23 }
 0x3d2   :  { %v3070_v1 = vpop.f32.mrf.mxu1  ;;  %v4069_v7 = vadd.f32 %v3905_v18, %v3349_v22  ;;  %11961 = vmatmul.mubr.msk.f32.gmra.mxu1 %vm879_vm3, %v4250_v6  ;;  %12157 = vmatprep.mubr.msk.f32.mxu0 %vm13222_vm1, %v15218_v63 }
 0x3d3   :  { %v3222_v28 = vadd.f32 %v3070_v1, %v2502_v54  ;;  %v11801_v55 = vpop.f32.mrf.mxu0  ;;  %11963 = vmatprep.mubr.msk.f32.mxu1 %vm13222_vm1, %v15218_v63  ;;  %v4257_v1 = vld [vmem:[#allocation3 + $0x178] sm:$0xff] }
 0x3d4   :  { %4134 = vst.msk [vmem:[#allocation4 + $0x140] sm:$0xff] %vm722_vm2, %v4069_v7  ;;  %v11607_v43 = vpop.f32.mrf.mxu1  ;;  %v3350_v35 = vld [vmem:[#allocation4 + $0x148] sm:$0xff]  ;;  %v2509_v7 = vld [vmem:[#allocation4 + $0x190] sm:$0xff] }
 0x3d5   :  { %3287 = vst.msk [vmem:[#allocation4 + $0x158] sm:$0xff] %vm722_vm2, %v3222_v28  ;;  %v3910_v38 = vpop.f32.mrf.mxu0  ;;  %12158 = vmatmul.mubr.msk.f32.gmra.mxu0 %vm879_vm3, %v4250_v6 }
 0x3d6   :  { %v3075_v42 = vpop.f32.mrf.mxu1  ;;  %v4070_v62 = vadd.f32 %v3910_v38, %v3350_v35  ;;  %11964 = vmatmul.mubr.msk.f32.gmra.mxu1 %vm879_vm3, %v4251_v48  ;;  %12160 = vmatprep.mubr.msk.f32.mxu0 %vm13222_vm1, %v15218_v63 }
 0x3d7   :  { %v3223_v32 = vadd.f32 %v3075_v42, %v2503_v27  ;;  %v11804_v16 = vpop.f32.mrf.mxu0  ;;  %11966 = vmatprep.mubr.msk.f32.mxu1 %vm13222_vm1, %v15218_v63  ;;  %v4258_v42 = vld [vmem:[#allocation3 + $0x180] sm:$0xff] }
 0x3d8   :  { %4135 = vst.msk [vmem:[#allocation4 + $0x148] sm:$0xff] %vm722_vm2, %v4070_v62  ;;  %v11610_v2 = vpop.f32.mrf.mxu1  ;;  %v3351_v57 = vld [vmem:[#allocation4 + $0x150] sm:$0xff]  ;;  %v2510_v62 = vld [vmem:[#allocation4 + $0x198] sm:$0xff] }
 0x3d9   :  { %3288 = vst.msk [vmem:[#allocation4 + $0x160] sm:$0xff] %vm722_vm2, %v3223_v32  ;;  %v3915_v15 = vpop.f32.mrf.mxu0  ;;  %12161 = vmatmul.mubr.msk.f32.gmra.mxu0 %vm879_vm3, %v4251_v48 }
 0x3da   :  { %v3080_v61 = vpop.f32.mrf.mxu1  ;;  %v4071_v30 = vadd.f32 %v3915_v15, %v3351_v57  ;;  %11967 = vmatmul.mubr.msk.f32.gmra.mxu1 %vm879_vm3, %v4252_v26  ;;  %12163 = vmatprep.mubr.msk.f32.mxu0 %vm13222_vm1, %v15218_v63 }
 0x3db   :  { %v3224_v8 = vadd.f32 %v3080_v61, %v2504_v29  ;;  %v11807_v4 = vpop.f32.mrf.mxu0  ;;  %11969 = vmatprep.mubr.msk.f32.mxu1 %vm13222_vm1, %v15218_v63  ;;  %v4259_v61 = vld [vmem:[#allocation3 + $0x188] sm:$0xff] }
 0x3dc   :  { %4136 = vst.msk [vmem:[#allocation4 + $0x150] sm:$0xff] %vm722_vm2, %v4071_v30  ;;  %v11613_v5 = vpop.f32.mrf.mxu1  ;;  %v3352_v60 = vld [vmem:[#allocation4 + $0x158] sm:$0xff]  ;;  %v2511_v30 = vld [vmem:[#allocation4 + $0x1a0] sm:$0xff] }
 0x3dd   :  { %3289 = vst.msk [vmem:[#allocation4 + $0x168] sm:$0xff] %vm722_vm2, %v3224_v8  ;;  %v3920_v37 = vpop.f32.mrf.mxu0  ;;  %12164 = vmatmul.mubr.msk.f32.gmra.mxu0 %vm879_vm3, %v4252_v26 }
 0x3de   :  { %v3085_v51 = vpop.f32.mrf.mxu1  ;;  %v4072_v40 = vadd.f32 %v3920_v37, %v3352_v60  ;;  %11970 = vmatmul.mubr.msk.f32.gmra.mxu1 %vm879_vm3, %v4253_v9  ;;  %12166 = vmatprep.mubr.msk.f32.mxu0 %vm13222_vm1, %v15218_v63 }
 0x3df   :  { %v3225_v34 = vadd.f32 %v3085_v51, %v2505_v17  ;;  %v11810_v56 = vpop.f32.mrf.mxu0  ;;  %11972 = vmatprep.mubr.msk.f32.mxu1 %vm13222_vm1, %v15218_v63  ;;  %v4260_v51 = vld [vmem:[#allocation3 + $0x190] sm:$0xff] }
 0x3e0   :  { %4137 = vst.msk [vmem:[#allocation4 + $0x158] sm:$0xff] %vm722_vm2, %v4072_v40  ;;  %v11616_v25 = vpop.f32.mrf.mxu1  ;;  %v3353_v14 = vld [vmem:[#allocation4 + $0x160] sm:$0xff]  ;;  %v2512_v40 = vld [vmem:[#allocation4 + $0x1a8] sm:$0xff] }
 0x3e1   :  { %3290 = vst.msk [vmem:[#allocation4 + $0x170] sm:$0xff] %vm722_vm2, %v3225_v34  ;;  %v3925_v20 = vpop.f32.mrf.mxu0  ;;  %12167 = vmatmul.mubr.msk.f32.gmra.mxu0 %vm879_vm3, %v4253_v9 }
 0x3e2   :  { %v3090_v36 = vpop.f32.mrf.mxu1  ;;  %v4073_v3 = vadd.f32 %v3925_v20, %v3353_v14  ;;  %11973 = vmatmul.mubr.msk.f32.gmra.mxu1 %vm879_vm3, %v4254_v53  ;;  %12169 = vmatprep.mubr.msk.f32.mxu0 %vm13222_vm1, %v15218_v63 }
 0x3e3   :  { %v3226_v46 = vadd.f32 %v3090_v36, %v2506_v10  ;;  %v11813_v0 = vpop.f32.mrf.mxu0  ;;  %11975 = vmatprep.mubr.msk.f32.mxu1 %vm13222_vm1, %v15218_v63  ;;  %v4261_v36 = vld [vmem:[#allocation3 + $0x198] sm:$0xff] }
 0x3e4   :  { %4138 = vst.msk [vmem:[#allocation4 + $0x160] sm:$0xff] %vm722_vm2, %v4073_v3  ;;  %v11619_v19 = vpop.f32.mrf.mxu1  ;;  %v3354_v49 = vld [vmem:[#allocation4 + $0x168] sm:$0xff]  ;;  %v2513_v3 = vld [vmem:[#allocation4 + $0x1b0] sm:$0xff] }
 0x3e5   :  { %3291 = vst.msk [vmem:[#allocation4 + $0x178] sm:$0xff] %vm722_vm2, %v3226_v46  ;;  %v3930_v12 = vpop.f32.mrf.mxu0  ;;  %12170 = vmatmul.mubr.msk.f32.gmra.mxu0 %vm879_vm3, %v4254_v53 }
 0x3e6   :  { %v3095_v31 = vpop.f32.mrf.mxu1  ;;  %v4074_v13 = vadd.f32 %v3930_v12, %v3354_v49  ;;  %11976 = vmatmul.mubr.msk.f32.gmra.mxu1 %vm879_vm3, %v4255_v58  ;;  %12172 = vmatprep.mubr.msk.f32.mxu0 %vm13222_vm1, %v15218_v63 }
 0x3e7   :  { %v3227_v24 = vadd.f32 %v3095_v31, %v2507_v21  ;;  %v11816_v44 = vpop.f32.mrf.mxu0  ;;  %11978 = vmatprep.mubr.msk.f32.mxu1 %vm13222_vm1, %v15218_v63  ;;  %v4262_v31 = vld [vmem:[#allocation3 + $0x1a0] sm:$0xff] }
 0x3e8   :  { %4139 = vst.msk [vmem:[#allocation4 + $0x168] sm:$0xff] %vm722_vm2, %v4074_v13  ;;  %v11622_v11 = vpop.f32.mrf.mxu1  ;;  %v3355_v23 = vld [vmem:[#allocation4 + $0x170] sm:$0xff]  ;;  %v2514_v13 = vld [vmem:[#allocation4 + $0x1b8] sm:$0xff] }
 0x3e9   :  { %3292 = vst.msk [vmem:[#allocation4 + $0x180] sm:$0xff] %vm722_vm2, %v3227_v24  ;;  %v3935_v39 = vpop.f32.mrf.mxu0  ;;  %12173 = vmatmul.mubr.msk.f32.gmra.mxu0 %vm879_vm3, %v4255_v58 }
 0x3ea   :  { %v3100_v47 = vpop.f32.mrf.mxu1  ;;  %v4075_v50 = vadd.f32 %v3935_v39, %v3355_v23  ;;  %11979 = vmatmul.mubr.msk.f32.gmra.mxu1 %vm879_vm3, %v4256_v52  ;;  %12175 = vmatprep.mubr.msk.f32.mxu0 %vm13222_vm1, %v15218_v63 }
 0x3eb   :  { %v3228_v59 = vadd.f32 %v3100_v47, %v2508_v33  ;;  %v11819_v22 = vpop.f32.mrf.mxu0  ;;  %11981 = vmatprep.mubr.msk.f32.mxu1 %vm13222_vm1, %v15218_v63  ;;  %v4263_v47 = vld [vmem:[#allocation3 + $0x1a8] sm:$0xff] }
 0x3ec   :  { %4140 = vst.msk [vmem:[#allocation4 + $0x170] sm:$0xff] %vm722_vm2, %v4075_v50  ;;  %v11625_v18 = vpop.f32.mrf.mxu1  ;;  %v3356_v6 = vld [vmem:[#allocation4 + $0x178] sm:$0xff]  ;;  %v2515_v50 = vld [vmem:[#allocation4 + $0x1c0] sm:$0xff] }
 0x3ed   :  { %3293 = vst.msk [vmem:[#allocation4 + $0x188] sm:$0xff] %vm722_vm2, %v3228_v59  ;;  %v3940_v54 = vpop.f32.mrf.mxu0  ;;  %12176 = vmatmul.mubr.msk.f32.gmra.mxu0 %vm879_vm3, %v4256_v52 }
 0x3ee   :  { %v3105_v28 = vpop.f32.mrf.mxu1  ;;  %v4076_v55 = vadd.f32 %v3940_v54, %v3356_v6  ;;  %11982 = vmatmul.mubr.msk.f32.gmra.mxu1 %vm879_vm3, %v4257_v1  ;;  %12178 = vmatprep.mubr.msk.f32.mxu0 %vm13222_vm1, %v15218_v63 }
 0x3ef   :  { %v3229_v43 = vadd.f32 %v3105_v28, %v2509_v7  ;;  %v11822_v35 = vpop.f32.mrf.mxu0  ;;  %11984 = vmatprep.mubr.msk.f32.mxu1 %vm13222_vm1, %v15218_v63  ;;  %v4264_v28 = vld [vmem:[#allocation3 + $0x1b0] sm:$0xff] }
 0x3f0   :  { %4141 = vst.msk [vmem:[#allocation4 + $0x178] sm:$0xff] %vm722_vm2, %v4076_v55  ;;  %v11628_v38 = vpop.f32.mrf.mxu1  ;;  %v3357_v48 = vld [vmem:[#allocation4 + $0x180] sm:$0xff]  ;;  %v2516_v55 = vld [vmem:[#allocation4 + $0x1c8] sm:$0xff] }
 0x3f1   :  { %3294 = vst.msk [vmem:[#allocation4 + $0x190] sm:$0xff] %vm722_vm2, %v3229_v43  ;;  %v3945_v27 = vpop.f32.mrf.mxu0  ;;  %12179 = vmatmul.mubr.msk.f32.gmra.mxu0 %vm879_vm3, %v4257_v1  ;;  %v15499_v38 = vld [vmem:[#allocation2 + $0x1c0] sm:$0xff] }
 0x3f2   :  { %v3110_v32 = vpop.f32.mrf.mxu1  ;;  %v4077_v16 = vadd.f32 %v3945_v27, %v3357_v48  ;;  %11985 = vmatmul.mubr.msk.f32.gmra.mxu1 %vm879_vm3, %v4258_v42  ;;  %12181 = vmatprep.mubr.msk.f32.mxu0 %vm13222_vm1, %v15218_v63 }
 0x3f3   :  { %v3230_v2 = vadd.f32 %v3110_v32, %v2510_v62  ;;  %v11825_v57 = vpop.f32.mrf.mxu0  ;;  %11987 = vmatprep.mubr.msk.f32.mxu1 %vm13222_vm1, %v15218_v63  ;;  %v4265_v32 = vld [vmem:[#allocation3 + $0x1b8] sm:$0xff] }
 0x3f4   :  { %4142 = vst.msk [vmem:[#allocation4 + $0x180] sm:$0xff] %vm722_vm2, %v4077_v16  ;;  %v11631_v15 = vpop.f32.mrf.mxu1  ;;  %v3358_v26 = vld [vmem:[#allocation4 + $0x188] sm:$0xff]  ;;  %v2517_v16 = vld [vmem:[#allocation4 + $0x1d0] sm:$0xff] }
 0x3f5   :  { %3295 = vst.msk [vmem:[#allocation4 + $0x198] sm:$0xff] %vm722_vm2, %v3230_v2  ;;  %v3950_v29 = vpop.f32.mrf.mxu0  ;;  %12182 = vmatmul.mubr.msk.f32.gmra.mxu0 %vm879_vm3, %v4258_v42 }
 0x3f6   :  { %v3115_v8 = vpop.f32.mrf.mxu1  ;;  %v4078_v4 = vadd.f32 %v3950_v29, %v3358_v26  ;;  %11988 = vmatmul.mubr.msk.f32.gmra.mxu1 %vm879_vm3, %v4259_v61  ;;  %12184 = vmatprep.mubr.msk.f32.mxu0 %vm13222_vm1, %v15218_v63 }
 0x3f7   :  { %v3231_v5 = vadd.f32 %v3115_v8, %v2511_v30  ;;  %v11828_v60 = vpop.f32.mrf.mxu0  ;;  %11990 = vmatprep.mubr.msk.f32.mxu1 %vm13222_vm1, %v15218_v63  ;;  %v4266_v8 = vld [vmem:[#allocation3 + $0x1c0] sm:$0xff] }
 0x3f8   :  { %4143 = vst.msk [vmem:[#allocation4 + $0x188] sm:$0xff] %vm722_vm2, %v4078_v4  ;;  %v11634_v37 = vpop.f32.mrf.mxu1  ;;  %v3359_v9 = vld [vmem:[#allocation4 + $0x190] sm:$0xff]  ;;  %v2518_v4 = vld [vmem:[#allocation4 + $0x1d8] sm:$0xff] }
 0x3f9   :  { %3296 = vst.msk [vmem:[#allocation4 + $0x1a0] sm:$0xff] %vm722_vm2, %v3231_v5  ;;  %v3955_v17 = vpop.f32.mrf.mxu0  ;;  %12185 = vmatmul.mubr.msk.f32.gmra.mxu0 %vm879_vm3, %v4259_v61 }
 0x3fa   :  { %v3120_v34 = vpop.f32.mrf.mxu1  ;;  %v4079_v56 = vadd.f32 %v3955_v17, %v3359_v9  ;;  %11991 = vmatmul.mubr.msk.f32.gmra.mxu1 %vm879_vm3, %v4260_v51  ;;  %12187 = vmatprep.mubr.msk.f32.mxu0 %vm13222_vm1, %v15218_v63 }
 0x3fb   :  { %v3232_v25 = vadd.f32 %v3120_v34, %v2512_v40  ;;  %v11831_v14 = vpop.f32.mrf.mxu0  ;;  %11993 = vmatprep.mubr.msk.f32.mxu1 %vm13222_vm1, %v15218_v63  ;;  %v4267_v34 = vld [vmem:[#allocation3 + $0x1c8] sm:$0xff] }
 0x3fc   :  { %4144 = vst.msk [vmem:[#allocation4 + $0x190] sm:$0xff] %vm722_vm2, %v4079_v56  ;;  %v11637_v20 = vpop.f32.mrf.mxu1  ;;  %v3360_v53 = vld [vmem:[#allocation4 + $0x198] sm:$0xff]  ;;  %v2519_v56 = vld [vmem:[#allocation4 + $0x1e0] sm:$0xff] }
 0x3fd   :  { %3297 = vst.msk [vmem:[#allocation4 + $0x1a8] sm:$0xff] %vm722_vm2, %v3232_v25  ;;  %v3960_v10 = vpop.f32.mrf.mxu0  ;;  %12188 = vmatmul.mubr.msk.f32.gmra.mxu0 %vm879_vm3, %v4260_v51 }
 0x3fe   :  { %v3125_v46 = vpop.f32.mrf.mxu1  ;;  %v4080_v0 = vadd.f32 %v3960_v10, %v3360_v53  ;;  %11994 = vmatmul.mubr.msk.f32.gmra.mxu1 %vm879_vm3, %v4261_v36  ;;  %12190 = vmatprep.mubr.msk.f32.mxu0 %vm13222_vm1, %v15218_v63 }
 0x3ff   :  { %v3233_v19 = vadd.f32 %v3125_v46, %v2513_v3  ;;  %v11834_v49 = vpop.f32.mrf.mxu0  ;;  %11996 = vmatprep.mubr.msk.f32.mxu1 %vm13222_vm1, %v15218_v63  ;;  %v4268_v46 = vld [vmem:[#allocation3 + $0x1d0] sm:$0xff] }
 0x400   :  { %4145 = vst.msk [vmem:[#allocation4 + $0x198] sm:$0xff] %vm722_vm2, %v4080_v0  ;;  %v11640_v12 = vpop.f32.mrf.mxu1  ;;  %v3361_v58 = vld [vmem:[#allocation4 + $0x1a0] sm:$0xff]  ;;  %v2520_v0 = vld [vmem:[#allocation4 + $0x1e8] sm:$0xff] }
 0x401   :  { %3298 = vst.msk [vmem:[#allocation4 + $0x1b0] sm:$0xff] %vm722_vm2, %v3233_v19  ;;  %v3965_v21 = vpop.f32.mrf.mxu0  ;;  %12191 = vmatmul.mubr.msk.f32.gmra.mxu0 %vm879_vm3, %v4261_v36 }
 0x402   :  { %v3130_v24 = vpop.f32.mrf.mxu1  ;;  %v4081_v44 = vadd.f32 %v3965_v21, %v3361_v58  ;;  %11997 = vmatmul.mubr.msk.f32.gmra.mxu1 %vm879_vm3, %v4262_v31  ;;  %12193 = vmatprep.mubr.msk.f32.mxu0 %vm13222_vm1, %v15218_v63 }
 0x403   :  { %v3234_v11 = vadd.f32 %v3130_v24, %v2514_v13  ;;  %v11837_v23 = vpop.f32.mrf.mxu0  ;;  %11999 = vmatprep.mubr.msk.f32.mxu1 %vm13222_vm1, %v15218_v63  ;;  %v4269_v24 = vld [vmem:[#allocation3 + $0x1d8] sm:$0xff] }
 0x404   :  { %4146 = vst.msk [vmem:[#allocation4 + $0x1a0] sm:$0xff] %vm722_vm2, %v4081_v44  ;;  %v11643_v39 = vpop.f32.mrf.mxu1  ;;  %v3362_v52 = vld [vmem:[#allocation4 + $0x1a8] sm:$0xff]  ;;  %v2521_v44 = vld [vmem:[#allocation4 + $0x1f0] sm:$0xff] }
 0x405   :  { %3299 = vst.msk [vmem:[#allocation4 + $0x1b8] sm:$0xff] %vm722_vm2, %v3234_v11  ;;  %v3970_v33 = vpop.f32.mrf.mxu0  ;;  %12194 = vmatmul.mubr.msk.f32.gmra.mxu0 %vm879_vm3, %v4262_v31 }
 0x406   :  { %v3135_v59 = vpop.f32.mrf.mxu1  ;;  %v4082_v22 = vadd.f32 %v3970_v33, %v3362_v52  ;;  %12000 = vmatmul.mubr.msk.f32.gmra.mxu1 %vm879_vm3, %v4263_v47  ;;  %12196 = vmatprep.mubr.msk.f32.mxu0 %vm13222_vm1, %v15218_v63 }
 0x407   :  { %v3235_v18 = vadd.f32 %v3135_v59, %v2515_v50  ;;  %v11840_v6 = vpop.f32.mrf.mxu0  ;;  %12002 = vmatprep.mubr.msk.f32.mxu1 %vm13222_vm1, %v15218_v63  ;;  %v4270_v59 = vld [vmem:[#allocation3 + $0x1e0] sm:$0xff] }
 0x408   :  { %4147 = vst.msk [vmem:[#allocation4 + $0x1a8] sm:$0xff] %vm722_vm2, %v4082_v22  ;;  %v11646_v54 = vpop.f32.mrf.mxu1  ;;  %v3363_v1 = vld [vmem:[#allocation4 + $0x1b0] sm:$0xff]  ;;  %v2522_v22 = vld [vmem:[#allocation4 + $0x1f8] sm:$0xff] }
 0x409   :  { %3300 = vst.msk [vmem:[#allocation4 + $0x1c0] sm:$0xff] %vm722_vm2, %v3235_v18  ;;  %v3975_v7 = vpop.f32.mrf.mxu0  ;;  %12197 = vmatmul.mubr.msk.f32.gmra.mxu0 %vm879_vm3, %v4263_v47 }
 0x40a   :  { %v3140_v43 = vpop.f32.mrf.mxu1  ;;  %v4083_v35 = vadd.f32 %v3975_v7, %v3363_v1  ;;  %12003 = vmatmul.mubr.msk.f32.gmra.mxu1 %vm879_vm3, %v4264_v28  ;;  %12199 = vmatprep.mubr.msk.f32.mxu0 %vm13222_vm1, %v15499_v38 }
 0x40b   :  { %v3236_v63 = vadd.f32 %v3140_v43, %v2516_v55  ;;  %v11843_v48 = vpop.f32.mrf.mxu0  ;;  %12005 = vmatprep.mubr.msk.f32.mxu1 %vm13222_vm1, %v15499_v38  ;;  %v4271_v43 = vld [vmem:[#allocation3 + $0x1e8] sm:$0xff] }
 0x40c   :  { %4148 = vst.msk [vmem:[#allocation4 + $0x1b0] sm:$0xff] %vm722_vm2, %v4083_v35  ;;  %v11649_v27 = vpop.f32.mrf.mxu1  ;;  %v3364_v42 = vld [vmem:[#allocation4 + $0x1b8] sm:$0xff]  ;;  %v2523_v35 = vld [vmem:[#allocation4 + $0x200] sm:$0xff] }
 0x40d   :  { %3301 = vst.msk [vmem:[#allocation4 + $0x1c8] sm:$0xff] %vm722_vm2, %v3236_v63  ;;  %v3980_v62 = vpop.f32.mrf.mxu0  ;;  %12200 = vmatmul.mubr.msk.f32.gmra.mxu0 %vm879_vm3, %v4264_v28 }
 0x40e   :  { %v3145_v2 = vpop.f32.mrf.mxu1  ;;  %v4084_v57 = vadd.f32 %v3980_v62, %v3364_v42  ;;  %12006 = vmatmul.mubr.msk.f32.gmra.mxu1 %vm879_vm3, %v4265_v32  ;;  %12202 = vmatprep.mubr.msk.f32.mxu0 %vm13222_vm1, %v15499_v38 }
 0x40f   :  { %v3237_v15 = vadd.f32 %v3145_v2, %v2517_v16  ;;  %v11846_v26 = vpop.f32.mrf.mxu0  ;;  %12008 = vmatprep.mubr.msk.f32.mxu1 %vm13222_vm1, %v15499_v38  ;;  %v4272_v2 = vld [vmem:[#allocation3 + $0x1f0] sm:$0xff] }
 0x410   :  { %4149 = vst.msk [vmem:[#allocation4 + $0x1b8] sm:$0xff] %vm722_vm2, %v4084_v57  ;;  %v11652_v29 = vpop.f32.mrf.mxu1  ;;  %v3365_v61 = vld [vmem:[#allocation4 + $0x1c0] sm:$0xff] }
 0x411   :  { %3302 = vst.msk [vmem:[#allocation4 + $0x1d0] sm:$0xff] %vm722_vm2, %v3237_v15  ;;  %v3985_v30 = vpop.f32.mrf.mxu0  ;;  %12203 = vmatmul.mubr.msk.f32.gmra.mxu0 %vm879_vm3, %v4265_v32  ;;  %v4159_v15 = vld [vmem:[#allocation4] sm:$0xff] }
 0x412   :  { %v3150_v5 = vpop.f32.mrf.mxu1  ;;  %v4085_v60 = vadd.f32 %v3985_v30, %v3365_v61  ;;  %12009 = vmatmul.mubr.msk.f32.gmra.mxu1 %vm879_vm3, %v4266_v8  ;;  %12205 = vmatprep.mubr.msk.f32.mxu0 %vm13222_vm1, %v15499_v38 }
 0x413   :  { %v3238_v37 = vadd.f32 %v3150_v5, %v2518_v4  ;;  %v11849_v9 = vpop.f32.mrf.mxu0  ;;  %12011 = vmatprep.mubr.msk.f32.mxu1 %vm13222_vm1, %v15499_v38  ;;  %v4273_v5 = vld [vmem:[#allocation3 + $0x1f8] sm:$0xff] }
 0x414   :  { %4150 = vst.msk [vmem:[#allocation4 + $0x1c0] sm:$0xff] %vm722_vm2, %v4085_v60  ;;  %v11655_v17 = vpop.f32.mrf.mxu1  ;;  %v3366_v51 = vld [vmem:[#allocation4 + $0x1c8] sm:$0xff] }
 0x415   :  { %3303 = vst.msk [vmem:[#allocation4 + $0x1d8] sm:$0xff] %vm722_vm2, %v3238_v37  ;;  %v3990_v40 = vpop.f32.mrf.mxu0  ;;  %12206 = vmatmul.mubr.msk.f32.gmra.mxu0 %vm879_vm3, %v4266_v8  ;;  %v4160_v37 = vld [vmem:[#allocation4 + $0x8] sm:$0xff] }
 0x416   :  { %v3155_v25 = vpop.f32.mrf.mxu1  ;;  %v4086_v14 = vadd.f32 %v3990_v40, %v3366_v51  ;;  %12012 = vmatmul.mubr.msk.f32.gmra.mxu1 %vm879_vm3, %v4267_v34  ;;  %12208 = vmatprep.mubr.msk.f32.mxu0 %vm13222_vm1, %v15499_v38 }
 0x417   :  { %v3239_v20 = vadd.f32 %v3155_v25, %v2519_v56  ;;  %v11852_v53 = vpop.f32.mrf.mxu0  ;;  %12014 = vmatprep.mubr.msk.f32.mxu1 %vm13222_vm1, %v15499_v38  ;;  %v4274_v25 = vld [vmem:[#allocation3 + $0x200] sm:$0xff] }
 0x418   :  { %4151 = vst.msk [vmem:[#allocation4 + $0x1c8] sm:$0xff] %vm722_vm2, %v4086_v14  ;;  %v11658_v10 = vpop.f32.mrf.mxu1  ;;  %v3367_v36 = vld [vmem:[#allocation4 + $0x1d0] sm:$0xff] }
 0x419   :  { %3304 = vst.msk [vmem:[#allocation4 + $0x1e0] sm:$0xff] %vm722_vm2, %v3239_v20  ;;  %v3995_v3 = vpop.f32.mrf.mxu0  ;;  %12209 = vmatmul.mubr.msk.f32.gmra.mxu0 %vm879_vm3, %v4267_v34  ;;  %v4161_v20 = vld [vmem:[#allocation4 + $0x10] sm:$0xff] }
 0x41a   :  { %v3160_v19 = vpop.f32.mrf.mxu1  ;;  %v4087_v49 = vadd.f32 %v3995_v3, %v3367_v36  ;;  %12015 = vmatmul.mubr.msk.f32.gmra.mxu1 %vm879_vm3, %v4268_v46  ;;  %12211 = vmatprep.mubr.msk.f32.mxu0 %vm13222_vm1, %v15499_v38 }
 0x41b   :  { %v3240_v12 = vadd.f32 %v3160_v19, %v2520_v0  ;;  %v11855_v58 = vpop.f32.mrf.mxu0  ;;  %12017 = vmatprep.mubr.msk.f32.mxu1 %vm13222_vm1, %v15499_v38 }
 0x41c   :  { %4152 = vst.msk [vmem:[#allocation4 + $0x1d0] sm:$0xff] %vm722_vm2, %v4087_v49  ;;  %v11661_v21 = vpop.f32.mrf.mxu1  ;;  %v3368_v31 = vld [vmem:[#allocation4 + $0x1d8] sm:$0xff] }
 0x41d   :  { %3305 = vst.msk [vmem:[#allocation4 + $0x1e8] sm:$0xff] %vm722_vm2, %v3240_v12  ;;  %v4000_v13 = vpop.f32.mrf.mxu0  ;;  %12212 = vmatmul.mubr.msk.f32.gmra.mxu0 %vm879_vm3, %v4268_v46  ;;  %v4275_v46 = vld [vmem:[#allocation3 + $0x208] sm:$0xff] }
 0x41e   :  { %v3165_v11 = vpop.f32.mrf.mxu1  ;;  %v4088_v23 = vadd.f32 %v4000_v13, %v3368_v31  ;;  %12018 = vmatmul.mubr.msk.f32.gmra.mxu1 %vm879_vm3, %v4269_v24  ;;  %12214 = vmatprep.mubr.msk.f32.mxu0 %vm13222_vm1, %v15499_v38  ;;  %v4162_v49 = vld [vmem:[#allocation4 + $0x18] sm:$0xff] }
 0x41f   :  { %v3241_v39 = vadd.f32 %v3165_v11, %v2521_v44  ;;  %v11858_v52 = vpop.f32.mrf.mxu0  ;;  %12020 = vmatprep.mubr.msk.f32.mxu1 %vm13222_vm1, %v15499_v38 }
 0x420   :  { %4153 = vst.msk [vmem:[#allocation4 + $0x1d8] sm:$0xff] %vm722_vm2, %v4088_v23  ;;  %v11664_v33 = vpop.f32.mrf.mxu1  ;;  %v3369_v47 = vld [vmem:[#allocation4 + $0x1e0] sm:$0xff] }
 0x421   :  { %3306 = vst.msk [vmem:[#allocation4 + $0x1f0] sm:$0xff] %vm722_vm2, %v3241_v39  ;;  %v4005_v50 = vpop.f32.mrf.mxu0  ;;  %12215 = vmatmul.mubr.msk.f32.gmra.mxu0 %vm879_vm3, %v4269_v24  ;;  %v4276_v24 = vld [vmem:[#allocation3 + $0x210] sm:$0xff] }
 0x422   :  { %v3170_v18 = vpop.f32.mrf.mxu1  ;;  %v4089_v6 = vadd.f32 %v4005_v50, %v3369_v47  ;;  %12021 = vmatmul.mubr.msk.f32.gmra.mxu1 %vm879_vm3, %v4270_v59  ;;  %12217 = vmatprep.mubr.msk.f32.mxu0 %vm13222_vm1, %v15499_v38  ;;  %v4163_v23 = vld [vmem:[#allocation4 + $0x20] sm:$0xff] }
 0x423   :  { %v3242_v54 = vadd.f32 %v3170_v18, %v2522_v22  ;;  %v11861_v1 = vpop.f32.mrf.mxu0  ;;  %12023 = vmatprep.mubr.msk.f32.mxu1 %vm13222_vm1, %v15499_v38 }
 0x424   :  { %4154 = vst.msk [vmem:[#allocation4 + $0x1e0] sm:$0xff] %vm722_vm2, %v4089_v6  ;;  %v11667_v7 = vpop.f32.mrf.mxu1  ;;  %v3370_v28 = vld [vmem:[#allocation4 + $0x1e8] sm:$0xff] }
 0x425   :  { %3307 = vst.msk [vmem:[#allocation4 + $0x1f8] sm:$0xff] %vm722_vm2, %v3242_v54  ;;  %v4010_v55 = vpop.f32.mrf.mxu0  ;;  %12218 = vmatmul.mubr.msk.f32.gmra.mxu0 %vm879_vm3, %v4270_v59  ;;  %v4277_v59 = vld [vmem:[#allocation3 + $0x218] sm:$0xff] }
 0x426   :  { %v3175_v63 = vpop.f32.mrf.mxu1  ;;  %v4090_v48 = vadd.f32 %v4010_v55, %v3370_v28  ;;  %12024 = vmatmul.mubr.msk.f32.gmra.mxu1 %vm879_vm3, %v4271_v43  ;;  %12220 = vmatprep.mubr.msk.f32.mxu0 %vm13222_vm1, %v15499_v38  ;;  %v4164_v6 = vld [vmem:[#allocation4 + $0x28] sm:$0xff] }
 0x427   :  { %v3243_v27 = vadd.f32 %v3175_v63, %v2523_v35  ;;  %v11864_v42 = vpop.f32.mrf.mxu0  ;;  %12026 = vmatprep.mubr.msk.f32.mxu1 %vm13222_vm1, %v15499_v38 }
 0x428   :  { %4155 = vst.msk [vmem:[#allocation4 + $0x1e8] sm:$0xff] %vm722_vm2, %v4090_v48  ;;  %v11670_v62 = vpop.f32.mrf.mxu1  ;;  %v3371_v32 = vld [vmem:[#allocation4 + $0x1f0] sm:$0xff] }
 0x429   :  { %3308 = vst.msk [vmem:[#allocation4 + $0x200] sm:$0xff] %vm722_vm2, %v3243_v27  ;;  %v4015_v16 = vpop.f32.mrf.mxu0  ;;  %12221 = vmatmul.mubr.msk.f32.gmra.mxu0 %vm879_vm3, %v4271_v43  ;;  %v4278_v43 = vld [vmem:[#allocation3 + $0x220] sm:$0xff] }
 0x42a   :  { %v4091_v57 = vadd.f32 %v4015_v16, %v3371_v32  ;;  %v4555_v26 = vpop.f32.mrf.mxu1  ;;  %12027 = vmatmul.mubr.msk.f32.gmra.mxu1 %vm879_vm3, %v4272_v2  ;;  %12223 = vmatprep.mubr.msk.f32.mxu0 %vm13222_vm1, %v15499_v38  ;;  %v4165_v48 = vld [vmem:[#allocation4 + $0x30] sm:$0xff] }
 0x42b   :  { %v4879_v29 = vadd.f32 %v4555_v26, %v4159_v15  ;;  %v11867_v61 = vpop.f32.mrf.mxu0  ;;  %12029 = vmatprep.mubr.msk.f32.mxu1 %vm13222_vm1, %v15499_v38  ;;  %v4166_v26 = vld [vmem:[#allocation4 + $0x38] sm:$0xff] }
 0x42c   :  { %4156 = vst.msk [vmem:[#allocation4 + $0x1f0] sm:$0xff] %vm722_vm2, %v4091_v57  ;;  %v11884_v30 = vpop.f32.mrf.mxu1  ;;  %v3372_v8 = vld [vmem:[#allocation4 + $0x1f8] sm:$0xff] }
 0x42d   :  { %4944 = vst.msk [vmem:[#allocation4] sm:$0xff] %vm722_vm2, %v4879_v29  ;;  %v4020_v4 = vpop.f32.mrf.mxu0  ;;  %12224 = vmatmul.mubr.msk.f32.gmra.mxu0 %vm879_vm3, %v4272_v2  ;;  %v4279_v2 = vld [vmem:[#allocation3 + $0x228] sm:$0xff] }
 0x42e   :  { %v4092_v60 = vadd.f32 %v4020_v4, %v3372_v8  ;;  %v4560_v9 = vpop.f32.mrf.mxu1  ;;  %12030 = vmatmul.mubr.msk.f32.gmra.mxu1 %vm879_vm3, %v4273_v5  ;;  %12226 = vmatprep.mubr.msk.f32.mxu0 %vm13222_vm1, %v15499_v38 }
 0x42f   :  { %v4880_v17 = vadd.f32 %v4560_v9, %v4160_v37  ;;  %v11870_v51 = vpop.f32.mrf.mxu0  ;;  %12032 = vmatprep.mubr.msk.f32.mxu1 %vm13222_vm1, %v15499_v38  ;;  %v4167_v9 = vld [vmem:[#allocation4 + $0x40] sm:$0xff] }
 0x430   :  { %4157 = vst.msk [vmem:[#allocation4 + $0x1f8] sm:$0xff] %vm722_vm2, %v4092_v60  ;;  %v11887_v40 = vpop.f32.mrf.mxu1  ;;  %v3373_v34 = vld [vmem:[#allocation4 + $0x200] sm:$0xff] }
 0x431   :  { %4945 = vst.msk [vmem:[#allocation4 + $0x8] sm:$0xff] %vm722_vm2, %v4880_v17  ;;  %v4025_v56 = vpop.f32.mrf.mxu0  ;;  %12227 = vmatmul.mubr.msk.f32.gmra.mxu0 %vm879_vm3, %v4273_v5  ;;  %v4280_v5 = vld [vmem:[#allocation3 + $0x230] sm:$0xff] }
 0x432   :  { %v4093_v14 = vadd.f32 %v4025_v56, %v3373_v34  ;;  %v4565_v53 = vpop.f32.mrf.mxu1  ;;  %12033 = vmatmul.mubr.msk.f32.gmra.mxu1 %vm879_vm3, %v4274_v25  ;;  %12229 = vmatprep.mubr.msk.f32.mxu0 %vm13222_vm1, %v15499_v38 }
 0x433   :  { %v4881_v10 = vadd.f32 %v4565_v53, %v4161_v20  ;;  %v11873_v36 = vpop.f32.mrf.mxu0  ;;  %12035 = vmatprep.mubr.msk.f32.mxu1 %vm13222_vm1, %v15499_v38  ;;  %v4168_v53 = vld [vmem:[#allocation4 + $0x48] sm:$0xff] }
 0x434   :  { %4158 = vst.msk [vmem:[#allocation4 + $0x200] sm:$0xff] %vm722_vm2, %v4093_v14  ;;  %v11890_v3 = vpop.f32.mrf.mxu1  ;;  %v5009_v0 = vld [vmem:[#allocation4] sm:$0xff] }
 0x435   :  { %4946 = vst.msk [vmem:[#allocation4 + $0x10] sm:$0xff] %vm722_vm2, %v4881_v10  ;;  %v5405_v19 = vpop.f32.mrf.mxu0  ;;  %12230 = vmatmul.mubr.msk.f32.gmra.mxu0 %vm879_vm3, %v4274_v25  ;;  %v4281_v25 = vld [vmem:[#allocation3 + $0x238] sm:$0xff] }
 0x436   :  { %v4570_v12 = vpop.f32.mrf.mxu1  ;;  %12036 = vmatmul.mubr.msk.f32.gmra.mxu1 %vm879_vm3, %v4275_v46  ;;  %v5729_v58 = vadd.f32 %v5405_v19, %v5009_v0  ;;  %12232 = vmatprep.mubr.msk.f32.mxu0 %vm13222_vm1, %v15499_v38  ;;  %v4282_v19 = vld [vmem:[#allocation3 + $0x240] sm:$0xff] }
 0x437   :  { %v4882_v21 = vadd.f32 %v4570_v12, %v4162_v49  ;;  %v12087_v31 = vpop.f32.mrf.mxu0  ;;  %12038 = vmatprep.mubr.msk.f32.mxu1 %vm13222_vm1, %v15499_v38 }
 0x438   :  { %5794 = vst.msk [vmem:[#allocation4] sm:$0xff] %vm722_vm2, %v5729_v58  ;;  %v11893_v13 = vpop.f32.mrf.mxu1  ;;  %v5010_v44 = vld [vmem:[#allocation4 + $0x8] sm:$0xff]  ;;  %v4169_v58 = vld [vmem:[#allocation4 + $0x50] sm:$0xff] }
 0x439   :  { %4947 = vst.msk [vmem:[#allocation4 + $0x18] sm:$0xff] %vm722_vm2, %v4882_v21  ;;  %v5410_v11 = vpop.f32.mrf.mxu0  ;;  %12233 = vmatmul.mubr.msk.f32.gmra.mxu0 %vm879_vm3, %v4275_v46 }
 0x43a   :  { %v4575_v39 = vpop.f32.mrf.mxu1  ;;  %12039 = vmatmul.mubr.msk.f32.gmra.mxu1 %vm879_vm3, %v4276_v24  ;;  %v5730_v52 = vadd.f32 %v5410_v11, %v5010_v44  ;;  %12235 = vmatprep.mubr.msk.f32.mxu0 %vm13222_vm1, %v15499_v38  ;;  %v4283_v11 = vld [vmem:[#allocation3 + $0x248] sm:$0xff] }
 0x43b   :  { %v4883_v33 = vadd.f32 %v4575_v39, %v4163_v23  ;;  %v12090_v47 = vpop.f32.mrf.mxu0  ;;  %12041 = vmatprep.mubr.msk.f32.mxu1 %vm13222_vm1, %v15499_v38 }
 0x43c   :  { %5795 = vst.msk [vmem:[#allocation4 + $0x8] sm:$0xff] %vm722_vm2, %v5730_v52  ;;  %v11896_v50 = vpop.f32.mrf.mxu1  ;;  %v5011_v22 = vld [vmem:[#allocation4 + $0x10] sm:$0xff]  ;;  %v4170_v52 = vld [vmem:[#allocation4 + $0x58] sm:$0xff] }
 0x43d   :  { %4948 = vst.msk [vmem:[#allocation4 + $0x20] sm:$0xff] %vm722_vm2, %v4883_v33  ;;  %v5415_v18 = vpop.f32.mrf.mxu0  ;;  %12236 = vmatmul.mubr.msk.f32.gmra.mxu0 %vm879_vm3, %v4276_v24 }
 0x43e   :  { %v4580_v54 = vpop.f32.mrf.mxu1  ;;  %12042 = vmatmul.mubr.msk.f32.gmra.mxu1 %vm879_vm3, %v4277_v59  ;;  %v5731_v1 = vadd.f32 %v5415_v18, %v5011_v22  ;;  %12238 = vmatprep.mubr.msk.f32.mxu0 %vm13222_vm1, %v15499_v38  ;;  %v4284_v18 = vld [vmem:[#allocation3 + $0x250] sm:$0xff] }
 0x43f   :  { %v4884_v7 = vadd.f32 %v4580_v54, %v4164_v6  ;;  %v12093_v28 = vpop.f32.mrf.mxu0  ;;  %12044 = vmatprep.mubr.msk.f32.mxu1 %vm13222_vm1, %v15499_v38 }
 0x440   :  { %5796 = vst.msk [vmem:[#allocation4 + $0x10] sm:$0xff] %vm722_vm2, %v5731_v1  ;;  %v11899_v55 = vpop.f32.mrf.mxu1  ;;  %v5012_v35 = vld [vmem:[#allocation4 + $0x18] sm:$0xff]  ;;  %v4171_v1 = vld [vmem:[#allocation4 + $0x60] sm:$0xff] }
 0x441   :  { %4949 = vst.msk [vmem:[#allocation4 + $0x28] sm:$0xff] %vm722_vm2, %v4884_v7  ;;  %v5420_v63 = vpop.f32.mrf.mxu0  ;;  %12239 = vmatmul.mubr.msk.f32.gmra.mxu0 %vm879_vm3, %v4277_v59 }
 0x442   :  { %v4585_v27 = vpop.f32.mrf.mxu1  ;;  %12045 = vmatmul.mubr.msk.f32.gmra.mxu1 %vm879_vm3, %v4278_v43  ;;  %v5732_v42 = vadd.f32 %v5420_v63, %v5012_v35  ;;  %12241 = vmatprep.mubr.msk.f32.mxu0 %vm13222_vm1, %v15499_v38  ;;  %v4285_v63 = vld [vmem:[#allocation3 + $0x258] sm:$0xff] }
 0x443   :  { %v4885_v62 = vadd.f32 %v4585_v27, %v4165_v48  ;;  %v12096_v32 = vpop.f32.mrf.mxu0  ;;  %12047 = vmatprep.mubr.msk.f32.mxu1 %vm13222_vm1, %v15499_v38 }
 0x444   :  { %5797 = vst.msk [vmem:[#allocation4 + $0x18] sm:$0xff] %vm722_vm2, %v5732_v42  ;;  %v11902_v16 = vpop.f32.mrf.mxu1  ;;  %v5013_v57 = vld [vmem:[#allocation4 + $0x20] sm:$0xff]  ;;  %v4172_v42 = vld [vmem:[#allocation4 + $0x68] sm:$0xff] }
 0x445   :  { %4950 = vst.msk [vmem:[#allocation4 + $0x30] sm:$0xff] %vm722_vm2, %v4885_v62  ;;  %v5425_v15 = vpop.f32.mrf.mxu0  ;;  %12242 = vmatmul.mubr.msk.f32.gmra.mxu0 %vm879_vm3, %v4278_v43 }
 0x446   :  { %v4590_v29 = vpop.f32.mrf.mxu1  ;;  %12048 = vmatmul.mubr.msk.f32.gmra.mxu1 %vm879_vm3, %v4279_v2  ;;  %v5733_v61 = vadd.f32 %v5425_v15, %v5013_v57  ;;  %12244 = vmatprep.mubr.msk.f32.mxu0 %vm13222_vm1, %v15499_v38  ;;  %v4286_v15 = vld [vmem:[#allocation3 + $0x260] sm:$0xff] }
 0x447   :  { %v4886_v30 = vadd.f32 %v4590_v29, %v4166_v26  ;;  %v12099_v8 = vpop.f32.mrf.mxu0  ;;  %12050 = vmatprep.mubr.msk.f32.mxu1 %vm13222_vm1, %v15499_v38 }
 0x448   :  { %5798 = vst.msk [vmem:[#allocation4 + $0x20] sm:$0xff] %vm722_vm2, %v5733_v61  ;;  %v11905_v4 = vpop.f32.mrf.mxu1  ;;  %v5014_v60 = vld [vmem:[#allocation4 + $0x28] sm:$0xff]  ;;  %v4173_v61 = vld [vmem:[#allocation4 + $0x70] sm:$0xff] }
 0x449   :  { %4951 = vst.msk [vmem:[#allocation4 + $0x38] sm:$0xff] %vm722_vm2, %v4886_v30  ;;  %v5430_v37 = vpop.f32.mrf.mxu0  ;;  %12245 = vmatmul.mubr.msk.f32.gmra.mxu0 %vm879_vm3, %v4279_v2 }
 0x44a   :  { %v4595_v17 = vpop.f32.mrf.mxu1  ;;  %12051 = vmatmul.mubr.msk.f32.gmra.mxu1 %vm879_vm3, %v4280_v5  ;;  %v5734_v51 = vadd.f32 %v5430_v37, %v5014_v60  ;;  %12247 = vmatprep.mubr.msk.f32.mxu0 %vm13222_vm1, %v15499_v38  ;;  %v4287_v37 = vld [vmem:[#allocation3 + $0x268] sm:$0xff] }
 0x44b   :  { %v4887_v40 = vadd.f32 %v4595_v17, %v4167_v9  ;;  %v12102_v34 = vpop.f32.mrf.mxu0  ;;  %12053 = vmatprep.mubr.msk.f32.mxu1 %vm13222_vm1, %v15499_v38 }
 0x44c   :  { %5799 = vst.msk [vmem:[#allocation4 + $0x28] sm:$0xff] %vm722_vm2, %v5734_v51  ;;  %v11908_v56 = vpop.f32.mrf.mxu1  ;;  %v5015_v14 = vld [vmem:[#allocation4 + $0x30] sm:$0xff]  ;;  %v4174_v51 = vld [vmem:[#allocation4 + $0x78] sm:$0xff] }
 0x44d   :  { %4952 = vst.msk [vmem:[#allocation4 + $0x40] sm:$0xff] %vm722_vm2, %v4887_v40  ;;  %v5435_v20 = vpop.f32.mrf.mxu0  ;;  %12248 = vmatmul.mubr.msk.f32.gmra.mxu0 %vm879_vm3, %v4280_v5 }
 0x44e   :  { %v4600_v10 = vpop.f32.mrf.mxu1  ;;  %12054 = vmatmul.mubr.msk.f32.gmra.mxu1 %vm879_vm3, %v4281_v25  ;;  %v5735_v36 = vadd.f32 %v5435_v20, %v5015_v14  ;;  %12250 = vmatprep.mubr.msk.f32.mxu0 %vm13222_vm1, %v15499_v38  ;;  %v4288_v20 = vld [vmem:[#allocation3 + $0x270] sm:$0xff] }
 0x44f   :  { %v4888_v3 = vadd.f32 %v4600_v10, %v4168_v53  ;;  %v12105_v46 = vpop.f32.mrf.mxu0  ;;  %12056 = vmatprep.mubr.msk.f32.mxu1 %vm13222_vm1, %v15499_v38 }
 0x450   :  { %5800 = vst.msk [vmem:[#allocation4 + $0x30] sm:$0xff] %vm722_vm2, %v5735_v36  ;;  %v11911_v0 = vpop.f32.mrf.mxu1  ;;  %v5016_v49 = vld [vmem:[#allocation4 + $0x38] sm:$0xff]  ;;  %v4175_v36 = vld [vmem:[#allocation4 + $0x80] sm:$0xff] }
 0x451   :  { %4953 = vst.msk [vmem:[#allocation4 + $0x48] sm:$0xff] %vm722_vm2, %v4888_v3  ;;  %v5440_v12 = vpop.f32.mrf.mxu0  ;;  %12251 = vmatmul.mubr.msk.f32.gmra.mxu0 %vm879_vm3, %v4281_v25 }
 0x452   :  { %v4605_v21 = vpop.f32.mrf.mxu1  ;;  %12057 = vmatmul.mubr.msk.f32.gmra.mxu1 %vm879_vm3, %v4282_v19  ;;  %v5736_v31 = vadd.f32 %v5440_v12, %v5016_v49  ;;  %12253 = vmatprep.mubr.msk.f32.mxu0 %vm13222_vm1, %v15499_v38  ;;  %v10455_v12 = vld [vmem:[%s17477_s3 + $0xf8] sm:$0xff] }
 0x453   :  { %v4889_v13 = vadd.f32 %v4605_v21, %v4169_v58  ;;  %v12108_v24 = vpop.f32.mrf.mxu0  ;;  %12059 = vmatprep.mubr.msk.f32.mxu1 %vm13222_vm1, %v15499_v38 }
 0x454   :  { %5801 = vst.msk [vmem:[#allocation4 + $0x38] sm:$0xff] %vm722_vm2, %v5736_v31  ;;  %v11914_v44 = vpop.f32.mrf.mxu1  ;;  %v5017_v23 = vld [vmem:[#allocation4 + $0x40] sm:$0xff] }
 0x455   :  { %4954 = vst.msk [vmem:[#allocation4 + $0x50] sm:$0xff] %vm722_vm2, %v4889_v13  ;;  %v5445_v39 = vpop.f32.mrf.mxu0  ;;  %12254 = vmatmul.mubr.msk.f32.gmra.mxu0 %vm879_vm3, %v4282_v19  ;;  %v5924_v31 = vld [vmem:[#allocation3 + $0x90] sm:$0xff]  ;;  %v4176_v13 = vld [vmem:[#allocation4 + $0x88] sm:$0xff] }
 0x456   :  { %v4610_v33 = vpop.f32.mrf.mxu1  ;;  %12060 = vmatmul.mubr.msk.f32.gmra.mxu1 %vm879_vm3, %v4283_v11  ;;  %v5737_v47 = vadd.f32 %v5445_v39, %v5017_v23  ;;  %12256 = vmatprep.mubr.msk.f32.mxu0 %vm13222_vm1, %v15499_v38 }
 0x457   :  { %v4890_v50 = vadd.f32 %v4610_v33, %v4170_v52  ;;  %v12111_v59 = vpop.f32.mrf.mxu0  ;;  %12062 = vmatprep.mubr.msk.f32.mxu1 %vm13222_vm1, %v15499_v38  ;;  %v5137_v33 = vld [vmem:[#allocation3 + $0x278] sm:$0xff] }
 0x458   :  { %5802 = vst.msk [vmem:[#allocation4 + $0x40] sm:$0xff] %vm722_vm2, %v5737_v47  ;;  %v11917_v22 = vpop.f32.mrf.mxu1  ;;  %v5018_v6 = vld [vmem:[#allocation4 + $0x48] sm:$0xff] }
 0x459   :  { %4955 = vst.msk [vmem:[#allocation4 + $0x58] sm:$0xff] %vm722_vm2, %v4890_v50  ;;  %v5450_v54 = vpop.f32.mrf.mxu0  ;;  %12257 = vmatmul.mubr.msk.f32.gmra.mxu0 %vm879_vm3, %v4283_v11  ;;  %v10454_v11 = vld [vmem:[%s17477_s3 + $0xf0] sm:$0xff]  ;;  %v5925_v59 = vld [vmem:[#allocation3 + $0x98] sm:$0xff]  ;;  %v4177_v22 = vld [vmem:[#allocation4 + $0x90] sm:$0xff] }
 0x45a   :  { %v4615_v7 = vpop.f32.mrf.mxu1  ;;  %12063 = vmatmul.mubr.msk.f32.gmra.mxu1 %vm879_vm3, %v4284_v18  ;;  %v5738_v28 = vadd.f32 %v5450_v54, %v5018_v6  ;;  %12259 = vmatprep.mubr.msk.f32.mxu0 %vm13222_vm1, %v15499_v38 }
 0x45b   :  { %v4891_v55 = vadd.f32 %v4615_v7, %v4171_v1  ;;  %v12114_v43 = vpop.f32.mrf.mxu0  ;;  %12065 = vmatprep.mubr.msk.f32.mxu1 %vm13222_vm1, %v15499_v38 }
 0x45c   :  { %5803 = vst.msk [vmem:[#allocation4 + $0x48] sm:$0xff] %vm722_vm2, %v5738_v28  ;;  %v11920_v35 = vpop.f32.mrf.mxu1  ;;  %v5019_v48 = vld [vmem:[#allocation4 + $0x50] sm:$0xff] }
 0x45d   :  { %4956 = vst.msk [vmem:[#allocation4 + $0x60] sm:$0xff] %vm722_vm2, %v4891_v55  ;;  %v5455_v27 = vpop.f32.mrf.mxu0  ;;  %12260 = vmatmul.mubr.msk.f32.gmra.mxu0 %vm879_vm3, %v4284_v18  ;;  %v5138_v28 = vld [vmem:[#allocation3 + $0x280] sm:$0xff] }
 0x45e   :  { %v4620_v62 = vpop.f32.mrf.mxu1  ;;  %12066 = vmatmul.mubr.msk.f32.gmra.mxu1 %vm879_vm3, %v4285_v63  ;;  %v5739_v32 = vadd.f32 %v5455_v27, %v5019_v48  ;;  %12262 = vmatprep.mubr.msk.f32.mxu0 %vm13222_vm1, %v15499_v38  ;;  %v5926_v35 = vld [vmem:[#allocation3 + $0xa0] sm:$0xff]  ;;  %v4178_v48 = vld [vmem:[#allocation4 + $0x98] sm:$0xff] }
 0x45f   :  { %v4892_v16 = vadd.f32 %v4620_v62, %v4172_v42  ;;  %v12117_v2 = vpop.f32.mrf.mxu0  ;;  %12068 = vmatprep.mubr.msk.f32.mxu1 %vm13222_vm1, %v15499_v38 }
 0x460   :  { %5804 = vst.msk [vmem:[#allocation4 + $0x50] sm:$0xff] %vm722_vm2, %v5739_v32  ;;  %v11923_v57 = vpop.f32.mrf.mxu1  ;;  %v5020_v26 = vld [vmem:[#allocation4 + $0x58] sm:$0xff] }
 0x461   :  { %4957 = vst.msk [vmem:[#allocation4 + $0x68] sm:$0xff] %vm722_vm2, %v4892_v16  ;;  %v5460_v29 = vpop.f32.mrf.mxu0  ;;  %12263 = vmatmul.mubr.msk.f32.gmra.mxu0 %vm879_vm3, %v4285_v63  ;;  %v10453_v63 = vld [vmem:[%s17477_s3 + $0xe8] sm:$0xff]  ;;  %v10524_v16 = vld [vmem:[%s17477_s3 + $0x118] sm:$0xff]  ;;  %v15736_v57 = vld [vmem:[#allocation3 + $0xe0] sm:$0xff] }
 0x462   :  { %v4625_v30 = vpop.f32.mrf.mxu1  ;;  %12069 = vmatmul.mubr.msk.f32.gmra.mxu1 %vm879_vm3, %v4286_v15  ;;  %v5740_v8 = vadd.f32 %v5460_v29, %v5020_v26  ;;  %12265 = vmatprep.mubr.msk.f32.mxu0 %vm13222_vm1, %v15499_v38  ;;  %v5927_v29 = vld [vmem:[#allocation3 + $0xa8] sm:$0xff] }
 0x463   :  { %v4893_v4 = vadd.f32 %v4625_v30, %v4173_v61  ;;  %v12120_v5 = vpop.f32.mrf.mxu0  ;;  %12071 = vmatprep.mubr.msk.f32.mxu1 %vm13222_vm1, %v15499_v38  ;;  %v4179_v61 = vld [vmem:[#allocation4 + $0xa0] sm:$0xff] }
 0x464   :  { %5805 = vst.msk [vmem:[#allocation4 + $0x58] sm:$0xff] %vm722_vm2, %v5740_v8  ;;  %v11926_v60 = vpop.f32.mrf.mxu1  ;;  %v5021_v9 = vld [vmem:[#allocation4 + $0x60] sm:$0xff] }
 0x465   :  { %4958 = vst.msk [vmem:[#allocation4 + $0x70] sm:$0xff] %vm722_vm2, %v4893_v4  ;;  %v5465_v17 = vpop.f32.mrf.mxu0  ;;  %12266 = vmatmul.mubr.msk.f32.gmra.mxu0 %vm879_vm3, %v4286_v15 }
 0x466   :  { %v4630_v40 = vpop.f32.mrf.mxu1  ;;  %12072 = vmatmul.mubr.msk.f32.gmra.mxu1 %vm879_vm3, %v4287_v37  ;;  %v5741_v34 = vadd.f32 %v5465_v17, %v5021_v9  ;;  %12268 = vmatprep.mubr.msk.f32.mxu0 %vm13222_vm1, %v15499_v38  ;;  %v10523_v9 = vld [vmem:[%s17477_s3 + $0x110] sm:$0xff] }
 0x467   :  { %v4894_v56 = vadd.f32 %v4630_v40, %v4174_v51  ;;  %v12123_v25 = vpop.f32.mrf.mxu0  ;;  %12074 = vmatprep.mubr.msk.f32.mxu1 %vm13222_vm1, %v15499_v38  ;;  %v5928_v40 = vld [vmem:[#allocation3 + $0xb0] sm:$0xff] }
 0x468   :  { %5806 = vst.msk [vmem:[#allocation4 + $0x60] sm:$0xff] %vm722_vm2, %v5741_v34  ;;  %v11929_v14 = vpop.f32.mrf.mxu1  ;;  %v5022_v53 = vld [vmem:[#allocation4 + $0x68] sm:$0xff] }
 0x469   :  { %4959 = vst.msk [vmem:[#allocation4 + $0x78] sm:$0xff] %vm722_vm2, %v4894_v56  ;;  %v5470_v10 = vpop.f32.mrf.mxu0  ;;  %12269 = vmatmul.mubr.msk.f32.gmra.mxu0 %vm879_vm3, %v4287_v37  ;;  %v15748_v37 = vld [vmem:[#allocation3 + $0xe8] sm:$0xff]  ;;  %v4180_v34 = vld [vmem:[#allocation4 + $0xa8] sm:$0xff] }
 0x46a   :  { %v4635_v3 = vpop.f32.mrf.mxu1  ;;  %12075 = vmatmul.mubr.msk.f32.gmra.mxu1 %vm879_vm3, %v4288_v20  ;;  %v5742_v46 = vadd.f32 %v5470_v10, %v5022_v53  ;;  %12271 = vmatprep.mubr.msk.f32.mxu0 %vm13222_vm1, %v15499_v38  ;;  %v15763_v10 = vld [vmem:[#allocation3 + $0xf0] sm:$0xff] }
 0x46b   :  { %v4895_v0 = vadd.f32 %v4635_v3, %v4175_v36  ;;  %v12126_v19 = vpop.f32.mrf.mxu0  ;;  %12288 = vmatprep.mubr.msk.f32.mxu1 %vm13222_vm1, %v15499_v38  ;;  %v10522_v36 = vld [vmem:[%s17477_s3 + $0x108] sm:$0xff] }
 0x46c   :  { %5807 = vst.msk [vmem:[#allocation4 + $0x68] sm:$0xff] %vm722_vm2, %v5742_v46  ;;  %v11932_v49 = vpop.f32.mrf.mxu1  ;;  %v5023_v58 = vld [vmem:[#allocation4 + $0x70] sm:$0xff] }
 0x46d   :  { %4960 = vst.msk [vmem:[#allocation4 + $0x80] sm:$0xff] %vm722_vm2, %v4895_v0  ;;  %v5475_v21 = vpop.f32.mrf.mxu0  ;;  %12272 = vmatmul.mubr.msk.f32.gmra.mxu0 %vm879_vm3, %v4288_v20  ;;  %v5929_v0 = vld [vmem:[#allocation3 + $0xb8] sm:$0xff]  ;;  %v4181_v19 = vld [vmem:[#allocation4 + $0xb0] sm:$0xff] }
 0x46e   :  { %v4640_v24 = vpop.f32.mrf.mxu1  ;;  %v5743_v44 = vadd.f32 %v5475_v21, %v5023_v58  ;;  %12289 = vmatmul.mubr.msk.f32.vlgmr.msra.gmra.mxu1 %vm879_vm3, %v5924_v31  ;;  %12274 = vmatprep.mubr.msk.f32.mxu0 %vm13222_vm1, %v15499_v38 }
 0x46f   :  { %v4896_v23 = vadd.f32 %v4640_v24, %v4176_v13  ;;  %v12129_v39 = vpop.f32.mrf.mxu0  ;;  %12687 = vmatpush3.msra.mxu1 %v10455_v12  ;;  %12291 = vmatprep.mubr.msk.f32.mxu1 %vm13222_vm1, %v15499_v38  ;;  %v15778_v13 = vld [vmem:[#allocation3 + $0xf8] sm:$0xff] }
 0x470   :  { %5808 = vst.msk [vmem:[#allocation4 + $0x70] sm:$0xff] %vm722_vm2, %v5743_v44  ;;  %v11935_v52 = vpop.f32.mrf.mxu1  ;;  %12688 = vmatprep.subr.mxu1 %v15499_v38  ;;  %v5024_v47 = vld [vmem:[#allocation4 + $0x78] sm:$0xff] }
 0x471   :  { %4961 = vst.msk [vmem:[#allocation4 + $0x88] sm:$0xff] %vm722_vm2, %v4896_v23  ;;  %v5480_v50 = vpop.f32.mrf.mxu0  ;;  %12275 = vmatmul.mubr.msk.f32.gmra.mxu0 %vm879_vm3, %v5137_v33  ;;  %12689 = vmatpush3.msra.mxu1 %v10454_v11  ;;  %v5930_v11 = vld [vmem:[#allocation3 + $0xc0] sm:$0xff]  ;;  %v4182_v23 = vld [vmem:[#allocation4 + $0xb8] sm:$0xff] }
 0x472   :  { %v4645_v18 = vpop.f32.mrf.mxu1  ;;  %v5744_v6 = vadd.f32 %v5480_v50, %v5024_v47  ;;  %12292 = vmatmul.mubr.msk.f32.gmra.mxu1 %vm879_vm3, %v5925_v59  ;;  %12277 = vmatprep.mubr.msk.f32.mxu0 %vm13222_vm1, %v15499_v38  ;;  %v15790_v59 = vld [vmem:[#allocation3 + $0x100] sm:$0xff] }
 0x473   :  { %v4897_v54 = vadd.f32 %v4645_v18, %v4177_v22  ;;  %v12132_v1 = vpop.f32.mrf.mxu0  ;;  %12294 = vmatprep.mubr.msk.f32.mxu1 %vm13222_vm1, %v15499_v38  ;;  %12690 = vmatprep.subr.mxu1 %v15499_v38 }
 0x474   :  { %5809 = vst.msk [vmem:[#allocation4 + $0x78] sm:$0xff] %vm722_vm2, %v5744_v6  ;;  %v11938_v7 = vpop.f32.mrf.mxu1  ;;  %v5025_v55 = vld [vmem:[#allocation4 + $0x80] sm:$0xff]  ;;  %12691 = vmatpush3.msra.mxu1 %v10453_v63  ;;  %v5931_v6 = vld [vmem:[#allocation3 + $0xc8] sm:$0xff] }
 0x475   :  { %4962 = vst.msk [vmem:[#allocation4 + $0x90] sm:$0xff] %vm722_vm2, %v4897_v54  ;;  %v5485_v43 = vpop.f32.mrf.mxu0  ;;  %12278 = vmatmul.mubr.msk.f32.gmra.mxu0 %vm879_vm3, %v5138_v28  ;;  %12692 = vmatprep.subr.mxu1 %v15499_v38  ;;  %v4183_v54 = vld [vmem:[#allocation4 + $0xc0] sm:$0xff] }
 0x476   :  { %v4650_v27 = vpop.f32.mrf.mxu1  ;;  %v5745_v42 = vadd.f32 %v5485_v43, %v5025_v55  ;;  %12295 = vmatmul.mubr.msk.f32.gmra.mxu1 %vm879_vm3, %v5926_v35  ;;  %12491 = vmatprep.mubr.msk.f32.mxu0 %vm13222_vm1, %v15499_v38  ;;  %v15801_v35 = vld [vmem:[#allocation3 + $0x108] sm:$0xff] }
 0x477   :  { %v4898_v62 = vadd.f32 %v4650_v27, %v4178_v48  ;;  %v12135_v32 = vpop.f32.mrf.mxu0  ;;  %12297 = vmatprep.mubr.msk.f32.mxu1 %vm13222_vm1, %v15499_v38  ;;  %v5932_v27 = vld [vmem:[#allocation3 + $0xd0] sm:$0xff] }
 0x478   :  { %5810 = vst.msk [vmem:[#allocation4 + $0x80] sm:$0xff] %vm722_vm2, %v5745_v42  ;;  %v11941_v2 = vpop.f32.mrf.mxu1  ;;  %v5026_v15 = vld [vmem:[#allocation4 + $0x88] sm:$0xff] }
 0x479   :  { %4963 = vst.msk [vmem:[#allocation4 + $0x98] sm:$0xff] %vm722_vm2, %v4898_v62  ;;  %v5490_v26 = vpop.f32.mrf.mxu0  ;;  %12492 = vmatmul.mubr.msk.f32.vlgmr.msra.gmra.mxu0 %vm879_vm3, %v15736_v57  ;;  %v4184_v42 = vld [vmem:[#allocation4 + $0xc8] sm:$0xff] }
 0x47a   :  { %v4655_v30 = vpop.f32.mrf.mxu1  ;;  %v5746_v8 = vadd.f32 %v5490_v26, %v5026_v15  ;;  %12298 = vmatmul.mubr.msk.f32.gmra.mxu1 %vm879_vm3, %v5927_v29  ;;  %12890 = vmatpush3.msra.mxu0 %v10524_v16  ;;  %v15807_v16 = vld [vmem:[#allocation2 + $0x1c0] sm:$0xff]  ;;  %v15814_v26 = vld [vmem:[#allocation3 + $0x110] sm:$0xff] }
 0x47b   :  { %v4899_v4 = vadd.f32 %v4655_v30, %v4179_v61  ;;  %v12138_v5 = vpop.f32.mrf.mxu0  ;;  %12300 = vmatprep.mubr.msk.f32.mxu1 %vm13222_vm1, %v15499_v38  ;;  %12494 = vmatprep.mubr.msk.f32.mxu0 %vm13222_vm1, %v15499_v38  ;;  %v5933_v30 = vld [vmem:[#allocation3 + $0xd8] sm:$0xff] }
 0x47c   :  { %5811 = vst.msk [vmem:[#allocation4 + $0x88] sm:$0xff] %vm722_vm2, %v5746_v8  ;;  %v11944_v60 = vpop.f32.mrf.mxu1  ;;  %12891 = vmatprep.subr.mxu0 %v15499_v38  ;;  %v5027_v17 = vld [vmem:[#allocation4 + $0x90] sm:$0xff] }
 0x47d   :  { %4964 = vst.msk [vmem:[#allocation4 + $0xa0] sm:$0xff] %vm722_vm2, %v4899_v4  ;;  %v5495_v51 = vpop.f32.mrf.mxu0  ;;  %12495 = vmatmul.mubr.msk.f32.gmra.mxu0 %vm879_vm3, %v15748_v37  ;;  %v4185_v8 = vld [vmem:[#allocation4 + $0xd0] sm:$0xff] }
 0x47e   :  { %v4660_v56 = vpop.f32.mrf.mxu1  ;;  %v5747_v25 = vadd.f32 %v5495_v51, %v5027_v17  ;;  %12301 = vmatmul.mubr.msk.f32.gmra.mxu1 %vm879_vm3, %v5928_v40  ;;  %12497 = vmatprep.mubr.msk.f32.mxu0 %vm13222_vm1, %v15499_v38  ;;  %v15825_v51 = vld [vmem:[#allocation3 + $0x118] sm:$0xff] }
 0x47f   :  { %v4900_v14 = vadd.f32 %v4660_v56, %v4180_v34  ;;  %v12141_v20 = vpop.f32.mrf.mxu0  ;;  %12303 = vmatprep.mubr.msk.f32.mxu1 %vm13222_vm1, %v15499_v38  ;;  %12892 = vmatpush3.msra.mxu0 %v10523_v9  ;;  %v4186_v56 = vld [vmem:[#allocation4 + $0xd8] sm:$0xff] }
 0x480   :  { %5812 = vst.msk [vmem:[#allocation4 + $0x90] sm:$0xff] %vm722_vm2, %v5747_v25  ;;  %v11947_v53 = vpop.f32.mrf.mxu1  ;;  %12893 = vmatprep.subr.mxu0 %v15499_v38  ;;  %v5028_v3 = vld [vmem:[#allocation4 + $0x98] sm:$0xff] }
 0x481   :  { %4965 = vst.msk [vmem:[#allocation4 + $0xa8] sm:$0xff] %vm722_vm2, %v4900_v14  ;;  %v5500_v46 = vpop.f32.mrf.mxu0  ;;  %12498 = vmatmul.mubr.msk.f32.gmra.mxu0 %vm879_vm3, %v15763_v10 }
 0x482   :  { %v4665_v49 = vpop.f32.mrf.mxu1  ;;  %v5748_v12 = vadd.f32 %v5500_v46, %v5028_v3  ;;  %12304 = vmatmul.mubr.msk.f32.gmra.mxu1 %vm879_vm3, %v5929_v0  ;;  %12500 = vmatprep.mubr.msk.f32.mxu0 %vm13222_vm1, %v15499_v38  ;;  %v15837_v3 = vld [vmem:[#allocation3 + $0x120] sm:$0xff] }
 0x483   :  { %v4901_v58 = vadd.f32 %v4665_v49, %v4181_v19  ;;  %v12144_v21 = vpop.f32.mrf.mxu0  ;;  %12306 = vmatprep.mubr.msk.f32.mxu1 %vm13222_vm1, %v15499_v38  ;;  %12894 = vmatpush3.msra.mxu0 %v10522_v36 }
 0x484   :  { %5813 = vst.msk [vmem:[#allocation4 + $0x98] sm:$0xff] %vm722_vm2, %v5748_v12  ;;  %v11950_v31 = vpop.f32.mrf.mxu1  ;;  %12895 = vmatprep.subr.mxu0 %v15499_v38  ;;  %v5029_v24 = vld [vmem:[#allocation4 + $0xa0] sm:$0xff] }
 0x485   :  { %4966 = vst.msk [vmem:[#allocation4 + $0xb0] sm:$0xff] %vm722_vm2, %v4901_v58  ;;  %v5505_v44 = vpop.f32.mrf.mxu0  ;;  %12501 = vmatmul.mubr.msk.f32.gmra.mxu0 %vm879_vm3, %v15778_v13  ;;  %v15849_v31 = vld [vmem:[#allocation3 + $0x128] sm:$0xff] }
 0x486   :  { %v4670_v39 = vpop.f32.mrf.mxu1  ;;  %v5749_v52 = vadd.f32 %v5505_v44, %v5029_v24  ;;  %12307 = vmatmul.mubr.msk.f32.gmra.mxu1 %vm879_vm3, %v5930_v11  ;;  %12503 = vmatprep.mubr.msk.f32.mxu0 %vm13222_vm1, %v15499_v38 }
 0x487   :  { %v4902_v33 = vadd.f32 %v4670_v39, %v4182_v23  ;;  %v12147_v47 = vpop.f32.mrf.mxu0  ;;  %12309 = vmatprep.mubr.msk.f32.mxu1 %vm13222_vm1, %v15499_v38 }
 0x488   :  { %5814 = vst.msk [vmem:[#allocation4 + $0xa0] sm:$0xff] %vm722_vm2, %v5749_v52  ;;  %v11953_v50 = vpop.f32.mrf.mxu1  ;;  %v5030_v22 = vld [vmem:[#allocation4 + $0xa8] sm:$0xff]  ;;  %v15861_v47 = vld [vmem:[#allocation3 + $0x130] sm:$0xff] }
 0x489   :  { %4967 = vst.msk [vmem:[#allocation4 + $0xb8] sm:$0xff] %vm722_vm2, %v4902_v33  ;;  %v5510_v18 = vpop.f32.mrf.mxu0  ;;  %12504 = vmatmul.mubr.msk.f32.gmra.mxu0 %vm879_vm3, %v15790_v59 }
 0x48a   :  { %v4675_v1 = vpop.f32.mrf.mxu1  ;;  %v5750_v7 = vadd.f32 %v5510_v18, %v5030_v22  ;;  %12310 = vmatmul.mubr.msk.f32.gmra.mxu1 %vm879_vm3, %v5931_v6  ;;  %12506 = vmatprep.mubr.msk.f32.mxu0 %vm13222_vm1, %v15499_v38 }
 0x48b   :  { %v4903_v28 = vadd.f32 %v4675_v1, %v4183_v54  ;;  %v12150_v55 = vpop.f32.mrf.mxu0  ;;  %12312 = vmatprep.mubr.msk.f32.mxu1 %vm13222_vm1, %v15499_v38 }
 0x48c   :  { %5815 = vst.msk [vmem:[#allocation4 + $0xa8] sm:$0xff] %vm722_vm2, %v5750_v7  ;;  %v11956_v43 = vpop.f32.mrf.mxu1  ;;  %v5031_v63 = vld [vmem:[#allocation4 + $0xb0] sm:$0xff] }
 0x48d   :  { %4968 = vst.msk [vmem:[#allocation4 + $0xc0] sm:$0xff] %vm722_vm2, %v4903_v28  ;;  %v5515_v48 = vpop.f32.mrf.mxu0  ;;  %12507 = vmatmul.mubr.msk.f32.gmra.mxu0 %vm879_vm3, %v15801_v35  ;;  %v15873_v28 = vld [vmem:[#allocation3 + $0x138] sm:$0xff] }
 0x48e   :  { %v4680_v62 = vpop.f32.mrf.mxu1  ;;  %v5751_v32 = vadd.f32 %v5515_v48, %v5031_v63  ;;  %12313 = vmatmul.mubr.msk.f32.gmra.mxu1 %vm879_vm3, %v5932_v27  ;;  %12509 = vmatprep.mubr.msk.f32.mxu0 %vm13222_vm1, %v15807_v16 }
 0x48f   :  { %v4904_v38 = vadd.f32 %v4680_v62, %v4184_v42  ;;  %v12153_v2 = vpop.f32.mrf.mxu0  ;;  %12315 = vmatprep.mubr.msk.f32.mxu1 %vm13222_vm1, %v15807_v16 }
 0x490   :  { %5816 = vst.msk [vmem:[#allocation4 + $0xb0] sm:$0xff] %vm722_vm2, %v5751_v32  ;;  %v11959_v15 = vpop.f32.mrf.mxu1  ;;  %v5032_v29 = vld [vmem:[#allocation4 + $0xb8] sm:$0xff]  ;;  %v15885_v32 = vld [vmem:[#allocation3 + $0x140] sm:$0xff] }
 0x491   :  { %4969 = vst.msk [vmem:[#allocation4 + $0xc8] sm:$0xff] %vm722_vm2, %v4904_v38  ;;  %v5520_v61 = vpop.f32.mrf.mxu0  ;;  %12510 = vmatmul.mubr.msk.f32.gmra.mxu0 %vm879_vm3, %v15814_v26 }
 0x492   :  { %v4685_v4 = vpop.f32.mrf.mxu1  ;;  %v5752_v5 = vadd.f32 %v5520_v61, %v5032_v29  ;;  %12316 = vmatmul.mubr.msk.f32.gmra.mxu1 %vm879_vm3, %v5933_v30  ;;  %12512 = vmatprep.mubr.msk.f32.mxu0 %vm13222_vm1, %v15807_v16 }
 0x493   :  { %v4905_v60 = vadd.f32 %v4685_v4, %v4185_v8  ;;  %v12156_v9 = vpop.f32.mrf.mxu0  ;;  %12318 = vmatprep.mubr.msk.f32.mxu1 %vm13222_vm1, %v15807_v16  ;;  %v15897_v4 = vld [vmem:[#allocation3 + $0x148] sm:$0xff] }
 0x494   :  { %5817 = vst.msk [vmem:[#allocation4 + $0xb8] sm:$0xff] %vm722_vm2, %v5752_v5  ;;  %v11962_v17 = vpop.f32.mrf.mxu1  ;;  %v5033_v40 = vld [vmem:[#allocation4 + $0xc0] sm:$0xff] }
 0x495   :  { %4970 = vst.msk [vmem:[#allocation4 + $0xd0] sm:$0xff] %vm722_vm2, %v4905_v60  ;;  %v5525_v34 = vpop.f32.mrf.mxu0  ;;  %12513 = vmatmul.mubr.msk.f32.gmra.mxu0 %vm879_vm3, %v15825_v51 }
 0x496   :  { %v4690_v25 = vpop.f32.mrf.mxu1  ;;  %v5753_v14 = vadd.f32 %v5525_v34, %v5033_v40  ;;  %12319 = vmatmul.mubr.msk.f32.gmra.mxu1 %vm879_vm3, %v15736_v57  ;;  %12515 = vmatprep.mubr.msk.f32.mxu0 %vm13222_vm1, %v15807_v16  ;;  %v4187_v57 = vld [vmem:[#allocation4 + $0xe0] sm:$0xff] }
 0x497   :  { %v4906_v20 = vadd.f32 %v4690_v25, %v4186_v56  ;;  %v12159_v53 = vpop.f32.mrf.mxu0  ;;  %12321 = vmatprep.mubr.msk.f32.mxu1 %vm13222_vm1, %v15807_v16  ;;  %v15909_v25 = vld [vmem:[#allocation3 + $0x150] sm:$0xff] }
 0x498   :  { %5818 = vst.msk [vmem:[#allocation4 + $0xc0] sm:$0xff] %vm722_vm2, %v5753_v14  ;;  %v11965_v36 = vpop.f32.mrf.mxu1  ;;  %v5034_v46 = vld [vmem:[#allocation4 + $0xc8] sm:$0xff] }
 0x499   :  { %4971 = vst.msk [vmem:[#allocation4 + $0xd8] sm:$0xff] %vm722_vm2, %v4906_v20  ;;  %v5530_v0 = vpop.f32.mrf.mxu0  ;;  %12516 = vmatmul.mubr.msk.f32.gmra.mxu0 %vm879_vm3, %v15837_v3 }
 0x49a   :  { %v4695_v19 = vpop.f32.mrf.mxu1  ;;  %v5754_v49 = vadd.f32 %v5530_v0, %v5034_v46  ;;  %12322 = vmatmul.mubr.msk.f32.gmra.mxu1 %vm879_vm3, %v15748_v37  ;;  %12518 = vmatprep.mubr.msk.f32.mxu0 %vm13222_vm1, %v15807_v16  ;;  %v4188_v37 = vld [vmem:[#allocation4 + $0xe8] sm:$0xff] }
 0x49b   :  { %v4907_v12 = vadd.f32 %v4695_v19, %v4187_v57  ;;  %v12162_v58 = vpop.f32.mrf.mxu0  ;;  %12324 = vmatprep.mubr.msk.f32.mxu1 %vm13222_vm1, %v15807_v16  ;;  %v15921_v19 = vld [vmem:[#allocation3 + $0x158] sm:$0xff] }
 0x49c   :  { %5819 = vst.msk [vmem:[#allocation4 + $0xc8] sm:$0xff] %vm722_vm2, %v5754_v49  ;;  %v11968_v21 = vpop.f32.mrf.mxu1  ;;  %v5035_v24 = vld [vmem:[#allocation4 + $0xd0] sm:$0xff]  ;;  %v4194_v58 = vld [vmem:[#allocation4 + $0x118] sm:$0xff] }
 0x49d   :  { %4972 = vst.msk [vmem:[#allocation4 + $0xe0] sm:$0xff] %vm722_vm2, %v4907_v12  ;;  %v5535_v44 = vpop.f32.mrf.mxu0  ;;  %12519 = vmatmul.mubr.msk.f32.gmra.mxu0 %vm879_vm3, %v15849_v31 }
 0x49e   :  { %v4700_v11 = vpop.f32.mrf.mxu1  ;;  %v5755_v23 = vadd.f32 %v5535_v44, %v5035_v24  ;;  %12325 = vmatmul.mubr.msk.f32.gmra.mxu1 %vm879_vm3, %v15763_v10  ;;  %12521 = vmatprep.mubr.msk.f32.mxu0 %vm13222_vm1, %v15807_v16  ;;  %v4189_v10 = vld [vmem:[#allocation4 + $0xf0] sm:$0xff] }
 0x49f   :  { %v4908_v39 = vadd.f32 %v4700_v11, %v4188_v37  ;;  %v12165_v52 = vpop.f32.mrf.mxu0  ;;  %12327 = vmatprep.mubr.msk.f32.mxu1 %vm13222_vm1, %v15807_v16 }
 0x4a0   :  { %5820 = vst.msk [vmem:[#allocation4 + $0xd0] sm:$0xff] %vm722_vm2, %v5755_v23  ;;  %v11971_v33 = vpop.f32.mrf.mxu1  ;;  %v5036_v50 = vld [vmem:[#allocation4 + $0xd8] sm:$0xff]  ;;  %v15936_v23 = vld [vmem:[#allocation3 + $0x160] sm:$0xff] }
 0x4a1   :  { %4973 = vst.msk [vmem:[#allocation4 + $0xe8] sm:$0xff] %vm722_vm2, %v4908_v39  ;;  %v5540_v22 = vpop.f32.mrf.mxu0  ;;  %12522 = vmatmul.mubr.msk.f32.gmra.mxu0 %vm879_vm3, %v15861_v47 }
 0x4a2   :  { %v4705_v18 = vpop.f32.mrf.mxu1  ;;  %v5756_v6 = vadd.f32 %v5540_v22, %v5036_v50  ;;  %12328 = vmatmul.mubr.msk.f32.gmra.mxu1 %vm879_vm3, %v15778_v13  ;;  %12524 = vmatprep.mubr.msk.f32.mxu0 %vm13222_vm1, %v15807_v16  ;;  %v4190_v13 = vld [vmem:[#allocation4 + $0xf8] sm:$0xff] }
 0x4a3   :  { %v4909_v54 = vadd.f32 %v4705_v18, %v4189_v10  ;;  %v12168_v1 = vpop.f32.mrf.mxu0  ;;  %12330 = vmatprep.mubr.msk.f32.mxu1 %vm13222_vm1, %v15807_v16 }
 0x4a4   :  { %5821 = vst.msk [vmem:[#allocation4 + $0xd8] sm:$0xff] %vm722_vm2, %v5756_v6  ;;  %v11974_v7 = vpop.f32.mrf.mxu1  ;;  %v5037_v55 = vld [vmem:[#allocation4 + $0xe0] sm:$0xff]  ;;  %v15948_v6 = vld [vmem:[#allocation3 + $0x168] sm:$0xff] }
 0x4a5   :  { %4974 = vst.msk [vmem:[#allocation4 + $0xf0] sm:$0xff] %vm722_vm2, %v4909_v54  ;;  %v5545_v43 = vpop.f32.mrf.mxu0  ;;  %12525 = vmatmul.mubr.msk.f32.gmra.mxu0 %vm879_vm3, %v15873_v28  ;;  %v4196_v7 = vld [vmem:[#allocation4 + $0x128] sm:$0xff] }
 0x4a6   :  { %v4710_v63 = vpop.f32.mrf.mxu1  ;;  %v5757_v48 = vadd.f32 %v5545_v43, %v5037_v55  ;;  %12331 = vmatmul.mubr.msk.f32.gmra.mxu1 %vm879_vm3, %v15790_v59  ;;  %12527 = vmatprep.mubr.msk.f32.mxu0 %vm13222_vm1, %v15807_v16  ;;  %v4191_v59 = vld [vmem:[#allocation4 + $0x100] sm:$0xff] }
 0x4a7   :  { %v4910_v27 = vadd.f32 %v4710_v63, %v4190_v13  ;;  %v12171_v42 = vpop.f32.mrf.mxu0  ;;  %12333 = vmatprep.mubr.msk.f32.mxu1 %vm13222_vm1, %v15807_v16 }
 0x4a8   :  { %5822 = vst.msk [vmem:[#allocation4 + $0xe0] sm:$0xff] %vm722_vm2, %v5757_v48  ;;  %v11977_v62 = vpop.f32.mrf.mxu1  ;;  %v5038_v38 = vld [vmem:[#allocation4 + $0xe8] sm:$0xff] }
 0x4a9   :  { %4975 = vst.msk [vmem:[#allocation4 + $0xf8] sm:$0xff] %vm722_vm2, %v4910_v27  ;;  %v5550_v2 = vpop.f32.mrf.mxu0  ;;  %12528 = vmatmul.mubr.msk.f32.gmra.mxu0 %vm879_vm3, %v15885_v32  ;;  %v15963_v27 = vld [vmem:[#allocation3 + $0x170] sm:$0xff] }
 0x4aa   :  { %v4715_v15 = vpop.f32.mrf.mxu1  ;;  %v5758_v29 = vadd.f32 %v5550_v2, %v5038_v38  ;;  %12334 = vmatmul.mubr.msk.f32.gmra.mxu1 %vm879_vm3, %v15801_v35  ;;  %12530 = vmatprep.mubr.msk.f32.mxu0 %vm13222_vm1, %v15807_v16  ;;  %v4192_v35 = vld [vmem:[#allocation4 + $0x108] sm:$0xff] }
 0x4ab   :  { %v4911_v61 = vadd.f32 %v4715_v15, %v4191_v59  ;;  %v12174_v30 = vpop.f32.mrf.mxu0  ;;  %12336 = vmatprep.mubr.msk.f32.mxu1 %vm13222_vm1, %v15807_v16 }
 0x4ac   :  { %5823 = vst.msk [vmem:[#allocation4 + $0xe8] sm:$0xff] %vm722_vm2, %v5758_v29  ;;  %v11980_v8 = vpop.f32.mrf.mxu1  ;;  %v5039_v5 = vld [vmem:[#allocation4 + $0xf0] sm:$0xff] }
 0x4ad   :  { %4976 = vst.msk [vmem:[#allocation4 + $0x100] sm:$0xff] %vm722_vm2, %v4911_v61  ;;  %v5555_v60 = vpop.f32.mrf.mxu0  ;;  %12531 = vmatmul.mubr.msk.f32.gmra.mxu0 %vm879_vm3, %v15897_v4  ;;  %v15975_v61 = vld [vmem:[#allocation3 + $0x178] sm:$0xff] }
 0x4ae   :  { %v4720_v9 = vpop.f32.mrf.mxu1  ;;  %v5759_v17 = vadd.f32 %v5555_v60, %v5039_v5  ;;  %12337 = vmatmul.mubr.msk.f32.gmra.mxu1 %vm879_vm3, %v15814_v26  ;;  %12533 = vmatprep.mubr.msk.f32.mxu0 %vm13222_vm1, %v15807_v16  ;;  %v4193_v26 = vld [vmem:[#allocation4 + $0x110] sm:$0xff] }
 0x4af   :  { %v4912_v40 = vadd.f32 %v4720_v9, %v4192_v35  ;;  %v12177_v34 = vpop.f32.mrf.mxu0  ;;  %12339 = vmatprep.mubr.msk.f32.mxu1 %vm13222_vm1, %v15807_v16 }
 0x4b0   :  { %5824 = vst.msk [vmem:[#allocation4 + $0xf0] sm:$0xff] %vm722_vm2, %v5759_v17  ;;  %v11983_v56 = vpop.f32.mrf.mxu1  ;;  %v5040_v14 = vld [vmem:[#allocation4 + $0xf8] sm:$0xff] }
 0x4b1   :  { %4977 = vst.msk [vmem:[#allocation4 + $0x108] sm:$0xff] %vm722_vm2, %v4912_v40  ;;  %v5560_v20 = vpop.f32.mrf.mxu0  ;;  %12534 = vmatmul.mubr.msk.f32.gmra.mxu0 %vm879_vm3, %v15909_v25  ;;  %v15987_v40 = vld [vmem:[#allocation3 + $0x180] sm:$0xff] }
 0x4b2   :  { %v4725_v53 = vpop.f32.mrf.mxu1  ;;  %v5760_v36 = vadd.f32 %v5560_v20, %v5040_v14  ;;  %12340 = vmatmul.mubr.msk.f32.gmra.mxu1 %vm879_vm3, %v15825_v51  ;;  %12536 = vmatprep.mubr.msk.f32.mxu0 %vm13222_vm1, %v15807_v16  ;;  %v10452_v51 = vld [vmem:[%s17477_s3 + $0xe0] sm:$0xff] }
 0x4b3   :  { %v4913_v46 = vadd.f32 %v4725_v53, %v4193_v26  ;;  %v12180_v0 = vpop.f32.mrf.mxu0  ;;  %12342 = vmatprep.mubr.msk.f32.mxu1 %vm13222_vm1, %v15807_v16  ;;  %12693 = vmatpush3.msra.mxu1 %v10452_v51 }
 0x4b4   :  { %5825 = vst.msk [vmem:[#allocation4 + $0xf8] sm:$0xff] %vm722_vm2, %v5760_v36  ;;  %v11986_v57 = vpop.f32.mrf.mxu1  ;;  %v5041_v49 = vld [vmem:[#allocation4 + $0x100] sm:$0xff] }
 0x4b5   :  { %4978 = vst.msk [vmem:[#allocation4 + $0x110] sm:$0xff] %vm722_vm2, %v4913_v46  ;;  %v5565_v12 = vpop.f32.mrf.mxu0  ;;  %12537 = vmatmul.mubr.msk.f32.gmra.mxu0 %vm879_vm3, %v15921_v19  ;;  %v15999_v46 = vld [vmem:[#allocation3 + $0x188] sm:$0xff] }
 0x4b6   :  { %v4730_v21 = vpop.f32.mrf.mxu1  ;;  %v5761_v24 = vadd.f32 %v5565_v12, %v5041_v49  ;;  %12343 = vmatmul.mubr.msk.f32.gmra.mxu1 %vm879_vm3, %v15837_v3  ;;  %12539 = vmatprep.mubr.msk.f32.mxu0 %vm13222_vm1, %v15807_v16  ;;  %v4195_v3 = vld [vmem:[#allocation4 + $0x120] sm:$0xff] }
 0x4b7   :  { %v4914_v44 = vadd.f32 %v4730_v21, %v4194_v58  ;;  %v12183_v37 = vpop.f32.mrf.mxu0  ;;  %12345 = vmatprep.mubr.msk.f32.mxu1 %vm13222_vm1, %v15807_v16 }
 0x4b8   :  { %5826 = vst.msk [vmem:[#allocation4 + $0x100] sm:$0xff] %vm722_vm2, %v5761_v24  ;;  %v11989_v11 = vpop.f32.mrf.mxu1  ;;  %v5042_v39 = vld [vmem:[#allocation4 + $0x108] sm:$0xff]  ;;  %v16011_v24 = vld [vmem:[#allocation3 + $0x190] sm:$0xff] }
 0x4b9   :  { %4979 = vst.msk [vmem:[#allocation4 + $0x118] sm:$0xff] %vm722_vm2, %v4914_v44  ;;  %v5570_v52 = vpop.f32.mrf.mxu0  ;;  %12540 = vmatmul.mubr.msk.f32.gmra.mxu0 %vm879_vm3, %v15936_v23 }
 0x4ba   :  { %v4735_v33 = vpop.f32.mrf.mxu1  ;;  %v5762_v50 = vadd.f32 %v5570_v52, %v5042_v39  ;;  %12346 = vmatmul.mubr.msk.f32.gmra.mxu1 %vm879_vm3, %v15849_v31  ;;  %12542 = vmatprep.mubr.msk.f32.mxu0 %vm13222_vm1, %v15807_v16  ;;  %v10521_v31 = vld [vmem:[%s17477_s3 + $0x100] sm:$0xff] }
 0x4bb   :  { %v4915_v22 = vadd.f32 %v4735_v33, %v4195_v3  ;;  %v12186_v10 = vpop.f32.mrf.mxu0  ;;  %12348 = vmatprep.mubr.msk.f32.mxu1 %vm13222_vm1, %v15807_v16  ;;  %12896 = vmatpush3.msra.mxu0 %v10521_v31 }
 0x4bc   :  { %5827 = vst.msk [vmem:[#allocation4 + $0x108] sm:$0xff] %vm722_vm2, %v5762_v50  ;;  %v11992_v18 = vpop.f32.mrf.mxu1  ;;  %v5043_v54 = vld [vmem:[#allocation4 + $0x110] sm:$0xff]  ;;  %v16023_v50 = vld [vmem:[#allocation3 + $0x198] sm:$0xff] }
 0x4bd   :  { %4980 = vst.msk [vmem:[#allocation4 + $0x120] sm:$0xff] %vm722_vm2, %v4915_v22  ;;  %v5575_v1 = vpop.f32.mrf.mxu0  ;;  %12543 = vmatmul.mubr.msk.f32.gmra.mxu0 %vm879_vm3, %v15948_v6 }
 0x4be   :  { %v4740_v55 = vpop.f32.mrf.mxu1  ;;  %v5763_v43 = vadd.f32 %v5575_v1, %v5043_v54  ;;  %12349 = vmatmul.mubr.msk.f32.gmra.mxu1 %vm879_vm3, %v15861_v47  ;;  %12545 = vmatprep.mubr.msk.f32.mxu0 %vm13222_vm1, %v15807_v16  ;;  %v4197_v47 = vld [vmem:[#allocation4 + $0x130] sm:$0xff] }
 0x4bf   :  { %v4916_v13 = vadd.f32 %v4740_v55, %v4196_v7  ;;  %v12189_v63 = vpop.f32.mrf.mxu0  ;;  %12351 = vmatprep.mubr.msk.f32.mxu1 %vm13222_vm1, %v15807_v16  ;;  %v16035_v55 = vld [vmem:[#allocation3 + $0x1a0] sm:$0xff] }
 0x4c0   :  { %5828 = vst.msk [vmem:[#allocation4 + $0x110] sm:$0xff] %vm722_vm2, %v5763_v43  ;;  %v11995_v48 = vpop.f32.mrf.mxu1  ;;  %v5044_v42 = vld [vmem:[#allocation4 + $0x118] sm:$0xff] }
 0x4c1   :  { %4981 = vst.msk [vmem:[#allocation4 + $0x128] sm:$0xff] %vm722_vm2, %v4916_v13  ;;  %v5580_v62 = vpop.f32.mrf.mxu0  ;;  %12546 = vmatmul.mubr.msk.f32.gmra.mxu0 %vm879_vm3, %v15963_v27 }
 0x4c2   :  { %v4745_v38 = vpop.f32.mrf.mxu1  ;;  %v5764_v2 = vadd.f32 %v5580_v62, %v5044_v42  ;;  %12352 = vmatmul.mubr.msk.f32.gmra.mxu1 %vm879_vm3, %v15873_v28  ;;  %12548 = vmatprep.mubr.msk.f32.mxu0 %vm13222_vm1, %v15807_v16  ;;  %v4198_v28 = vld [vmem:[#allocation4 + $0x138] sm:$0xff] }
 0x4c3   :  { %v4917_v59 = vadd.f32 %v4745_v38, %v4197_v47  ;;  %v12192_v15 = vpop.f32.mrf.mxu0  ;;  %12354 = vmatprep.mubr.msk.f32.mxu1 %vm13222_vm1, %v15807_v16  ;;  %v16047_v38 = vld [vmem:[#allocation3 + $0x1a8] sm:$0xff] }
 0x4c4   :  { %5829 = vst.msk [vmem:[#allocation4 + $0x118] sm:$0xff] %vm722_vm2, %v5764_v2  ;;  %v11998_v29 = vpop.f32.mrf.mxu1  ;;  %v5045_v30 = vld [vmem:[#allocation4 + $0x120] sm:$0xff] }
 0x4c5   :  { %4982 = vst.msk [vmem:[#allocation4 + $0x130] sm:$0xff] %vm722_vm2, %v4917_v59  ;;  %v5585_v8 = vpop.f32.mrf.mxu0  ;;  %12549 = vmatmul.mubr.msk.f32.gmra.mxu0 %vm879_vm3, %v15975_v61 }
 0x4c6   :  { %v4750_v5 = vpop.f32.mrf.mxu1  ;;  %v5765_v60 = vadd.f32 %v5585_v8, %v5045_v30  ;;  %12355 = vmatmul.mubr.msk.f32.gmra.mxu1 %vm879_vm3, %v15885_v32  ;;  %12551 = vmatprep.mubr.msk.f32.mxu0 %vm13222_vm1, %v15807_v16  ;;  %v4199_v32 = vld [vmem:[#allocation4 + $0x140] sm:$0xff] }
 0x4c7   :  { %v4918_v35 = vadd.f32 %v4750_v5, %v4198_v28  ;;  %v12195_v9 = vpop.f32.mrf.mxu0  ;;  %12357 = vmatprep.mubr.msk.f32.mxu1 %vm13222_vm1, %v15807_v16  ;;  %v16059_v5 = vld [vmem:[#allocation3 + $0x1b0] sm:$0xff] }
 0x4c8   :  { %5830 = vst.msk [vmem:[#allocation4 + $0x120] sm:$0xff] %vm722_vm2, %v5765_v60  ;;  %v12001_v17 = vpop.f32.mrf.mxu1  ;;  %v5046_v34 = vld [vmem:[#allocation4 + $0x128] sm:$0xff] }
 0x4c9   :  { %4983 = vst.msk [vmem:[#allocation4 + $0x138] sm:$0xff] %vm722_vm2, %v4918_v35  ;;  %v5590_v56 = vpop.f32.mrf.mxu0  ;;  %12552 = vmatmul.mubr.msk.f32.gmra.mxu0 %vm879_vm3, %v15987_v40 }
 0x4ca   :  { %v4755_v14 = vpop.f32.mrf.mxu1  ;;  %v5766_v20 = vadd.f32 %v5590_v56, %v5046_v34  ;;  %12358 = vmatmul.mubr.msk.f32.gmra.mxu1 %vm879_vm3, %v15897_v4  ;;  %12554 = vmatprep.mubr.msk.f32.mxu0 %vm13222_vm1, %v15807_v16  ;;  %v4200_v4 = vld [vmem:[#allocation4 + $0x148] sm:$0xff] }
 0x4cb   :  { %v4919_v26 = vadd.f32 %v4755_v14, %v4199_v32  ;;  %v12198_v53 = vpop.f32.mrf.mxu0  ;;  %12360 = vmatprep.mubr.msk.f32.mxu1 %vm13222_vm1, %v15807_v16  ;;  %v16071_v14 = vld [vmem:[#allocation3 + $0x1b8] sm:$0xff] }
 0x4cc   :  { %5831 = vst.msk [vmem:[#allocation4 + $0x128] sm:$0xff] %vm722_vm2, %v5766_v20  ;;  %v12004_v36 = vpop.f32.mrf.mxu1  ;;  %v5047_v0 = vld [vmem:[#allocation4 + $0x130] sm:$0xff] }
 0x4cd   :  { %4984 = vst.msk [vmem:[#allocation4 + $0x140] sm:$0xff] %vm722_vm2, %v4919_v26  ;;  %v5595_v57 = vpop.f32.mrf.mxu0  ;;  %12555 = vmatmul.mubr.msk.f32.gmra.mxu0 %vm879_vm3, %v15999_v46 }
 0x4ce   :  { %v4760_v49 = vpop.f32.mrf.mxu1  ;;  %v5767_v12 = vadd.f32 %v5595_v57, %v5047_v0  ;;  %12361 = vmatmul.mubr.msk.f32.gmra.mxu1 %vm879_vm3, %v15909_v25  ;;  %12557 = vmatprep.mubr.msk.f32.mxu0 %vm13222_vm1, %v15807_v16  ;;  %v4201_v25 = vld [vmem:[#allocation4 + $0x150] sm:$0xff] }
 0x4cf   :  { %v4920_v51 = vadd.f32 %v4760_v49, %v4200_v4  ;;  %v12201_v58 = vpop.f32.mrf.mxu0  ;;  %12363 = vmatprep.mubr.msk.f32.mxu1 %vm13222_vm1, %v15807_v16  ;;  %v16083_v49 = vld [vmem:[#allocation3 + $0x1c0] sm:$0xff] }
 0x4d0   :  { %5832 = vst.msk [vmem:[#allocation4 + $0x130] sm:$0xff] %vm722_vm2, %v5767_v12  ;;  %v12007_v21 = vpop.f32.mrf.mxu1  ;;  %v5048_v44 = vld [vmem:[#allocation4 + $0x138] sm:$0xff] }
 0x4d1   :  { %4985 = vst.msk [vmem:[#allocation4 + $0x148] sm:$0xff] %vm722_vm2, %v4920_v51  ;;  %v5600_v37 = vpop.f32.mrf.mxu0  ;;  %12558 = vmatmul.mubr.msk.f32.gmra.mxu0 %vm879_vm3, %v16011_v24 }
 0x4d2   :  { %v4765_v11 = vpop.f32.mrf.mxu1  ;;  %v5768_v39 = vadd.f32 %v5600_v37, %v5048_v44  ;;  %12364 = vmatmul.mubr.msk.f32.gmra.mxu1 %vm879_vm3, %v15921_v19  ;;  %12560 = vmatprep.mubr.msk.f32.mxu0 %vm13222_vm1, %v15807_v16  ;;  %v4202_v19 = vld [vmem:[#allocation4 + $0x158] sm:$0xff] }
 0x4d3   :  { %v4921_v52 = vadd.f32 %v4765_v11, %v4201_v25  ;;  %v12204_v3 = vpop.f32.mrf.mxu0  ;;  %12366 = vmatprep.mubr.msk.f32.mxu1 %vm13222_vm1, %v15807_v16  ;;  %v16095_v11 = vld [vmem:[#allocation3 + $0x1c8] sm:$0xff] }
 0x4d4   :  { %5833 = vst.msk [vmem:[#allocation4 + $0x138] sm:$0xff] %vm722_vm2, %v5768_v39  ;;  %v12010_v33 = vpop.f32.mrf.mxu1  ;;  %v5049_v22 = vld [vmem:[#allocation4 + $0x140] sm:$0xff] }
 0x4d5   :  { %4986 = vst.msk [vmem:[#allocation4 + $0x150] sm:$0xff] %vm722_vm2, %v4921_v52  ;;  %v5605_v10 = vpop.f32.mrf.mxu0  ;;  %12561 = vmatmul.mubr.msk.f32.gmra.mxu0 %vm879_vm3, %v16023_v50 }
 0x4d6   :  { %v4770_v18 = vpop.f32.mrf.mxu1  ;;  %v5769_v54 = vadd.f32 %v5605_v10, %v5049_v22  ;;  %12367 = vmatmul.mubr.msk.f32.gmra.mxu1 %vm879_vm3, %v15936_v23  ;;  %12563 = vmatprep.mubr.msk.f32.mxu0 %vm13222_vm1, %v15807_v16  ;;  %v4203_v23 = vld [vmem:[#allocation4 + $0x160] sm:$0xff] }
 0x4d7   :  { %v4922_v1 = vadd.f32 %v4770_v18, %v4202_v19  ;;  %v12207_v31 = vpop.f32.mrf.mxu0  ;;  %12369 = vmatprep.mubr.msk.f32.mxu1 %vm13222_vm1, %v15807_v16  ;;  %v16107_v18 = vld [vmem:[#allocation3 + $0x1d0] sm:$0xff] }
 0x4d8   :  { %5834 = vst.msk [vmem:[#allocation4 + $0x140] sm:$0xff] %vm722_vm2, %v5769_v54  ;;  %v12013_v7 = vpop.f32.mrf.mxu1  ;;  %v5050_v43 = vld [vmem:[#allocation4 + $0x148] sm:$0xff] }
 0x4d9   :  { %4987 = vst.msk [vmem:[#allocation4 + $0x158] sm:$0xff] %vm722_vm2, %v4922_v1  ;;  %v5610_v13 = vpop.f32.mrf.mxu0  ;;  %12564 = vmatmul.mubr.msk.f32.gmra.mxu0 %vm879_vm3, %v16035_v55 }
 0x4da   :  { %v4775_v63 = vpop.f32.mrf.mxu1  ;;  %v5770_v48 = vadd.f32 %v5610_v13, %v5050_v43  ;;  %12370 = vmatmul.mubr.msk.f32.gmra.mxu1 %vm879_vm3, %v15948_v6  ;;  %12566 = vmatprep.mubr.msk.f32.mxu0 %vm13222_vm1, %v15807_v16  ;;  %v4204_v6 = vld [vmem:[#allocation4 + $0x168] sm:$0xff] }
 0x4db   :  { %v4923_v42 = vadd.f32 %v4775_v63, %v4203_v23  ;;  %v12210_v62 = vpop.f32.mrf.mxu0  ;;  %12372 = vmatprep.mubr.msk.f32.mxu1 %vm13222_vm1, %v15807_v16  ;;  %v16119_v63 = vld [vmem:[#allocation3 + $0x1d8] sm:$0xff] }
 0x4dc   :  { %5835 = vst.msk [vmem:[#allocation4 + $0x148] sm:$0xff] %vm722_vm2, %v5770_v48  ;;  %v12016_v47 = vpop.f32.mrf.mxu1  ;;  %v5051_v2 = vld [vmem:[#allocation4 + $0x150] sm:$0xff] }
 0x4dd   :  { %4988 = vst.msk [vmem:[#allocation4 + $0x160] sm:$0xff] %vm722_vm2, %v4923_v42  ;;  %v5615_v59 = vpop.f32.mrf.mxu0  ;;  %12567 = vmatmul.mubr.msk.f32.gmra.mxu0 %vm879_vm3, %v16047_v38 }
 0x4de   :  { %v4780_v15 = vpop.f32.mrf.mxu1  ;;  %v5771_v29 = vadd.f32 %v5615_v59, %v5051_v2  ;;  %12373 = vmatmul.mubr.msk.f32.gmra.mxu1 %vm879_vm3, %v15963_v27  ;;  %12569 = vmatprep.mubr.msk.f32.mxu0 %vm13222_vm1, %v15807_v16  ;;  %v4205_v27 = vld [vmem:[#allocation4 + $0x170] sm:$0xff] }
 0x4df   :  { %v4924_v30 = vadd.f32 %v4780_v15, %v4204_v6  ;;  %v12213_v8 = vpop.f32.mrf.mxu0  ;;  %12375 = vmatprep.mubr.msk.f32.mxu1 %vm13222_vm1, %v15807_v16  ;;  %v16131_v15 = vld [vmem:[#allocation3 + $0x1e0] sm:$0xff] }
 0x4e0   :  { %5836 = vst.msk [vmem:[#allocation4 + $0x150] sm:$0xff] %vm722_vm2, %v5771_v29  ;;  %v12019_v28 = vpop.f32.mrf.mxu1  ;;  %v5052_v60 = vld [vmem:[#allocation4 + $0x158] sm:$0xff] }
 0x4e1   :  { %4989 = vst.msk [vmem:[#allocation4 + $0x168] sm:$0xff] %vm722_vm2, %v4924_v30  ;;  %v5620_v35 = vpop.f32.mrf.mxu0  ;;  %12570 = vmatmul.mubr.msk.f32.gmra.mxu0 %vm879_vm3, %v16059_v5 }
 0x4e2   :  { %v4785_v9 = vpop.f32.mrf.mxu1  ;;  %v5772_v17 = vadd.f32 %v5620_v35, %v5052_v60  ;;  %12376 = vmatmul.mubr.msk.f32.gmra.mxu1 %vm879_vm3, %v15975_v61  ;;  %12572 = vmatprep.mubr.msk.f32.mxu0 %vm13222_vm1, %v15807_v16  ;;  %v4206_v61 = vld [vmem:[#allocation4 + $0x178] sm:$0xff] }
 0x4e3   :  { %v4925_v34 = vadd.f32 %v4785_v9, %v4205_v27  ;;  %v12216_v56 = vpop.f32.mrf.mxu0  ;;  %12378 = vmatprep.mubr.msk.f32.mxu1 %vm13222_vm1, %v15807_v16  ;;  %v16143_v9 = vld [vmem:[#allocation3 + $0x1e8] sm:$0xff] }
 0x4e4   :  { %5837 = vst.msk [vmem:[#allocation4 + $0x158] sm:$0xff] %vm722_vm2, %v5772_v17  ;;  %v12022_v32 = vpop.f32.mrf.mxu1  ;;  %v5053_v20 = vld [vmem:[#allocation4 + $0x160] sm:$0xff] }
 0x4e5   :  { %4990 = vst.msk [vmem:[#allocation4 + $0x170] sm:$0xff] %vm722_vm2, %v4925_v34  ;;  %v5625_v26 = vpop.f32.mrf.mxu0  ;;  %12573 = vmatmul.mubr.msk.f32.gmra.mxu0 %vm879_vm3, %v16071_v14 }
 0x4e6   :  { %v4790_v53 = vpop.f32.mrf.mxu1  ;;  %v5773_v36 = vadd.f32 %v5625_v26, %v5053_v20  ;;  %12379 = vmatmul.mubr.msk.f32.gmra.mxu1 %vm879_vm3, %v15987_v40  ;;  %12575 = vmatprep.mubr.msk.f32.mxu0 %vm13222_vm1, %v15807_v16  ;;  %v4207_v40 = vld [vmem:[#allocation4 + $0x180] sm:$0xff] }
 0x4e7   :  { %v4926_v0 = vadd.f32 %v4790_v53, %v4206_v61  ;;  %v12219_v57 = vpop.f32.mrf.mxu0  ;;  %12381 = vmatprep.mubr.msk.f32.mxu1 %vm13222_vm1, %v15807_v16  ;;  %v16155_v53 = vld [vmem:[#allocation3 + $0x1f0] sm:$0xff] }
 0x4e8   :  { %5838 = vst.msk [vmem:[#allocation4 + $0x160] sm:$0xff] %vm722_vm2, %v5773_v36  ;;  %v12025_v4 = vpop.f32.mrf.mxu1  ;;  %v5054_v12 = vld [vmem:[#allocation4 + $0x168] sm:$0xff] }
 0x4e9   :  { %4991 = vst.msk [vmem:[#allocation4 + $0x178] sm:$0xff] %vm722_vm2, %v4926_v0  ;;  %v5630_v51 = vpop.f32.mrf.mxu0  ;;  %12576 = vmatmul.mubr.msk.f32.gmra.mxu0 %vm879_vm3, %v16083_v49 }
 0x4ea   :  { %v4795_v58 = vpop.f32.mrf.mxu1  ;;  %v5774_v21 = vadd.f32 %v5630_v51, %v5054_v12  ;;  %12382 = vmatmul.mubr.msk.f32.gmra.mxu1 %vm879_vm3, %v15999_v46  ;;  %12578 = vmatprep.mubr.msk.f32.mxu0 %vm13222_vm1, %v15807_v16  ;;  %v4208_v46 = vld [vmem:[#allocation4 + $0x188] sm:$0xff] }
 0x4eb   :  { %v4927_v44 = vadd.f32 %v4795_v58, %v4207_v40  ;;  %v12222_v37 = vpop.f32.mrf.mxu0  ;;  %12384 = vmatprep.mubr.msk.f32.mxu1 %vm13222_vm1, %v15807_v16  ;;  %v16167_v58 = vld [vmem:[#allocation3 + $0x1f8] sm:$0xff] }
 0x4ec   :  { %5839 = vst.msk [vmem:[#allocation4 + $0x168] sm:$0xff] %vm722_vm2, %v5774_v21  ;;  %v12028_v25 = vpop.f32.mrf.mxu1  ;;  %v5055_v39 = vld [vmem:[#allocation4 + $0x170] sm:$0xff] }
 0x4ed   :  { %4992 = vst.msk [vmem:[#allocation4 + $0x180] sm:$0xff] %vm722_vm2, %v4927_v44  ;;  %v5635_v52 = vpop.f32.mrf.mxu0  ;;  %12579 = vmatmul.mubr.msk.f32.gmra.mxu0 %vm879_vm3, %v16095_v11 }
 0x4ee   :  { %v4800_v3 = vpop.f32.mrf.mxu1  ;;  %v5775_v33 = vadd.f32 %v5635_v52, %v5055_v39  ;;  %12385 = vmatmul.mubr.msk.f32.gmra.mxu1 %vm879_vm3, %v16011_v24  ;;  %12581 = vmatprep.mubr.msk.f32.mxu0 %vm13222_vm1, %v15807_v16  ;;  %v4209_v24 = vld [vmem:[#allocation4 + $0x190] sm:$0xff] }
 0x4ef   :  { %v4928_v22 = vadd.f32 %v4800_v3, %v4208_v46  ;;  %v12225_v10 = vpop.f32.mrf.mxu0  ;;  %12387 = vmatprep.mubr.msk.f32.mxu1 %vm13222_vm1, %v15807_v16  ;;  %v16179_v3 = vld [vmem:[#allocation3 + $0x200] sm:$0xff] }
 0x4f0   :  { %5840 = vst.msk [vmem:[#allocation4 + $0x170] sm:$0xff] %vm722_vm2, %v5775_v33  ;;  %v12031_v19 = vpop.f32.mrf.mxu1  ;;  %v5056_v54 = vld [vmem:[#allocation4 + $0x178] sm:$0xff] }
 0x4f1   :  { %4993 = vst.msk [vmem:[#allocation4 + $0x188] sm:$0xff] %vm722_vm2, %v4928_v22  ;;  %v5640_v1 = vpop.f32.mrf.mxu0  ;;  %12582 = vmatmul.mubr.msk.f32.gmra.mxu0 %vm879_vm3, %v16107_v18 }
 0x4f2   :  { %v4805_v31 = vpop.f32.mrf.mxu1  ;;  %v5776_v7 = vadd.f32 %v5640_v1, %v5056_v54  ;;  %12388 = vmatmul.mubr.msk.f32.gmra.mxu1 %vm879_vm3, %v16023_v50  ;;  %12584 = vmatprep.mubr.msk.f32.mxu0 %vm13222_vm1, %v15807_v16  ;;  %v4210_v50 = vld [vmem:[#allocation4 + $0x198] sm:$0xff] }
 0x4f3   :  { %v4929_v43 = vadd.f32 %v4805_v31, %v4209_v24  ;;  %v12228_v13 = vpop.f32.mrf.mxu0  ;;  %12390 = vmatprep.mubr.msk.f32.mxu1 %vm13222_vm1, %v15807_v16  ;;  %v16191_v31 = vld [vmem:[#allocation3 + $0x208] sm:$0xff] }
 0x4f4   :  { %5841 = vst.msk [vmem:[#allocation4 + $0x178] sm:$0xff] %vm722_vm2, %v5776_v7  ;;  %v12034_v23 = vpop.f32.mrf.mxu1  ;;  %v5057_v48 = vld [vmem:[#allocation4 + $0x180] sm:$0xff] }
 0x4f5   :  { %4994 = vst.msk [vmem:[#allocation4 + $0x190] sm:$0xff] %vm722_vm2, %v4929_v43  ;;  %v5645_v42 = vpop.f32.mrf.mxu0  ;;  %12585 = vmatmul.mubr.msk.f32.gmra.mxu0 %vm879_vm3, %v16119_v63 }
 0x4f6   :  { %v4810_v62 = vpop.f32.mrf.mxu1  ;;  %v5777_v47 = vadd.f32 %v5645_v42, %v5057_v48  ;;  %12391 = vmatmul.mubr.msk.f32.gmra.mxu1 %vm879_vm3, %v16035_v55  ;;  %12587 = vmatprep.mubr.msk.f32.mxu0 %vm13222_vm1, %v15807_v16  ;;  %v4211_v55 = vld [vmem:[#allocation4 + $0x1a0] sm:$0xff] }
 0x4f7   :  { %v4930_v2 = vadd.f32 %v4810_v62, %v4210_v50  ;;  %v12231_v59 = vpop.f32.mrf.mxu0  ;;  %12393 = vmatprep.mubr.msk.f32.mxu1 %vm13222_vm1, %v15807_v16  ;;  %v16203_v62 = vld [vmem:[#allocation3 + $0x210] sm:$0xff] }
 0x4f8   :  { %5842 = vst.msk [vmem:[#allocation4 + $0x180] sm:$0xff] %vm722_vm2, %v5777_v47  ;;  %v12037_v6 = vpop.f32.mrf.mxu1  ;;  %v5058_v29 = vld [vmem:[#allocation4 + $0x188] sm:$0xff] }
 0x4f9   :  { %4995 = vst.msk [vmem:[#allocation4 + $0x198] sm:$0xff] %vm722_vm2, %v4930_v2  ;;  %v5650_v30 = vpop.f32.mrf.mxu0  ;;  %12588 = vmatmul.mubr.msk.f32.gmra.mxu0 %vm879_vm3, %v16131_v15 }
 0x4fa   :  { %v4815_v8 = vpop.f32.mrf.mxu1  ;;  %v5778_v28 = vadd.f32 %v5650_v30, %v5058_v29  ;;  %12394 = vmatmul.mubr.msk.f32.gmra.mxu1 %vm879_vm3, %v16047_v38  ;;  %12590 = vmatprep.mubr.msk.f32.mxu0 %vm13222_vm1, %v15807_v16  ;;  %v4212_v38 = vld [vmem:[#allocation4 + $0x1a8] sm:$0xff] }
 0x4fb   :  { %v4931_v60 = vadd.f32 %v4815_v8, %v4211_v55  ;;  %v12234_v35 = vpop.f32.mrf.mxu0  ;;  %12396 = vmatprep.mubr.msk.f32.mxu1 %vm13222_vm1, %v15807_v16  ;;  %v16215_v8 = vld [vmem:[#allocation3 + $0x218] sm:$0xff] }
 0x4fc   :  { %5843 = vst.msk [vmem:[#allocation4 + $0x188] sm:$0xff] %vm722_vm2, %v5778_v28  ;;  %v12040_v27 = vpop.f32.mrf.mxu1  ;;  %v5059_v17 = vld [vmem:[#allocation4 + $0x190] sm:$0xff] }
 0x4fd   :  { %4996 = vst.msk [vmem:[#allocation4 + $0x1a0] sm:$0xff] %vm722_vm2, %v4931_v60  ;;  %v5655_v34 = vpop.f32.mrf.mxu0  ;;  %12591 = vmatmul.mubr.msk.f32.gmra.mxu0 %vm879_vm3, %v16143_v9 }
 0x4fe   :  { %v4820_v56 = vpop.f32.mrf.mxu1  ;;  %v5779_v32 = vadd.f32 %v5655_v34, %v5059_v17  ;;  %12397 = vmatmul.mubr.msk.f32.gmra.mxu1 %vm879_vm3, %v16059_v5  ;;  %12593 = vmatprep.mubr.msk.f32.mxu0 %vm13222_vm1, %v15807_v16  ;;  %v4213_v5 = vld [vmem:[#allocation4 + $0x1b0] sm:$0xff] }
 0x4ff   :  { %v4932_v20 = vadd.f32 %v4820_v56, %v4212_v38  ;;  %v12237_v26 = vpop.f32.mrf.mxu0  ;;  %12399 = vmatprep.mubr.msk.f32.mxu1 %vm13222_vm1, %v15807_v16  ;;  %v16222_v17 = vld [vmem:[#allocation2 + $0x1c0] sm:$0xff] }
 0x500   :  { %5844 = vst.msk [vmem:[#allocation4 + $0x190] sm:$0xff] %vm722_vm2, %v5779_v32  ;;  %v12043_v61 = vpop.f32.mrf.mxu1  ;;  %v5060_v36 = vld [vmem:[#allocation4 + $0x198] sm:$0xff]  ;;  %v16229_v56 = vld [vmem:[#allocation3 + $0x220] sm:$0xff] }
 0x501   :  { %4997 = vst.msk [vmem:[#allocation4 + $0x1a8] sm:$0xff] %vm722_vm2, %v4932_v20  ;;  %v5660_v0 = vpop.f32.mrf.mxu0  ;;  %12594 = vmatmul.mubr.msk.f32.gmra.mxu0 %vm879_vm3, %v16155_v53 }
 0x502   :  { %v4825_v57 = vpop.f32.mrf.mxu1  ;;  %v5780_v4 = vadd.f32 %v5660_v0, %v5060_v36  ;;  %12400 = vmatmul.mubr.msk.f32.gmra.mxu1 %vm879_vm3, %v16071_v14  ;;  %12596 = vmatprep.mubr.msk.f32.mxu0 %vm13222_vm1, %v15807_v16  ;;  %v4214_v14 = vld [vmem:[#allocation4 + $0x1b8] sm:$0xff] }
 0x503   :  { %v4933_v12 = vadd.f32 %v4825_v57, %v4213_v5  ;;  %v12240_v51 = vpop.f32.mrf.mxu0  ;;  %12402 = vmatprep.mubr.msk.f32.mxu1 %vm13222_vm1, %v15807_v16  ;;  %v16241_v57 = vld [vmem:[#allocation3 + $0x228] sm:$0xff] }
 0x504   :  { %5845 = vst.msk [vmem:[#allocation4 + $0x198] sm:$0xff] %vm722_vm2, %v5780_v4  ;;  %v12046_v40 = vpop.f32.mrf.mxu1  ;;  %v5061_v21 = vld [vmem:[#allocation4 + $0x1a0] sm:$0xff] }
 0x505   :  { %4998 = vst.msk [vmem:[#allocation4 + $0x1b0] sm:$0xff] %vm722_vm2, %v4933_v12  ;;  %v5665_v44 = vpop.f32.mrf.mxu0  ;;  %12597 = vmatmul.mubr.msk.f32.gmra.mxu0 %vm879_vm3, %v16167_v58 }
 0x506   :  { %v4830_v37 = vpop.f32.mrf.mxu1  ;;  %v5781_v25 = vadd.f32 %v5665_v44, %v5061_v21  ;;  %12403 = vmatmul.mubr.msk.f32.gmra.mxu1 %vm879_vm3, %v16083_v49  ;;  %12599 = vmatprep.mubr.msk.f32.mxu0 %vm13222_vm1, %v15807_v16  ;;  %v4215_v49 = vld [vmem:[#allocation4 + $0x1c0] sm:$0xff] }
 0x507   :  { %v4934_v39 = vadd.f32 %v4830_v37, %v4214_v14  ;;  %v12243_v52 = vpop.f32.mrf.mxu0  ;;  %12405 = vmatprep.mubr.msk.f32.mxu1 %vm13222_vm1, %v15807_v16  ;;  %v16253_v37 = vld [vmem:[#allocation3 + $0x230] sm:$0xff] }
 0x508   :  { %5846 = vst.msk [vmem:[#allocation4 + $0x1a0] sm:$0xff] %vm722_vm2, %v5781_v25  ;;  %v12049_v46 = vpop.f32.mrf.mxu1  ;;  %v5062_v33 = vld [vmem:[#allocation4 + $0x1a8] sm:$0xff] }
 0x509   :  { %4999 = vst.msk [vmem:[#allocation4 + $0x1b8] sm:$0xff] %vm722_vm2, %v4934_v39  ;;  %v5670_v22 = vpop.f32.mrf.mxu0  ;;  %12600 = vmatmul.mubr.msk.f32.gmra.mxu0 %vm879_vm3, %v16179_v3 }
 0x50a   :  { %v4835_v10 = vpop.f32.mrf.mxu1  ;;  %v5782_v19 = vadd.f32 %v5670_v22, %v5062_v33  ;;  %12406 = vmatmul.mubr.msk.f32.gmra.mxu1 %vm879_vm3, %v16095_v11  ;;  %12602 = vmatprep.mubr.msk.f32.mxu0 %vm13222_vm1, %v15807_v16  ;;  %v4216_v11 = vld [vmem:[#allocation4 + $0x1c8] sm:$0xff] }
 0x50b   :  { %v4935_v54 = vadd.f32 %v4835_v10, %v4215_v49  ;;  %v12246_v1 = vpop.f32.mrf.mxu0  ;;  %12408 = vmatprep.mubr.msk.f32.mxu1 %vm13222_vm1, %v15807_v16  ;;  %v16265_v10 = vld [vmem:[#allocation3 + $0x238] sm:$0xff] }
 0x50c   :  { %5847 = vst.msk [vmem:[#allocation4 + $0x1a8] sm:$0xff] %vm722_vm2, %v5782_v19  ;;  %v12052_v24 = vpop.f32.mrf.mxu1  ;;  %v5063_v7 = vld [vmem:[#allocation4 + $0x1b0] sm:$0xff] }
 0x50d   :  { %5000 = vst.msk [vmem:[#allocation4 + $0x1c0] sm:$0xff] %vm722_vm2, %v4935_v54  ;;  %v5675_v43 = vpop.f32.mrf.mxu0  ;;  %12603 = vmatmul.mubr.msk.f32.gmra.mxu0 %vm879_vm3, %v16191_v31 }
 0x50e   :  { %v4840_v13 = vpop.f32.mrf.mxu1  ;;  %v5783_v23 = vadd.f32 %v5675_v43, %v5063_v7  ;;  %12409 = vmatmul.mubr.msk.f32.gmra.mxu1 %vm879_vm3, %v16107_v18  ;;  %12605 = vmatprep.mubr.msk.f32.mxu0 %vm13222_vm1, %v15807_v16  ;;  %v4217_v18 = vld [vmem:[#allocation4 + $0x1d0] sm:$0xff] }
 0x50f   :  { %v4936_v48 = vadd.f32 %v4840_v13, %v4216_v11  ;;  %v12249_v42 = vpop.f32.mrf.mxu0  ;;  %12411 = vmatprep.mubr.msk.f32.mxu1 %vm13222_vm1, %v15807_v16  ;;  %v16277_v13 = vld [vmem:[#allocation3 + $0x240] sm:$0xff] }
 0x510   :  { %5848 = vst.msk [vmem:[#allocation4 + $0x1b0] sm:$0xff] %vm722_vm2, %v5783_v23  ;;  %v12055_v50 = vpop.f32.mrf.mxu1  ;;  %v5064_v47 = vld [vmem:[#allocation4 + $0x1b8] sm:$0xff] }
 0x511   :  { %5001 = vst.msk [vmem:[#allocation4 + $0x1c8] sm:$0xff] %vm722_vm2, %v4936_v48  ;;  %v5680_v2 = vpop.f32.mrf.mxu0  ;;  %12606 = vmatmul.mubr.msk.f32.gmra.mxu0 %vm879_vm3, %v16203_v62 }
 0x512   :  { %v4845_v59 = vpop.f32.mrf.mxu1  ;;  %v5784_v6 = vadd.f32 %v5680_v2, %v5064_v47  ;;  %12412 = vmatmul.mubr.msk.f32.gmra.mxu1 %vm879_vm3, %v16119_v63  ;;  %12608 = vmatprep.mubr.msk.f32.mxu0 %vm13222_vm1, %v15807_v16  ;;  %v4218_v63 = vld [vmem:[#allocation4 + $0x1d8] sm:$0xff] }
 0x513   :  { %v4937_v29 = vadd.f32 %v4845_v59, %v4217_v18  ;;  %v12252_v30 = vpop.f32.mrf.mxu0  ;;  %12414 = vmatprep.mubr.msk.f32.mxu1 %vm13222_vm1, %v15807_v16  ;;  %v16289_v59 = vld [vmem:[#allocation3 + $0x248] sm:$0xff] }
 0x514   :  { %5849 = vst.msk [vmem:[#allocation4 + $0x1b8] sm:$0xff] %vm722_vm2, %v5784_v6  ;;  %v12058_v55 = vpop.f32.mrf.mxu1  ;;  %v5065_v28 = vld [vmem:[#allocation4 + $0x1c0] sm:$0xff] }
 0x515   :  { %5002 = vst.msk [vmem:[#allocation4 + $0x1d0] sm:$0xff] %vm722_vm2, %v4937_v29  ;;  %v5685_v60 = vpop.f32.mrf.mxu0  ;;  %12609 = vmatmul.mubr.msk.f32.gmra.mxu0 %vm879_vm3, %v16215_v8  ;;  %v5859_v30 = vld [vmem:[#allocation4] sm:$0xff] }
 0x516   :  { %v4850_v35 = vpop.f32.mrf.mxu1  ;;  %v5785_v27 = vadd.f32 %v5685_v60, %v5065_v28  ;;  %12415 = vmatmul.mubr.msk.f32.gmra.mxu1 %vm879_vm3, %v16131_v15  ;;  %12611 = vmatprep.mubr.msk.f32.mxu0 %vm13222_vm1, %v16222_v17  ;;  %v4219_v15 = vld [vmem:[#allocation4 + $0x1e0] sm:$0xff] }
 0x517   :  { %v4938_v16 = vadd.f32 %v4850_v35, %v4218_v63  ;;  %v12255_v34 = vpop.f32.mrf.mxu0  ;;  %12417 = vmatprep.mubr.msk.f32.mxu1 %vm13222_vm1, %v16222_v17  ;;  %v16301_v35 = vld [vmem:[#allocation3 + $0x250] sm:$0xff] }
 0x518   :  { %5850 = vst.msk [vmem:[#allocation4 + $0x1c0] sm:$0xff] %vm722_vm2, %v5785_v27  ;;  %v12061_v38 = vpop.f32.mrf.mxu1  ;;  %v5066_v32 = vld [vmem:[#allocation4 + $0x1c8] sm:$0xff] }
 0x519   :  { %5003 = vst.msk [vmem:[#allocation4 + $0x1d8] sm:$0xff] %vm722_vm2, %v4938_v16  ;;  %v5690_v20 = vpop.f32.mrf.mxu0  ;;  %12612 = vmatmul.mubr.msk.f32.gmra.mxu0 %vm879_vm3, %v16229_v56  ;;  %v5860_v34 = vld [vmem:[#allocation4 + $0x8] sm:$0xff] }
 0x51a   :  { %v4855_v26 = vpop.f32.mrf.mxu1  ;;  %v5786_v61 = vadd.f32 %v5690_v20, %v5066_v32  ;;  %12418 = vmatmul.mubr.msk.f32.gmra.mxu1 %vm879_vm3, %v16143_v9  ;;  %12614 = vmatprep.mubr.msk.f32.mxu0 %vm13222_vm1, %v16222_v17  ;;  %v4220_v9 = vld [vmem:[#allocation4 + $0x1e8] sm:$0xff] }
 0x51b   :  { %v4939_v36 = vadd.f32 %v4855_v26, %v4219_v15  ;;  %v12258_v0 = vpop.f32.mrf.mxu0  ;;  %12420 = vmatprep.mubr.msk.f32.mxu1 %vm13222_vm1, %v16222_v17  ;;  %v16313_v26 = vld [vmem:[#allocation3 + $0x258] sm:$0xff] }
 0x51c   :  { %5851 = vst.msk [vmem:[#allocation4 + $0x1c8] sm:$0xff] %vm722_vm2, %v5786_v61  ;;  %v12064_v5 = vpop.f32.mrf.mxu1  ;;  %v5067_v4 = vld [vmem:[#allocation4 + $0x1d0] sm:$0xff] }
 0x51d   :  { %5004 = vst.msk [vmem:[#allocation4 + $0x1e0] sm:$0xff] %vm722_vm2, %v4939_v36  ;;  %v5695_v12 = vpop.f32.mrf.mxu0  ;;  %12615 = vmatmul.mubr.msk.f32.gmra.mxu0 %vm879_vm3, %v16241_v57  ;;  %v5861_v0 = vld [vmem:[#allocation4 + $0x10] sm:$0xff] }
 0x51e   :  { %v4860_v51 = vpop.f32.mrf.mxu1  ;;  %v5787_v40 = vadd.f32 %v5695_v12, %v5067_v4  ;;  %12421 = vmatmul.mubr.msk.f32.gmra.mxu1 %vm879_vm3, %v16155_v53  ;;  %12617 = vmatprep.mubr.msk.f32.mxu0 %vm13222_vm1, %v16222_v17  ;;  %v4221_v53 = vld [vmem:[#allocation4 + $0x1f0] sm:$0xff] }
 0x51f   :  { %v4940_v21 = vadd.f32 %v4860_v51, %v4220_v9  ;;  %v12261_v44 = vpop.f32.mrf.mxu0  ;;  %12423 = vmatprep.mubr.msk.f32.mxu1 %vm13222_vm1, %v16222_v17  ;;  %v16325_v51 = vld [vmem:[#allocation3 + $0x260] sm:$0xff] }
 0x520   :  { %5852 = vst.msk [vmem:[#allocation4 + $0x1d0] sm:$0xff] %vm722_vm2, %v5787_v40  ;;  %v12067_v14 = vpop.f32.mrf.mxu1  ;;  %v5068_v25 = vld [vmem:[#allocation4 + $0x1d8] sm:$0xff] }
 0x521   :  { %5005 = vst.msk [vmem:[#allocation4 + $0x1e8] sm:$0xff] %vm722_vm2, %v4940_v21  ;;  %v5700_v39 = vpop.f32.mrf.mxu0  ;;  %12618 = vmatmul.mubr.msk.f32.gmra.mxu0 %vm879_vm3, %v16253_v37 }
 0x522   :  { %v4865_v52 = vpop.f32.mrf.mxu1  ;;  %v5788_v46 = vadd.f32 %v5700_v39, %v5068_v25  ;;  %12424 = vmatmul.mubr.msk.f32.gmra.mxu1 %vm879_vm3, %v16167_v58  ;;  %12620 = vmatprep.mubr.msk.f32.mxu0 %vm13222_vm1, %v16222_v17  ;;  %v4222_v58 = vld [vmem:[#allocation4 + $0x1f8] sm:$0xff] }
 0x523   :  { %v4941_v33 = vadd.f32 %v4865_v52, %v4221_v53  ;;  %v12264_v22 = vpop.f32.mrf.mxu0  ;;  %12426 = vmatprep.mubr.msk.f32.mxu1 %vm13222_vm1, %v16222_v17  ;;  %v16337_v52 = vld [vmem:[#allocation3 + $0x268] sm:$0xff] }
 0x524   :  { %5853 = vst.msk [vmem:[#allocation4 + $0x1d8] sm:$0xff] %vm722_vm2, %v5788_v46  ;;  %v12070_v49 = vpop.f32.mrf.mxu1  ;;  %v5069_v19 = vld [vmem:[#allocation4 + $0x1e0] sm:$0xff] }
 0x525   :  { %5006 = vst.msk [vmem:[#allocation4 + $0x1f0] sm:$0xff] %vm722_vm2, %v4941_v33  ;;  %v5705_v54 = vpop.f32.mrf.mxu0  ;;  %12621 = vmatmul.mubr.msk.f32.gmra.mxu0 %vm879_vm3, %v16265_v10 }
 0x526   :  { %v4870_v1 = vpop.f32.mrf.mxu1  ;;  %v5789_v24 = vadd.f32 %v5705_v54, %v5069_v19  ;;  %12427 = vmatmul.mubr.msk.f32.gmra.mxu1 %vm879_vm3, %v16179_v3  ;;  %12623 = vmatprep.mubr.msk.f32.mxu0 %vm13222_vm1, %v16222_v17  ;;  %v4223_v3 = vld [vmem:[#allocation4 + $0x200] sm:$0xff] }
 0x527   :  { %v4942_v7 = vadd.f32 %v4870_v1, %v4222_v58  ;;  %v12267_v43 = vpop.f32.mrf.mxu0  ;;  %12429 = vmatprep.mubr.msk.f32.mxu1 %vm13222_vm1, %v16222_v17  ;;  %v16349_v1 = vld [vmem:[#allocation3 + $0x270] sm:$0xff] }
 0x528   :  { %5854 = vst.msk [vmem:[#allocation4 + $0x1e0] sm:$0xff] %vm722_vm2, %v5789_v24  ;;  %v12073_v11 = vpop.f32.mrf.mxu1  ;;  %v5070_v23 = vld [vmem:[#allocation4 + $0x1e8] sm:$0xff] }
 0x529   :  { %5007 = vst.msk [vmem:[#allocation4 + $0x1f8] sm:$0xff] %vm722_vm2, %v4942_v7  ;;  %v5710_v48 = vpop.f32.mrf.mxu0  ;;  %12624 = vmatmul.mubr.msk.f32.gmra.mxu0 %vm879_vm3, %v16277_v13 }
 0x52a   :  { %v4875_v42 = vpop.f32.mrf.mxu1  ;;  %v5790_v50 = vadd.f32 %v5710_v48, %v5070_v23  ;;  %12430 = vmatmul.mubr.msk.f32.gmra.mxu1 %vm879_vm3, %v16191_v31  ;;  %12626 = vmatprep.mubr.msk.f32.mxu0 %vm13222_vm1, %v16222_v17 }
 0x52b   :  { %v4943_v47 = vadd.f32 %v4875_v42, %v4223_v3  ;;  %v12270_v2 = vpop.f32.mrf.mxu0  ;;  %12432 = vmatprep.mubr.msk.f32.mxu1 %vm13222_vm1, %v16222_v17  ;;  %v16361_v42 = vld [vmem:[#allocation3 + $0x278] sm:$0xff] }
 0x52c   :  { %5855 = vst.msk [vmem:[#allocation4 + $0x1e8] sm:$0xff] %vm722_vm2, %v5790_v50  ;;  %v12076_v18 = vpop.f32.mrf.mxu1  ;;  %v5071_v6 = vld [vmem:[#allocation4 + $0x1f0] sm:$0xff] }
 0x52d   :  { %5008 = vst.msk [vmem:[#allocation4 + $0x200] sm:$0xff] %vm722_vm2, %v4943_v47  ;;  %v5715_v29 = vpop.f32.mrf.mxu0  ;;  %12627 = vmatmul.mubr.msk.f32.gmra.mxu0 %vm879_vm3, %v16289_v59 }
 0x52e   :  { %v5791_v31 = vadd.f32 %v5715_v29, %v5071_v6  ;;  %v6255_v55 = vpop.f32.mrf.mxu1  ;;  %12433 = vmatmul.mubr.msk.f32.gmra.mxu1 %vm879_vm3, %v16203_v62  ;;  %12629 = vmatprep.mubr.msk.f32.mxu0 %vm13222_vm1, %v16222_v17 }
 0x52f   :  { %v6579_v28 = vadd.f32 %v6255_v55, %v5859_v30  ;;  %v12273_v60 = vpop.f32.mrf.mxu0  ;;  %12435 = vmatprep.mubr.msk.f32.mxu1 %vm13222_vm1, %v16222_v17  ;;  %v16373_v30 = vld [vmem:[#allocation3 + $0x280] sm:$0xff] }
 0x530   :  { %5856 = vst.msk [vmem:[#allocation4 + $0x1f0] sm:$0xff] %vm722_vm2, %v5791_v31  ;;  %v12290_v63 = vpop.f32.mrf.mxu1  ;;  %v5072_v27 = vld [vmem:[#allocation4 + $0x1f8] sm:$0xff] }
 0x531   :  { %6644 = vst.msk [vmem:[#allocation4] sm:$0xff] %vm722_vm2, %v6579_v28  ;;  %v5720_v16 = vpop.f32.mrf.mxu0  ;;  %12630 = vmatmul.mubr.msk.f32.gmra.mxu0 %vm879_vm3, %v16301_v35 }
 0x532   :  { %v5792_v62 = vadd.f32 %v5720_v16, %v5072_v27  ;;  %v6260_v38 = vpop.f32.mrf.mxu1  ;;  %12436 = vmatmul.mubr.msk.f32.gmra.mxu1 %vm879_vm3, %v16215_v8  ;;  %12632 = vmatprep.mubr.msk.f32.mxu0 %vm13222_vm1, %v16222_v17 }
 0x533   :  { %v6580_v32 = vadd.f32 %v6260_v38, %v5860_v34  ;;  %v12276_v20 = vpop.f32.mrf.mxu0  ;;  %12438 = vmatprep.mubr.msk.f32.mxu1 %vm13222_vm1, %v16222_v17  ;;  %v16385_v34 = vld [vmem:[#allocation3 + $0x288] sm:$0xff] }
 0x534   :  { %5857 = vst.msk [vmem:[#allocation4 + $0x1f8] sm:$0xff] %vm722_vm2, %v5792_v62  ;;  %v12293_v15 = vpop.f32.mrf.mxu1  ;;  %v5073_v61 = vld [vmem:[#allocation4 + $0x200] sm:$0xff] }
 0x535   :  { %6645 = vst.msk [vmem:[#allocation4 + $0x8] sm:$0xff] %vm722_vm2, %v6580_v32  ;;  %v5725_v36 = vpop.f32.mrf.mxu0  ;;  %12633 = vmatmul.mubr.msk.f32.gmra.mxu0 %vm879_vm3, %v16313_v26 }
 0x536   :  { %v5793_v8 = vadd.f32 %v5725_v36, %v5073_v61  ;;  %v6265_v5 = vpop.f32.mrf.mxu1  ;;  %12439 = vmatmul.mubr.msk.f32.gmra.mxu1 %vm879_vm3, %v16229_v56  ;;  %12635 = vmatprep.mubr.msk.f32.mxu0 %vm13222_vm1, %v16222_v17  ;;  %v5862_v56 = vld [vmem:[#allocation4 + $0x18] sm:$0xff] }
 0x537   :  { %v6581_v4 = vadd.f32 %v6265_v5, %v5861_v0  ;;  %v12279_v12 = vpop.f32.mrf.mxu0  ;;  %12441 = vmatprep.mubr.msk.f32.mxu1 %vm13222_vm1, %v16222_v17  ;;  %v16397_v0 = vld [vmem:[#allocation3 + $0x290] sm:$0xff] }
 0x538   :  { %5858 = vst.msk [vmem:[#allocation4 + $0x200] sm:$0xff] %vm722_vm2, %v5793_v8  ;;  %v12296_v9 = vpop.f32.mrf.mxu1  ;;  %v6709_v40 = vld [vmem:[#allocation4] sm:$0xff] }
 0x539   :  { %6646 = vst.msk [vmem:[#allocation4 + $0x10] sm:$0xff] %vm722_vm2, %v6581_v4  ;;  %v7105_v21 = vpop.f32.mrf.mxu0  ;;  %12636 = vmatmul.mubr.msk.f32.gmra.mxu0 %vm879_vm3, %v16325_v51 }
 0x53a   :  { %v6270_v44 = vpop.f32.mrf.mxu1  ;;  %12442 = vmatmul.mubr.msk.f32.gmra.mxu1 %vm879_vm3, %v16241_v57  ;;  %v7429_v14 = vadd.f32 %v7105_v21, %v6709_v40  ;;  %12638 = vmatprep.mubr.msk.f32.mxu0 %vm13222_vm1, %v16222_v17  ;;  %v5863_v57 = vld [vmem:[#allocation4 + $0x20] sm:$0xff] }
 0x53b   :  { %v6582_v25 = vadd.f32 %v6270_v44, %v5862_v56  ;;  %v12493_v39 = vpop.f32.mrf.mxu0  ;;  %12444 = vmatprep.mubr.msk.f32.mxu1 %vm13222_vm1, %v16222_v17  ;;  %v6829_v44 = vld [vmem:[#allocation3 + $0x298] sm:$0xff] }
 0x53c   :  { %7494 = vst.msk [vmem:[#allocation4] sm:$0xff] %vm722_vm2, %v7429_v14  ;;  %v12299_v53 = vpop.f32.mrf.mxu1  ;;  %v6710_v46 = vld [vmem:[#allocation4 + $0x8] sm:$0xff] }
 0x53d   :  { %6647 = vst.msk [vmem:[#allocation4 + $0x18] sm:$0xff] %vm722_vm2, %v6582_v25  ;;  %v7110_v33 = vpop.f32.mrf.mxu0  ;;  %12639 = vmatmul.mubr.msk.f32.gmra.mxu0 %vm879_vm3, %v16337_v52 }
 0x53e   :  { %v6275_v22 = vpop.f32.mrf.mxu1  ;;  %12445 = vmatmul.mubr.msk.f32.gmra.mxu1 %vm879_vm3, %v16253_v37  ;;  %v7430_v49 = vadd.f32 %v7110_v33, %v6710_v46  ;;  %12641 = vmatprep.mubr.msk.f32.mxu0 %vm13222_vm1, %v16222_v17  ;;  %v5864_v37 = vld [vmem:[#allocation4 + $0x28] sm:$0xff] }
 0x53f   :  { %v6583_v19 = vadd.f32 %v6275_v22, %v5863_v57  ;;  %v12496_v54 = vpop.f32.mrf.mxu0  ;;  %12447 = vmatprep.mubr.msk.f32.mxu1 %vm13222_vm1, %v16222_v17  ;;  %v6830_v22 = vld [vmem:[#allocation3 + $0x2a0] sm:$0xff] }
 0x540   :  { %7495 = vst.msk [vmem:[#allocation4 + $0x8] sm:$0xff] %vm722_vm2, %v7430_v49  ;;  %v12302_v58 = vpop.f32.mrf.mxu1  ;;  %v6711_v24 = vld [vmem:[#allocation4 + $0x10] sm:$0xff] }
 0x541   :  { %6648 = vst.msk [vmem:[#allocation4 + $0x20] sm:$0xff] %vm722_vm2, %v6583_v19  ;;  %v7115_v7 = vpop.f32.mrf.mxu0  ;;  %12642 = vmatmul.mubr.msk.f32.gmra.mxu0 %vm879_vm3, %v16349_v1 }
 0x542   :  { %v6280_v43 = vpop.f32.mrf.mxu1  ;;  %12448 = vmatmul.mubr.msk.f32.gmra.mxu1 %vm879_vm3, %v16265_v10  ;;  %v7431_v11 = vadd.f32 %v7115_v7, %v6711_v24  ;;  %12644 = vmatprep.mubr.msk.f32.mxu0 %vm13222_vm1, %v16222_v17  ;;  %v5865_v10 = vld [vmem:[#allocation4 + $0x30] sm:$0xff] }
 0x543   :  { %v6584_v23 = vadd.f32 %v6280_v43, %v5864_v37  ;;  %v12499_v48 = vpop.f32.mrf.mxu0  ;;  %12450 = vmatprep.mubr.msk.f32.mxu1 %vm13222_vm1, %v16222_v17  ;;  %v6831_v43 = vld [vmem:[#allocation3 + $0x2a8] sm:$0xff] }
 0x544   :  { %7496 = vst.msk [vmem:[#allocation4 + $0x10] sm:$0xff] %vm722_vm2, %v7431_v11  ;;  %v12305_v3 = vpop.f32.mrf.mxu1  ;;  %v6712_v50 = vld [vmem:[#allocation4 + $0x18] sm:$0xff] }
 0x545   :  { %6649 = vst.msk [vmem:[#allocation4 + $0x28] sm:$0xff] %vm722_vm2, %v6584_v23  ;;  %v7120_v47 = vpop.f32.mrf.mxu0  ;;  %12645 = vmatmul.mubr.msk.f32.gmra.mxu0 %vm879_vm3, %v16361_v42 }
 0x546   :  { %v6285_v2 = vpop.f32.mrf.mxu1  ;;  %12451 = vmatmul.mubr.msk.f32.gmra.mxu1 %vm879_vm3, %v16277_v13  ;;  %v7432_v18 = vadd.f32 %v7120_v47, %v6712_v50  ;;  %12647 = vmatprep.mubr.msk.f32.mxu0 %vm13222_vm1, %v16222_v17  ;;  %v5866_v13 = vld [vmem:[#allocation4 + $0x38] sm:$0xff] }
 0x547   :  { %v6585_v6 = vadd.f32 %v6285_v2, %v5865_v10  ;;  %v12502_v29 = vpop.f32.mrf.mxu0  ;;  %12453 = vmatprep.mubr.msk.f32.mxu1 %vm13222_vm1, %v16222_v17  ;;  %v6832_v2 = vld [vmem:[#allocation3 + $0x2b0] sm:$0xff] }
 0x548   :  { %7497 = vst.msk [vmem:[#allocation4 + $0x18] sm:$0xff] %vm722_vm2, %v7432_v18  ;;  %v12308_v31 = vpop.f32.mrf.mxu1  ;;  %v6713_v55 = vld [vmem:[#allocation4 + $0x20] sm:$0xff] }
 0x549   :  { %6650 = vst.msk [vmem:[#allocation4 + $0x30] sm:$0xff] %vm722_vm2, %v6585_v6  ;;  %v7125_v28 = vpop.f32.mrf.mxu0  ;;  %12648 = vmatmul.mubr.msk.f32.gmra.mxu0 %vm879_vm3, %v16373_v30 }
 0x54a   :  { %v6290_v60 = vpop.f32.mrf.mxu1  ;;  %12454 = vmatmul.mubr.msk.f32.gmra.mxu1 %vm879_vm3, %v16289_v59  ;;  %v7433_v63 = vadd.f32 %v7125_v28, %v6713_v55  ;;  %12650 = vmatprep.mubr.msk.f32.mxu0 %vm13222_vm1, %v16222_v17  ;;  %v5867_v59 = vld [vmem:[#allocation4 + $0x40] sm:$0xff] }
 0x54b   :  { %v6586_v27 = vadd.f32 %v6290_v60, %v5866_v13  ;;  %v12505_v16 = vpop.f32.mrf.mxu0  ;;  %12456 = vmatprep.mubr.msk.f32.mxu1 %vm13222_vm1, %v16222_v17  ;;  %v6833_v60 = vld [vmem:[#allocation3 + $0x2b8] sm:$0xff] }
 0x54c   :  { %7498 = vst.msk [vmem:[#allocation4 + $0x20] sm:$0xff] %vm722_vm2, %v7433_v63  ;;  %v12311_v62 = vpop.f32.mrf.mxu1  ;;  %v6714_v38 = vld [vmem:[#allocation4 + $0x28] sm:$0xff] }
 0x54d   :  { %6651 = vst.msk [vmem:[#allocation4 + $0x38] sm:$0xff] %vm722_vm2, %v6586_v27  ;;  %v7130_v32 = vpop.f32.mrf.mxu0  ;;  %12651 = vmatmul.mubr.msk.f32.gmra.mxu0 %vm879_vm3, %v16385_v34 }
 0x54e   :  { %v6295_v20 = vpop.f32.mrf.mxu1  ;;  %12457 = vmatmul.mubr.msk.f32.gmra.mxu1 %vm879_vm3, %v16301_v35  ;;  %v7434_v15 = vadd.f32 %v7130_v32, %v6714_v38  ;;  %12653 = vmatprep.mubr.msk.f32.mxu0 %vm13222_vm1, %v16222_v17  ;;  %v5868_v35 = vld [vmem:[#allocation4 + $0x48] sm:$0xff] }
 0x54f   :  { %v6587_v61 = vadd.f32 %v6295_v20, %v5867_v59  ;;  %v12508_v36 = vpop.f32.mrf.mxu0  ;;  %12459 = vmatprep.mubr.msk.f32.mxu1 %vm13222_vm1, %v16222_v17  ;;  %v6834_v20 = vld [vmem:[#allocation3 + $0x2c0] sm:$0xff] }
 0x550   :  { %7499 = vst.msk [vmem:[#allocation4 + $0x28] sm:$0xff] %vm722_vm2, %v7434_v15  ;;  %v12314_v8 = vpop.f32.mrf.mxu1  ;;  %v6715_v5 = vld [vmem:[#allocation4 + $0x30] sm:$0xff] }
 0x551   :  { %6652 = vst.msk [vmem:[#allocation4 + $0x40] sm:$0xff] %vm722_vm2, %v6587_v61  ;;  %v7135_v4 = vpop.f32.mrf.mxu0  ;;  %12654 = vmatmul.mubr.msk.f32.gmra.mxu0 %vm879_vm3, %v16397_v0 }
 0x552   :  { %v6300_v12 = vpop.f32.mrf.mxu1  ;;  %12460 = vmatmul.mubr.msk.f32.gmra.mxu1 %vm879_vm3, %v16313_v26  ;;  %v7435_v9 = vadd.f32 %v7135_v4, %v6715_v5  ;;  %12656 = vmatprep.mubr.msk.f32.mxu0 %vm13222_vm1, %v16222_v17  ;;  %v5869_v26 = vld [vmem:[#allocation4 + $0x50] sm:$0xff] }
 0x553   :  { %v6588_v40 = vadd.f32 %v6300_v12, %v5868_v35  ;;  %v12511_v21 = vpop.f32.mrf.mxu0  ;;  %12462 = vmatprep.mubr.msk.f32.mxu1 %vm13222_vm1, %v16222_v17  ;;  %v6835_v12 = vld [vmem:[#allocation3 + $0x2c8] sm:$0xff] }
 0x554   :  { %7500 = vst.msk [vmem:[#allocation4 + $0x30] sm:$0xff] %vm722_vm2, %v7435_v9  ;;  %v12317_v56 = vpop.f32.mrf.mxu1  ;;  %v6716_v14 = vld [vmem:[#allocation4 + $0x38] sm:$0xff] }
 0x555   :  { %6653 = vst.msk [vmem:[#allocation4 + $0x48] sm:$0xff] %vm722_vm2, %v6588_v40  ;;  %v7140_v25 = vpop.f32.mrf.mxu0  ;;  %12657 = vmatmul.mubr.msk.f32.gmra.mxu0 %vm879_vm3, %v6829_v44 }
 0x556   :  { %v6305_v39 = vpop.f32.mrf.mxu1  ;;  %12463 = vmatmul.mubr.msk.f32.gmra.mxu1 %vm879_vm3, %v16325_v51  ;;  %v7436_v53 = vadd.f32 %v7140_v25, %v6716_v14  ;;  %12659 = vmatprep.mubr.msk.f32.mxu0 %vm13222_vm1, %v16222_v17  ;;  %v5870_v51 = vld [vmem:[#allocation4 + $0x58] sm:$0xff] }
 0x557   :  { %v6589_v46 = vadd.f32 %v6305_v39, %v5869_v26  ;;  %v12514_v33 = vpop.f32.mrf.mxu0  ;;  %12465 = vmatprep.mubr.msk.f32.mxu1 %vm13222_vm1, %v16222_v17  ;;  %v6836_v26 = vld [vmem:[#allocation3 + $0x2d0] sm:$0xff] }
 0x558   :  { %7501 = vst.msk [vmem:[#allocation4 + $0x38] sm:$0xff] %vm722_vm2, %v7436_v53  ;;  %v12320_v57 = vpop.f32.mrf.mxu1  ;;  %v6717_v49 = vld [vmem:[#allocation4 + $0x40] sm:$0xff] }
 0x559   :  { %6654 = vst.msk [vmem:[#allocation4 + $0x50] sm:$0xff] %vm722_vm2, %v6589_v46  ;;  %v7145_v19 = vpop.f32.mrf.mxu0  ;;  %12660 = vmatmul.mubr.msk.f32.gmra.mxu0 %vm879_vm3, %v6830_v22  ;;  %v5876_v46 = vld [vmem:[#allocation4 + $0x88] sm:$0xff] }
 0x55a   :  { %v6310_v54 = vpop.f32.mrf.mxu1  ;;  %12466 = vmatmul.mubr.msk.f32.gmra.mxu1 %vm879_vm3, %v16337_v52  ;;  %v7437_v58 = vadd.f32 %v7145_v19, %v6717_v49  ;;  %12662 = vmatprep.mubr.msk.f32.mxu0 %vm13222_vm1, %v16222_v17  ;;  %v5871_v52 = vld [vmem:[#allocation4 + $0x60] sm:$0xff] }
 0x55b   :  { %v6590_v24 = vadd.f32 %v6310_v54, %v5870_v51  ;;  %v12517_v7 = vpop.f32.mrf.mxu0  ;;  %12468 = vmatprep.mubr.msk.f32.mxu1 %vm13222_vm1, %v16222_v17  ;;  %v6837_v51 = vld [vmem:[#allocation3 + $0x2d8] sm:$0xff] }
 0x55c   :  { %7502 = vst.msk [vmem:[#allocation4 + $0x40] sm:$0xff] %vm722_vm2, %v7437_v58  ;;  %v12323_v37 = vpop.f32.mrf.mxu1  ;;  %v6718_v11 = vld [vmem:[#allocation4 + $0x48] sm:$0xff]  ;;  %v5877_v7 = vld [vmem:[#allocation4 + $0x90] sm:$0xff] }
 0x55d   :  { %6655 = vst.msk [vmem:[#allocation4 + $0x58] sm:$0xff] %vm722_vm2, %v6590_v24  ;;  %v7150_v23 = vpop.f32.mrf.mxu0  ;;  %12663 = vmatmul.mubr.msk.f32.gmra.mxu0 %vm879_vm3, %v6831_v43  ;;  %v7625_v24 = vld [vmem:[#allocation3 + $0xf8] sm:$0xff] }
 0x55e   :  { %v6315_v48 = vpop.f32.mrf.mxu1  ;;  %12469 = vmatmul.mubr.msk.f32.gmra.mxu1 %vm879_vm3, %v16349_v1  ;;  %v7438_v3 = vadd.f32 %v7150_v23, %v6718_v11  ;;  %12665 = vmatprep.mubr.msk.f32.mxu0 %vm13222_vm1, %v16222_v17  ;;  %v5872_v1 = vld [vmem:[#allocation4 + $0x68] sm:$0xff] }
 0x55f   :  { %v6591_v50 = vadd.f32 %v6315_v48, %v5871_v52  ;;  %v12520_v47 = vpop.f32.mrf.mxu0  ;;  %12471 = vmatprep.mubr.msk.f32.mxu1 %vm13222_vm1, %v16222_v17  ;;  %v6838_v48 = vld [vmem:[#allocation3 + $0x2e0] sm:$0xff] }
 0x560   :  { %7503 = vst.msk [vmem:[#allocation4 + $0x48] sm:$0xff] %vm722_vm2, %v7438_v3  ;;  %v12326_v10 = vpop.f32.mrf.mxu1  ;;  %v6719_v18 = vld [vmem:[#allocation4 + $0x50] sm:$0xff] }
 0x561   :  { %6656 = vst.msk [vmem:[#allocation4 + $0x60] sm:$0xff] %vm722_vm2, %v6591_v50  ;;  %v7155_v6 = vpop.f32.mrf.mxu0  ;;  %12666 = vmatmul.mubr.msk.f32.gmra.mxu0 %vm879_vm3, %v6832_v2  ;;  %v7626_v47 = vld [vmem:[#allocation3 + $0x100] sm:$0xff]  ;;  %v5878_v10 = vld [vmem:[#allocation4 + $0x98] sm:$0xff] }
 0x562   :  { %v6320_v29 = vpop.f32.mrf.mxu1  ;;  %12472 = vmatmul.mubr.msk.f32.gmra.mxu1 %vm879_vm3, %v16361_v42  ;;  %v7439_v31 = vadd.f32 %v7155_v6, %v6719_v18  ;;  %12668 = vmatprep.mubr.msk.f32.mxu0 %vm13222_vm1, %v16222_v17  ;;  %v5873_v42 = vld [vmem:[#allocation4 + $0x70] sm:$0xff] }
 0x563   :  { %v6592_v55 = vadd.f32 %v6320_v29, %v5872_v1  ;;  %v12523_v28 = vpop.f32.mrf.mxu0  ;;  %12474 = vmatprep.mubr.msk.f32.mxu1 %vm13222_vm1, %v16222_v17 }
 0x564   :  { %7504 = vst.msk [vmem:[#allocation4 + $0x50] sm:$0xff] %vm722_vm2, %v7439_v31  ;;  %v12329_v13 = vpop.f32.mrf.mxu1  ;;  %v6720_v63 = vld [vmem:[#allocation4 + $0x58] sm:$0xff] }
 0x565   :  { %6657 = vst.msk [vmem:[#allocation4 + $0x68] sm:$0xff] %vm722_vm2, %v6592_v55  ;;  %v7160_v27 = vpop.f32.mrf.mxu0  ;;  %12669 = vmatmul.mubr.msk.f32.gmra.mxu0 %vm879_vm3, %v6833_v60  ;;  %v7627_v28 = vld [vmem:[#allocation3 + $0x108] sm:$0xff]  ;;  %v5879_v13 = vld [vmem:[#allocation4 + $0xa0] sm:$0xff] }
 0x566   :  { %v6325_v16 = vpop.f32.mrf.mxu1  ;;  %12475 = vmatmul.mubr.msk.f32.gmra.mxu1 %vm879_vm3, %v16373_v30  ;;  %v7440_v62 = vadd.f32 %v7160_v27, %v6720_v63  ;;  %12671 = vmatprep.mubr.msk.f32.mxu0 %vm13222_vm1, %v16222_v17  ;;  %v5874_v30 = vld [vmem:[#allocation4 + $0x78] sm:$0xff] }
 0x567   :  { %v6593_v38 = vadd.f32 %v6325_v16, %v5873_v42  ;;  %v12526_v32 = vpop.f32.mrf.mxu0  ;;  %12477 = vmatprep.mubr.msk.f32.mxu1 %vm13222_vm1, %v16222_v17 }
 0x568   :  { %7505 = vst.msk [vmem:[#allocation4 + $0x58] sm:$0xff] %vm722_vm2, %v7440_v62  ;;  %v12332_v59 = vpop.f32.mrf.mxu1  ;;  %v6721_v15 = vld [vmem:[#allocation4 + $0x60] sm:$0xff] }
 0x569   :  { %6658 = vst.msk [vmem:[#allocation4 + $0x70] sm:$0xff] %vm722_vm2, %v6593_v38  ;;  %v7165_v61 = vpop.f32.mrf.mxu0  ;;  %12672 = vmatmul.mubr.msk.f32.gmra.mxu0 %vm879_vm3, %v6834_v20  ;;  %v7628_v32 = vld [vmem:[#allocation3 + $0x110] sm:$0xff]  ;;  %v5880_v59 = vld [vmem:[#allocation4 + $0xa8] sm:$0xff] }
 0x56a   :  { %v6330_v36 = vpop.f32.mrf.mxu1  ;;  %12478 = vmatmul.mubr.msk.f32.gmra.mxu1 %vm879_vm3, %v16385_v34  ;;  %v7441_v8 = vadd.f32 %v7165_v61, %v6721_v15  ;;  %12674 = vmatprep.mubr.msk.f32.mxu0 %vm13222_vm1, %v16222_v17  ;;  %v5875_v34 = vld [vmem:[#allocation4 + $0x80] sm:$0xff] }
 0x56b   :  { %v6594_v5 = vadd.f32 %v6330_v36, %v5874_v30  ;;  %v12529_v4 = vpop.f32.mrf.mxu0  ;;  %12480 = vmatprep.mubr.msk.f32.mxu1 %vm13222_vm1, %v16222_v17 }
 0x56c   :  { %7506 = vst.msk [vmem:[#allocation4 + $0x60] sm:$0xff] %vm722_vm2, %v7441_v8  ;;  %v12335_v35 = vpop.f32.mrf.mxu1  ;;  %v6722_v9 = vld [vmem:[#allocation4 + $0x68] sm:$0xff] }
 0x56d   :  { %6659 = vst.msk [vmem:[#allocation4 + $0x78] sm:$0xff] %vm722_vm2, %v6594_v5  ;;  %v7170_v40 = vpop.f32.mrf.mxu0  ;;  %12675 = vmatmul.mubr.msk.f32.gmra.mxu0 %vm879_vm3, %v6835_v12  ;;  %v7629_v4 = vld [vmem:[#allocation3 + $0x118] sm:$0xff]  ;;  %v5881_v35 = vld [vmem:[#allocation4 + $0xb0] sm:$0xff] }
 0x56e   :  { %v6335_v21 = vpop.f32.mrf.mxu1  ;;  %12481 = vmatmul.mubr.msk.f32.gmra.mxu1 %vm879_vm3, %v16397_v0  ;;  %v7442_v56 = vadd.f32 %v7170_v40, %v6722_v9  ;;  %12677 = vmatprep.mubr.msk.f32.mxu0 %vm13222_vm1, %v16222_v17  ;;  %v7624_v0 = vld [vmem:[#allocation3 + $0xf0] sm:$0xff] }
 0x56f   :  { %v6595_v44 = vadd.f32 %v6335_v21, %v5875_v34  ;;  %v12532_v14 = vpop.f32.mrf.mxu0  ;;  %12694 = vmatprep.mubr.msk.f32.mxu1 %vm13222_vm1, %v16222_v17 }
 0x570   :  { %7507 = vst.msk [vmem:[#allocation4 + $0x68] sm:$0xff] %vm722_vm2, %v7442_v56  ;;  %v12338_v25 = vpop.f32.mrf.mxu1  ;;  %v6723_v39 = vld [vmem:[#allocation4 + $0x70] sm:$0xff] }
 0x571   :  { %6660 = vst.msk [vmem:[#allocation4 + $0x80] sm:$0xff] %vm722_vm2, %v6595_v44  ;;  %v7175_v53 = vpop.f32.mrf.mxu0  ;;  %12678 = vmatmul.mubr.msk.f32.gmra.mxu0 %vm879_vm3, %v6836_v26  ;;  %v7630_v14 = vld [vmem:[#allocation3 + $0x120] sm:$0xff]  ;;  %v5882_v25 = vld [vmem:[#allocation4 + $0xb8] sm:$0xff] }
 0x572   :  { %v6340_v33 = vpop.f32.mrf.mxu1  ;;  %v7443_v57 = vadd.f32 %v7175_v53, %v6723_v39  ;;  %12695 = vmatmul.mubr.msk.f32.vlgmr.msra.gmra.mxu1 %vm879_vm3, %v7624_v0  ;;  %12680 = vmatprep.mubr.msk.f32.mxu0 %vm13222_vm1, %v16222_v17 }
 0x573   :  { %v6596_v22 = vadd.f32 %v6340_v33, %v5876_v46  ;;  %v12535_v49 = vpop.f32.mrf.mxu0  ;;  %12697 = vmatprep.mubr.msk.f32.mxu1 %vm13222_vm1, %v16222_v17 }
 0x574   :  { %7508 = vst.msk [vmem:[#allocation4 + $0x70] sm:$0xff] %vm722_vm2, %v7443_v57  ;;  %v12341_v19 = vpop.f32.mrf.mxu1  ;;  %v6724_v54 = vld [vmem:[#allocation4 + $0x78] sm:$0xff]  ;;  %v5883_v49 = vld [vmem:[#allocation4 + $0xc0] sm:$0xff] }
 0x575   :  { %6661 = vst.msk [vmem:[#allocation4 + $0x88] sm:$0xff] %vm722_vm2, %v6596_v22  ;;  %v7180_v58 = vpop.f32.mrf.mxu0  ;;  %12681 = vmatmul.mubr.msk.f32.gmra.mxu0 %vm879_vm3, %v6837_v51  ;;  %v7631_v22 = vld [vmem:[#allocation3 + $0x128] sm:$0xff] }
 0x576   :  { %v6345_v37 = vpop.f32.mrf.mxu1  ;;  %v7444_v43 = vadd.f32 %v7180_v58, %v6724_v54  ;;  %12698 = vmatmul.mubr.msk.f32.gmra.mxu1 %vm879_vm3, %v7625_v24  ;;  %12683 = vmatprep.mubr.msk.f32.mxu0 %vm13222_vm1, %v16222_v17 }
 0x577   :  { %v6597_v11 = vadd.f32 %v6345_v37, %v5877_v7  ;;  %v12538_v23 = vpop.f32.mrf.mxu0  ;;  %12700 = vmatprep.mubr.msk.f32.mxu1 %vm13222_vm1, %v16222_v17 }
 0x578   :  { %7509 = vst.msk [vmem:[#allocation4 + $0x78] sm:$0xff] %vm722_vm2, %v7444_v43  ;;  %v12344_v52 = vpop.f32.mrf.mxu1  ;;  %v6725_v3 = vld [vmem:[#allocation4 + $0x80] sm:$0xff] }
 0x579   :  { %6662 = vst.msk [vmem:[#allocation4 + $0x90] sm:$0xff] %vm722_vm2, %v6597_v11  ;;  %v7185_v50 = vpop.f32.mrf.mxu0  ;;  %12684 = vmatmul.mubr.msk.f32.gmra.mxu0 %vm879_vm3, %v6838_v48  ;;  %v7632_v43 = vld [vmem:[#allocation3 + $0x130] sm:$0xff]  ;;  %v5884_v11 = vld [vmem:[#allocation4 + $0xc8] sm:$0xff] }
 0x57a   :  { %v6350_v2 = vpop.f32.mrf.mxu1  ;;  %v7445_v18 = vadd.f32 %v7185_v50, %v6725_v3  ;;  %12701 = vmatmul.mubr.msk.f32.gmra.mxu1 %vm879_vm3, %v7626_v47  ;;  %12897 = vmatprep.mubr.msk.f32.mxu0 %vm13222_vm1, %v16222_v17 }
 0x57b   :  { %v6598_v6 = vadd.f32 %v6350_v2, %v5878_v10  ;;  %v12541_v1 = vpop.f32.mrf.mxu0  ;;  %12703 = vmatprep.mubr.msk.f32.mxu1 %vm13222_vm1, %v16222_v17  ;;  %v7633_v2 = vld [vmem:[#allocation3 + $0x138] sm:$0xff] }
 0x57c   :  { %7510 = vst.msk [vmem:[#allocation4 + $0x80] sm:$0xff] %vm722_vm2, %v7445_v18  ;;  %v12347_v29 = vpop.f32.mrf.mxu1  ;;  %v6726_v31 = vld [vmem:[#allocation4 + $0x88] sm:$0xff]  ;;  %v5885_v18 = vld [vmem:[#allocation4 + $0xd0] sm:$0xff] }
 0x57d   :  { %6663 = vst.msk [vmem:[#allocation4 + $0x98] sm:$0xff] %vm722_vm2, %v6598_v6  ;;  %v7190_v55 = vpop.f32.mrf.mxu0  ;;  %12898 = vmatmul.mubr.msk.f32.vlgmr.msra.gmra.mxu0 %vm879_vm3, %v7626_v47 }
 0x57e   :  { %v6355_v60 = vpop.f32.mrf.mxu1  ;;  %v7446_v63 = vadd.f32 %v7190_v55, %v6726_v31  ;;  %12704 = vmatmul.mubr.msk.f32.gmra.mxu1 %vm879_vm3, %v7627_v28  ;;  %12900 = vmatprep.mubr.msk.f32.mxu0 %vm13222_vm1, %v16222_v17 }
 0x57f   :  { %v6599_v27 = vadd.f32 %v6355_v60, %v5879_v13  ;;  %v12544_v42 = vpop.f32.mrf.mxu0  ;;  %12706 = vmatprep.mubr.msk.f32.mxu1 %vm13222_vm1, %v16222_v17  ;;  %v7634_v60 = vld [vmem:[#allocation3 + $0x140] sm:$0xff] }
 0x580   :  { %7511 = vst.msk [vmem:[#allocation4 + $0x88] sm:$0xff] %vm722_vm2, %v7446_v63  ;;  %v12350_v16 = vpop.f32.mrf.mxu1  ;;  %v6727_v62 = vld [vmem:[#allocation4 + $0x90] sm:$0xff]  ;;  %v5886_v63 = vld [vmem:[#allocation4 + $0xd8] sm:$0xff] }
 0x581   :  { %6664 = vst.msk [vmem:[#allocation4 + $0xa0] sm:$0xff] %vm722_vm2, %v6599_v27  ;;  %v7195_v38 = vpop.f32.mrf.mxu0  ;;  %12901 = vmatmul.mubr.msk.f32.gmra.mxu0 %vm879_vm3, %v7627_v28 }
 0x582   :  { %v6360_v20 = vpop.f32.mrf.mxu1  ;;  %v7447_v15 = vadd.f32 %v7195_v38, %v6727_v62  ;;  %12707 = vmatmul.mubr.msk.f32.gmra.mxu1 %vm879_vm3, %v7628_v32  ;;  %12903 = vmatprep.mubr.msk.f32.mxu0 %vm13222_vm1, %v16222_v17 }
 0x583   :  { %v6600_v61 = vadd.f32 %v6360_v20, %v5880_v59  ;;  %v12547_v30 = vpop.f32.mrf.mxu0  ;;  %12709 = vmatprep.mubr.msk.f32.mxu1 %vm13222_vm1, %v16222_v17  ;;  %v7635_v20 = vld [vmem:[#allocation3 + $0x148] sm:$0xff] }
 0x584   :  { %7512 = vst.msk [vmem:[#allocation4 + $0x90] sm:$0xff] %vm722_vm2, %v7447_v15  ;;  %v12353_v36 = vpop.f32.mrf.mxu1  ;;  %v6728_v8 = vld [vmem:[#allocation4 + $0x98] sm:$0xff]  ;;  %v5887_v15 = vld [vmem:[#allocation4 + $0xe0] sm:$0xff] }
 0x585   :  { %6665 = vst.msk [vmem:[#allocation4 + $0xa8] sm:$0xff] %vm722_vm2, %v6600_v61  ;;  %v7200_v5 = vpop.f32.mrf.mxu0  ;;  %12904 = vmatmul.mubr.msk.f32.gmra.mxu0 %vm879_vm3, %v7628_v32  ;;  %v16563_v36 = vld [vmem:[#allocation2 + $0x1c0] sm:$0xff] }
 0x586   :  { %v6365_v12 = vpop.f32.mrf.mxu1  ;;  %v7448_v9 = vadd.f32 %v7200_v5, %v6728_v8  ;;  %12710 = vmatmul.mubr.msk.f32.gmra.mxu1 %vm879_vm3, %v7629_v4  ;;  %12906 = vmatprep.mubr.msk.f32.mxu0 %vm13222_vm1, %v16222_v17 }
 0x587   :  { %v6601_v40 = vadd.f32 %v6365_v12, %v5881_v35  ;;  %v12550_v34 = vpop.f32.mrf.mxu0  ;;  %12712 = vmatprep.mubr.msk.f32.mxu1 %vm13222_vm1, %v16222_v17  ;;  %v7636_v12 = vld [vmem:[#allocation3 + $0x150] sm:$0xff] }
 0x588   :  { %7513 = vst.msk [vmem:[#allocation4 + $0x98] sm:$0xff] %vm722_vm2, %v7448_v9  ;;  %v12356_v21 = vpop.f32.mrf.mxu1  ;;  %v6729_v56 = vld [vmem:[#allocation4 + $0xa0] sm:$0xff]  ;;  %v5888_v9 = vld [vmem:[#allocation4 + $0xe8] sm:$0xff] }
 0x589   :  { %6666 = vst.msk [vmem:[#allocation4 + $0xb0] sm:$0xff] %vm722_vm2, %v6601_v40  ;;  %v7205_v44 = vpop.f32.mrf.mxu0  ;;  %12907 = vmatmul.mubr.msk.f32.gmra.mxu0 %vm879_vm3, %v7629_v4 }
 0x58a   :  { %v6370_v26 = vpop.f32.mrf.mxu1  ;;  %v7449_v39 = vadd.f32 %v7205_v44, %v6729_v56  ;;  %12713 = vmatmul.mubr.msk.f32.gmra.mxu1 %vm879_vm3, %v7630_v14  ;;  %12909 = vmatprep.mubr.msk.f32.mxu0 %vm13222_vm1, %v16222_v17 }
 0x58b   :  { %v6602_v53 = vadd.f32 %v6370_v26, %v5882_v25  ;;  %v12553_v0 = vpop.f32.mrf.mxu0  ;;  %12715 = vmatprep.mubr.msk.f32.mxu1 %vm13222_vm1, %v16222_v17  ;;  %v7637_v26 = vld [vmem:[#allocation3 + $0x158] sm:$0xff] }
 0x58c   :  { %7514 = vst.msk [vmem:[#allocation4 + $0xa0] sm:$0xff] %vm722_vm2, %v7449_v39  ;;  %v12359_v46 = vpop.f32.mrf.mxu1  ;;  %v6730_v33 = vld [vmem:[#allocation4 + $0xa8] sm:$0xff]  ;;  %v5889_v39 = vld [vmem:[#allocation4 + $0xf0] sm:$0xff] }
 0x58d   :  { %6667 = vst.msk [vmem:[#allocation4 + $0xb8] sm:$0xff] %vm722_vm2, %v6602_v53  ;;  %v7210_v57 = vpop.f32.mrf.mxu0  ;;  %12910 = vmatmul.mubr.msk.f32.gmra.mxu0 %vm879_vm3, %v7630_v14 }
 0x58e   :  { %v6375_v19 = vpop.f32.mrf.mxu1  ;;  %v7450_v51 = vadd.f32 %v7210_v57, %v6730_v33  ;;  %12716 = vmatmul.mubr.msk.f32.gmra.mxu1 %vm879_vm3, %v7631_v22  ;;  %12912 = vmatprep.mubr.msk.f32.mxu0 %vm13222_vm1, %v16222_v17 }
 0x58f   :  { %v6603_v54 = vadd.f32 %v6375_v19, %v5883_v49  ;;  %v12556_v58 = vpop.f32.mrf.mxu0  ;;  %12718 = vmatprep.mubr.msk.f32.mxu1 %vm13222_vm1, %v16222_v17  ;;  %v7638_v19 = vld [vmem:[#allocation3 + $0x160] sm:$0xff] }
 0x590   :  { %7515 = vst.msk [vmem:[#allocation4 + $0xa8] sm:$0xff] %vm722_vm2, %v7450_v51  ;;  %v12362_v24 = vpop.f32.mrf.mxu1  ;;  %v6731_v7 = vld [vmem:[#allocation4 + $0xb0] sm:$0xff]  ;;  %v5890_v51 = vld [vmem:[#allocation4 + $0xf8] sm:$0xff] }
 0x591   :  { %6668 = vst.msk [vmem:[#allocation4 + $0xc0] sm:$0xff] %vm722_vm2, %v6603_v54  ;;  %v7215_v37 = vpop.f32.mrf.mxu0  ;;  %12913 = vmatmul.mubr.msk.f32.gmra.mxu0 %vm879_vm3, %v7631_v22 }
 0x592   :  { %v6380_v23 = vpop.f32.mrf.mxu1  ;;  %v7451_v52 = vadd.f32 %v7215_v37, %v6731_v7  ;;  %12719 = vmatmul.mubr.msk.f32.gmra.mxu1 %vm879_vm3, %v7632_v43  ;;  %12915 = vmatprep.mubr.msk.f32.mxu0 %vm13222_vm1, %v16222_v17 }
 0x593   :  { %v6604_v48 = vadd.f32 %v6380_v23, %v5884_v11  ;;  %v12559_v3 = vpop.f32.mrf.mxu0  ;;  %12721 = vmatprep.mubr.msk.f32.mxu1 %vm13222_vm1, %v16222_v17  ;;  %v7639_v23 = vld [vmem:[#allocation3 + $0x168] sm:$0xff] }
 0x594   :  { %7516 = vst.msk [vmem:[#allocation4 + $0xb0] sm:$0xff] %vm722_vm2, %v7451_v52  ;;  %v12365_v50 = vpop.f32.mrf.mxu1  ;;  %v6732_v47 = vld [vmem:[#allocation4 + $0xb8] sm:$0xff]  ;;  %v5891_v52 = vld [vmem:[#allocation4 + $0x100] sm:$0xff] }
 0x595   :  { %6669 = vst.msk [vmem:[#allocation4 + $0xc8] sm:$0xff] %vm722_vm2, %v6604_v48  ;;  %v7220_v10 = vpop.f32.mrf.mxu0  ;;  %12916 = vmatmul.mubr.msk.f32.gmra.mxu0 %vm879_vm3, %v7632_v43 }
 0x596   :  { %v6385_v6 = vpop.f32.mrf.mxu1  ;;  %v7452_v1 = vadd.f32 %v7220_v10, %v6732_v47  ;;  %12722 = vmatmul.mubr.msk.f32.gmra.mxu1 %vm879_vm3, %v7633_v2  ;;  %12918 = vmatprep.mubr.msk.f32.mxu0 %vm13222_vm1, %v16222_v17 }
 0x597   :  { %v6605_v29 = vadd.f32 %v6385_v6, %v5885_v18  ;;  %v12562_v31 = vpop.f32.mrf.mxu0  ;;  %12724 = vmatprep.mubr.msk.f32.mxu1 %vm13222_vm1, %v16222_v17  ;;  %v7640_v6 = vld [vmem:[#allocation3 + $0x170] sm:$0xff] }
 0x598   :  { %7517 = vst.msk [vmem:[#allocation4 + $0xb8] sm:$0xff] %vm722_vm2, %v7452_v1  ;;  %v12368_v55 = vpop.f32.mrf.mxu1  ;;  %v6733_v28 = vld [vmem:[#allocation4 + $0xc0] sm:$0xff]  ;;  %v5892_v1 = vld [vmem:[#allocation4 + $0x108] sm:$0xff] }
 0x599   :  { %6670 = vst.msk [vmem:[#allocation4 + $0xd0] sm:$0xff] %vm722_vm2, %v6605_v29  ;;  %v7225_v13 = vpop.f32.mrf.mxu0  ;;  %12919 = vmatmul.mubr.msk.f32.gmra.mxu0 %vm879_vm3, %v7633_v2 }
 0x59a   :  { %v6390_v27 = vpop.f32.mrf.mxu1  ;;  %v7453_v42 = vadd.f32 %v7225_v13, %v6733_v28  ;;  %12725 = vmatmul.mubr.msk.f32.gmra.mxu1 %vm879_vm3, %v7634_v60  ;;  %12921 = vmatprep.mubr.msk.f32.mxu0 %vm13222_vm1, %v16222_v17 }
 0x59b   :  { %v6606_v16 = vadd.f32 %v6390_v27, %v5886_v63  ;;  %v12565_v62 = vpop.f32.mrf.mxu0  ;;  %12727 = vmatprep.mubr.msk.f32.mxu1 %vm13222_vm1, %v16222_v17  ;;  %v7641_v27 = vld [vmem:[#allocation3 + $0x178] sm:$0xff] }
 0x59c   :  { %7518 = vst.msk [vmem:[#allocation4 + $0xc0] sm:$0xff] %vm722_vm2, %v7453_v42  ;;  %v12371_v38 = vpop.f32.mrf.mxu1  ;;  %v6734_v32 = vld [vmem:[#allocation4 + $0xc8] sm:$0xff]  ;;  %v5893_v42 = vld [vmem:[#allocation4 + $0x110] sm:$0xff] }
 0x59d   :  { %6671 = vst.msk [vmem:[#allocation4 + $0xd8] sm:$0xff] %vm722_vm2, %v6606_v16  ;;  %v7230_v59 = vpop.f32.mrf.mxu0  ;;  %12922 = vmatmul.mubr.msk.f32.gmra.mxu0 %vm879_vm3, %v7634_v60 }
 0x59e   :  { %v6395_v61 = vpop.f32.mrf.mxu1  ;;  %v7454_v30 = vadd.f32 %v7230_v59, %v6734_v32  ;;  %12728 = vmatmul.mubr.msk.f32.gmra.mxu1 %vm879_vm3, %v7635_v20  ;;  %12924 = vmatprep.mubr.msk.f32.mxu0 %vm13222_vm1, %v16563_v36 }
 0x59f   :  { %v6607_v17 = vadd.f32 %v6395_v61, %v5887_v15  ;;  %v12568_v8 = vpop.f32.mrf.mxu0  ;;  %12730 = vmatprep.mubr.msk.f32.mxu1 %vm13222_vm1, %v16563_v36  ;;  %v7642_v61 = vld [vmem:[#allocation3 + $0x180] sm:$0xff] }
 0x5a0   :  { %7519 = vst.msk [vmem:[#allocation4 + $0xc8] sm:$0xff] %vm722_vm2, %v7454_v30  ;;  %v12374_v5 = vpop.f32.mrf.mxu1  ;;  %v6735_v4 = vld [vmem:[#allocation4 + $0xd0] sm:$0xff]  ;;  %v5894_v30 = vld [vmem:[#allocation4 + $0x118] sm:$0xff] }
 0x5a1   :  { %6672 = vst.msk [vmem:[#allocation4 + $0xe0] sm:$0xff] %vm722_vm2, %v6607_v17  ;;  %v7235_v35 = vpop.f32.mrf.mxu0  ;;  %12925 = vmatmul.mubr.msk.f32.gmra.mxu0 %vm879_vm3, %v7635_v20 }
 0x5a2   :  { %v6400_v40 = vpop.f32.mrf.mxu1  ;;  %v7455_v34 = vadd.f32 %v7235_v35, %v6735_v4  ;;  %12731 = vmatmul.mubr.msk.f32.gmra.mxu1 %vm879_vm3, %v7636_v12  ;;  %12927 = vmatprep.mubr.msk.f32.mxu0 %vm13222_vm1, %v16563_v36 }
 0x5a3   :  { %v6608_v21 = vadd.f32 %v6400_v40, %v5888_v9  ;;  %v12571_v56 = vpop.f32.mrf.mxu0  ;;  %12733 = vmatprep.mubr.msk.f32.mxu1 %vm13222_vm1, %v16563_v36  ;;  %v7643_v40 = vld [vmem:[#allocation3 + $0x188] sm:$0xff] }
 0x5a4   :  { %7520 = vst.msk [vmem:[#allocation4 + $0xd0] sm:$0xff] %vm722_vm2, %v7455_v34  ;;  %v12377_v44 = vpop.f32.mrf.mxu1  ;;  %v6736_v14 = vld [vmem:[#allocation4 + $0xd8] sm:$0xff]  ;;  %v5895_v34 = vld [vmem:[#allocation4 + $0x120] sm:$0xff] }
 0x5a5   :  { %6673 = vst.msk [vmem:[#allocation4 + $0xe8] sm:$0xff] %vm722_vm2, %v6608_v21  ;;  %v7240_v25 = vpop.f32.mrf.mxu0  ;;  %12928 = vmatmul.mubr.msk.f32.gmra.mxu0 %vm879_vm3, %v7636_v12 }
 0x5a6   :  { %v6405_v53 = vpop.f32.mrf.mxu1  ;;  %v7456_v0 = vadd.f32 %v7240_v25, %v6736_v14  ;;  %12734 = vmatmul.mubr.msk.f32.gmra.mxu1 %vm879_vm3, %v7637_v26  ;;  %12930 = vmatprep.mubr.msk.f32.mxu0 %vm13222_vm1, %v16563_v36 }
 0x5a7   :  { %v6609_v46 = vadd.f32 %v6405_v53, %v5889_v39  ;;  %v12574_v33 = vpop.f32.mrf.mxu0  ;;  %12736 = vmatprep.mubr.msk.f32.mxu1 %vm13222_vm1, %v16563_v36  ;;  %v7644_v53 = vld [vmem:[#allocation3 + $0x190] sm:$0xff] }
 0x5a8   :  { %7521 = vst.msk [vmem:[#allocation4 + $0xd8] sm:$0xff] %vm722_vm2, %v7456_v0  ;;  %v12380_v57 = vpop.f32.mrf.mxu1  ;;  %v6737_v22 = vld [vmem:[#allocation4 + $0xe0] sm:$0xff]  ;;  %v5896_v0 = vld [vmem:[#allocation4 + $0x128] sm:$0xff] }
 0x5a9   :  { %6674 = vst.msk [vmem:[#allocation4 + $0xf0] sm:$0xff] %vm722_vm2, %v6609_v46  ;;  %v7245_v49 = vpop.f32.mrf.mxu0  ;;  %12931 = vmatmul.mubr.msk.f32.gmra.mxu0 %vm879_vm3, %v7637_v26 }
 0x5aa   :  { %v6410_v54 = vpop.f32.mrf.mxu1  ;;  %v7457_v58 = vadd.f32 %v7245_v49, %v6737_v22  ;;  %12737 = vmatmul.mubr.msk.f32.gmra.mxu1 %vm879_vm3, %v7638_v19  ;;  %12933 = vmatprep.mubr.msk.f32.mxu0 %vm13222_vm1, %v16563_v36 }
 0x5ab   :  { %v6610_v24 = vadd.f32 %v6410_v54, %v5890_v51  ;;  %v12577_v7 = vpop.f32.mrf.mxu0  ;;  %12739 = vmatprep.mubr.msk.f32.mxu1 %vm13222_vm1, %v16563_v36  ;;  %v7645_v54 = vld [vmem:[#allocation3 + $0x198] sm:$0xff] }
 0x5ac   :  { %7522 = vst.msk [vmem:[#allocation4 + $0xe0] sm:$0xff] %vm722_vm2, %v7457_v58  ;;  %v12383_v37 = vpop.f32.mrf.mxu1  ;;  %v6738_v43 = vld [vmem:[#allocation4 + $0xe8] sm:$0xff]  ;;  %v5897_v58 = vld [vmem:[#allocation4 + $0x130] sm:$0xff] }
 0x5ad   :  { %6675 = vst.msk [vmem:[#allocation4 + $0xf8] sm:$0xff] %vm722_vm2, %v6610_v24  ;;  %v7250_v11 = vpop.f32.mrf.mxu0  ;;  %12934 = vmatmul.mubr.msk.f32.gmra.mxu0 %vm879_vm3, %v7638_v19 }
 0x5ae   :  { %v6415_v48 = vpop.f32.mrf.mxu1  ;;  %v7458_v3 = vadd.f32 %v7250_v11, %v6738_v43  ;;  %12740 = vmatmul.mubr.msk.f32.gmra.mxu1 %vm879_vm3, %v7639_v23  ;;  %12936 = vmatprep.mubr.msk.f32.mxu0 %vm13222_vm1, %v16563_v36 }
 0x5af   :  { %v6611_v50 = vadd.f32 %v6415_v48, %v5891_v52  ;;  %v12580_v47 = vpop.f32.mrf.mxu0  ;;  %12742 = vmatprep.mubr.msk.f32.mxu1 %vm13222_vm1, %v16563_v36  ;;  %v7646_v48 = vld [vmem:[#allocation3 + $0x1a0] sm:$0xff] }
 0x5b0   :  { %7523 = vst.msk [vmem:[#allocation4 + $0xe8] sm:$0xff] %vm722_vm2, %v7458_v3  ;;  %v12386_v10 = vpop.f32.mrf.mxu1  ;;  %v6739_v2 = vld [vmem:[#allocation4 + $0xf0] sm:$0xff]  ;;  %v5898_v3 = vld [vmem:[#allocation4 + $0x138] sm:$0xff] }
 0x5b1   :  { %6676 = vst.msk [vmem:[#allocation4 + $0x100] sm:$0xff] %vm722_vm2, %v6611_v50  ;;  %v7255_v18 = vpop.f32.mrf.mxu0  ;;  %12937 = vmatmul.mubr.msk.f32.gmra.mxu0 %vm879_vm3, %v7639_v23 }
 0x5b2   :  { %v6420_v29 = vpop.f32.mrf.mxu1  ;;  %v7459_v31 = vadd.f32 %v7255_v18, %v6739_v2  ;;  %12743 = vmatmul.mubr.msk.f32.gmra.mxu1 %vm879_vm3, %v7640_v6  ;;  %12939 = vmatprep.mubr.msk.f32.mxu0 %vm13222_vm1, %v16563_v36 }
 0x5b3   :  { %v6612_v55 = vadd.f32 %v6420_v29, %v5892_v1  ;;  %v12583_v28 = vpop.f32.mrf.mxu0  ;;  %12745 = vmatprep.mubr.msk.f32.mxu1 %vm13222_vm1, %v16563_v36  ;;  %v7647_v29 = vld [vmem:[#allocation3 + $0x1a8] sm:$0xff] }
 0x5b4   :  { %7524 = vst.msk [vmem:[#allocation4 + $0xf0] sm:$0xff] %vm722_vm2, %v7459_v31  ;;  %v12389_v13 = vpop.f32.mrf.mxu1  ;;  %v6740_v60 = vld [vmem:[#allocation4 + $0xf8] sm:$0xff]  ;;  %v5899_v31 = vld [vmem:[#allocation4 + $0x140] sm:$0xff] }
 0x5b5   :  { %6677 = vst.msk [vmem:[#allocation4 + $0x108] sm:$0xff] %vm722_vm2, %v6612_v55  ;;  %v7260_v63 = vpop.f32.mrf.mxu0  ;;  %12940 = vmatmul.mubr.msk.f32.gmra.mxu0 %vm879_vm3, %v7640_v6 }
 0x5b6   :  { %v6425_v16 = vpop.f32.mrf.mxu1  ;;  %v7460_v62 = vadd.f32 %v7260_v63, %v6740_v60  ;;  %12746 = vmatmul.mubr.msk.f32.gmra.mxu1 %vm879_vm3, %v7641_v27  ;;  %12942 = vmatprep.mubr.msk.f32.mxu0 %vm13222_vm1, %v16563_v36 }
 0x5b7   :  { %v6613_v38 = vadd.f32 %v6425_v16, %v5893_v42  ;;  %v12586_v32 = vpop.f32.mrf.mxu0  ;;  %12748 = vmatprep.mubr.msk.f32.mxu1 %vm13222_vm1, %v16563_v36  ;;  %v7648_v16 = vld [vmem:[#allocation3 + $0x1b0] sm:$0xff] }
 0x5b8   :  { %7525 = vst.msk [vmem:[#allocation4 + $0xf8] sm:$0xff] %vm722_vm2, %v7460_v62  ;;  %v12392_v59 = vpop.f32.mrf.mxu1  ;;  %v6741_v20 = vld [vmem:[#allocation4 + $0x100] sm:$0xff]  ;;  %v5900_v62 = vld [vmem:[#allocation4 + $0x148] sm:$0xff] }
 0x5b9   :  { %6678 = vst.msk [vmem:[#allocation4 + $0x110] sm:$0xff] %vm722_vm2, %v6613_v38  ;;  %v7265_v15 = vpop.f32.mrf.mxu0  ;;  %12943 = vmatmul.mubr.msk.f32.gmra.mxu0 %vm879_vm3, %v7641_v27 }
 0x5ba   :  { %v6430_v17 = vpop.f32.mrf.mxu1  ;;  %v7461_v8 = vadd.f32 %v7265_v15, %v6741_v20  ;;  %12749 = vmatmul.mubr.msk.f32.gmra.mxu1 %vm879_vm3, %v7642_v61  ;;  %12945 = vmatprep.mubr.msk.f32.mxu0 %vm13222_vm1, %v16563_v36 }
 0x5bb   :  { %v6614_v5 = vadd.f32 %v6430_v17, %v5894_v30  ;;  %v12589_v4 = vpop.f32.mrf.mxu0  ;;  %12751 = vmatprep.mubr.msk.f32.mxu1 %vm13222_vm1, %v16563_v36  ;;  %v7649_v17 = vld [vmem:[#allocation3 + $0x1b8] sm:$0xff] }
 0x5bc   :  { %7526 = vst.msk [vmem:[#allocation4 + $0x100] sm:$0xff] %vm722_vm2, %v7461_v8  ;;  %v12395_v35 = vpop.f32.mrf.mxu1  ;;  %v6742_v12 = vld [vmem:[#allocation4 + $0x108] sm:$0xff]  ;;  %v5901_v8 = vld [vmem:[#allocation4 + $0x150] sm:$0xff] }
 0x5bd   :  { %6679 = vst.msk [vmem:[#allocation4 + $0x118] sm:$0xff] %vm722_vm2, %v6614_v5  ;;  %v7270_v9 = vpop.f32.mrf.mxu0  ;;  %12946 = vmatmul.mubr.msk.f32.gmra.mxu0 %vm879_vm3, %v7642_v61 }
 0x5be   :  { %v6435_v21 = vpop.f32.mrf.mxu1  ;;  %v7462_v56 = vadd.f32 %v7270_v9, %v6742_v12  ;;  %12752 = vmatmul.mubr.msk.f32.gmra.mxu1 %vm879_vm3, %v7643_v40  ;;  %12948 = vmatprep.mubr.msk.f32.mxu0 %vm13222_vm1, %v16563_v36 }
 0x5bf   :  { %v6615_v44 = vadd.f32 %v6435_v21, %v5895_v34  ;;  %v12592_v14 = vpop.f32.mrf.mxu0  ;;  %12754 = vmatprep.mubr.msk.f32.mxu1 %vm13222_vm1, %v16563_v36  ;;  %v7650_v21 = vld [vmem:[#allocation3 + $0x1c0] sm:$0xff] }
 0x5c0   :  { %7527 = vst.msk [vmem:[#allocation4 + $0x108] sm:$0xff] %vm722_vm2, %v7462_v56  ;;  %v12398_v25 = vpop.f32.mrf.mxu1  ;;  %v6743_v26 = vld [vmem:[#allocation4 + $0x110] sm:$0xff]  ;;  %v5902_v56 = vld [vmem:[#allocation4 + $0x158] sm:$0xff] }
 0x5c1   :  { %6680 = vst.msk [vmem:[#allocation4 + $0x120] sm:$0xff] %vm722_vm2, %v6615_v44  ;;  %v7275_v39 = vpop.f32.mrf.mxu0  ;;  %12949 = vmatmul.mubr.msk.f32.gmra.mxu0 %vm879_vm3, %v7643_v40 }
 0x5c2   :  { %v6440_v46 = vpop.f32.mrf.mxu1  ;;  %v7463_v33 = vadd.f32 %v7275_v39, %v6743_v26  ;;  %12755 = vmatmul.mubr.msk.f32.gmra.mxu1 %vm879_vm3, %v7644_v53  ;;  %12951 = vmatprep.mubr.msk.f32.mxu0 %vm13222_vm1, %v16563_v36 }
 0x5c3   :  { %v6616_v57 = vadd.f32 %v6440_v46, %v5896_v0  ;;  %v12595_v22 = vpop.f32.mrf.mxu0  ;;  %12757 = vmatprep.mubr.msk.f32.mxu1 %vm13222_vm1, %v16563_v36  ;;  %v7651_v46 = vld [vmem:[#allocation3 + $0x1c8] sm:$0xff] }
 0x5c4   :  { %7528 = vst.msk [vmem:[#allocation4 + $0x110] sm:$0xff] %vm722_vm2, %v7463_v33  ;;  %v12401_v49 = vpop.f32.mrf.mxu1  ;;  %v6744_v19 = vld [vmem:[#allocation4 + $0x118] sm:$0xff]  ;;  %v5903_v33 = vld [vmem:[#allocation4 + $0x160] sm:$0xff] }
 0x5c5   :  { %6681 = vst.msk [vmem:[#allocation4 + $0x128] sm:$0xff] %vm722_vm2, %v6616_v57  ;;  %v7280_v51 = vpop.f32.mrf.mxu0  ;;  %12952 = vmatmul.mubr.msk.f32.gmra.mxu0 %vm879_vm3, %v7644_v53 }
 0x5c6   :  { %v6445_v24 = vpop.f32.mrf.mxu1  ;;  %v7464_v7 = vadd.f32 %v7280_v51, %v6744_v19  ;;  %12758 = vmatmul.mubr.msk.f32.gmra.mxu1 %vm879_vm3, %v7645_v54  ;;  %12954 = vmatprep.mubr.msk.f32.mxu0 %vm13222_vm1, %v16563_v36 }
 0x5c7   :  { %v6617_v37 = vadd.f32 %v6445_v24, %v5897_v58  ;;  %v12598_v43 = vpop.f32.mrf.mxu0  ;;  %12760 = vmatprep.mubr.msk.f32.mxu1 %vm13222_vm1, %v16563_v36  ;;  %v7652_v24 = vld [vmem:[#allocation3 + $0x1d0] sm:$0xff] }
 0x5c8   :  { %7529 = vst.msk [vmem:[#allocation4 + $0x118] sm:$0xff] %vm722_vm2, %v7464_v7  ;;  %v12404_v11 = vpop.f32.mrf.mxu1  ;;  %v6745_v23 = vld [vmem:[#allocation4 + $0x120] sm:$0xff]  ;;  %v5904_v7 = vld [vmem:[#allocation4 + $0x168] sm:$0xff] }
 0x5c9   :  { %6682 = vst.msk [vmem:[#allocation4 + $0x130] sm:$0xff] %vm722_vm2, %v6617_v37  ;;  %v7285_v52 = vpop.f32.mrf.mxu0  ;;  %12955 = vmatmul.mubr.msk.f32.gmra.mxu0 %vm879_vm3, %v7645_v54 }
 0x5ca   :  { %v6450_v50 = vpop.f32.mrf.mxu1  ;;  %v7465_v47 = vadd.f32 %v7285_v52, %v6745_v23  ;;  %12761 = vmatmul.mubr.msk.f32.gmra.mxu1 %vm879_vm3, %v7646_v48  ;;  %12957 = vmatprep.mubr.msk.f32.mxu0 %vm13222_vm1, %v16563_v36 }
 0x5cb   :  { %v6618_v10 = vadd.f32 %v6450_v50, %v5898_v3  ;;  %v12601_v2 = vpop.f32.mrf.mxu0  ;;  %12763 = vmatprep.mubr.msk.f32.mxu1 %vm13222_vm1, %v16563_v36  ;;  %v7653_v50 = vld [vmem:[#allocation3 + $0x1d8] sm:$0xff] }
 0x5cc   :  { %7530 = vst.msk [vmem:[#allocation4 + $0x120] sm:$0xff] %vm722_vm2, %v7465_v47  ;;  %v12407_v18 = vpop.f32.mrf.mxu1  ;;  %v6746_v6 = vld [vmem:[#allocation4 + $0x128] sm:$0xff]  ;;  %v5905_v47 = vld [vmem:[#allocation4 + $0x170] sm:$0xff] }
 0x5cd   :  { %6683 = vst.msk [vmem:[#allocation4 + $0x138] sm:$0xff] %vm722_vm2, %v6618_v10  ;;  %v7290_v1 = vpop.f32.mrf.mxu0  ;;  %12958 = vmatmul.mubr.msk.f32.gmra.mxu0 %vm879_vm3, %v7646_v48 }
 0x5ce   :  { %v6455_v55 = vpop.f32.mrf.mxu1  ;;  %v7466_v28 = vadd.f32 %v7290_v1, %v6746_v6  ;;  %12764 = vmatmul.mubr.msk.f32.gmra.mxu1 %vm879_vm3, %v7647_v29  ;;  %12960 = vmatprep.mubr.msk.f32.mxu0 %vm13222_vm1, %v16563_v36 }
 0x5cf   :  { %v6619_v13 = vadd.f32 %v6455_v55, %v5899_v31  ;;  %v12604_v60 = vpop.f32.mrf.mxu0  ;;  %12766 = vmatprep.mubr.msk.f32.mxu1 %vm13222_vm1, %v16563_v36  ;;  %v7654_v55 = vld [vmem:[#allocation3 + $0x1e0] sm:$0xff] }
 0x5d0   :  { %7531 = vst.msk [vmem:[#allocation4 + $0x128] sm:$0xff] %vm722_vm2, %v7466_v28  ;;  %v12410_v63 = vpop.f32.mrf.mxu1  ;;  %v6747_v27 = vld [vmem:[#allocation4 + $0x130] sm:$0xff]  ;;  %v5906_v28 = vld [vmem:[#allocation4 + $0x178] sm:$0xff] }
 0x5d1   :  { %6684 = vst.msk [vmem:[#allocation4 + $0x140] sm:$0xff] %vm722_vm2, %v6619_v13  ;;  %v7295_v42 = vpop.f32.mrf.mxu0  ;;  %12961 = vmatmul.mubr.msk.f32.gmra.mxu0 %vm879_vm3, %v7647_v29 }
 0x5d2   :  { %v6460_v38 = vpop.f32.mrf.mxu1  ;;  %v7467_v32 = vadd.f32 %v7295_v42, %v6747_v27  ;;  %12767 = vmatmul.mubr.msk.f32.gmra.mxu1 %vm879_vm3, %v7648_v16  ;;  %12963 = vmatprep.mubr.msk.f32.mxu0 %vm13222_vm1, %v16563_v36 }
 0x5d3   :  { %v6620_v59 = vadd.f32 %v6460_v38, %v5900_v62  ;;  %v12607_v20 = vpop.f32.mrf.mxu0  ;;  %12769 = vmatprep.mubr.msk.f32.mxu1 %vm13222_vm1, %v16563_v36  ;;  %v7655_v38 = vld [vmem:[#allocation3 + $0x1e8] sm:$0xff] }
 0x5d4   :  { %7532 = vst.msk [vmem:[#allocation4 + $0x130] sm:$0xff] %vm722_vm2, %v7467_v32  ;;  %v12413_v15 = vpop.f32.mrf.mxu1  ;;  %v6748_v61 = vld [vmem:[#allocation4 + $0x138] sm:$0xff]  ;;  %v5907_v32 = vld [vmem:[#allocation4 + $0x180] sm:$0xff] }
 0x5d5   :  { %6685 = vst.msk [vmem:[#allocation4 + $0x148] sm:$0xff] %vm722_vm2, %v6620_v59  ;;  %v7300_v30 = vpop.f32.mrf.mxu0  ;;  %12964 = vmatmul.mubr.msk.f32.gmra.mxu0 %vm879_vm3, %v7648_v16 }
 0x5d6   :  { %v6465_v5 = vpop.f32.mrf.mxu1  ;;  %v7468_v4 = vadd.f32 %v7300_v30, %v6748_v61  ;;  %12770 = vmatmul.mubr.msk.f32.gmra.mxu1 %vm879_vm3, %v7649_v17  ;;  %12966 = vmatprep.mubr.msk.f32.mxu0 %vm13222_vm1, %v16563_v36 }
 0x5d7   :  { %v6621_v35 = vadd.f32 %v6465_v5, %v5901_v8  ;;  %v12610_v12 = vpop.f32.mrf.mxu0  ;;  %12772 = vmatprep.mubr.msk.f32.mxu1 %vm13222_vm1, %v16563_v36  ;;  %v7656_v5 = vld [vmem:[#allocation3 + $0x1f0] sm:$0xff] }
 0x5d8   :  { %7533 = vst.msk [vmem:[#allocation4 + $0x138] sm:$0xff] %vm722_vm2, %v7468_v4  ;;  %v12416_v9 = vpop.f32.mrf.mxu1  ;;  %v6749_v40 = vld [vmem:[#allocation4 + $0x140] sm:$0xff]  ;;  %v5908_v4 = vld [vmem:[#allocation4 + $0x188] sm:$0xff] }
 0x5d9   :  { %6686 = vst.msk [vmem:[#allocation4 + $0x150] sm:$0xff] %vm722_vm2, %v6621_v35  ;;  %v7305_v34 = vpop.f32.mrf.mxu0  ;;  %12967 = vmatmul.mubr.msk.f32.gmra.mxu0 %vm879_vm3, %v7649_v17 }
 0x5da   :  { %v6470_v44 = vpop.f32.mrf.mxu1  ;;  %v7469_v14 = vadd.f32 %v7305_v34, %v6749_v40  ;;  %12773 = vmatmul.mubr.msk.f32.gmra.mxu1 %vm879_vm3, %v7650_v21  ;;  %12969 = vmatprep.mubr.msk.f32.mxu0 %vm13222_vm1, %v16563_v36 }
 0x5db   :  { %v6622_v25 = vadd.f32 %v6470_v44, %v5902_v56  ;;  %v12613_v26 = vpop.f32.mrf.mxu0  ;;  %12775 = vmatprep.mubr.msk.f32.mxu1 %vm13222_vm1, %v16563_v36  ;;  %v7657_v44 = vld [vmem:[#allocation3 + $0x1f8] sm:$0xff] }
 0x5dc   :  { %7534 = vst.msk [vmem:[#allocation4 + $0x140] sm:$0xff] %vm722_vm2, %v7469_v14  ;;  %v12419_v39 = vpop.f32.mrf.mxu1  ;;  %v6750_v53 = vld [vmem:[#allocation4 + $0x148] sm:$0xff]  ;;  %v5909_v14 = vld [vmem:[#allocation4 + $0x190] sm:$0xff] }
 0x5dd   :  { %6687 = vst.msk [vmem:[#allocation4 + $0x158] sm:$0xff] %vm722_vm2, %v6622_v25  ;;  %v7310_v0 = vpop.f32.mrf.mxu0  ;;  %12970 = vmatmul.mubr.msk.f32.gmra.mxu0 %vm879_vm3, %v7650_v21 }
 0x5de   :  { %v6475_v57 = vpop.f32.mrf.mxu1  ;;  %v7470_v22 = vadd.f32 %v7310_v0, %v6750_v53  ;;  %12776 = vmatmul.mubr.msk.f32.gmra.mxu1 %vm879_vm3, %v7651_v46  ;;  %12972 = vmatprep.mubr.msk.f32.mxu0 %vm13222_vm1, %v16563_v36 }
 0x5df   :  { %v6623_v49 = vadd.f32 %v6475_v57, %v5903_v33  ;;  %v12616_v19 = vpop.f32.mrf.mxu0  ;;  %12778 = vmatprep.mubr.msk.f32.mxu1 %vm13222_vm1, %v16563_v36  ;;  %v7658_v57 = vld [vmem:[#allocation3 + $0x200] sm:$0xff] }
 0x5e0   :  { %7535 = vst.msk [vmem:[#allocation4 + $0x148] sm:$0xff] %vm722_vm2, %v7470_v22  ;;  %v12422_v51 = vpop.f32.mrf.mxu1  ;;  %v6751_v54 = vld [vmem:[#allocation4 + $0x150] sm:$0xff]  ;;  %v5910_v22 = vld [vmem:[#allocation4 + $0x198] sm:$0xff] }
 0x5e1   :  { %6688 = vst.msk [vmem:[#allocation4 + $0x160] sm:$0xff] %vm722_vm2, %v6623_v49  ;;  %v7315_v58 = vpop.f32.mrf.mxu0  ;;  %12973 = vmatmul.mubr.msk.f32.gmra.mxu0 %vm879_vm3, %v7651_v46 }
 0x5e2   :  { %v6480_v37 = vpop.f32.mrf.mxu1  ;;  %v7471_v43 = vadd.f32 %v7315_v58, %v6751_v54  ;;  %12779 = vmatmul.mubr.msk.f32.gmra.mxu1 %vm879_vm3, %v7652_v24  ;;  %12975 = vmatprep.mubr.msk.f32.mxu0 %vm13222_vm1, %v16563_v36 }
 0x5e3   :  { %v6624_v11 = vadd.f32 %v6480_v37, %v5904_v7  ;;  %v12619_v23 = vpop.f32.mrf.mxu0  ;;  %12781 = vmatprep.mubr.msk.f32.mxu1 %vm13222_vm1, %v16563_v36  ;;  %v7659_v37 = vld [vmem:[#allocation3 + $0x208] sm:$0xff] }
 0x5e4   :  { %7536 = vst.msk [vmem:[#allocation4 + $0x150] sm:$0xff] %vm722_vm2, %v7471_v43  ;;  %v12425_v52 = vpop.f32.mrf.mxu1  ;;  %v6752_v48 = vld [vmem:[#allocation4 + $0x158] sm:$0xff]  ;;  %v5911_v43 = vld [vmem:[#allocation4 + $0x1a0] sm:$0xff] }
 0x5e5   :  { %6689 = vst.msk [vmem:[#allocation4 + $0x168] sm:$0xff] %vm722_vm2, %v6624_v11  ;;  %v7320_v3 = vpop.f32.mrf.mxu0  ;;  %12976 = vmatmul.mubr.msk.f32.gmra.mxu0 %vm879_vm3, %v7652_v24 }
 0x5e6   :  { %v6485_v10 = vpop.f32.mrf.mxu1  ;;  %v7472_v2 = vadd.f32 %v7320_v3, %v6752_v48  ;;  %12782 = vmatmul.mubr.msk.f32.gmra.mxu1 %vm879_vm3, %v7653_v50  ;;  %12978 = vmatprep.mubr.msk.f32.mxu0 %vm13222_vm1, %v16563_v36 }
 0x5e7   :  { %v6625_v18 = vadd.f32 %v6485_v10, %v5905_v47  ;;  %v12622_v6 = vpop.f32.mrf.mxu0  ;;  %12784 = vmatprep.mubr.msk.f32.mxu1 %vm13222_vm1, %v16563_v36  ;;  %v7660_v10 = vld [vmem:[#allocation3 + $0x210] sm:$0xff] }
 0x5e8   :  { %7537 = vst.msk [vmem:[#allocation4 + $0x158] sm:$0xff] %vm722_vm2, %v7472_v2  ;;  %v12428_v1 = vpop.f32.mrf.mxu1  ;;  %v6753_v29 = vld [vmem:[#allocation4 + $0x160] sm:$0xff]  ;;  %v5912_v2 = vld [vmem:[#allocation4 + $0x1a8] sm:$0xff] }
 0x5e9   :  { %6690 = vst.msk [vmem:[#allocation4 + $0x170] sm:$0xff] %vm722_vm2, %v6625_v18  ;;  %v7325_v31 = vpop.f32.mrf.mxu0  ;;  %12979 = vmatmul.mubr.msk.f32.gmra.mxu0 %vm879_vm3, %v7653_v50 }
 0x5ea   :  { %v6490_v13 = vpop.f32.mrf.mxu1  ;;  %v7473_v60 = vadd.f32 %v7325_v31, %v6753_v29  ;;  %12785 = vmatmul.mubr.msk.f32.gmra.mxu1 %vm879_vm3, %v7654_v55  ;;  %12981 = vmatprep.mubr.msk.f32.mxu0 %vm13222_vm1, %v16563_v36 }
 0x5eb   :  { %v6626_v63 = vadd.f32 %v6490_v13, %v5906_v28  ;;  %v12625_v27 = vpop.f32.mrf.mxu0  ;;  %12787 = vmatprep.mubr.msk.f32.mxu1 %vm13222_vm1, %v16563_v36  ;;  %v7661_v13 = vld [vmem:[#allocation3 + $0x218] sm:$0xff] }
 0x5ec   :  { %7538 = vst.msk [vmem:[#allocation4 + $0x160] sm:$0xff] %vm722_vm2, %v7473_v60  ;;  %v12431_v42 = vpop.f32.mrf.mxu1  ;;  %v6754_v16 = vld [vmem:[#allocation4 + $0x168] sm:$0xff]  ;;  %v5913_v60 = vld [vmem:[#allocation4 + $0x1b0] sm:$0xff] }
 0x5ed   :  { %6691 = vst.msk [vmem:[#allocation4 + $0x178] sm:$0xff] %vm722_vm2, %v6626_v63  ;;  %v7330_v62 = vpop.f32.mrf.mxu0  ;;  %12982 = vmatmul.mubr.msk.f32.gmra.mxu0 %vm879_vm3, %v7654_v55 }
 0x5ee   :  { %v6495_v59 = vpop.f32.mrf.mxu1  ;;  %v7474_v20 = vadd.f32 %v7330_v62, %v6754_v16  ;;  %12788 = vmatmul.mubr.msk.f32.gmra.mxu1 %vm879_vm3, %v7655_v38  ;;  %12984 = vmatprep.mubr.msk.f32.mxu0 %vm13222_vm1, %v16563_v36 }
 0x5ef   :  { %v6627_v15 = vadd.f32 %v6495_v59, %v5907_v32  ;;  %v12628_v61 = vpop.f32.mrf.mxu0  ;;  %12790 = vmatprep.mubr.msk.f32.mxu1 %vm13222_vm1, %v16563_v36  ;;  %v7662_v59 = vld [vmem:[#allocation3 + $0x220] sm:$0xff] }
 0x5f0   :  { %7539 = vst.msk [vmem:[#allocation4 + $0x168] sm:$0xff] %vm722_vm2, %v7474_v20  ;;  %v12434_v30 = vpop.f32.mrf.mxu1  ;;  %v6755_v17 = vld [vmem:[#allocation4 + $0x170] sm:$0xff]  ;;  %v5914_v20 = vld [vmem:[#allocation4 + $0x1b8] sm:$0xff] }
 0x5f1   :  { %6692 = vst.msk [vmem:[#allocation4 + $0x180] sm:$0xff] %vm722_vm2, %v6627_v15  ;;  %v7335_v8 = vpop.f32.mrf.mxu0  ;;  %12985 = vmatmul.mubr.msk.f32.gmra.mxu0 %vm879_vm3, %v7655_v38 }
 0x5f2   :  { %v6500_v35 = vpop.f32.mrf.mxu1  ;;  %v7475_v12 = vadd.f32 %v7335_v8, %v6755_v17  ;;  %12791 = vmatmul.mubr.msk.f32.gmra.mxu1 %vm879_vm3, %v7656_v5  ;;  %12987 = vmatprep.mubr.msk.f32.mxu0 %vm13222_vm1, %v16563_v36 }
 0x5f3   :  { %v6628_v9 = vadd.f32 %v6500_v35, %v5908_v4  ;;  %v12631_v40 = vpop.f32.mrf.mxu0  ;;  %12793 = vmatprep.mubr.msk.f32.mxu1 %vm13222_vm1, %v16563_v36  ;;  %v7663_v35 = vld [vmem:[#allocation3 + $0x228] sm:$0xff] }
 0x5f4   :  { %7540 = vst.msk [vmem:[#allocation4 + $0x170] sm:$0xff] %vm722_vm2, %v7475_v12  ;;  %v12437_v34 = vpop.f32.mrf.mxu1  ;;  %v6756_v21 = vld [vmem:[#allocation4 + $0x178] sm:$0xff]  ;;  %v5915_v12 = vld [vmem:[#allocation4 + $0x1c0] sm:$0xff] }
 0x5f5   :  { %6693 = vst.msk [vmem:[#allocation4 + $0x188] sm:$0xff] %vm722_vm2, %v6628_v9  ;;  %v7340_v56 = vpop.f32.mrf.mxu0  ;;  %12988 = vmatmul.mubr.msk.f32.gmra.mxu0 %vm879_vm3, %v7656_v5 }
 0x5f6   :  { %v6505_v25 = vpop.f32.mrf.mxu1  ;;  %v7476_v26 = vadd.f32 %v7340_v56, %v6756_v21  ;;  %12794 = vmatmul.mubr.msk.f32.gmra.mxu1 %vm879_vm3, %v7657_v44  ;;  %12990 = vmatprep.mubr.msk.f32.mxu0 %vm13222_vm1, %v16563_v36 }
 0x5f7   :  { %v6629_v39 = vadd.f32 %v6505_v25, %v5909_v14  ;;  %v12634_v53 = vpop.f32.mrf.mxu0  ;;  %12796 = vmatprep.mubr.msk.f32.mxu1 %vm13222_vm1, %v16563_v36  ;;  %v7664_v25 = vld [vmem:[#allocation3 + $0x230] sm:$0xff] }
 0x5f8   :  { %7541 = vst.msk [vmem:[#allocation4 + $0x178] sm:$0xff] %vm722_vm2, %v7476_v26  ;;  %v12440_v0 = vpop.f32.mrf.mxu1  ;;  %v6757_v46 = vld [vmem:[#allocation4 + $0x180] sm:$0xff]  ;;  %v5916_v26 = vld [vmem:[#allocation4 + $0x1c8] sm:$0xff] }
 0x5f9   :  { %6694 = vst.msk [vmem:[#allocation4 + $0x190] sm:$0xff] %vm722_vm2, %v6629_v39  ;;  %v7345_v33 = vpop.f32.mrf.mxu0  ;;  %12991 = vmatmul.mubr.msk.f32.gmra.mxu0 %vm879_vm3, %v7657_v44 }
 0x5fa   :  { %v6510_v49 = vpop.f32.mrf.mxu1  ;;  %v7477_v19 = vadd.f32 %v7345_v33, %v6757_v46  ;;  %12797 = vmatmul.mubr.msk.f32.gmra.mxu1 %vm879_vm3, %v7658_v57  ;;  %12993 = vmatprep.mubr.msk.f32.mxu0 %vm13222_vm1, %v16563_v36 }
 0x5fb   :  { %v6630_v51 = vadd.f32 %v6510_v49, %v5910_v22  ;;  %v12637_v54 = vpop.f32.mrf.mxu0  ;;  %12799 = vmatprep.mubr.msk.f32.mxu1 %vm13222_vm1, %v16563_v36  ;;  %v7665_v49 = vld [vmem:[#allocation3 + $0x238] sm:$0xff] }
 0x5fc   :  { %7542 = vst.msk [vmem:[#allocation4 + $0x180] sm:$0xff] %vm722_vm2, %v7477_v19  ;;  %v12443_v58 = vpop.f32.mrf.mxu1  ;;  %v6758_v24 = vld [vmem:[#allocation4 + $0x188] sm:$0xff]  ;;  %v5917_v19 = vld [vmem:[#allocation4 + $0x1d0] sm:$0xff] }
 0x5fd   :  { %6695 = vst.msk [vmem:[#allocation4 + $0x198] sm:$0xff] %vm722_vm2, %v6630_v51  ;;  %v7350_v7 = vpop.f32.mrf.mxu0  ;;  %12994 = vmatmul.mubr.msk.f32.gmra.mxu0 %vm879_vm3, %v7658_v57 }
 0x5fe   :  { %v6515_v11 = vpop.f32.mrf.mxu1  ;;  %v7478_v23 = vadd.f32 %v7350_v7, %v6758_v24  ;;  %12800 = vmatmul.mubr.msk.f32.gmra.mxu1 %vm879_vm3, %v7659_v37  ;;  %12996 = vmatprep.mubr.msk.f32.mxu0 %vm13222_vm1, %v16563_v36 }
 0x5ff   :  { %v6631_v52 = vadd.f32 %v6515_v11, %v5911_v43  ;;  %v12640_v48 = vpop.f32.mrf.mxu0  ;;  %12802 = vmatprep.mubr.msk.f32.mxu1 %vm13222_vm1, %v16563_v36  ;;  %v7666_v11 = vld [vmem:[#allocation3 + $0x240] sm:$0xff] }
 0x600   :  { %7543 = vst.msk [vmem:[#allocation4 + $0x188] sm:$0xff] %vm722_vm2, %v7478_v23  ;;  %v12446_v3 = vpop.f32.mrf.mxu1  ;;  %v6759_v50 = vld [vmem:[#allocation4 + $0x190] sm:$0xff]  ;;  %v5918_v23 = vld [vmem:[#allocation4 + $0x1d8] sm:$0xff] }
 0x601   :  { %6696 = vst.msk [vmem:[#allocation4 + $0x1a0] sm:$0xff] %vm722_vm2, %v6631_v52  ;;  %v7355_v47 = vpop.f32.mrf.mxu0  ;;  %12997 = vmatmul.mubr.msk.f32.gmra.mxu0 %vm879_vm3, %v7659_v37 }
 0x602   :  { %v6520_v18 = vpop.f32.mrf.mxu1  ;;  %v7479_v6 = vadd.f32 %v7355_v47, %v6759_v50  ;;  %12803 = vmatmul.mubr.msk.f32.gmra.mxu1 %vm879_vm3, %v7660_v10  ;;  %12999 = vmatprep.mubr.msk.f32.mxu0 %vm13222_vm1, %v16563_v36 }
 0x603   :  { %v6632_v1 = vadd.f32 %v6520_v18, %v5912_v2  ;;  %v12643_v29 = vpop.f32.mrf.mxu0  ;;  %12805 = vmatprep.mubr.msk.f32.mxu1 %vm13222_vm1, %v16563_v36  ;;  %v7667_v18 = vld [vmem:[#allocation3 + $0x248] sm:$0xff] }
 0x604   :  { %7544 = vst.msk [vmem:[#allocation4 + $0x190] sm:$0xff] %vm722_vm2, %v7479_v6  ;;  %v12449_v31 = vpop.f32.mrf.mxu1  ;;  %v6760_v55 = vld [vmem:[#allocation4 + $0x198] sm:$0xff]  ;;  %v5919_v6 = vld [vmem:[#allocation4 + $0x1e0] sm:$0xff] }
 0x605   :  { %6697 = vst.msk [vmem:[#allocation4 + $0x1a8] sm:$0xff] %vm722_vm2, %v6632_v1  ;;  %v7360_v28 = vpop.f32.mrf.mxu0  ;;  %13000 = vmatmul.mubr.msk.f32.gmra.mxu0 %vm879_vm3, %v7660_v10 }
 0x606   :  { %v6525_v63 = vpop.f32.mrf.mxu1  ;;  %v7480_v27 = vadd.f32 %v7360_v28, %v6760_v55  ;;  %12806 = vmatmul.mubr.msk.f32.gmra.mxu1 %vm879_vm3, %v7661_v13  ;;  %13002 = vmatprep.mubr.msk.f32.mxu0 %vm13222_vm1, %v16563_v36 }
 0x607   :  { %v6633_v42 = vadd.f32 %v6525_v63, %v5913_v60  ;;  %v12646_v16 = vpop.f32.mrf.mxu0  ;;  %12808 = vmatprep.mubr.msk.f32.mxu1 %vm13222_vm1, %v16563_v36 }
 0x608   :  { %7545 = vst.msk [vmem:[#allocation4 + $0x198] sm:$0xff] %vm722_vm2, %v7480_v27  ;;  %v12452_v62 = vpop.f32.mrf.mxu1  ;;  %v6761_v38 = vld [vmem:[#allocation4 + $0x1a0] sm:$0xff] }
 0x609   :  { %6698 = vst.msk [vmem:[#allocation4 + $0x1b0] sm:$0xff] %vm722_vm2, %v6633_v42  ;;  %v7365_v32 = vpop.f32.mrf.mxu0  ;;  %13003 = vmatmul.mubr.msk.f32.gmra.mxu0 %vm879_vm3, %v7661_v13  ;;  %v9732_v13 = vld [vmem:[#allocation7 + $0xf8] sm:$0xff]  ;;  %v5920_v42 = vld [vmem:[#allocation4 + $0x1e8] sm:$0xff] }
 0x60a   :  { %v6530_v15 = vpop.f32.mrf.mxu1  ;;  %v7481_v61 = vadd.f32 %v7365_v32, %v6761_v38  ;;  %12809 = vmatmul.mubr.msk.f32.gmra.mxu1 %vm879_vm3, %v7662_v59  ;;  %13005 = vmatprep.mubr.msk.f32.mxu0 %vm13222_vm1, %v16563_v36  ;;  %v7668_v27 = vld [vmem:[#allocation3 + $0x250] sm:$0xff] }
 0x60b   :  { %v6634_v30 = vadd.f32 %v6530_v15, %v5914_v20  ;;  %v12649_v17 = vpop.f32.mrf.mxu0  ;;  %12811 = vmatprep.mubr.msk.f32.mxu1 %vm13222_vm1, %v16563_v36  ;;  %11213 = vmatprep.subr.mxu1 %v9732_v13  ;;  %v9716_v20 = vld [vmem:[#allocation7 + $0x78] sm:$0xff] }
 0x60c   :  { %7546 = vst.msk [vmem:[#allocation4 + $0x1a0] sm:$0xff] %vm722_vm2, %v7481_v61  ;;  %v12455_v8 = vpop.f32.mrf.mxu1  ;;  %v6762_v5 = vld [vmem:[#allocation4 + $0x1a8] sm:$0xff]  ;;  %11214 = vmatpush3.msra.mxu1 %v9716_v20  ;;  %v5921_v17 = vld [vmem:[#allocation4 + $0x1f0] sm:$0xff] }
 0x60d   :  { %6699 = vst.msk [vmem:[#allocation4 + $0x1b8] sm:$0xff] %vm722_vm2, %v6634_v30  ;;  %v7370_v4 = vpop.f32.mrf.mxu0  ;;  %13006 = vmatmul.mubr.msk.f32.gmra.mxu0 %vm879_vm3, %v7662_v59  ;;  %v7669_v30 = vld [vmem:[#allocation3 + $0x258] sm:$0xff] }
 0x60e   :  { %v6535_v9 = vpop.f32.mrf.mxu1  ;;  %v7482_v40 = vadd.f32 %v7370_v4, %v6762_v5  ;;  %12812 = vmatmul.mubr.msk.f32.gmra.mxu1 %vm879_vm3, %v7663_v35  ;;  %13008 = vmatprep.mubr.msk.f32.mxu0 %vm13222_vm1, %v16563_v36  ;;  %v16837_v4 = vld [vmem:[#allocation2 + $0x1c0] sm:$0xff] }
 0x60f   :  { %v6635_v34 = vadd.f32 %v6535_v9, %v5915_v12  ;;  %v12652_v21 = vpop.f32.mrf.mxu0  ;;  %12814 = vmatprep.mubr.msk.f32.mxu1 %vm13222_vm1, %v16563_v36 }
 0x610   :  { %7547 = vst.msk [vmem:[#allocation4 + $0x1a8] sm:$0xff] %vm722_vm2, %v7482_v40  ;;  %v12458_v56 = vpop.f32.mrf.mxu1  ;;  %v6763_v44 = vld [vmem:[#allocation4 + $0x1b0] sm:$0xff]  ;;  %v5922_v21 = vld [vmem:[#allocation4 + $0x1f8] sm:$0xff] }
 0x611   :  { %6700 = vst.msk [vmem:[#allocation4 + $0x1c0] sm:$0xff] %vm722_vm2, %v6635_v34  ;;  %v7375_v14 = vpop.f32.mrf.mxu0  ;;  %13009 = vmatmul.mubr.msk.f32.gmra.mxu0 %vm879_vm3, %v7663_v35  ;;  %v7670_v34 = vld [vmem:[#allocation3 + $0x260] sm:$0xff] }
 0x612   :  { %v6540_v39 = vpop.f32.mrf.mxu1  ;;  %v7483_v53 = vadd.f32 %v7375_v14, %v6763_v44  ;;  %12815 = vmatmul.mubr.msk.f32.gmra.mxu1 %vm879_vm3, %v7664_v25  ;;  %13011 = vmatprep.mubr.msk.f32.mxu0 %vm13222_vm1, %v16563_v36 }
 0x613   :  { %v6636_v0 = vadd.f32 %v6540_v39, %v5916_v26  ;;  %v12655_v46 = vpop.f32.mrf.mxu0  ;;  %12817 = vmatprep.mubr.msk.f32.mxu1 %vm13222_vm1, %v16563_v36 }
 0x614   :  { %7548 = vst.msk [vmem:[#allocation4 + $0x1b0] sm:$0xff] %vm722_vm2, %v7483_v53  ;;  %v12461_v33 = vpop.f32.mrf.mxu1  ;;  %v6764_v57 = vld [vmem:[#allocation4 + $0x1b8] sm:$0xff]  ;;  %v5923_v46 = vld [vmem:[#allocation4 + $0x200] sm:$0xff] }
 0x615   :  { %6701 = vst.msk [vmem:[#allocation4 + $0x1c8] sm:$0xff] %vm722_vm2, %v6636_v0  ;;  %v7380_v22 = vpop.f32.mrf.mxu0  ;;  %13012 = vmatmul.mubr.msk.f32.gmra.mxu0 %vm879_vm3, %v7664_v25  ;;  %v7671_v0 = vld [vmem:[#allocation3 + $0x268] sm:$0xff] }
 0x616   :  { %v6545_v51 = vpop.f32.mrf.mxu1  ;;  %v7484_v54 = vadd.f32 %v7380_v22, %v6764_v57  ;;  %12818 = vmatmul.mubr.msk.f32.gmra.mxu1 %vm879_vm3, %v7665_v49  ;;  %13014 = vmatprep.mubr.msk.f32.mxu0 %vm13222_vm1, %v16563_v36 }
 0x617   :  { %v6637_v58 = vadd.f32 %v6545_v51, %v5917_v19  ;;  %v12658_v24 = vpop.f32.mrf.mxu0  ;;  %12820 = vmatprep.mubr.msk.f32.mxu1 %vm13222_vm1, %v16563_v36 }
 0x618   :  { %7549 = vst.msk [vmem:[#allocation4 + $0x1b8] sm:$0xff] %vm722_vm2, %v7484_v54  ;;  %v12464_v7 = vpop.f32.mrf.mxu1  ;;  %v6765_v37 = vld [vmem:[#allocation4 + $0x1c0] sm:$0xff] }
 0x619   :  { %6702 = vst.msk [vmem:[#allocation4 + $0x1d0] sm:$0xff] %vm722_vm2, %v6637_v58  ;;  %v7385_v43 = vpop.f32.mrf.mxu0  ;;  %13015 = vmatmul.mubr.msk.f32.gmra.mxu0 %vm879_vm3, %v7665_v49  ;;  %v7672_v58 = vld [vmem:[#allocation3 + $0x270] sm:$0xff] }
 0x61a   :  { %v6550_v52 = vpop.f32.mrf.mxu1  ;;  %v7485_v48 = vadd.f32 %v7385_v43, %v6765_v37  ;;  %12821 = vmatmul.mubr.msk.f32.gmra.mxu1 %vm879_vm3, %v7666_v11  ;;  %13017 = vmatprep.mubr.msk.f32.mxu0 %vm13222_vm1, %v16563_v36  ;;  %v7559_v7 = vld [vmem:[#allocation4] sm:$0xff] }
 0x61b   :  { %v6638_v3 = vadd.f32 %v6550_v52, %v5918_v23  ;;  %v12661_v50 = vpop.f32.mrf.mxu0  ;;  %12823 = vmatprep.mubr.msk.f32.mxu1 %vm13222_vm1, %v16563_v36  ;;  %v9731_v52 = vld [vmem:[#allocation7 + $0xf0] sm:$0xff] }
 0x61c   :  { %7550 = vst.msk [vmem:[#allocation4 + $0x1c0] sm:$0xff] %vm722_vm2, %v7485_v48  ;;  %v12467_v47 = vpop.f32.mrf.mxu1  ;;  %v6766_v10 = vld [vmem:[#allocation4 + $0x1c8] sm:$0xff]  ;;  %v9715_v48 = vld [vmem:[#allocation7 + $0x70] sm:$0xff]  ;;  %11215 = vmatprep.subr.mxu1 %v9731_v52 }
 0x61d   :  { %6703 = vst.msk [vmem:[#allocation4 + $0x1d8] sm:$0xff] %vm722_vm2, %v6638_v3  ;;  %v7390_v2 = vpop.f32.mrf.mxu0  ;;  %13018 = vmatmul.mubr.msk.f32.gmra.mxu0 %vm879_vm3, %v7666_v11  ;;  %v7673_v47 = vld [vmem:[#allocation3 + $0x278] sm:$0xff]  ;;  %11216 = vmatpush3.msra.mxu1 %v9715_v48 }
 0x61e   :  { %v6555_v1 = vpop.f32.mrf.mxu1  ;;  %v7486_v29 = vadd.f32 %v7390_v2, %v6766_v10  ;;  %12824 = vmatmul.mubr.msk.f32.gmra.mxu1 %vm879_vm3, %v7667_v18  ;;  %13020 = vmatprep.mubr.msk.f32.mxu0 %vm13222_vm1, %v16563_v36  ;;  %v7560_v2 = vld [vmem:[#allocation4 + $0x8] sm:$0xff] }
 0x61f   :  { %v6639_v31 = vadd.f32 %v6555_v1, %v5919_v6  ;;  %v12664_v55 = vpop.f32.mrf.mxu0  ;;  %12826 = vmatprep.mubr.msk.f32.mxu1 %vm13222_vm1, %v16563_v36 }
 0x620   :  { %7551 = vst.msk [vmem:[#allocation4 + $0x1c8] sm:$0xff] %vm722_vm2, %v7486_v29  ;;  %v12470_v28 = vpop.f32.mrf.mxu1  ;;  %v6767_v60 = vld [vmem:[#allocation4 + $0x1d0] sm:$0xff] }
 0x621   :  { %6704 = vst.msk [vmem:[#allocation4 + $0x1e0] sm:$0xff] %vm722_vm2, %v6639_v31  ;;  %v7395_v63 = vpop.f32.mrf.mxu0  ;;  %13021 = vmatmul.mubr.msk.f32.gmra.mxu0 %vm879_vm3, %v7667_v18  ;;  %v7674_v28 = vld [vmem:[#allocation3 + $0x280] sm:$0xff] }
 0x622   :  { %v6560_v16 = vpop.f32.mrf.mxu1  ;;  %v7487_v62 = vadd.f32 %v7395_v63, %v6767_v60  ;;  %12827 = vmatmul.mubr.msk.f32.gmra.mxu1 %vm879_vm3, %v7668_v27  ;;  %13023 = vmatprep.mubr.msk.f32.mxu0 %vm13222_vm1, %v16563_v36  ;;  %v7561_v60 = vld [vmem:[#allocation4 + $0x10] sm:$0xff] }
 0x623   :  { %v6640_v38 = vadd.f32 %v6560_v16, %v5920_v42  ;;  %v12667_v32 = vpop.f32.mrf.mxu0  ;;  %12829 = vmatprep.mubr.msk.f32.mxu1 %vm13222_vm1, %v16563_v36 }
 0x624   :  { %7552 = vst.msk [vmem:[#allocation4 + $0x1d0] sm:$0xff] %vm722_vm2, %v7487_v62  ;;  %v12473_v59 = vpop.f32.mrf.mxu1  ;;  %v6768_v15 = vld [vmem:[#allocation4 + $0x1d8] sm:$0xff] }
 0x625   :  { %6705 = vst.msk [vmem:[#allocation4 + $0x1e8] sm:$0xff] %vm722_vm2, %v6640_v38  ;;  %v7400_v61 = vpop.f32.mrf.mxu0  ;;  %13024 = vmatmul.mubr.msk.f32.gmra.mxu0 %vm879_vm3, %v7668_v27  ;;  %v7675_v62 = vld [vmem:[#allocation3 + $0x288] sm:$0xff] }
 0x626   :  { %v6565_v8 = vpop.f32.mrf.mxu1  ;;  %v7488_v5 = vadd.f32 %v7400_v61, %v6768_v15  ;;  %12830 = vmatmul.mubr.msk.f32.gmra.mxu1 %vm879_vm3, %v7669_v30  ;;  %13026 = vmatprep.mubr.msk.f32.mxu0 %vm13222_vm1, %v16837_v4  ;;  %v7562_v59 = vld [vmem:[#allocation4 + $0x18] sm:$0xff] }
 0x627   :  { %v6641_v36 = vadd.f32 %v6565_v8, %v5921_v17  ;;  %v12670_v35 = vpop.f32.mrf.mxu0  ;;  %12832 = vmatprep.mubr.msk.f32.mxu1 %vm13222_vm1, %v16837_v4  ;;  %v9259_v8 = vld [vmem:[%s17478_s4] sm:$0x7] }
 0x628   :  { %7553 = vst.msk [vmem:[#allocation4 + $0x1d8] sm:$0xff] %vm722_vm2, %v7488_v5  ;;  %v12476_v12 = vpop.f32.mrf.mxu1  ;;  %v6769_v9 = vld [vmem:[#allocation4 + $0x1e0] sm:$0xff] }
 0x629   :  { %6706 = vst.msk [vmem:[#allocation4 + $0x1f0] sm:$0xff] %vm722_vm2, %v6641_v36  ;;  %v7405_v40 = vpop.f32.mrf.mxu0  ;;  %13027 = vmatmul.mubr.msk.f32.gmra.mxu0 %vm879_vm3, %v7669_v30  ;;  %v7676_v5 = vld [vmem:[#allocation3 + $0x290] sm:$0xff] }
 0x62a   :  { %v6570_v56 = vpop.f32.mrf.mxu1  ;;  %v7489_v44 = vadd.f32 %v7405_v40, %v6769_v9  ;;  %12833 = vmatmul.mubr.msk.f32.gmra.mxu1 %vm879_vm3, %v7670_v34  ;;  %13029 = vmatprep.mubr.msk.f32.mxu0 %vm13222_vm1, %v16837_v4  ;;  %v7563_v12 = vld [vmem:[#allocation4 + $0x20] sm:$0xff] }
 0x62b   :  { %v6642_v14 = vadd.f32 %v6570_v56, %v5922_v21  ;;  %v12673_v25 = vpop.f32.mrf.mxu0  ;;  %12835 = vmatprep.mubr.msk.f32.mxu1 %vm13222_vm1, %v16837_v4  ;;  %v16903_v56 = vrot.slane %v9259_v8, %v13390_v41 }
 0x62c   :  { %7554 = vst.msk [vmem:[#allocation4 + $0x1e0] sm:$0xff] %vm722_vm2, %v7489_v44  ;;  %v12479_v26 = vpop.f32.mrf.mxu1  ;;  %v6770_v39 = vld [vmem:[#allocation4 + $0x1e8] sm:$0xff]  ;;  %v9714_v25 = vld [vmem:[#allocation7 + $0x68] sm:$0xff] }
 0x62d   :  { %6707 = vst.msk [vmem:[#allocation4 + $0x1f8] sm:$0xff] %vm722_vm2, %v6642_v14  ;;  %v7410_v53 = vpop.f32.mrf.mxu0  ;;  %13030 = vmatmul.mubr.msk.f32.gmra.mxu0 %vm879_vm3, %v7670_v34  ;;  %v9730_v14 = vld [vmem:[#allocation7 + $0xe8] sm:$0xff]  ;;  %v7677_v26 = vld [vmem:[#allocation3 + $0x298] sm:$0xff] }
 0x62e   :  { %v6575_v33 = vpop.f32.mrf.mxu1  ;;  %v7490_v57 = vadd.f32 %v7410_v53, %v6770_v39  ;;  %12836 = vmatmul.mubr.msk.f32.gmra.mxu1 %vm879_vm3, %v7671_v0  ;;  %13032 = vmatprep.mubr.msk.f32.mxu0 %vm13222_vm1, %v16837_v4 }
 0x62f   :  { %v6643_v22 = vadd.f32 %v6575_v33, %v5923_v46  ;;  %v12676_v49 = vpop.f32.mrf.mxu0  ;;  %12838 = vmatprep.mubr.msk.f32.mxu1 %vm13222_vm1, %v16837_v4  ;;  %11217 = vmatprep.subr.mxu1 %v9730_v14 }
 0x630   :  { %7555 = vst.msk [vmem:[#allocation4 + $0x1e8] sm:$0xff] %vm722_vm2, %v7490_v57  ;;  %v12482_v19 = vpop.f32.mrf.mxu1  ;;  %v6771_v51 = vld [vmem:[#allocation4 + $0x1f0] sm:$0xff]  ;;  %11218 = vmatpush3.msra.mxu1 %v9714_v25 }
 0x631   :  { %6708 = vst.msk [vmem:[#allocation4 + $0x200] sm:$0xff] %vm722_vm2, %v6643_v22  ;;  %v7415_v54 = vpop.f32.mrf.mxu0  ;;  %13033 = vmatmul.mubr.msk.f32.gmra.mxu0 %vm879_vm3, %v7671_v0  ;;  %v7564_v0 = vld [vmem:[#allocation4 + $0x28] sm:$0xff] }
 0x632   :  { %v7491_v24 = vadd.f32 %v7415_v54, %v6771_v51  ;;  %v7955_v37 = vpop.f32.mrf.mxu1  ;;  %12839 = vmatmul.mubr.msk.f32.gmra.mxu1 %vm879_vm3, %v7672_v58  ;;  %13035 = vmatprep.mubr.msk.f32.mxu0 %vm13222_vm1, %v16837_v4  ;;  %v16915_v51 = vrot.slane %v9259_v8, %v13398_v45 }
 0x633   :  { %v8279_v43 = vadd.f32 %v7955_v37, %v7559_v7  ;;  %v12679_v11 = vpop.f32.mrf.mxu0  ;;  %12841 = vmatprep.mubr.msk.f32.mxu1 %vm13222_vm1, %v16837_v4 }
 0x634   :  { %7556 = vst.msk [vmem:[#allocation4 + $0x1f0] sm:$0xff] %vm722_vm2, %v7491_v24  ;;  %v12696_v23 = vpop.f32.mrf.mxu1  ;;  %v6772_v3 = vld [vmem:[#allocation4 + $0x1f8] sm:$0xff] }
 0x635   :  { %8344 = vst.msk [vmem:[#allocation4] sm:$0xff] %vm722_vm2, %v8279_v43  ;;  %v7420_v50 = vpop.f32.mrf.mxu0  ;;  %13036 = vmatmul.mubr.msk.f32.gmra.mxu0 %vm879_vm3, %v7672_v58  ;;  %v7678_v58 = vld [vmem:[#allocation3 + $0x2a0] sm:$0xff]  ;;  %v17488_v43 = vld [vmem:[#allocation11_spill] sm:$0xff] }
 0x636   :  { %v7492_v10 = vadd.f32 %v7420_v50, %v6772_v3  ;;  %v7960_v18 = vpop.f32.mrf.mxu1  ;;  %12842 = vmatmul.mubr.msk.f32.gmra.mxu1 %vm879_vm3, %v7673_v47  ;;  %13038 = vmatprep.mubr.msk.f32.mxu0 %vm13222_vm1, %v16837_v4  ;;  %v16921_v11 = vrot.slane %v9259_v8, %v17488_v43  ;;  %v7565_v23 = vld [vmem:[#allocation4 + $0x30] sm:$0xff] }
 0x637   :  { %v8280_v6 = vadd.f32 %v7960_v18, %v7560_v2  ;;  %v12682_v1 = vpop.f32.mrf.mxu0  ;;  %12844 = vmatprep.mubr.msk.f32.mxu1 %vm13222_vm1, %v16837_v4 }
 0x638   :  { %7557 = vst.msk [vmem:[#allocation4 + $0x1f8] sm:$0xff] %vm722_vm2, %v7492_v10  ;;  %v12699_v29 = vpop.f32.mrf.mxu1  ;;  %v6773_v31 = vld [vmem:[#allocation4 + $0x200] sm:$0xff] }
 0x639   :  { %8345 = vst.msk [vmem:[#allocation4 + $0x8] sm:$0xff] %vm722_vm2, %v8280_v6  ;;  %v7425_v55 = vpop.f32.mrf.mxu0  ;;  %13039 = vmatmul.mubr.msk.f32.gmra.mxu0 %vm879_vm3, %v7673_v47  ;;  %v7679_v6 = vld [vmem:[#allocation3 + $0x2a8] sm:$0xff] }
 0x63a   :  { %v7493_v13 = vadd.f32 %v7425_v55, %v6773_v31  ;;  %v7965_v63 = vpop.f32.mrf.mxu1  ;;  %12845 = vmatmul.mubr.msk.f32.gmra.mxu1 %vm879_vm3, %v7674_v28  ;;  %13041 = vmatprep.mubr.msk.f32.mxu0 %vm13222_vm1, %v16837_v4 }
 0x63b   :  { %v8281_v27 = vadd.f32 %v7965_v63, %v7561_v60  ;;  %v12685_v42 = vpop.f32.mrf.mxu0  ;;  %12847 = vmatprep.mubr.msk.f32.mxu1 %vm13222_vm1, %v16837_v4 }
 0x63c   :  { %7558 = vst.msk [vmem:[#allocation4 + $0x200] sm:$0xff] %vm722_vm2, %v7493_v13  ;;  %v12702_v16 = vpop.f32.mrf.mxu1  ;;  %v8409_v38 = vld [vmem:[#allocation4] sm:$0xff] }
 0x63d   :  { %8346 = vst.msk [vmem:[#allocation4 + $0x10] sm:$0xff] %vm722_vm2, %v8281_v27  ;;  %v8805_v32 = vpop.f32.mrf.mxu0  ;;  %13042 = vmatmul.mubr.msk.f32.gmra.mxu0 %vm879_vm3, %v7674_v28  ;;  %v7566_v28 = vld [vmem:[#allocation4 + $0x38] sm:$0xff] }
 0x63e   :  { %v7970_v20 = vpop.f32.mrf.mxu1  ;;  %12848 = vmatmul.mubr.msk.f32.gmra.mxu1 %vm879_vm3, %v7675_v62  ;;  %v9129_v15 = vadd.f32 %v8805_v32, %v8409_v38  ;;  %13044 = vmatprep.mubr.msk.f32.mxu0 %vm13222_vm1, %v16837_v4  ;;  %v7680_v32 = vld [vmem:[#allocation3 + $0x2b0] sm:$0xff] }
 0x63f   :  { %v8282_v61 = vadd.f32 %v7970_v20, %v7562_v59  ;;  %v12899_v30 = vpop.f32.mrf.mxu0  ;;  %12850 = vmatprep.mubr.msk.f32.mxu1 %vm13222_vm1, %v16837_v4 }
 0x640   :  { %9194 = vst.msk [vmem:[#allocation4] sm:$0xff] %vm722_vm2, %v9129_v15  ;;  %v12705_v17 = vpop.f32.mrf.mxu1  ;;  %v8410_v36 = vld [vmem:[#allocation4 + $0x8] sm:$0xff]  ;;  %v7567_v30 = vld [vmem:[#allocation4 + $0x40] sm:$0xff] }
 0x641   :  { %8347 = vst.msk [vmem:[#allocation4 + $0x18] sm:$0xff] %vm722_vm2, %v8282_v61  ;;  %v8810_v35 = vpop.f32.mrf.mxu0  ;;  %13045 = vmatmul.mubr.msk.f32.gmra.mxu0 %vm879_vm3, %v7675_v62 }
 0x642   :  { %v7975_v9 = vpop.f32.mrf.mxu1  ;;  %12851 = vmatmul.mubr.msk.f32.gmra.mxu1 %vm879_vm3, %v7676_v5  ;;  %v9130_v40 = vadd.f32 %v8810_v35, %v8410_v36  ;;  %13047 = vmatprep.mubr.msk.f32.mxu0 %vm13222_vm1, %v16837_v4 }
 0x643   :  { %v8283_v34 = vadd.f32 %v7975_v9, %v7563_v12  ;;  %v12902_v21 = vpop.f32.mrf.mxu0  ;;  %12853 = vmatprep.mubr.msk.f32.mxu1 %vm13222_vm1, %v16837_v4 }
 0x644   :  { %9195 = vst.msk [vmem:[#allocation4 + $0x8] sm:$0xff] %vm722_vm2, %v9130_v40  ;;  %v12708_v44 = vpop.f32.mrf.mxu1  ;;  %v8411_v39 = vld [vmem:[#allocation4 + $0x10] sm:$0xff]  ;;  %v9713_v21 = vld [vmem:[#allocation7 + $0x60] sm:$0xff] }
 0x645   :  { %8348 = vst.msk [vmem:[#allocation4 + $0x20] sm:$0xff] %vm722_vm2, %v8283_v34  ;;  %v8815_v53 = vpop.f32.mrf.mxu0  ;;  %13048 = vmatmul.mubr.msk.f32.gmra.mxu0 %vm879_vm3, %v7676_v5  ;;  %v9729_v34 = vld [vmem:[#allocation7 + $0xe0] sm:$0xff] }
 0x646   :  { %v7980_v46 = vpop.f32.mrf.mxu1  ;;  %12854 = vmatmul.mubr.msk.f32.gmra.mxu1 %vm879_vm3, %v7677_v26  ;;  %v9131_v33 = vadd.f32 %v8815_v53, %v8411_v39  ;;  %13050 = vmatprep.mubr.msk.f32.mxu0 %vm13222_vm1, %v16837_v4  ;;  %v7681_v44 = vld [vmem:[#allocation3 + $0x2b8] sm:$0xff] }
 0x647   :  { %v9260_v57 = vld [vmem:[#allocation4] sm:$0xff]  ;;  %v8284_v22 = vadd.f32 %v7980_v46, %v7564_v0  ;;  %v12905_v49 = vpop.f32.mrf.mxu0  ;;  %12856 = vmatprep.mubr.msk.f32.mxu1 %vm13222_vm1, %v16837_v4  ;;  %11219 = vmatprep.subr.mxu1 %v9729_v34  ;;  %v7568_v53 = vld [vmem:[#allocation4 + $0x48] sm:$0xff] }
 0x648   :  { %v9329_v19 = vadd.f32 %v16903_v56, %v9260_v57  ;;  %9196 = vst.msk [vmem:[#allocation4 + $0x10] sm:$0xff] %vm722_vm2, %v9131_v33  ;;  %v12711_v54 = vpop.f32.mrf.mxu1  ;;  %v8412_v24 = vld [vmem:[#allocation4 + $0x18] sm:$0xff]  ;;  %11220 = vmatpush3.msra.mxu1 %v9713_v21  ;;  %v9728_v21 = vld [vmem:[#allocation7 + $0xd8] sm:$0xff] }
 0x649   :  { %8349 = vst.msk [vmem:[#allocation4 + $0x28] sm:$0xff] %vm722_vm2, %v8284_v22  ;;  %v8820_v7 = vpop.f32.mrf.mxu0  ;;  %13051 = vmatmul.mubr.msk.f32.gmra.mxu0 %vm879_vm3, %v7677_v26  ;;  %11221 = vmatprep.subr.mxu1 %v9728_v21 }
 0x64a   :  { %v9394_v37 = vmax.f32 %v9329_v19, 0.0  ;;  %v7985_v52 = vpop.f32.mrf.mxu1  ;;  %12857 = vmatmul.mubr.msk.f32.gmra.mxu1 %vm879_vm3, %v7678_v58  ;;  %v9132_v48 = vadd.f32 %v8820_v7, %v8412_v24  ;;  %13053 = vmatprep.mubr.msk.f32.mxu0 %vm13222_vm1, %v16837_v4 }
 0x64b   :  { %v9261_v3 = vld [vmem:[#allocation4 + $0x8] sm:$0xff]  ;;  %v8285_v50 = vadd.f32 %v7985_v52, %v7565_v23  ;;  %v12908_v47 = vpop.f32.mrf.mxu0  ;;  %12859 = vmatprep.mubr.msk.f32.mxu1 %vm13222_vm1, %v16837_v4  ;;  %v7569_v52 = vld [vmem:[#allocation4 + $0x50] sm:$0xff] }
 0x64c   :  { %v9463_v10 = vmul.f32 %v16915_v51, %v9394_v37  ;;  %v9330_v2 = vadd.f32 %v16903_v56, %v9261_v3  ;;  %9197 = vst.msk [vmem:[#allocation4 + $0x18] sm:$0xff] %vm722_vm2, %v9132_v48  ;;  %v12714_v18 = vpop.f32.mrf.mxu1  ;;  %v8413_v1 = vld [vmem:[#allocation4 + $0x20] sm:$0xff] }
 0x64d   :  { %8350 = vst.msk [vmem:[#allocation4 + $0x30] sm:$0xff] %vm722_vm2, %v8285_v50  ;;  %v8825_v29 = vpop.f32.mrf.mxu0  ;;  %13054 = vmatmul.mubr.msk.f32.gmra.mxu0 %vm879_vm3, %v7678_v58  ;;  %v7682_v58 = vld [vmem:[#allocation3 + $0x2c0] sm:$0xff] }
 0x64e   :  { %v9532_v31 = vadd.f32 %v16921_v11, %v9463_v10  ;;  %v9395_v55 = vmax.f32 %v9330_v2, 0.0  ;;  %v7990_v13 = vpop.f32.mrf.mxu1  ;;  %12860 = vmatmul.mubr.msk.f32.gmra.mxu1 %vm879_vm3, %v7679_v6  ;;  %v9133_v60 = vadd.f32 %v8825_v29, %v8413_v1  ;;  %13056 = vmatprep.mubr.msk.f32.mxu0 %vm13222_vm1, %v16837_v4  ;;  %v7683_v1 = vld [vmem:[#allocation3 + $0x2c8] sm:$0xff] }
 0x64f   :  { %v9262_v63 = vld [vmem:[#allocation4 + $0x10] sm:$0xff]  ;;  %v8286_v27 = vadd.f32 %v7990_v13, %v7566_v28  ;;  %v12911_v42 = vpop.f32.mrf.mxu0  ;;  %12862 = vmatprep.mubr.msk.f32.mxu1 %vm13222_vm1, %v16837_v4  ;;  %v7570_v13 = vld [vmem:[#allocation4 + $0x58] sm:$0xff] }
 0x650   :  { %9597 = vst.msk [vmem:[#allocation4] sm:$0xff] %vm722_vm2, %v9532_v31  ;;  %v9464_v16 = vmul.f32 %v16915_v51, %v9395_v55  ;;  %v9331_v62 = vadd.f32 %v16903_v56, %v9262_v63  ;;  %9198 = vst.msk [vmem:[#allocation4 + $0x20] sm:$0xff] %vm722_vm2, %v9133_v60  ;;  %v12717_v38 = vpop.f32.mrf.mxu1  ;;  %v8414_v59 = vld [vmem:[#allocation4 + $0x28] sm:$0xff] }
 0x651   :  { %8351 = vst.msk [vmem:[#allocation4 + $0x38] sm:$0xff] %vm722_vm2, %v8286_v27  ;;  %v8830_v20 = vpop.f32.mrf.mxu0  ;;  %13057 = vmatmul.mubr.msk.f32.gmra.mxu0 %vm879_vm3, %v7679_v6 }
 0x652   :  { %v9533_v15 = vadd.f32 %v16921_v11, %v9464_v16  ;;  %v9396_v61 = vmax.f32 %v9331_v62, 0.0  ;;  %v7995_v17 = vpop.f32.mrf.mxu1  ;;  %12863 = vmatmul.mubr.msk.f32.gmra.mxu1 %vm879_vm3, %v7680_v32  ;;  %v9134_v8 = vadd.f32 %v8830_v20, %v8414_v59  ;;  %13059 = vmatprep.mubr.msk.f32.mxu0 %vm13222_vm1, %v16837_v4  ;;  %v7684_v59 = vld [vmem:[#allocation3 + $0x2d0] sm:$0xff] }
 0x653   :  { %v9263_v5 = vld [vmem:[#allocation4 + $0x18] sm:$0xff]  ;;  %v8287_v36 = vadd.f32 %v7995_v17, %v7567_v30  ;;  %v12914_v35 = vpop.f32.mrf.mxu0  ;;  %12865 = vmatprep.mubr.msk.f32.mxu1 %vm13222_vm1, %v16837_v4  ;;  %v7571_v17 = vld [vmem:[#allocation4 + $0x60] sm:$0xff] }
 0x654   :  { %9598 = vst.msk [vmem:[#allocation4 + $0x8] sm:$0xff] %vm722_vm2, %v9533_v15  ;;  %v9465_v12 = vmul.f32 %v16915_v51, %v9396_v61  ;;  %v9332_v9 = vadd.f32 %v16903_v56, %v9263_v5  ;;  %9199 = vst.msk [vmem:[#allocation4 + $0x28] sm:$0xff] %vm722_vm2, %v9134_v8  ;;  %v12720_v40 = vpop.f32.mrf.mxu1  ;;  %v8415_v14 = vld [vmem:[#allocation4 + $0x30] sm:$0xff] }
 0x655   :  { %8352 = vst.msk [vmem:[#allocation4 + $0x40] sm:$0xff] %vm722_vm2, %v8287_v36  ;;  %v8835_v25 = vpop.f32.mrf.mxu0  ;;  %13060 = vmatmul.mubr.msk.f32.gmra.mxu0 %vm879_vm3, %v7680_v32 }
 0x656   :  { %v9534_v26 = vadd.f32 %v16921_v11, %v9465_v12  ;;  %v9397_v39 = vmax.f32 %v9332_v9, 0.0  ;;  %v8000_v0 = vpop.f32.mrf.mxu1  ;;  %12866 = vmatmul.mubr.msk.f32.gmra.mxu1 %vm879_vm3, %v7681_v44  ;;  %v9135_v46 = vadd.f32 %v8835_v25, %v8415_v14  ;;  %13062 = vmatprep.mubr.msk.f32.mxu0 %vm13222_vm1, %v16837_v4  ;;  %v7685_v14 = vld [vmem:[#allocation3 + $0x2d8] sm:$0xff] }
 0x657   :  { %v9264_v33 = vld [vmem:[#allocation4 + $0x20] sm:$0xff]  ;;  %v8288_v57 = vadd.f32 %v8000_v0, %v7568_v53  ;;  %v12917_v22 = vpop.f32.mrf.mxu0  ;;  %12868 = vmatprep.mubr.msk.f32.mxu1 %vm13222_vm1, %v16837_v4  ;;  %v7572_v0 = vld [vmem:[#allocation4 + $0x68] sm:$0xff] }
 0x658   :  { %9599 = vst.msk [vmem:[#allocation4 + $0x10] sm:$0xff] %vm722_vm2, %v9534_v26  ;;  %v9466_v49 = vmul.f32 %v16915_v51, %v9397_v39  ;;  %v9333_v19 = vadd.f32 %v16903_v56, %v9264_v33  ;;  %9200 = vst.msk [vmem:[#allocation4 + $0x30] sm:$0xff] %vm722_vm2, %v9135_v46  ;;  %v12723_v54 = vpop.f32.mrf.mxu1  ;;  %v8416_v24 = vld [vmem:[#allocation4 + $0x38] sm:$0xff] }
 0x659   :  { %8353 = vst.msk [vmem:[#allocation4 + $0x48] sm:$0xff] %vm722_vm2, %v8288_v57  ;;  %v8840_v7 = vpop.f32.mrf.mxu0  ;;  %13063 = vmatmul.mubr.msk.f32.gmra.mxu0 %vm879_vm3, %v7681_v44  ;;  %v9712_v44 = vld [vmem:[#allocation7 + $0x58] sm:$0xff] }
 0x65a   :  { %v9535_v37 = vadd.f32 %v16921_v11, %v9466_v49  ;;  %v9398_v23 = vmax.f32 %v9333_v19, 0.0  ;;  %v8005_v48 = vpop.f32.mrf.mxu1  ;;  %12869 = vmatmul.mubr.msk.f32.gmra.mxu1 %vm879_vm3, %v7682_v58  ;;  %v9136_v3 = vadd.f32 %v8840_v7, %v8416_v24  ;;  %13065 = vmatprep.mubr.msk.f32.mxu0 %vm13222_vm1, %v16837_v4  ;;  %v7686_v24 = vld [vmem:[#allocation3 + $0x2e0] sm:$0xff] }
 0x65b   :  { %v9265_v50 = vld [vmem:[#allocation4 + $0x28] sm:$0xff]  ;;  %v8289_v47 = vadd.f32 %v8005_v48, %v7569_v52  ;;  %v12920_v10 = vpop.f32.mrf.mxu0  ;;  %12871 = vmatprep.mubr.msk.f32.mxu1 %vm13222_vm1, %v16837_v4  ;;  %11222 = vmatpush3.msra.mxu1 %v9712_v44  ;;  %v7573_v48 = vld [vmem:[#allocation4 + $0x70] sm:$0xff]  ;;  %v9727_v44 = vld [vmem:[#allocation7 + $0xd0] sm:$0xff] }
 0x65c   :  { %9600 = vst.msk [vmem:[#allocation4 + $0x18] sm:$0xff] %vm722_vm2, %v9535_v37  ;;  %v9467_v2 = vmul.f32 %v16915_v51, %v9398_v23  ;;  %v9334_v18 = vadd.f32 %v16903_v56, %v9265_v50  ;;  %9201 = vst.msk [vmem:[#allocation4 + $0x38] sm:$0xff] %vm722_vm2, %v9136_v3  ;;  %v12726_v6 = vpop.f32.mrf.mxu1  ;;  %v8417_v29 = vld [vmem:[#allocation4 + $0x40] sm:$0xff]  ;;  %11223 = vmatprep.subr.mxu1 %v9727_v44 }
 0x65d   :  { %8354 = vst.msk [vmem:[#allocation4 + $0x50] sm:$0xff] %vm722_vm2, %v8289_v47  ;;  %v8845_v31 = vpop.f32.mrf.mxu0  ;;  %13066 = vmatmul.mubr.msk.f32.gmra.mxu0 %vm879_vm3, %v7682_v58 }
 0x65e   :  { %v9536_v55 = vadd.f32 %v16921_v11, %v9467_v2  ;;  %v9399_v28 = vmax.f32 %v9334_v18, 0.0  ;;  %v8010_v60 = vpop.f32.mrf.mxu1  ;;  %12872 = vmatmul.mubr.msk.f32.gmra.mxu1 %vm879_vm3, %v7683_v1  ;;  %v9137_v63 = vadd.f32 %v8845_v31, %v8417_v29  ;;  %13068 = vmatprep.mubr.msk.f32.mxu0 %vm13222_vm1, %v16837_v4  ;;  %v7687_v29 = vld [vmem:[#allocation3 + $0x2e8] sm:$0xff] }
 0x65f   :  { %v9266_v27 = vld [vmem:[#allocation4 + $0x30] sm:$0xff]  ;;  %v8290_v42 = vadd.f32 %v8010_v60, %v7570_v13  ;;  %v12923_v16 = vpop.f32.mrf.mxu0  ;;  %12874 = vmatprep.mubr.msk.f32.mxu1 %vm13222_vm1, %v16837_v4  ;;  %v7574_v60 = vld [vmem:[#allocation4 + $0x78] sm:$0xff] }
 0x660   :  { %9601 = vst.msk [vmem:[#allocation4 + $0x20] sm:$0xff] %vm722_vm2, %v9536_v55  ;;  %v9468_v62 = vmul.f32 %v16915_v51, %v9399_v28  ;;  %v9335_v38 = vadd.f32 %v16903_v56, %v9266_v27  ;;  %9202 = vst.msk [vmem:[#allocation4 + $0x40] sm:$0xff] %vm722_vm2, %v9137_v63  ;;  %v12729_v32 = vpop.f32.mrf.mxu1  ;;  %v8418_v20 = vld [vmem:[#allocation4 + $0x48] sm:$0xff] }
 0x661   :  { %8355 = vst.msk [vmem:[#allocation4 + $0x58] sm:$0xff] %vm722_vm2, %v8290_v42  ;;  %v8850_v15 = vpop.f32.mrf.mxu0  ;;  %13069 = vmatmul.mubr.msk.f32.gmra.mxu0 %vm879_vm3, %v7683_v1 }
 0x662   :  { %v9537_v61 = vadd.f32 %v16921_v11, %v9468_v62  ;;  %v9400_v30 = vmax.f32 %v9335_v38, 0.0  ;;  %v8015_v8 = vpop.f32.mrf.mxu1  ;;  %12875 = vmatmul.mubr.msk.f32.gmra.mxu1 %vm879_vm3, %v7684_v59  ;;  %v9138_v5 = vadd.f32 %v8850_v15, %v8418_v20  ;;  %13071 = vmatprep.mubr.msk.f32.mxu0 %vm13222_vm1, %v16837_v4  ;;  %v7688_v20 = vld [vmem:[#allocation3 + $0x2f0] sm:$0xff] }
 0x663   :  { %v9267_v36 = vld [vmem:[#allocation4 + $0x38] sm:$0xff]  ;;  %v8291_v35 = vadd.f32 %v8015_v8, %v7571_v17  ;;  %v12926_v12 = vpop.f32.mrf.mxu0  ;;  %12877 = vmatprep.mubr.msk.f32.mxu1 %vm13222_vm1, %v16837_v4  ;;  %v7575_v8 = vld [vmem:[#allocation4 + $0x80] sm:$0xff] }
 0x664   :  { %9602 = vst.msk [vmem:[#allocation4 + $0x28] sm:$0xff] %vm722_vm2, %v9537_v61  ;;  %v9469_v9 = vmul.f32 %v16915_v51, %v9400_v30  ;;  %v9336_v40 = vadd.f32 %v16903_v56, %v9267_v36  ;;  %9203 = vst.msk [vmem:[#allocation4 + $0x48] sm:$0xff] %vm722_vm2, %v9138_v5  ;;  %v12732_v34 = vpop.f32.mrf.mxu1  ;;  %v8419_v25 = vld [vmem:[#allocation4 + $0x50] sm:$0xff] }
 0x665   :  { %8356 = vst.msk [vmem:[#allocation4 + $0x60] sm:$0xff] %vm722_vm2, %v8291_v35  ;;  %v8855_v26 = vpop.f32.mrf.mxu0  ;;  %13072 = vmatmul.mubr.msk.f32.gmra.mxu0 %vm879_vm3, %v7684_v59 }
 0x666   :  { %v9538_v39 = vadd.f32 %v16921_v11, %v9469_v9  ;;  %v9401_v53 = vmax.f32 %v9336_v40, 0.0  ;;  %v8020_v46 = vpop.f32.mrf.mxu1  ;;  %12878 = vmatmul.mubr.msk.f32.gmra.mxu1 %vm879_vm3, %v7685_v14  ;;  %v9139_v33 = vadd.f32 %v8855_v26, %v8419_v25  ;;  %13074 = vmatprep.mubr.msk.f32.mxu0 %vm13222_vm1, %v16837_v4 }
 0x667   :  { %v9268_v57 = vld [vmem:[#allocation4 + $0x40] sm:$0xff]  ;;  %v8292_v22 = vadd.f32 %v8020_v46, %v7572_v0  ;;  %v12929_v49 = vpop.f32.mrf.mxu0  ;;  %12880 = vmatprep.mubr.msk.f32.mxu1 %vm13222_vm1, %v16837_v4  ;;  %v7576_v0 = vld [vmem:[#allocation4 + $0x88] sm:$0xff] }
 0x668   :  { %9603 = vst.msk [vmem:[#allocation4 + $0x30] sm:$0xff] %vm722_vm2, %v9538_v39  ;;  %v9470_v19 = vmul.f32 %v16915_v51, %v9401_v53  ;;  %v9337_v54 = vadd.f32 %v16903_v56, %v9268_v57  ;;  %9204 = vst.msk [vmem:[#allocation4 + $0x50] sm:$0xff] %vm722_vm2, %v9139_v33  ;;  %v12735_v58 = vpop.f32.mrf.mxu1  ;;  %v8420_v7 = vld [vmem:[#allocation4 + $0x58] sm:$0xff] }
 0x669   :  { %8357 = vst.msk [vmem:[#allocation4 + $0x68] sm:$0xff] %vm722_vm2, %v8292_v22  ;;  %v8860_v37 = vpop.f32.mrf.mxu0  ;;  %13075 = vmatmul.mubr.msk.f32.gmra.mxu0 %vm879_vm3, %v7685_v14  ;;  %v9711_v14 = vld [vmem:[#allocation7 + $0x50] sm:$0xff] }
 0x66a   :  { %v9539_v23 = vadd.f32 %v16921_v11, %v9470_v19  ;;  %v9402_v52 = vmax.f32 %v9337_v54, 0.0  ;;  %v8025_v3 = vpop.f32.mrf.mxu1  ;;  %12881 = vmatmul.mubr.msk.f32.gmra.mxu1 %vm879_vm3, %v7686_v24  ;;  %v9140_v50 = vadd.f32 %v8860_v37, %v8420_v7  ;;  %13077 = vmatprep.mubr.msk.f32.mxu0 %vm13222_vm1, %v16837_v4 }
 0x66b   :  { %v9269_v47 = vld [vmem:[#allocation4 + $0x48] sm:$0xff]  ;;  %v8293_v10 = vadd.f32 %v8025_v3, %v7573_v48  ;;  %v12932_v2 = vpop.f32.mrf.mxu0  ;;  %12883 = vmatprep.mubr.msk.f32.mxu1 %vm13222_vm1, %v16837_v4  ;;  %11224 = vmatpush3.msra.mxu1 %v9711_v14 }
 0x66c   :  { %9604 = vst.msk [vmem:[#allocation4 + $0x38] sm:$0xff] %vm722_vm2, %v9539_v23  ;;  %v9471_v18 = vmul.f32 %v16915_v51, %v9402_v52  ;;  %v9338_v6 = vadd.f32 %v16903_v56, %v9269_v47  ;;  %9205 = vst.msk [vmem:[#allocation4 + $0x58] sm:$0xff] %vm722_vm2, %v9140_v50  ;;  %v12738_v1 = vpop.f32.mrf.mxu1  ;;  %v8421_v31 = vld [vmem:[#allocation4 + $0x60] sm:$0xff] }
 0x66d   :  { %8358 = vst.msk [vmem:[#allocation4 + $0x70] sm:$0xff] %vm722_vm2, %v8293_v10  ;;  %v8865_v55 = vpop.f32.mrf.mxu0  ;;  %13078 = vmatmul.mubr.msk.f32.gmra.mxu0 %vm879_vm3, %v7686_v24 }
 0x66e   :  { %v9540_v28 = vadd.f32 %v16921_v11, %v9471_v18  ;;  %v9403_v13 = vmax.f32 %v9338_v6, 0.0  ;;  %v8030_v63 = vpop.f32.mrf.mxu1  ;;  %12884 = vmatmul.mubr.msk.f32.gmra.mxu1 %vm879_vm3, %v7687_v29  ;;  %v9141_v27 = vadd.f32 %v8865_v55, %v8421_v31  ;;  %13080 = vmatprep.mubr.msk.f32.mxu0 %vm13222_vm1, %v16837_v4  ;;  %v7578_v55 = vld [vmem:[#allocation4 + $0x98] sm:$0xff] }
 0x66f   :  { %v9270_v42 = vld [vmem:[#allocation4 + $0x50] sm:$0xff]  ;;  %v8294_v16 = vadd.f32 %v8030_v63, %v7574_v60  ;;  %v12935_v62 = vpop.f32.mrf.mxu0  ;;  %12886 = vmatprep.mubr.msk.f32.mxu1 %vm13222_vm1, %v16837_v4 }
 0x670   :  { %9605 = vst.msk [vmem:[#allocation4 + $0x40] sm:$0xff] %vm722_vm2, %v9540_v28  ;;  %v9472_v38 = vmul.f32 %v16915_v51, %v9403_v13  ;;  %v9339_v32 = vadd.f32 %v16903_v56, %v9270_v42  ;;  %9206 = vst.msk [vmem:[#allocation4 + $0x60] sm:$0xff] %vm722_vm2, %v9141_v27  ;;  %v12741_v59 = vpop.f32.mrf.mxu1  ;;  %v8422_v15 = vld [vmem:[#allocation4 + $0x68] sm:$0xff] }
 0x671   :  { %8359 = vst.msk [vmem:[#allocation4 + $0x78] sm:$0xff] %vm722_vm2, %v8294_v16  ;;  %v8870_v61 = vpop.f32.mrf.mxu0  ;;  %13081 = vmatmul.mubr.msk.f32.gmra.mxu0 %vm879_vm3, %v7687_v29 }
 0x672   :  { %v9541_v30 = vadd.f32 %v16921_v11, %v9472_v38  ;;  %v9404_v17 = vmax.f32 %v9339_v32, 0.0  ;;  %v8035_v5 = vpop.f32.mrf.mxu1  ;;  %12887 = vmatmul.mubr.msk.f32.gmra.mxu1 %vm879_vm3, %v7688_v20  ;;  %v9142_v36 = vadd.f32 %v8870_v61, %v8422_v15  ;;  %13083 = vmatprep.mubr.msk.f32.mxu0 %vm13222_vm1, %v16837_v4  ;;  %v7579_v15 = vld [vmem:[#allocation4 + $0xa0] sm:$0xff] }
 0x673   :  { %v9271_v35 = vld [vmem:[#allocation4 + $0x58] sm:$0xff]  ;;  %v8295_v12 = vadd.f32 %v8035_v5, %v7575_v8  ;;  %v12938_v9 = vpop.f32.mrf.mxu0 }
 0x674   :  { %9606 = vst.msk [vmem:[#allocation4 + $0x48] sm:$0xff] %vm722_vm2, %v9541_v30  ;;  %v9473_v40 = vmul.f32 %v16915_v51, %v9404_v17  ;;  %v9340_v34 = vadd.f32 %v16903_v56, %v9271_v35  ;;  %9207 = vst.msk [vmem:[#allocation4 + $0x68] sm:$0xff] %vm722_vm2, %v9142_v36  ;;  %v12744_v21 = vpop.f32.mrf.mxu1  ;;  %v8423_v25 = vld [vmem:[#allocation4 + $0x70] sm:$0xff] }
 0x675   :  { %8360 = vst.msk [vmem:[#allocation4 + $0x80] sm:$0xff] %vm722_vm2, %v8295_v12  ;;  %v8875_v26 = vpop.f32.mrf.mxu0  ;;  %13084 = vmatmul.mubr.msk.f32.gmra.mxu0 %vm879_vm3, %v7688_v20  ;;  %v9726_v9 = vld [vmem:[#allocation7 + $0xc8] sm:$0xff] }
 0x676   :  { %v9542_v39 = vadd.f32 %v16921_v11, %v9473_v40  ;;  %v9405_v53 = vmax.f32 %v9340_v34, 0.0  ;;  %v8040_v46 = vpop.f32.mrf.mxu1  ;;  %v9143_v33 = vadd.f32 %v8875_v26, %v8423_v25  ;;  %13086 = vmatprep.mubr.msk.f32.mxu0 %vm13222_vm1, %v16837_v4  ;;  %v7577_v4 = vld [vmem:[#allocation4 + $0x90] sm:$0xff]  ;;  %11225 = vmatprep.subr.mxu1 %v9726_v9  ;;  %v7580_v25 = vld [vmem:[#allocation4 + $0xa8] sm:$0xff] }
 0x677   :  { %v9272_v57 = vld [vmem:[#allocation4 + $0x60] sm:$0xff]  ;;  %v8296_v22 = vadd.f32 %v8040_v46, %v7576_v0  ;;  %v12941_v49 = vpop.f32.mrf.mxu0  ;;  %v9710_v40 = vld [vmem:[#allocation7 + $0x48] sm:$0xff] }
 0x678   :  { %9607 = vst.msk [vmem:[#allocation4 + $0x50] sm:$0xff] %vm722_vm2, %v9542_v39  ;;  %v9474_v19 = vmul.f32 %v16915_v51, %v9405_v53  ;;  %v9341_v54 = vadd.f32 %v16903_v56, %v9272_v57  ;;  %9208 = vst.msk [vmem:[#allocation4 + $0x70] sm:$0xff] %vm722_vm2, %v9143_v33  ;;  %v12747_v58 = vpop.f32.mrf.mxu1  ;;  %v8424_v24 = vld [vmem:[#allocation4 + $0x78] sm:$0xff]  ;;  %11226 = vmatpush3.msra.mxu1 %v9710_v40 }
 0x679   :  { %8361 = vst.msk [vmem:[#allocation4 + $0x88] sm:$0xff] %vm722_vm2, %v8296_v22  ;;  %v8880_v7 = vpop.f32.mrf.mxu0 }
 0x67a   :  { %v9543_v37 = vadd.f32 %v16921_v11, %v9474_v19  ;;  %v9406_v23 = vmax.f32 %v9341_v54, 0.0  ;;  %v8045_v52 = vpop.f32.mrf.mxu1  ;;  %v9144_v48 = vadd.f32 %v8880_v7, %v8424_v24  ;;  %v7581_v24 = vld [vmem:[#allocation4 + $0xb0] sm:$0xff] }
 0x67b   :  { %v9273_v3 = vld [vmem:[#allocation4 + $0x68] sm:$0xff]  ;;  %v8297_v50 = vadd.f32 %v8045_v52, %v7577_v4  ;;  %v12944_v47 = vpop.f32.mrf.mxu0 }
 0x67c   :  { %9608 = vst.msk [vmem:[#allocation4 + $0x58] sm:$0xff] %vm722_vm2, %v9543_v37  ;;  %v9475_v10 = vmul.f32 %v16915_v51, %v9406_v23  ;;  %v9342_v2 = vadd.f32 %v16903_v56, %v9273_v3  ;;  %9209 = vst.msk [vmem:[#allocation4 + $0x78] sm:$0xff] %vm722_vm2, %v9144_v48  ;;  %v12750_v18 = vpop.f32.mrf.mxu1  ;;  %v8425_v6 = vld [vmem:[#allocation4 + $0x80] sm:$0xff] }
 0x67d   :  { %8362 = vst.msk [vmem:[#allocation4 + $0x90] sm:$0xff] %vm722_vm2, %v8297_v50  ;;  %v8885_v1 = vpop.f32.mrf.mxu0 }
 0x67e   :  { %v9544_v29 = vadd.f32 %v16921_v11, %v9475_v10  ;;  %v9407_v31 = vmax.f32 %v9342_v2, 0.0  ;;  %v8050_v28 = vpop.f32.mrf.mxu1  ;;  %v9145_v13 = vadd.f32 %v8885_v1, %v8425_v6  ;;  %v7582_v6 = vld [vmem:[#allocation4 + $0xb8] sm:$0xff] }
 0x67f   :  { %v9274_v60 = vld [vmem:[#allocation4 + $0x70] sm:$0xff]  ;;  %v8298_v63 = vadd.f32 %v8050_v28, %v7578_v55  ;;  %v12947_v27 = vpop.f32.mrf.mxu0 }
 0x680   :  { %9609 = vst.msk [vmem:[#allocation4 + $0x60] sm:$0xff] %vm722_vm2, %v9544_v29  ;;  %v9476_v42 = vmul.f32 %v16915_v51, %v9407_v31  ;;  %v9343_v16 = vadd.f32 %v16903_v56, %v9274_v60  ;;  %9210 = vst.msk [vmem:[#allocation4 + $0x80] sm:$0xff] %vm722_vm2, %v9145_v13  ;;  %v12753_v62 = vpop.f32.mrf.mxu1  ;;  %v8426_v38 = vld [vmem:[#allocation4 + $0x88] sm:$0xff] }
 0x681   :  { %8363 = vst.msk [vmem:[#allocation4 + $0x98] sm:$0xff] %vm722_vm2, %v8298_v63  ;;  %v8890_v32 = vpop.f32.mrf.mxu0 }
 0x682   :  { %v9545_v59 = vadd.f32 %v16921_v11, %v9476_v42  ;;  %v9408_v20 = vmax.f32 %v9343_v16, 0.0  ;;  %v8055_v61 = vpop.f32.mrf.mxu1  ;;  %v9146_v30 = vadd.f32 %v8890_v32, %v8426_v38  ;;  %v7583_v38 = vld [vmem:[#allocation4 + $0xc0] sm:$0xff] }
 0x683   :  { %v9275_v17 = vld [vmem:[#allocation4 + $0x78] sm:$0xff]  ;;  %v8299_v8 = vadd.f32 %v8055_v61, %v7579_v15  ;;  %v12950_v5 = vpop.f32.mrf.mxu0 }
 0x684   :  { %9610 = vst.msk [vmem:[#allocation4 + $0x68] sm:$0xff] %vm722_vm2, %v9545_v59  ;;  %v9477_v36 = vmul.f32 %v16915_v51, %v9408_v20  ;;  %v9344_v35 = vadd.f32 %v16903_v56, %v9275_v17  ;;  %9211 = vst.msk [vmem:[#allocation4 + $0x88] sm:$0xff] %vm722_vm2, %v9146_v30  ;;  %v12756_v12 = vpop.f32.mrf.mxu1  ;;  %v8427_v34 = vld [vmem:[#allocation4 + $0x90] sm:$0xff]  ;;  %v9725_v5 = vld [vmem:[#allocation7 + $0xc0] sm:$0xff] }
 0x685   :  { %8364 = vst.msk [vmem:[#allocation4 + $0xa0] sm:$0xff] %vm722_vm2, %v8299_v8  ;;  %v8895_v21 = vpop.f32.mrf.mxu0  ;;  %11227 = vmatprep.subr.mxu1 %v9725_v5 }
 0x686   :  { %v9546_v44 = vadd.f32 %v16921_v11, %v9477_v36  ;;  %v9409_v14 = vmax.f32 %v9344_v35, 0.0  ;;  %v8060_v26 = vpop.f32.mrf.mxu1  ;;  %v9147_v39 = vadd.f32 %v8895_v21, %v8427_v34  ;;  %v9709_v36 = vld [vmem:[#allocation7 + $0x40] sm:$0xff] }
 0x687   :  { %v9276_v53 = vld [vmem:[#allocation4 + $0x80] sm:$0xff]  ;;  %v8300_v0 = vadd.f32 %v8060_v26, %v7580_v25  ;;  %v12953_v46 = vpop.f32.mrf.mxu0  ;;  %v7584_v34 = vld [vmem:[#allocation4 + $0xc8] sm:$0xff]  ;;  %11228 = vmatpush3.msra.mxu1 %v9709_v36 }
 0x688   :  { %9611 = vst.msk [vmem:[#allocation4 + $0x70] sm:$0xff] %vm722_vm2, %v9546_v44  ;;  %v9478_v33 = vmul.f32 %v16915_v51, %v9409_v14  ;;  %v9345_v57 = vadd.f32 %v16903_v56, %v9276_v53  ;;  %9212 = vst.msk [vmem:[#allocation4 + $0x90] sm:$0xff] %vm722_vm2, %v9147_v39  ;;  %v12759_v22 = vpop.f32.mrf.mxu1  ;;  %v8428_v49 = vld [vmem:[#allocation4 + $0x98] sm:$0xff] }
 0x689   :  { %8365 = vst.msk [vmem:[#allocation4 + $0xa8] sm:$0xff] %vm722_vm2, %v8300_v0  ;;  %v8900_v19 = vpop.f32.mrf.mxu0 }
 0x68a   :  { %v9547_v54 = vadd.f32 %v16921_v11, %v9478_v33  ;;  %v9410_v58 = vmax.f32 %v9345_v57, 0.0  ;;  %v8065_v7 = vpop.f32.mrf.mxu1  ;;  %v9148_v37 = vadd.f32 %v8900_v19, %v8428_v49  ;;  %v7585_v49 = vld [vmem:[#allocation4 + $0xd0] sm:$0xff] }
 0x68b   :  { %v9277_v23 = vld [vmem:[#allocation4 + $0x88] sm:$0xff]  ;;  %v8301_v4 = vadd.f32 %v8065_v7, %v7581_v24  ;;  %v12956_v52 = vpop.f32.mrf.mxu0 }
 0x68c   :  { %9612 = vst.msk [vmem:[#allocation4 + $0x78] sm:$0xff] %vm722_vm2, %v9547_v54  ;;  %v9479_v48 = vmul.f32 %v16915_v51, %v9410_v58  ;;  %v9346_v3 = vadd.f32 %v16903_v56, %v9277_v23  ;;  %9213 = vst.msk [vmem:[#allocation4 + $0x98] sm:$0xff] %vm722_vm2, %v9148_v37  ;;  %v12762_v50 = vpop.f32.mrf.mxu1  ;;  %v8429_v47 = vld [vmem:[#allocation4 + $0xa0] sm:$0xff] }
 0x68d   :  { %8366 = vst.msk [vmem:[#allocation4 + $0xb0] sm:$0xff] %vm722_vm2, %v8301_v4  ;;  %v8905_v10 = vpop.f32.mrf.mxu0 }
 0x68e   :  { %v9548_v2 = vadd.f32 %v16921_v11, %v9479_v48  ;;  %v9411_v18 = vmax.f32 %v9346_v3, 0.0  ;;  %v8070_v1 = vpop.f32.mrf.mxu1  ;;  %v9149_v29 = vadd.f32 %v8905_v10, %v8429_v47  ;;  %v7586_v47 = vld [vmem:[#allocation4 + $0xd8] sm:$0xff] }
 0x68f   :  { %v9278_v31 = vld [vmem:[#allocation4 + $0x90] sm:$0xff]  ;;  %v8302_v55 = vadd.f32 %v8070_v1, %v7582_v6  ;;  %v12959_v28 = vpop.f32.mrf.mxu0 }
 0x690   :  { %9613 = vst.msk [vmem:[#allocation4 + $0x80] sm:$0xff] %vm722_vm2, %v9548_v2  ;;  %v9480_v13 = vmul.f32 %v16915_v51, %v9411_v18  ;;  %v9347_v60 = vadd.f32 %v16903_v56, %v9278_v31  ;;  %9214 = vst.msk [vmem:[#allocation4 + $0xa0] sm:$0xff] %vm722_vm2, %v9149_v29  ;;  %v12765_v63 = vpop.f32.mrf.mxu1  ;;  %v8430_v27 = vld [vmem:[#allocation4 + $0xa8] sm:$0xff] }
 0x691   :  { %8367 = vst.msk [vmem:[#allocation4 + $0xb8] sm:$0xff] %vm722_vm2, %v8302_v55  ;;  %v8910_v42 = vpop.f32.mrf.mxu0 }
 0x692   :  { %v9549_v16 = vadd.f32 %v16921_v11, %v9480_v13  ;;  %v9412_v62 = vmax.f32 %v9347_v60, 0.0  ;;  %v8075_v32 = vpop.f32.mrf.mxu1  ;;  %v9150_v59 = vadd.f32 %v8910_v42, %v8430_v27  ;;  %v7587_v27 = vld [vmem:[#allocation4 + $0xe0] sm:$0xff] }
 0x693   :  { %v9279_v20 = vld [vmem:[#allocation4 + $0x98] sm:$0xff]  ;;  %v8303_v15 = vadd.f32 %v8075_v32, %v7583_v38  ;;  %v12962_v61 = vpop.f32.mrf.mxu0 }
 0x694   :  { %9614 = vst.msk [vmem:[#allocation4 + $0x88] sm:$0xff] %vm722_vm2, %v9549_v16  ;;  %v9481_v30 = vmul.f32 %v16915_v51, %v9412_v62  ;;  %v9348_v17 = vadd.f32 %v16903_v56, %v9279_v20  ;;  %9215 = vst.msk [vmem:[#allocation4 + $0xa8] sm:$0xff] %vm722_vm2, %v9150_v59  ;;  %v12768_v8 = vpop.f32.mrf.mxu1  ;;  %v8431_v35 = vld [vmem:[#allocation4 + $0xb0] sm:$0xff]  ;;  %v9724_v61 = vld [vmem:[#allocation7 + $0xb8] sm:$0xff] }
 0x695   :  { %8368 = vst.msk [vmem:[#allocation4 + $0xc0] sm:$0xff] %vm722_vm2, %v8303_v15  ;;  %v8915_v12 = vpop.f32.mrf.mxu0  ;;  %11229 = vmatprep.subr.mxu1 %v9724_v61 }
 0x696   :  { %v9550_v9 = vadd.f32 %v16921_v11, %v9481_v30  ;;  %v9413_v40 = vmax.f32 %v9348_v17, 0.0  ;;  %v8080_v21 = vpop.f32.mrf.mxu1  ;;  %v9151_v44 = vadd.f32 %v8915_v12, %v8431_v35  ;;  %v9708_v30 = vld [vmem:[#allocation7 + $0x38] sm:$0xff]  ;;  %v7588_v35 = vld [vmem:[#allocation4 + $0xe8] sm:$0xff] }
 0x697   :  { %v9280_v14 = vld [vmem:[#allocation4 + $0xa0] sm:$0xff]  ;;  %v8304_v25 = vadd.f32 %v8080_v21, %v7584_v34  ;;  %v12965_v26 = vpop.f32.mrf.mxu0  ;;  %11230 = vmatpush3.msra.mxu1 %v9708_v30 }
 0x698   :  { %9615 = vst.msk [vmem:[#allocation4 + $0x90] sm:$0xff] %vm722_vm2, %v9550_v9  ;;  %v9482_v39 = vmul.f32 %v16915_v51, %v9413_v40  ;;  %v9349_v53 = vadd.f32 %v16903_v56, %v9280_v14  ;;  %9216 = vst.msk [vmem:[#allocation4 + $0xb0] sm:$0xff] %vm722_vm2, %v9151_v44  ;;  %v12771_v0 = vpop.f32.mrf.mxu1  ;;  %v8432_v46 = vld [vmem:[#allocation4 + $0xb8] sm:$0xff] }
 0x699   :  { %8369 = vst.msk [vmem:[#allocation4 + $0xc8] sm:$0xff] %vm722_vm2, %v8304_v25  ;;  %v8920_v33 = vpop.f32.mrf.mxu0 }
 0x69a   :  { %v9551_v57 = vadd.f32 %v16921_v11, %v9482_v39  ;;  %v9414_v22 = vmax.f32 %v9349_v53, 0.0  ;;  %v8085_v19 = vpop.f32.mrf.mxu1  ;;  %v9152_v54 = vadd.f32 %v8920_v33, %v8432_v46  ;;  %v7589_v46 = vld [vmem:[#allocation4 + $0xf0] sm:$0xff] }
 0x69b   :  { %v9281_v58 = vld [vmem:[#allocation4 + $0xa8] sm:$0xff]  ;;  %v8305_v24 = vadd.f32 %v8085_v19, %v7585_v49  ;;  %v12968_v7 = vpop.f32.mrf.mxu0 }
 0x69c   :  { %9616 = vst.msk [vmem:[#allocation4 + $0x98] sm:$0xff] %vm722_vm2, %v9551_v57  ;;  %v9483_v37 = vmul.f32 %v16915_v51, %v9414_v22  ;;  %v9350_v23 = vadd.f32 %v16903_v56, %v9281_v58  ;;  %9217 = vst.msk [vmem:[#allocation4 + $0xb8] sm:$0xff] %vm722_vm2, %v9152_v54  ;;  %v12774_v4 = vpop.f32.mrf.mxu1  ;;  %v8433_v52 = vld [vmem:[#allocation4 + $0xc0] sm:$0xff] }
 0x69d   :  { %8370 = vst.msk [vmem:[#allocation4 + $0xd0] sm:$0xff] %vm722_vm2, %v8305_v24  ;;  %v8925_v48 = vpop.f32.mrf.mxu0 }
 0x69e   :  { %v9552_v3 = vadd.f32 %v16921_v11, %v9483_v37  ;;  %v9415_v50 = vmax.f32 %v9350_v23, 0.0  ;;  %v8090_v10 = vpop.f32.mrf.mxu1  ;;  %v9153_v2 = vadd.f32 %v8925_v48, %v8433_v52  ;;  %v7590_v52 = vld [vmem:[#allocation4 + $0xf8] sm:$0xff] }
 0x69f   :  { %v9282_v18 = vld [vmem:[#allocation4 + $0xb0] sm:$0xff]  ;;  %v8306_v6 = vadd.f32 %v8090_v10, %v7586_v47  ;;  %v12971_v1 = vpop.f32.mrf.mxu0 }
 0x6a0   :  { %9617 = vst.msk [vmem:[#allocation4 + $0xa0] sm:$0xff] %vm722_vm2, %v9552_v3  ;;  %v9484_v29 = vmul.f32 %v16915_v51, %v9415_v50  ;;  %v9351_v31 = vadd.f32 %v16903_v56, %v9282_v18  ;;  %9218 = vst.msk [vmem:[#allocation4 + $0xc0] sm:$0xff] %vm722_vm2, %v9153_v2  ;;  %v12777_v55 = vpop.f32.mrf.mxu1  ;;  %v8434_v28 = vld [vmem:[#allocation4 + $0xc8] sm:$0xff] }
 0x6a1   :  { %8371 = vst.msk [vmem:[#allocation4 + $0xd8] sm:$0xff] %vm722_vm2, %v8306_v6  ;;  %v8930_v13 = vpop.f32.mrf.mxu0 }
 0x6a2   :  { %v9553_v60 = vadd.f32 %v16921_v11, %v9484_v29  ;;  %v9416_v63 = vmax.f32 %v9351_v31, 0.0  ;;  %v8095_v42 = vpop.f32.mrf.mxu1  ;;  %v9154_v16 = vadd.f32 %v8930_v13, %v8434_v28  ;;  %v7591_v28 = vld [vmem:[#allocation4 + $0x100] sm:$0xff] }
 0x6a3   :  { %v9283_v62 = vld [vmem:[#allocation4 + $0xb8] sm:$0xff]  ;;  %v8307_v38 = vadd.f32 %v8095_v42, %v7587_v27  ;;  %v12974_v32 = vpop.f32.mrf.mxu0 }
 0x6a4   :  { %9618 = vst.msk [vmem:[#allocation4 + $0xa8] sm:$0xff] %vm722_vm2, %v9553_v60  ;;  %v9485_v59 = vmul.f32 %v16915_v51, %v9416_v63  ;;  %v9352_v20 = vadd.f32 %v16903_v56, %v9283_v62  ;;  %9219 = vst.msk [vmem:[#allocation4 + $0xc8] sm:$0xff] %vm722_vm2, %v9154_v16  ;;  %v12780_v15 = vpop.f32.mrf.mxu1  ;;  %v8435_v17 = vld [vmem:[#allocation4 + $0xd0] sm:$0xff]  ;;  %v9723_v32 = vld [vmem:[#allocation7 + $0xb0] sm:$0xff] }
 0x6a5   :  { %8372 = vst.msk [vmem:[#allocation4 + $0xe0] sm:$0xff] %vm722_vm2, %v8307_v38  ;;  %v8935_v8 = vpop.f32.mrf.mxu0  ;;  %11231 = vmatprep.subr.mxu1 %v9723_v32 }
 0x6a6   :  { %v9554_v5 = vadd.f32 %v16921_v11, %v9485_v59  ;;  %v9417_v36 = vmax.f32 %v9352_v20, 0.0  ;;  %v8100_v12 = vpop.f32.mrf.mxu1  ;;  %v9155_v9 = vadd.f32 %v8935_v8, %v8435_v17  ;;  %v9707_v59 = vld [vmem:[#allocation7 + $0x30] sm:$0xff]  ;;  %v7592_v17 = vld [vmem:[#allocation4 + $0x108] sm:$0xff] }
 0x6a7   :  { %v9284_v40 = vld [vmem:[#allocation4 + $0xc0] sm:$0xff]  ;;  %v8308_v34 = vadd.f32 %v8100_v12, %v7588_v35  ;;  %v12977_v21 = vpop.f32.mrf.mxu0  ;;  %11232 = vmatpush3.msra.mxu1 %v9707_v59 }
 0x6a8   :  { %9619 = vst.msk [vmem:[#allocation4 + $0xb0] sm:$0xff] %vm722_vm2, %v9554_v5  ;;  %v9486_v44 = vmul.f32 %v16915_v51, %v9417_v36  ;;  %v9353_v14 = vadd.f32 %v16903_v56, %v9284_v40  ;;  %9220 = vst.msk [vmem:[#allocation4 + $0xd0] sm:$0xff] %vm722_vm2, %v9155_v9  ;;  %v12783_v25 = vpop.f32.mrf.mxu1  ;;  %v8436_v26 = vld [vmem:[#allocation4 + $0xd8] sm:$0xff] }
 0x6a9   :  { %8373 = vst.msk [vmem:[#allocation4 + $0xe8] sm:$0xff] %vm722_vm2, %v8308_v34  ;;  %v8940_v39 = vpop.f32.mrf.mxu0 }
 0x6aa   :  { %v9555_v53 = vadd.f32 %v16921_v11, %v9486_v44  ;;  %v9418_v0 = vmax.f32 %v9353_v14, 0.0  ;;  %v8105_v33 = vpop.f32.mrf.mxu1  ;;  %v9156_v57 = vadd.f32 %v8940_v39, %v8436_v26  ;;  %v7593_v26 = vld [vmem:[#allocation4 + $0x110] sm:$0xff] }
 0x6ab   :  { %v9285_v22 = vld [vmem:[#allocation4 + $0xc8] sm:$0xff]  ;;  %v8309_v49 = vadd.f32 %v8105_v33, %v7589_v46  ;;  %v12980_v19 = vpop.f32.mrf.mxu0 }
 0x6ac   :  { %9620 = vst.msk [vmem:[#allocation4 + $0xb8] sm:$0xff] %vm722_vm2, %v9555_v53  ;;  %v9487_v54 = vmul.f32 %v16915_v51, %v9418_v0  ;;  %v9354_v58 = vadd.f32 %v16903_v56, %v9285_v22  ;;  %9221 = vst.msk [vmem:[#allocation4 + $0xd8] sm:$0xff] %vm722_vm2, %v9156_v57  ;;  %v12786_v24 = vpop.f32.mrf.mxu1  ;;  %v8437_v7 = vld [vmem:[#allocation4 + $0xe0] sm:$0xff] }
 0x6ad   :  { %8374 = vst.msk [vmem:[#allocation4 + $0xf0] sm:$0xff] %vm722_vm2, %v8309_v49  ;;  %v8945_v37 = vpop.f32.mrf.mxu0 }
 0x6ae   :  { %v9556_v23 = vadd.f32 %v16921_v11, %v9487_v54  ;;  %v9419_v4 = vmax.f32 %v9354_v58, 0.0  ;;  %v8110_v48 = vpop.f32.mrf.mxu1  ;;  %v9157_v3 = vadd.f32 %v8945_v37, %v8437_v7  ;;  %v7594_v7 = vld [vmem:[#allocation4 + $0x118] sm:$0xff] }
 0x6af   :  { %v9286_v50 = vld [vmem:[#allocation4 + $0xd0] sm:$0xff]  ;;  %v8310_v47 = vadd.f32 %v8110_v48, %v7590_v52  ;;  %v12983_v10 = vpop.f32.mrf.mxu0 }
 0x6b0   :  { %9621 = vst.msk [vmem:[#allocation4 + $0xc0] sm:$0xff] %vm722_vm2, %v9556_v23  ;;  %v9488_v2 = vmul.f32 %v16915_v51, %v9419_v4  ;;  %v9355_v18 = vadd.f32 %v16903_v56, %v9286_v50  ;;  %9222 = vst.msk [vmem:[#allocation4 + $0xe0] sm:$0xff] %vm722_vm2, %v9157_v3  ;;  %v12789_v6 = vpop.f32.mrf.mxu1  ;;  %v8438_v1 = vld [vmem:[#allocation4 + $0xe8] sm:$0xff] }
 0x6b1   :  { %8375 = vst.msk [vmem:[#allocation4 + $0xf8] sm:$0xff] %vm722_vm2, %v8310_v47  ;;  %v8950_v29 = vpop.f32.mrf.mxu0 }
 0x6b2   :  { %v9557_v31 = vadd.f32 %v16921_v11, %v9488_v2  ;;  %v9420_v55 = vmax.f32 %v9355_v18, 0.0  ;;  %v8115_v13 = vpop.f32.mrf.mxu1  ;;  %v9158_v60 = vadd.f32 %v8950_v29, %v8438_v1  ;;  %v7595_v1 = vld [vmem:[#allocation4 + $0x120] sm:$0xff] }
 0x6b3   :  { %v9287_v63 = vld [vmem:[#allocation4 + $0xd8] sm:$0xff]  ;;  %v8311_v27 = vadd.f32 %v8115_v13, %v7591_v28  ;;  %v12986_v42 = vpop.f32.mrf.mxu0 }
 0x6b4   :  { %9622 = vst.msk [vmem:[#allocation4 + $0xc8] sm:$0xff] %vm722_vm2, %v9557_v31  ;;  %v9489_v16 = vmul.f32 %v16915_v51, %v9420_v55  ;;  %v9356_v62 = vadd.f32 %v16903_v56, %v9287_v63  ;;  %9223 = vst.msk [vmem:[#allocation4 + $0xe8] sm:$0xff] %vm722_vm2, %v9158_v60  ;;  %v12792_v38 = vpop.f32.mrf.mxu1  ;;  %v8439_v20 = vld [vmem:[#allocation4 + $0xf0] sm:$0xff] }
 0x6b5   :  { %8376 = vst.msk [vmem:[#allocation4 + $0x100] sm:$0xff] %vm722_vm2, %v8311_v27  ;;  %v8955_v15 = vpop.f32.mrf.mxu0  ;;  %v9722_v42 = vld [vmem:[#allocation7 + $0xa8] sm:$0xff] }
 0x6b6   :  { %v9558_v61 = vadd.f32 %v16921_v11, %v9489_v16  ;;  %v9421_v30 = vmax.f32 %v9356_v62, 0.0  ;;  %v8120_v8 = vpop.f32.mrf.mxu1  ;;  %v9159_v5 = vadd.f32 %v8955_v15, %v8439_v20  ;;  %v9706_v16 = vld [vmem:[#allocation7 + $0x28] sm:$0xff]  ;;  %11233 = vmatprep.subr.mxu1 %v9722_v42  ;;  %v7596_v20 = vld [vmem:[#allocation4 + $0x128] sm:$0xff] }
 0x6b7   :  { %v9288_v36 = vld [vmem:[#allocation4 + $0xe0] sm:$0xff]  ;;  %v8312_v35 = vadd.f32 %v8120_v8, %v7592_v17  ;;  %v12989_v12 = vpop.f32.mrf.mxu0  ;;  %11234 = vmatpush3.msra.mxu1 %v9706_v16 }
 0x6b8   :  { %9623 = vst.msk [vmem:[#allocation4 + $0xd0] sm:$0xff] %vm722_vm2, %v9558_v61  ;;  %v9490_v9 = vmul.f32 %v16915_v51, %v9421_v30  ;;  %v9357_v40 = vadd.f32 %v16903_v56, %v9288_v36  ;;  %9224 = vst.msk [vmem:[#allocation4 + $0xf0] sm:$0xff] %vm722_vm2, %v9159_v5  ;;  %v12795_v34 = vpop.f32.mrf.mxu1  ;;  %v8440_v21 = vld [vmem:[#allocation4 + $0xf8] sm:$0xff]  ;;  %v9721_v12 = vld [vmem:[#allocation7 + $0xa0] sm:$0xff] }
 0x6b9   :  { %8377 = vst.msk [vmem:[#allocation4 + $0x108] sm:$0xff] %vm722_vm2, %v8312_v35  ;;  %v8960_v44 = vpop.f32.mrf.mxu0  ;;  %11235 = vmatprep.subr.mxu1 %v9721_v12 }
 0x6ba   :  { %v9559_v14 = vadd.f32 %v16921_v11, %v9490_v9  ;;  %v9422_v25 = vmax.f32 %v9357_v40, 0.0  ;;  %v8125_v39 = vpop.f32.mrf.mxu1  ;;  %v9160_v53 = vadd.f32 %v8960_v44, %v8440_v21  ;;  %v9705_v9 = vld [vmem:[#allocation7 + $0x20] sm:$0xff]  ;;  %v9720_v21 = vld [vmem:[#allocation7 + $0x98] sm:$0xff] }
 0x6bb   :  { %v9289_v0 = vld [vmem:[#allocation4 + $0xe8] sm:$0xff]  ;;  %v8313_v46 = vadd.f32 %v8125_v39, %v7593_v26  ;;  %v12992_v33 = vpop.f32.mrf.mxu0  ;;  %v9704_v44 = vld [vmem:[#allocation7 + $0x18] sm:$0xff]  ;;  %v7597_v26 = vld [vmem:[#allocation4 + $0x130] sm:$0xff]  ;;  %11236 = vmatpush3.msra.mxu1 %v9705_v9 }
 0x6bc   :  { %9624 = vst.msk [vmem:[#allocation4 + $0xd8] sm:$0xff] %vm722_vm2, %v9559_v14  ;;  %v9491_v57 = vmul.f32 %v16915_v51, %v9422_v25  ;;  %v9358_v22 = vadd.f32 %v16903_v56, %v9289_v0  ;;  %9225 = vst.msk [vmem:[#allocation4 + $0xf8] sm:$0xff] %vm722_vm2, %v9160_v53  ;;  %v12798_v49 = vpop.f32.mrf.mxu1  ;;  %v8441_v19 = vld [vmem:[#allocation4 + $0x100] sm:$0xff]  ;;  %v9719_v0 = vld [vmem:[#allocation7 + $0x90] sm:$0xff]  ;;  %11237 = vmatprep.subr.mxu1 %v9720_v21 }
 0x6bd   :  { %8378 = vst.msk [vmem:[#allocation4 + $0x110] sm:$0xff] %vm722_vm2, %v8313_v46  ;;  %v8965_v54 = vpop.f32.mrf.mxu0  ;;  %11238 = vmatpush3.msra.mxu1 %v9704_v44 }
 0x6be   :  { %v9560_v58 = vadd.f32 %v16921_v11, %v9491_v57  ;;  %v9423_v24 = vmax.f32 %v9358_v22, 0.0  ;;  %v8130_v37 = vpop.f32.mrf.mxu1  ;;  %v9161_v23 = vadd.f32 %v8965_v54, %v8441_v19  ;;  %v9703_v22 = vld [vmem:[#allocation7 + $0x10] sm:$0xff]  ;;  %11239 = vmatprep.subr.mxu1 %v9719_v0 }
 0x6bf   :  { %v9290_v4 = vld [vmem:[#allocation4 + $0xf0] sm:$0xff]  ;;  %v8314_v52 = vadd.f32 %v8130_v37, %v7594_v7  ;;  %v12995_v48 = vpop.f32.mrf.mxu0  ;;  %11240 = vmatpush3.msra.mxu1 %v9703_v22 }
 0x6c0   :  { %9625 = vst.msk [vmem:[#allocation4 + $0xe0] sm:$0xff] %vm722_vm2, %v9560_v58  ;;  %v9492_v3 = vmul.f32 %v16915_v51, %v9423_v24  ;;  %v9359_v50 = vadd.f32 %v16903_v56, %v9290_v4  ;;  %9226 = vst.msk [vmem:[#allocation4 + $0x100] sm:$0xff] %vm722_vm2, %v9161_v23  ;;  %v12801_v47 = vpop.f32.mrf.mxu1  ;;  %v8442_v10 = vld [vmem:[#allocation4 + $0x108] sm:$0xff]  ;;  %v9718_v58 = vld [vmem:[#allocation7 + $0x88] sm:$0xff] }
 0x6c1   :  { %8379 = vst.msk [vmem:[#allocation4 + $0x118] sm:$0xff] %vm722_vm2, %v8314_v52  ;;  %v8970_v2 = vpop.f32.mrf.mxu0  ;;  %v9702_v37 = vld [vmem:[#allocation7 + $0x8] sm:$0xff]  ;;  %v7598_v52 = vld [vmem:[#allocation4 + $0x138] sm:$0xff]  ;;  %11241 = vmatprep.subr.mxu1 %v9718_v58 }
 0x6c2   :  { %v9561_v18 = vadd.f32 %v16921_v11, %v9492_v3  ;;  %v9424_v6 = vmax.f32 %v9359_v50, 0.0  ;;  %v8135_v29 = vpop.f32.mrf.mxu1  ;;  %v9162_v31 = vadd.f32 %v8970_v2, %v8442_v10  ;;  %v9717_v50 = vld [vmem:[#allocation7 + $0x80] sm:$0xff]  ;;  %11242 = vmatpush3.msra.mxu1 %v9702_v37  ;;  %v7602_v37 = vld [vmem:[#allocation4 + $0x158] sm:$0xff] }
 0x6c3   :  { %v9291_v55 = vld [vmem:[#allocation4 + $0xf8] sm:$0xff]  ;;  %v8315_v28 = vadd.f32 %v8135_v29, %v7595_v1  ;;  %v12998_v13 = vpop.f32.mrf.mxu0  ;;  %11243 = vmatprep.subr.mxu1 %v9717_v50 }
 0x6c4   :  { %9626 = vst.msk [vmem:[#allocation4 + $0xe8] sm:$0xff] %vm722_vm2, %v9561_v18  ;;  %v9493_v60 = vmul.f32 %v16915_v51, %v9424_v6  ;;  %v9360_v63 = vadd.f32 %v16903_v56, %v9291_v55  ;;  %9227 = vst.msk [vmem:[#allocation4 + $0x108] sm:$0xff] %vm722_vm2, %v9162_v31  ;;  %v12804_v27 = vpop.f32.mrf.mxu1  ;;  %v8443_v62 = vld [vmem:[#allocation4 + $0x110] sm:$0xff]  ;;  %v9701_v18 = vld [vmem:[#allocation7] sm:$0xff] }
 0x6c5   :  { %8380 = vst.msk [vmem:[#allocation4 + $0x120] sm:$0xff] %vm722_vm2, %v8315_v28  ;;  %v8975_v38 = vpop.f32.mrf.mxu0  ;;  %11244 = vmatpush3.msra.mxu1 %v9701_v18 }
 0x6c6   :  { %v9562_v32 = vadd.f32 %v16921_v11, %v9493_v60  ;;  %v9425_v59 = vmax.f32 %v9360_v63, 0.0  ;;  %v8140_v15 = vpop.f32.mrf.mxu1  ;;  %v9163_v61 = vadd.f32 %v8975_v38, %v8443_v62  ;;  %v7599_v60 = vld [vmem:[#allocation4 + $0x140] sm:$0xff]  ;;  %v17192_v38 = vld [vmem:[#allocation2 + $0x1c0] sm:$0xff] }
 0x6c7   :  { %v9292_v30 = vld [vmem:[#allocation4 + $0x100] sm:$0xff]  ;;  %v8316_v17 = vadd.f32 %v8140_v15, %v7596_v20  ;;  %v13001_v8 = vpop.f32.mrf.mxu0  ;;  %13092 = vmatprep.subr.mxu1 %v17192_v38 }
 0x6c8   :  { %9627 = vst.msk [vmem:[#allocation4 + $0xf0] sm:$0xff] %vm722_vm2, %v9562_v32  ;;  %v9494_v5 = vmul.f32 %v16915_v51, %v9425_v59  ;;  %v9361_v36 = vadd.f32 %v16903_v56, %v9292_v30  ;;  %9228 = vst.msk [vmem:[#allocation4 + $0x110] sm:$0xff] %vm722_vm2, %v9163_v61  ;;  %v12807_v35 = vpop.f32.mrf.mxu1  ;;  %v8444_v40 = vld [vmem:[#allocation4 + $0x118] sm:$0xff]  ;;  %v7600_v8 = vld [vmem:[#allocation4 + $0x148] sm:$0xff] }
 0x6c9   :  { %8381 = vst.msk [vmem:[#allocation4 + $0x128] sm:$0xff] %vm722_vm2, %v8316_v17  ;;  %v8980_v34 = vpop.f32.mrf.mxu0 }
 0x6ca   :  { %v9563_v14 = vadd.f32 %v16921_v11, %v9494_v5  ;;  %v9426_v25 = vmax.f32 %v9361_v36, 0.0  ;;  %v8145_v39 = vpop.f32.mrf.mxu1  ;;  %v9164_v53 = vadd.f32 %v8980_v34, %v8444_v40 }
 0x6cb   :  { %v9293_v46 = vld [vmem:[#allocation4 + $0x108] sm:$0xff]  ;;  %v8317_v33 = vadd.f32 %v8145_v39, %v7597_v26  ;;  %v13004_v57 = vpop.f32.mrf.mxu0  ;;  %v7601_v39 = vld [vmem:[#allocation4 + $0x150] sm:$0xff] }
 0x6cc   :  { %9628 = vst.msk [vmem:[#allocation4 + $0xf8] sm:$0xff] %vm722_vm2, %v9563_v14  ;;  %v9495_v49 = vmul.f32 %v16915_v51, %v9426_v25  ;;  %v9362_v19 = vadd.f32 %v16903_v56, %v9293_v46  ;;  %9229 = vst.msk [vmem:[#allocation4 + $0x118] sm:$0xff] %vm722_vm2, %v9164_v53  ;;  %v12810_v54 = vpop.f32.mrf.mxu1  ;;  %v8445_v24 = vld [vmem:[#allocation4 + $0x120] sm:$0xff] }
 0x6cd   :  { %8382 = vst.msk [vmem:[#allocation4 + $0x130] sm:$0xff] %vm722_vm2, %v8317_v33  ;;  %v8985_v7 = vpop.f32.mrf.mxu0 }
 0x6ce   :  { %v9564_v23 = vadd.f32 %v16921_v11, %v9495_v49  ;;  %v9427_v4 = vmax.f32 %v9362_v19, 0.0  ;;  %v8150_v48 = vpop.f32.mrf.mxu1  ;;  %v9165_v3 = vadd.f32 %v8985_v7, %v8445_v24 }
 0x6cf   :  { %v9294_v47 = vld [vmem:[#allocation4 + $0x110] sm:$0xff]  ;;  %v8318_v10 = vadd.f32 %v8150_v48, %v7598_v52  ;;  %v13007_v2 = vpop.f32.mrf.mxu0 }
 0x6d0   :  { %9629 = vst.msk [vmem:[#allocation4 + $0x100] sm:$0xff] %vm722_vm2, %v9564_v23  ;;  %v9496_v6 = vmul.f32 %v16915_v51, %v9427_v4  ;;  %v9363_v1 = vadd.f32 %v16903_v56, %v9294_v47  ;;  %9230 = vst.msk [vmem:[#allocation4 + $0x120] sm:$0xff] %vm722_vm2, %v9165_v3  ;;  %v12813_v29 = vpop.f32.mrf.mxu1  ;;  %v8446_v31 = vld [vmem:[#allocation4 + $0x128] sm:$0xff] }
 0x6d1   :  { %8383 = vst.msk [vmem:[#allocation4 + $0x138] sm:$0xff] %vm722_vm2, %v8318_v10  ;;  %v8990_v55 = vpop.f32.mrf.mxu0  ;;  %v7603_v29 = vld [vmem:[#allocation4 + $0x160] sm:$0xff] }
 0x6d2   :  { %v9565_v28 = vadd.f32 %v16921_v11, %v9496_v6  ;;  %v9428_v13 = vmax.f32 %v9363_v1, 0.0  ;;  %v8155_v63 = vpop.f32.mrf.mxu1  ;;  %v9166_v27 = vadd.f32 %v8990_v55, %v8446_v31 }
 0x6d3   :  { %v9295_v42 = vld [vmem:[#allocation4 + $0x118] sm:$0xff]  ;;  %v8319_v16 = vadd.f32 %v8155_v63, %v7599_v60  ;;  %v13010_v62 = vpop.f32.mrf.mxu0 }
 0x6d4   :  { %9630 = vst.msk [vmem:[#allocation4 + $0x108] sm:$0xff] %vm722_vm2, %v9565_v28  ;;  %v9497_v32 = vmul.f32 %v16915_v51, %v9428_v13  ;;  %v9364_v59 = vadd.f32 %v16903_v56, %v9295_v42  ;;  %9231 = vst.msk [vmem:[#allocation4 + $0x128] sm:$0xff] %vm722_vm2, %v9166_v27  ;;  %v12816_v20 = vpop.f32.mrf.mxu1  ;;  %v8447_v15 = vld [vmem:[#allocation4 + $0x130] sm:$0xff] }
 0x6d5   :  { %8384 = vst.msk [vmem:[#allocation4 + $0x140] sm:$0xff] %vm722_vm2, %v8319_v16  ;;  %v8995_v61 = vpop.f32.mrf.mxu0  ;;  %v7604_v20 = vld [vmem:[#allocation4 + $0x168] sm:$0xff] }
 0x6d6   :  { %v9566_v30 = vadd.f32 %v16921_v11, %v9497_v32  ;;  %v9429_v17 = vmax.f32 %v9364_v59, 0.0  ;;  %v8160_v5 = vpop.f32.mrf.mxu1  ;;  %v9167_v36 = vadd.f32 %v8995_v61, %v8447_v15 }
 0x6d7   :  { %v9296_v35 = vld [vmem:[#allocation4 + $0x120] sm:$0xff]  ;;  %v8320_v12 = vadd.f32 %v8160_v5, %v7600_v8  ;;  %v13013_v9 = vpop.f32.mrf.mxu0 }
 0x6d8   :  { %9631 = vst.msk [vmem:[#allocation4 + $0x110] sm:$0xff] %vm722_vm2, %v9566_v30  ;;  %v9498_v40 = vmul.f32 %v16915_v51, %v9429_v17  ;;  %v9365_v34 = vadd.f32 %v16903_v56, %v9296_v35  ;;  %9232 = vst.msk [vmem:[#allocation4 + $0x130] sm:$0xff] %vm722_vm2, %v9167_v36  ;;  %v12819_v21 = vpop.f32.mrf.mxu1  ;;  %v8448_v44 = vld [vmem:[#allocation4 + $0x138] sm:$0xff] }
 0x6d9   :  { %8385 = vst.msk [vmem:[#allocation4 + $0x148] sm:$0xff] %vm722_vm2, %v8320_v12  ;;  %v9000_v14 = vpop.f32.mrf.mxu0  ;;  %v7605_v21 = vld [vmem:[#allocation4 + $0x170] sm:$0xff] }
 0x6da   :  { %v9567_v25 = vadd.f32 %v16921_v11, %v9498_v40  ;;  %v9430_v26 = vmax.f32 %v9365_v34, 0.0  ;;  %v8165_v53 = vpop.f32.mrf.mxu1  ;;  %v9168_v0 = vadd.f32 %v9000_v14, %v8448_v44 }
 0x6db   :  { %v9297_v46 = vld [vmem:[#allocation4 + $0x128] sm:$0xff]  ;;  %v8321_v33 = vadd.f32 %v8165_v53, %v7601_v39  ;;  %v13016_v57 = vpop.f32.mrf.mxu0 }
 0x6dc   :  { %9632 = vst.msk [vmem:[#allocation4 + $0x118] sm:$0xff] %vm722_vm2, %v9567_v25  ;;  %v9499_v22 = vmul.f32 %v16915_v51, %v9430_v26  ;;  %v9366_v49 = vadd.f32 %v16903_v56, %v9297_v46  ;;  %9233 = vst.msk [vmem:[#allocation4 + $0x138] sm:$0xff] %vm722_vm2, %v9168_v0  ;;  %v12822_v19 = vpop.f32.mrf.mxu1  ;;  %v8449_v54 = vld [vmem:[#allocation4 + $0x140] sm:$0xff] }
 0x6dd   :  { %8386 = vst.msk [vmem:[#allocation4 + $0x150] sm:$0xff] %vm722_vm2, %v8321_v33  ;;  %v9005_v58 = vpop.f32.mrf.mxu0  ;;  %v7606_v19 = vld [vmem:[#allocation4 + $0x178] sm:$0xff] }
 0x6de   :  { %v9568_v24 = vadd.f32 %v16921_v11, %v9499_v22  ;;  %v9431_v7 = vmax.f32 %v9366_v49, 0.0  ;;  %v8170_v23 = vpop.f32.mrf.mxu1  ;;  %v9169_v4 = vadd.f32 %v9005_v58, %v8449_v54 }
 0x6df   :  { %v9298_v52 = vld [vmem:[#allocation4 + $0x130] sm:$0xff]  ;;  %v8322_v48 = vadd.f32 %v8170_v23, %v7602_v37  ;;  %v13019_v3 = vpop.f32.mrf.mxu0 }
 0x6e0   :  { %9633 = vst.msk [vmem:[#allocation4 + $0x120] sm:$0xff] %vm722_vm2, %v9568_v24  ;;  %v9500_v50 = vmul.f32 %v16915_v51, %v9431_v7  ;;  %v9367_v47 = vadd.f32 %v16903_v56, %v9298_v52  ;;  %9234 = vst.msk [vmem:[#allocation4 + $0x140] sm:$0xff] %vm722_vm2, %v9169_v4  ;;  %v12825_v10 = vpop.f32.mrf.mxu1  ;;  %v8450_v2 = vld [vmem:[#allocation4 + $0x148] sm:$0xff] }
 0x6e1   :  { %8387 = vst.msk [vmem:[#allocation4 + $0x158] sm:$0xff] %vm722_vm2, %v8322_v48  ;;  %v9010_v18 = vpop.f32.mrf.mxu0  ;;  %v7607_v10 = vld [vmem:[#allocation4 + $0x180] sm:$0xff] }
 0x6e2   :  { %v9569_v6 = vadd.f32 %v16921_v11, %v9500_v50  ;;  %v9432_v1 = vmax.f32 %v9367_v47, 0.0  ;;  %v8175_v31 = vpop.f32.mrf.mxu1  ;;  %v9170_v55 = vadd.f32 %v9010_v18, %v8450_v2 }
 0x6e3   :  { %v9299_v28 = vld [vmem:[#allocation4 + $0x138] sm:$0xff]  ;;  %v8323_v13 = vadd.f32 %v8175_v31, %v7603_v29  ;;  %v13022_v60 = vpop.f32.mrf.mxu0 }
 0x6e4   :  { %9634 = vst.msk [vmem:[#allocation4 + $0x128] sm:$0xff] %vm722_vm2, %v9569_v6  ;;  %v9501_v63 = vmul.f32 %v16915_v51, %v9432_v1  ;;  %v9368_v27 = vadd.f32 %v16903_v56, %v9299_v28  ;;  %9235 = vst.msk [vmem:[#allocation4 + $0x148] sm:$0xff] %vm722_vm2, %v9170_v55  ;;  %v12828_v42 = vpop.f32.mrf.mxu1  ;;  %v8451_v16 = vld [vmem:[#allocation4 + $0x150] sm:$0xff] }
 0x6e5   :  { %8388 = vst.msk [vmem:[#allocation4 + $0x160] sm:$0xff] %vm722_vm2, %v8323_v13  ;;  %v9015_v62 = vpop.f32.mrf.mxu0  ;;  %v7608_v42 = vld [vmem:[#allocation4 + $0x188] sm:$0xff] }
 0x6e6   :  { %v9570_v32 = vadd.f32 %v16921_v11, %v9501_v63  ;;  %v9433_v59 = vmax.f32 %v9368_v27, 0.0  ;;  %v8180_v15 = vpop.f32.mrf.mxu1  ;;  %v9171_v61 = vadd.f32 %v9015_v62, %v8451_v16 }
 0x6e7   :  { %v9300_v30 = vld [vmem:[#allocation4 + $0x140] sm:$0xff]  ;;  %v8324_v17 = vadd.f32 %v8180_v15, %v7604_v20  ;;  %v13025_v8 = vpop.f32.mrf.mxu0 }
 0x6e8   :  { %9635 = vst.msk [vmem:[#allocation4 + $0x130] sm:$0xff] %vm722_vm2, %v9570_v32  ;;  %v9502_v5 = vmul.f32 %v16915_v51, %v9433_v59  ;;  %v9369_v36 = vadd.f32 %v16903_v56, %v9300_v30  ;;  %9236 = vst.msk [vmem:[#allocation4 + $0x150] sm:$0xff] %vm722_vm2, %v9171_v61  ;;  %v12831_v35 = vpop.f32.mrf.mxu1  ;;  %v8452_v12 = vld [vmem:[#allocation4 + $0x158] sm:$0xff] }
 0x6e9   :  { %8389 = vst.msk [vmem:[#allocation4 + $0x168] sm:$0xff] %vm722_vm2, %v8324_v17  ;;  %v9020_v9 = vpop.f32.mrf.mxu0  ;;  %v7609_v35 = vld [vmem:[#allocation4 + $0x190] sm:$0xff] }
 0x6ea   :  { %v9571_v40 = vadd.f32 %v16921_v11, %v9502_v5  ;;  %v9434_v34 = vmax.f32 %v9369_v36, 0.0  ;;  %v8185_v44 = vpop.f32.mrf.mxu1  ;;  %v9172_v14 = vadd.f32 %v9020_v9, %v8452_v12 }
 0x6eb   :  { %v9301_v25 = vld [vmem:[#allocation4 + $0x148] sm:$0xff]  ;;  %v8325_v26 = vadd.f32 %v8185_v44, %v7605_v21  ;;  %v13028_v39 = vpop.f32.mrf.mxu0 }
 0x6ec   :  { %9636 = vst.msk [vmem:[#allocation4 + $0x138] sm:$0xff] %vm722_vm2, %v9571_v40  ;;  %v9503_v53 = vmul.f32 %v16915_v51, %v9434_v34  ;;  %v9370_v0 = vadd.f32 %v16903_v56, %v9301_v25  ;;  %9237 = vst.msk [vmem:[#allocation4 + $0x158] sm:$0xff] %vm722_vm2, %v9172_v14  ;;  %v12834_v46 = vpop.f32.mrf.mxu1  ;;  %v8453_v33 = vld [vmem:[#allocation4 + $0x160] sm:$0xff] }
 0x6ed   :  { %8390 = vst.msk [vmem:[#allocation4 + $0x170] sm:$0xff] %vm722_vm2, %v8325_v26  ;;  %v9025_v57 = vpop.f32.mrf.mxu0  ;;  %v7610_v46 = vld [vmem:[#allocation4 + $0x198] sm:$0xff] }
 0x6ee   :  { %v9572_v22 = vadd.f32 %v16921_v11, %v9503_v53  ;;  %v9435_v49 = vmax.f32 %v9370_v0, 0.0  ;;  %v8190_v54 = vpop.f32.mrf.mxu1  ;;  %v9173_v58 = vadd.f32 %v9025_v57, %v8453_v33 }
 0x6ef   :  { %v9302_v24 = vld [vmem:[#allocation4 + $0x150] sm:$0xff]  ;;  %v8326_v7 = vadd.f32 %v8190_v54, %v7606_v19  ;;  %v13031_v37 = vpop.f32.mrf.mxu0 }
 0x6f0   :  { %9637 = vst.msk [vmem:[#allocation4 + $0x140] sm:$0xff] %vm722_vm2, %v9572_v22  ;;  %v9504_v23 = vmul.f32 %v16915_v51, %v9435_v49  ;;  %v9371_v4 = vadd.f32 %v16903_v56, %v9302_v24  ;;  %9238 = vst.msk [vmem:[#allocation4 + $0x160] sm:$0xff] %vm722_vm2, %v9173_v58  ;;  %v12837_v52 = vpop.f32.mrf.mxu1  ;;  %v8454_v48 = vld [vmem:[#allocation4 + $0x168] sm:$0xff] }
 0x6f1   :  { %8391 = vst.msk [vmem:[#allocation4 + $0x178] sm:$0xff] %vm722_vm2, %v8326_v7  ;;  %v9030_v3 = vpop.f32.mrf.mxu0  ;;  %v7611_v52 = vld [vmem:[#allocation4 + $0x1a0] sm:$0xff] }
 0x6f2   :  { %v9573_v50 = vadd.f32 %v16921_v11, %v9504_v23  ;;  %v9436_v47 = vmax.f32 %v9371_v4, 0.0  ;;  %v8195_v2 = vpop.f32.mrf.mxu1  ;;  %v9174_v18 = vadd.f32 %v9030_v3, %v8454_v48 }
 0x6f3   :  { %v9303_v6 = vld [vmem:[#allocation4 + $0x158] sm:$0xff]  ;;  %v8327_v1 = vadd.f32 %v8195_v2, %v7607_v10  ;;  %v13034_v29 = vpop.f32.mrf.mxu0 }
 0x6f4   :  { %9638 = vst.msk [vmem:[#allocation4 + $0x148] sm:$0xff] %vm722_vm2, %v9573_v50  ;;  %v9505_v31 = vmul.f32 %v16915_v51, %v9436_v47  ;;  %v9372_v55 = vadd.f32 %v16903_v56, %v9303_v6  ;;  %9239 = vst.msk [vmem:[#allocation4 + $0x168] sm:$0xff] %vm722_vm2, %v9174_v18  ;;  %v12840_v28 = vpop.f32.mrf.mxu1  ;;  %v8455_v13 = vld [vmem:[#allocation4 + $0x170] sm:$0xff] }
 0x6f5   :  { %8392 = vst.msk [vmem:[#allocation4 + $0x180] sm:$0xff] %vm722_vm2, %v8327_v1  ;;  %v9035_v60 = vpop.f32.mrf.mxu0  ;;  %v7612_v28 = vld [vmem:[#allocation4 + $0x1a8] sm:$0xff] }
 0x6f6   :  { %v9574_v63 = vadd.f32 %v16921_v11, %v9505_v31  ;;  %v9437_v27 = vmax.f32 %v9372_v55, 0.0  ;;  %v8200_v16 = vpop.f32.mrf.mxu1  ;;  %v9175_v62 = vadd.f32 %v9035_v60, %v8455_v13 }
 0x6f7   :  { %v9304_v32 = vld [vmem:[#allocation4 + $0x160] sm:$0xff]  ;;  %v8328_v59 = vadd.f32 %v8200_v16, %v7608_v42  ;;  %v13037_v20 = vpop.f32.mrf.mxu0 }
 0x6f8   :  { %9639 = vst.msk [vmem:[#allocation4 + $0x150] sm:$0xff] %vm722_vm2, %v9574_v63  ;;  %v9506_v15 = vmul.f32 %v16915_v51, %v9437_v27  ;;  %v9373_v61 = vadd.f32 %v16903_v56, %v9304_v32  ;;  %9240 = vst.msk [vmem:[#allocation4 + $0x170] sm:$0xff] %vm722_vm2, %v9175_v62  ;;  %v12843_v30 = vpop.f32.mrf.mxu1  ;;  %v8456_v17 = vld [vmem:[#allocation4 + $0x178] sm:$0xff] }
 0x6f9   :  { %8393 = vst.msk [vmem:[#allocation4 + $0x188] sm:$0xff] %vm722_vm2, %v8328_v59  ;;  %v9040_v8 = vpop.f32.mrf.mxu0  ;;  %v7613_v30 = vld [vmem:[#allocation4 + $0x1b0] sm:$0xff] }
 0x6fa   :  { %v9575_v5 = vadd.f32 %v16921_v11, %v9506_v15  ;;  %v9438_v36 = vmax.f32 %v9373_v61, 0.0  ;;  %v8205_v12 = vpop.f32.mrf.mxu1  ;;  %v9176_v9 = vadd.f32 %v9040_v8, %v8456_v17 }
 0x6fb   :  { %v9305_v40 = vld [vmem:[#allocation4 + $0x168] sm:$0xff]  ;;  %v8329_v34 = vadd.f32 %v8205_v12, %v7609_v35  ;;  %v13040_v21 = vpop.f32.mrf.mxu0 }
 0x6fc   :  { %9640 = vst.msk [vmem:[#allocation4 + $0x158] sm:$0xff] %vm722_vm2, %v9575_v5  ;;  %v9507_v44 = vmul.f32 %v16915_v51, %v9438_v36  ;;  %v9374_v14 = vadd.f32 %v16903_v56, %v9305_v40  ;;  %9241 = vst.msk [vmem:[#allocation4 + $0x178] sm:$0xff] %vm722_vm2, %v9176_v9  ;;  %v12846_v25 = vpop.f32.mrf.mxu1  ;;  %v8457_v26 = vld [vmem:[#allocation4 + $0x180] sm:$0xff] }
 0x6fd   :  { %8394 = vst.msk [vmem:[#allocation4 + $0x190] sm:$0xff] %vm722_vm2, %v8329_v34  ;;  %v9045_v39 = vpop.f32.mrf.mxu0  ;;  %v7614_v25 = vld [vmem:[#allocation4 + $0x1b8] sm:$0xff] }
 0x6fe   :  { %v9576_v53 = vadd.f32 %v16921_v11, %v9507_v44  ;;  %v9439_v0 = vmax.f32 %v9374_v14, 0.0  ;;  %v8210_v33 = vpop.f32.mrf.mxu1  ;;  %v9177_v57 = vadd.f32 %v9045_v39, %v8457_v26 }
 0x6ff   :  { %v9306_v22 = vld [vmem:[#allocation4 + $0x170] sm:$0xff]  ;;  %v8330_v49 = vadd.f32 %v8210_v33, %v7610_v46  ;;  %v13043_v19 = vpop.f32.mrf.mxu0 }
 0x700   :  { %9641 = vst.msk [vmem:[#allocation4 + $0x160] sm:$0xff] %vm722_vm2, %v9576_v53  ;;  %v9508_v54 = vmul.f32 %v16915_v51, %v9439_v0  ;;  %v9375_v58 = vadd.f32 %v16903_v56, %v9306_v22  ;;  %9242 = vst.msk [vmem:[#allocation4 + $0x180] sm:$0xff] %vm722_vm2, %v9177_v57  ;;  %v12849_v24 = vpop.f32.mrf.mxu1  ;;  %v8458_v7 = vld [vmem:[#allocation4 + $0x188] sm:$0xff] }
 0x701   :  { %8395 = vst.msk [vmem:[#allocation4 + $0x198] sm:$0xff] %vm722_vm2, %v8330_v49  ;;  %v9050_v37 = vpop.f32.mrf.mxu0  ;;  %v7615_v24 = vld [vmem:[#allocation4 + $0x1c0] sm:$0xff] }
 0x702   :  { %v9577_v23 = vadd.f32 %v16921_v11, %v9508_v54  ;;  %v9440_v4 = vmax.f32 %v9375_v58, 0.0  ;;  %v8215_v48 = vpop.f32.mrf.mxu1  ;;  %v9178_v3 = vadd.f32 %v9050_v37, %v8458_v7 }
 0x703   :  { %v9307_v50 = vld [vmem:[#allocation4 + $0x178] sm:$0xff]  ;;  %v8331_v47 = vadd.f32 %v8215_v48, %v7611_v52  ;;  %v13046_v10 = vpop.f32.mrf.mxu0 }
 0x704   :  { %9642 = vst.msk [vmem:[#allocation4 + $0x168] sm:$0xff] %vm722_vm2, %v9577_v23  ;;  %v9509_v2 = vmul.f32 %v16915_v51, %v9440_v4  ;;  %v9376_v18 = vadd.f32 %v16903_v56, %v9307_v50  ;;  %9243 = vst.msk [vmem:[#allocation4 + $0x188] sm:$0xff] %vm722_vm2, %v9178_v3  ;;  %v12852_v6 = vpop.f32.mrf.mxu1  ;;  %v8459_v1 = vld [vmem:[#allocation4 + $0x190] sm:$0xff]  ;;  %v9673_v23 = vld [vmem:[#allocation4 + $0xa0] sm:$0xff] }
 0x705   :  { %8396 = vst.msk [vmem:[#allocation4 + $0x1a0] sm:$0xff] %vm722_vm2, %v8331_v47  ;;  %v9055_v29 = vpop.f32.mrf.mxu0  ;;  %v9670_v10 = vld [vmem:[#allocation4 + $0x30] sm:$0xff] }
 0x706   :  { %v9578_v31 = vadd.f32 %v16921_v11, %v9509_v2  ;;  %v9441_v55 = vmax.f32 %v9376_v18, 0.0  ;;  %v8220_v13 = vpop.f32.mrf.mxu1  ;;  %v9179_v60 = vadd.f32 %v9055_v29, %v8459_v1  ;;  %v9672_v2 = vld [vmem:[#allocation4 + $0x90] sm:$0xff] }
 0x707   :  { %v9308_v63 = vld [vmem:[#allocation4 + $0x180] sm:$0xff]  ;;  %v8332_v27 = vadd.f32 %v8220_v13, %v7612_v28  ;;  %v13049_v42 = vpop.f32.mrf.mxu0  ;;  %v9674_v1 = vmax.f32 %v9672_v2, %v9673_v23  ;;  %v9684_v29 = vld [vmem:[#allocation4 + $0x110] sm:$0xff]  ;;  %v7616_v28 = vld [vmem:[#allocation4 + $0x1c8] sm:$0xff] }
 0x708   :  { %9643 = vst.msk [vmem:[#allocation4 + $0x170] sm:$0xff] %vm722_vm2, %v9578_v31  ;;  %v9510_v16 = vmul.f32 %v16915_v51, %v9441_v55  ;;  %v9377_v62 = vadd.f32 %v16903_v56, %v9308_v63  ;;  %9244 = vst.msk [vmem:[#allocation4 + $0x190] sm:$0xff] %vm722_vm2, %v9179_v60  ;;  %v12855_v32 = vpop.f32.mrf.mxu1  ;;  %v8460_v59 = vld [vmem:[#allocation4 + $0x198] sm:$0xff]  ;;  %v9669_v63 = vld [vmem:[#allocation4 + $0x20] sm:$0xff] }
 0x709   :  { %8397 = vst.msk [vmem:[#allocation4 + $0x1a8] sm:$0xff] %vm722_vm2, %v8332_v27  ;;  %v9060_v20 = vpop.f32.mrf.mxu0  ;;  %v9683_v27 = vld [vmem:[#allocation4 + $0x100] sm:$0xff]  ;;  %v9671_v32 = vmax.f32 %v9669_v63, %v9670_v10  ;;  %v17317_v2 = vld [vmem:[#allocation2 + $0x1b8] sm:$0xff] }
 0x70a   :  { %v9579_v15 = vadd.f32 %v16921_v11, %v9510_v16  ;;  %v9442_v61 = vmax.f32 %v9377_v62, 0.0  ;;  %v8225_v17 = vpop.f32.mrf.mxu1  ;;  %v9180_v8 = vadd.f32 %v9060_v20, %v8460_v59 }
 0x70b   :  { %v9309_v5 = vld [vmem:[#allocation4 + $0x188] sm:$0xff]  ;;  %v8333_v36 = vadd.f32 %v8225_v17, %v7613_v30  ;;  %v13052_v35 = vpop.f32.mrf.mxu0  ;;  %v9685_v17 = vmax.f32 %v9683_v27, %v9684_v29 }
 0x70c   :  { %9644 = vst.msk [vmem:[#allocation4 + $0x178] sm:$0xff] %vm722_vm2, %v9579_v15  ;;  %v9511_v12 = vmul.f32 %v16915_v51, %v9442_v61  ;;  %v9378_v9 = vadd.f32 %v16903_v56, %v9309_v5  ;;  %9245 = vst.msk [vmem:[#allocation4 + $0x198] sm:$0xff] %vm722_vm2, %v9180_v8  ;;  %v12858_v40 = vpop.f32.mrf.mxu1  ;;  %v8461_v34 = vld [vmem:[#allocation4 + $0x1a0] sm:$0xff]  ;;  %v9675_v35 = vmax.f32 %v9671_v32, %v9674_v1 }
 0x70d   :  { %8398 = vst.msk [vmem:[#allocation4 + $0x1b0] sm:$0xff] %vm722_vm2, %v8333_v36  ;;  %v9065_v21 = vpop.f32.mrf.mxu0  ;;  %v7617_v40 = vld [vmem:[#allocation4 + $0x1d0] sm:$0xff]  ;;  %v7619_v1 = vld [vmem:[#allocation4 + $0x1e0] sm:$0xff] }
 0x70e   :  { %v9580_v44 = vadd.f32 %v16921_v11, %v9511_v12  ;;  %v9443_v14 = vmax.f32 %v9378_v9, 0.0  ;;  %v8230_v26 = vpop.f32.mrf.mxu1  ;;  %v9181_v39 = vadd.f32 %v9065_v21, %v8461_v34 }
 0x70f   :  { %v9310_v53 = vld [vmem:[#allocation4 + $0x190] sm:$0xff]  ;;  %v8334_v0 = vadd.f32 %v8230_v26, %v7614_v25  ;;  %v13055_v46 = vpop.f32.mrf.mxu0 }
 0x710   :  { %9645 = vst.msk [vmem:[#allocation4 + $0x180] sm:$0xff] %vm722_vm2, %v9580_v44  ;;  %v9512_v33 = vmul.f32 %v16915_v51, %v9443_v14  ;;  %v9379_v57 = vadd.f32 %v16903_v56, %v9310_v53  ;;  %9246 = vst.msk [vmem:[#allocation4 + $0x1a0] sm:$0xff] %vm722_vm2, %v9181_v39  ;;  %v12861_v22 = vpop.f32.mrf.mxu1  ;;  %v8462_v49 = vld [vmem:[#allocation4 + $0x1a8] sm:$0xff]  ;;  %v9686_v59 = vld [vmem:[#allocation4 + $0x170] sm:$0xff] }
 0x711   :  { %8399 = vst.msk [vmem:[#allocation4 + $0x1b8] sm:$0xff] %vm722_vm2, %v8334_v0  ;;  %v9070_v19 = vpop.f32.mrf.mxu0  ;;  %v1639_v22 = vld [vmem:[#allocation2 + $0x198] sm:$0xff] }
 0x712   :  { %v9581_v54 = vadd.f32 %v16921_v11, %v9512_v33  ;;  %v9444_v58 = vmax.f32 %v9379_v57, 0.0  ;;  %v8235_v7 = vpop.f32.mrf.mxu1  ;;  %v9182_v37 = vadd.f32 %v9070_v19, %v8462_v49 }
 0x713   :  { %v9311_v4 = vld [vmem:[#allocation4 + $0x198] sm:$0xff]  ;;  %v8335_v52 = vadd.f32 %v8235_v7, %v7615_v24  ;;  %v13058_v48 = vpop.f32.mrf.mxu0 }
 0x714   :  { %9646 = vst.msk [vmem:[#allocation4 + $0x188] sm:$0xff] %vm722_vm2, %v9581_v54  ;;  %v9513_v3 = vmul.f32 %v16915_v51, %v9444_v58  ;;  %v9380_v50 = vadd.f32 %v16903_v56, %v9311_v4  ;;  %9247 = vst.msk [vmem:[#allocation4 + $0x1a8] sm:$0xff] %vm722_vm2, %v9182_v37  ;;  %v12864_v47 = vpop.f32.mrf.mxu1  ;;  %v8463_v18 = vld [vmem:[#allocation4 + $0x1b0] sm:$0xff]  ;;  %v7618_v54 = vld [vmem:[#allocation4 + $0x1d8] sm:$0xff] }
 0x715   :  { %8400 = vst.msk [vmem:[#allocation4 + $0x1c0] sm:$0xff] %vm722_vm2, %v8335_v52  ;;  %v9075_v6 = vpop.f32.mrf.mxu0 }
 0x716   :  { %v9582_v31 = vadd.f32 %v16921_v11, %v9513_v3  ;;  %v9445_v55 = vmax.f32 %v9380_v50, 0.0  ;;  %v8240_v13 = vpop.f32.mrf.mxu1  ;;  %v9183_v60 = vadd.f32 %v9075_v6, %v8463_v18  ;;  %v13169_v3 = vld [vmem:[#allocation2 + $0x178] sm:$0xff] }
 0x717   :  { %v9312_v42 = vld [vmem:[#allocation4 + $0x1a0] sm:$0xff]  ;;  %v8336_v16 = vadd.f32 %v8240_v13, %v7616_v28  ;;  %v13061_v62 = vpop.f32.mrf.mxu0  ;;  %v17314_v50 = vmax.f32 %v13169_v3, %v1639_v22 }
 0x718   :  { %v9687_v20 = vld [vmem:[#allocation4 + $0x180] sm:$0xff]  ;;  %9647 = vst.msk [vmem:[#allocation4 + $0x190] sm:$0xff] %vm722_vm2, %v9582_v31  ;;  %v9514_v15 = vmul.f32 %v16915_v51, %v9445_v55  ;;  %v9381_v61 = vadd.f32 %v16903_v56, %v9312_v42  ;;  %9248 = vst.msk [vmem:[#allocation4 + $0x1b0] sm:$0xff] %vm722_vm2, %v9183_v60  ;;  %v12867_v30 = vpop.f32.mrf.mxu1  ;;  %v8464_v5 = vld [vmem:[#allocation4 + $0x1b8] sm:$0xff]  ;;  %v17327_v42 = vmax.f32 %v1639_v22, %v17317_v2 }
 0x719   :  { %v9688_v8 = vmax.f32 %v9686_v59, %v9687_v20  ;;  %8401 = vst.msk [vmem:[#allocation4 + $0x1c8] sm:$0xff] %vm722_vm2, %v8336_v16  ;;  %v9080_v36 = vpop.f32.mrf.mxu0  ;;  %v7620_v20 = vld [vmem:[#allocation4 + $0x1e8] sm:$0xff] }
 0x71a   :  { %v9583_v12 = vadd.f32 %v16921_v11, %v9514_v15  ;;  %v9446_v9 = vmax.f32 %v9381_v61, 0.0  ;;  %v8245_v34 = vpop.f32.mrf.mxu1  ;;  %v9184_v21 = vadd.f32 %v9080_v36, %v8464_v5 }
 0x71b   :  { %v9689_v44 = vmax.f32 %v9685_v17, %v9688_v8  ;;  %v9313_v14 = vld [vmem:[#allocation4 + $0x1a8] sm:$0xff]  ;;  %v8337_v25 = vadd.f32 %v8245_v34, %v7617_v40  ;;  %v13064_v26 = vpop.f32.mrf.mxu0 }
 0x71c   :  { %9648 = vst.msk [vmem:[#allocation4 + $0x198] sm:$0xff] %vm722_vm2, %v9583_v12  ;;  %v9515_v39 = vmul.f32 %v16915_v51, %v9446_v9  ;;  %v9382_v53 = vadd.f32 %v16903_v56, %v9313_v14  ;;  %9249 = vst.msk [vmem:[#allocation4 + $0x1b8] sm:$0xff] %vm722_vm2, %v9184_v21  ;;  %v12870_v0 = vpop.f32.mrf.mxu1  ;;  %v8465_v33 = vld [vmem:[#allocation4 + $0x1c0] sm:$0xff]  ;;  %v7621_v21 = vld [vmem:[#allocation4 + $0x1f0] sm:$0xff] }
 0x71d   :  { %v13145_v46 = vpack.i.bf16 %v9675_v35, %v9689_v44  ;;  %8402 = vst.msk [vmem:[#allocation4 + $0x1d0] sm:$0xff] %vm722_vm2, %v8337_v25  ;;  %v9085_v57 = vpop.f32.mrf.mxu0 }
 0x71e   :  { %v9584_v49 = vadd.f32 %v16921_v11, %v9515_v39  ;;  %v9447_v19 = vmax.f32 %v9382_v53, 0.0  ;;  %v8250_v58 = vpop.f32.mrf.mxu1  ;;  %v9185_v24 = vadd.f32 %v9085_v57, %v8465_v33 }
 0x71f   :  { %13146 = vrot.lane.b32.xlu1 %v13145_v46, %s13224_s2  ;;  %v9314_v7 = vld [vmem:[#allocation4 + $0x1b0] sm:$0xff]  ;;  %v8338_v37 = vadd.f32 %v8250_v58, %v7618_v54  ;;  %v13067_v23 = vpop.f32.mrf.mxu0 }
 0x720   :  { %9649 = vst.msk [vmem:[#allocation4 + $0x1a0] sm:$0xff] %vm722_vm2, %v9584_v49  ;;  %v9516_v4 = vmul.f32 %v16915_v51, %v9447_v19  ;;  %v9383_v52 = vadd.f32 %v16903_v56, %v9314_v7  ;;  %9250 = vst.msk [vmem:[#allocation4 + $0x1c0] sm:$0xff] %vm722_vm2, %v9185_v24  ;;  %v12873_v48 = vpop.f32.mrf.mxu1  ;;  %v8466_v47 = vld [vmem:[#allocation4 + $0x1c8] sm:$0xff]  ;;  %v7622_v19 = vld [vmem:[#allocation4 + $0x1f8] sm:$0xff] }
 0x721   :  { %8403 = vst.msk [vmem:[#allocation4 + $0x1d8] sm:$0xff] %vm722_vm2, %v8338_v37  ;;  %v9090_v10 = vpop.f32.mrf.mxu0 }
 0x722   :  { %v9585_v18 = vadd.f32 %v16921_v11, %v9516_v4  ;;  %v9448_v6 = vmax.f32 %v9383_v52, 0.0  ;;  %v8255_v29 = vpop.f32.mrf.mxu1  ;;  %v9186_v31 = vadd.f32 %v9090_v10, %v8466_v47 }
 0x723   :  { %1692 = vrot.lane.b32.xlu1 %v17314_v50, %s13223_s14  ;;  %v9315_v55 = vld [vmem:[#allocation4 + $0x1b8] sm:$0xff]  ;;  %v8339_v28 = vadd.f32 %v8255_v29, %v7619_v1  ;;  %v13070_v13 = vpop.f32.mrf.mxu0 }
 0x724   :  { %9650 = vst.msk [vmem:[#allocation4 + $0x1a8] sm:$0xff] %vm722_vm2, %v9585_v18  ;;  %v9517_v60 = vmul.f32 %v16915_v51, %v9448_v6  ;;  %v9384_v63 = vadd.f32 %v16903_v56, %v9315_v55  ;;  %9251 = vst.msk [vmem:[#allocation4 + $0x1c8] sm:$0xff] %vm722_vm2, %v9186_v31  ;;  %v12876_v27 = vpop.f32.mrf.mxu1  ;;  %v8467_v16 = vld [vmem:[#allocation4 + $0x1d0] sm:$0xff]  ;;  %v7623_v18 = vld [vmem:[#allocation4 + $0x200] sm:$0xff] }
 0x725   :  { %8404 = vst.msk [vmem:[#allocation4 + $0x1e0] sm:$0xff] %vm722_vm2, %v8339_v28  ;;  %v9095_v62 = vpop.f32.mrf.mxu0 }
 0x726   :  { %v9586_v32 = vadd.f32 %v16921_v11, %v9517_v60  ;;  %v9449_v59 = vmax.f32 %v9384_v63, 0.0  ;;  %v8260_v15 = vpop.f32.mrf.mxu1  ;;  %v9187_v61 = vadd.f32 %v9095_v62, %v8467_v16 }
 0x727   :  { %1694 = vrot.lane.b32.xlu1 %v17327_v42, %s13223_s14  ;;  %v9316_v30 = vld [vmem:[#allocation4 + $0x1c0] sm:$0xff]  ;;  %v8340_v17 = vadd.f32 %v8260_v15, %v7620_v20  ;;  %v13073_v8 = vpop.f32.mrf.mxu0 }
 0x728   :  { %9651 = vst.msk [vmem:[#allocation4 + $0x1b0] sm:$0xff] %vm722_vm2, %v9586_v32  ;;  %v9518_v5 = vmul.f32 %v16915_v51, %v9449_v59  ;;  %v9385_v36 = vadd.f32 %v16903_v56, %v9316_v30  ;;  %9252 = vst.msk [vmem:[#allocation4 + $0x1d0] sm:$0xff] %vm722_vm2, %v9187_v61  ;;  %v12879_v35 = vpop.f32.mrf.mxu1  ;;  %v8468_v12 = vld [vmem:[#allocation4 + $0x1d8] sm:$0xff] }
 0x729   :  { %8405 = vst.msk [vmem:[#allocation4 + $0x1e8] sm:$0xff] %vm722_vm2, %v8340_v17  ;;  %v9100_v9 = vpop.f32.mrf.mxu0 }
 0x72a   :  { %v9587_v40 = vadd.f32 %v16921_v11, %v9518_v5  ;;  %v9450_v34 = vmax.f32 %v9385_v36, 0.0  ;;  %v8265_v44 = vpop.f32.mrf.mxu1  ;;  %v9188_v14 = vadd.f32 %v9100_v9, %v8468_v12 }
 0x72b   :  { %v9317_v25 = vld [vmem:[#allocation4 + $0x1c8] sm:$0xff]  ;;  %v8341_v26 = vadd.f32 %v8265_v44, %v7621_v21  ;;  %v13076_v39 = vpop.f32.mrf.mxu0 }
 0x72c   :  { %9652 = vst.msk [vmem:[#allocation4 + $0x1b8] sm:$0xff] %vm722_vm2, %v9587_v40  ;;  %v9519_v53 = vmul.f32 %v16915_v51, %v9450_v34  ;;  %v9386_v0 = vadd.f32 %v16903_v56, %v9317_v25  ;;  %9253 = vst.msk [vmem:[#allocation4 + $0x1d8] sm:$0xff] %vm722_vm2, %v9188_v14  ;;  %v12882_v46 = vpop.f32.mrf.mxu1  ;;  %v8469_v33 = vld [vmem:[#allocation4 + $0x1e0] sm:$0xff] }
 0x72d   :  { %8406 = vst.msk [vmem:[#allocation4 + $0x1f0] sm:$0xff] %vm722_vm2, %v8341_v26  ;;  %v9105_v57 = vpop.f32.mrf.mxu0  ;;  %v9666_v26 = vld [vmem:[#allocation4 + $0x80] sm:$0xff]  ;;  %v9677_v46 = vld [vmem:[#allocation4 + $0xf0] sm:$0xff] }
 0x72e   :  { %v9588_v22 = vadd.f32 %v16921_v11, %v9519_v53  ;;  %v9451_v49 = vmax.f32 %v9386_v0, 0.0  ;;  %v8270_v54 = vpop.f32.mrf.mxu1  ;;  %v9189_v58 = vadd.f32 %v9105_v57, %v8469_v33  ;;  %v9680_v39 = vld [vmem:[#allocation4 + $0x160] sm:$0xff]  ;;  %v9663_v53 = vld [vmem:[#allocation4 + $0x10] sm:$0xff] }
 0x72f   :  { %v9318_v24 = vld [vmem:[#allocation4 + $0x1d0] sm:$0xff]  ;;  %v8342_v7 = vadd.f32 %v8270_v54, %v7622_v19  ;;  %v13079_v37 = vpop.f32.mrf.mxu0  ;;  %v9676_v19 = vld [vmem:[#allocation4 + $0xe0] sm:$0xff] }
 0x730   :  { %9653 = vst.msk [vmem:[#allocation4 + $0x1c0] sm:$0xff] %vm722_vm2, %v9588_v22  ;;  %v9520_v23 = vmul.f32 %v16915_v51, %v9451_v49  ;;  %v9387_v4 = vadd.f32 %v16903_v56, %v9318_v24  ;;  %9254 = vst.msk [vmem:[#allocation4 + $0x1e0] sm:$0xff] %vm722_vm2, %v9189_v58  ;;  %v12885_v52 = vpop.f32.mrf.mxu1  ;;  %v8470_v48 = vld [vmem:[#allocation4 + $0x1e8] sm:$0xff]  ;;  %v9665_v0 = vld [vmem:[#allocation4 + $0x70] sm:$0xff]  ;;  %v9678_v58 = vmax.f32 %v9676_v19, %v9677_v46 }
 0x731   :  { %8407 = vst.msk [vmem:[#allocation4 + $0x1f8] sm:$0xff] %vm722_vm2, %v8342_v7  ;;  %v9110_v3 = vpop.f32.mrf.mxu0  ;;  %v9679_v33 = vld [vmem:[#allocation4 + $0x150] sm:$0xff]  ;;  %v9667_v57 = vmax.f32 %v9665_v0, %v9666_v26  ;;  %v9662_v49 = vld [vmem:[#allocation4] sm:$0xff] }
 0x732   :  { %v9589_v47 = vadd.f32 %v16921_v11, %v9520_v23  ;;  %v9452_v10 = vmax.f32 %v9387_v4, 0.0  ;;  %v8275_v6 = vpop.f32.mrf.mxu1  ;;  %v9190_v1 = vadd.f32 %v9110_v3, %v8470_v48  ;;  %v9681_v22 = vmax.f32 %v9679_v33, %v9680_v39  ;;  %v9833_v3 = vld [vmem:[%s17481_s7 + $0x78] sm:$0xff] }
 0x733   :  { %v9319_v29 = vld [vmem:[#allocation4 + $0x1d8] sm:$0xff]  ;;  %v8343_v31 = vadd.f32 %v8275_v6, %v7623_v18  ;;  %v13082_v55 = vpop.f32.mrf.mxu0  ;;  %v9664_v54 = vmax.f32 %v9662_v49, %v9663_v53  ;;  %v9832_v18 = vld [vmem:[%s17481_s7 + $0x70] sm:$0xff] }
 0x734   :  { %9654 = vst.msk [vmem:[#allocation4 + $0x1c8] sm:$0xff] %vm722_vm2, %v9589_v47  ;;  %v9521_v28 = vmul.f32 %v16915_v51, %v9452_v10  ;;  %v9388_v13 = vadd.f32 %v16903_v56, %v9319_v29  ;;  %9255 = vst.msk [vmem:[#allocation4 + $0x1e8] sm:$0xff] %vm722_vm2, %v9190_v1  ;;  %v12888_v60 = vpop.f32.mrf.mxu1  ;;  %v8471_v63 = vld [vmem:[#allocation4 + $0x1f0] sm:$0xff]  ;;  %v9682_v4 = vmax.f32 %v9678_v58, %v9681_v22  ;;  %v9831_v6 = vld [vmem:[%s17481_s7 + $0x68] sm:$0xff]  ;;  %v17489_v58 = vlaneseq }
 0x735   :  { %8408 = vst.msk [vmem:[#allocation4 + $0x200] sm:$0xff] %vm722_vm2, %v8343_v31  ;;  %v9115_v27 = vpop.f32.mrf.mxu0  ;;  %v9668_v7 = vmax.f32 %v9664_v54, %v9667_v57  ;;  %v9830_v29 = vld [vmem:[%s17481_s7 + $0x60] sm:$0xff]  ;;  %v9829_v31 = vld [vmem:[%s17481_s7 + $0x58] sm:$0xff] }
 0x736   :  { %v9590_v16 = vadd.f32 %v16921_v11, %v9521_v28  ;;  %v9453_v62 = vmax.f32 %v9388_v13, 0.0  ;;  %v9191_v32 = vadd.f32 %v9115_v27, %v8471_v63  ;;  %v9827_v28 = vld [vmem:[%s17481_s7 + $0x48] sm:$0xff]  ;;  %v9826_v13 = vld [vmem:[%s17481_s7 + $0x40] sm:$0xff]  ;;  %v9825_v63 = vld [vmem:[%s17481_s7 + $0x38] sm:$0xff] }
 0x737   :  { %v9320_v59 = vld [vmem:[#allocation4 + $0x1e0] sm:$0xff]  ;;  %v13085_v20 = vpop.f32.mrf.mxu0 }
 0x738   :  { %9655 = vst.msk [vmem:[#allocation4 + $0x1d0] sm:$0xff] %vm722_vm2, %v9590_v16  ;;  %v9522_v15 = vmul.f32 %v16915_v51, %v9453_v62  ;;  %v9389_v61 = vadd.f32 %v16903_v56, %v9320_v59  ;;  %9256 = vst.msk [vmem:[#allocation4 + $0x1f0] sm:$0xff] %vm722_vm2, %v9191_v32  ;;  %v9824_v27 = vld [vmem:[%s17481_s7 + $0x30] sm:$0xff]  ;;  %v9823_v16 = vld [vmem:[%s17481_s7 + $0x28] sm:$0xff] }
 0x739   :  { %v9822_v62 = vld [vmem:[%s17481_s7 + $0x20] sm:$0xff]  ;;  %v9821_v32 = vld [vmem:[%s17481_s7 + $0x18] sm:$0xff]  ;;  %v9820_v20 = vld [vmem:[%s17481_s7 + $0x10] sm:$0xff] }
 0x73a   :  { %v9591_v30 = vadd.f32 %v16921_v11, %v9522_v15  ;;  %v9454_v17 = vmax.f32 %v9389_v61, 0.0  ;;  %v13170_v59 = vld [vmem:[#allocation2 + $0x1c0] sm:$0xff]  ;;  %v9819_v15 = vld [vmem:[%s17481_s7 + $0x8] sm:$0xff] }
 0x73b   :  { %v9321_v8 = vld [vmem:[#allocation4 + $0x1e8] sm:$0xff]  ;;  %v9700_v61 = vld [vmem:[%s17480_s6] sm:$0x7] }
 0x73c   :  { %9656 = vst.msk [vmem:[#allocation4 + $0x1d8] sm:$0xff] %vm722_vm2, %v9591_v30  ;;  %v9523_v5 = vmul.f32 %v16915_v51, %v9454_v17  ;;  %v9390_v36 = vadd.f32 %v16903_v56, %v9321_v8  ;;  %v9736_v17 = vrot.slane %v9700_v61, %v13390_v41  ;;  %v8473_v26 = vld [vmem:[#allocation4 + $0x200] sm:$0xff] }
 0x73e   :  { %v9592_v35 = vadd.f32 %v16921_v11, %v9523_v5  ;;  %v9455_v12 = vmax.f32 %v9390_v36, 0.0  ;;  %v9810_v36 = vrot.slane %v9700_v61, %v13398_v45 }
 0x73f   :  { %v9322_v9 = vld [vmem:[#allocation4 + $0x1f0] sm:$0xff] }
 0x740   :  { %9657 = vst.msk [vmem:[#allocation4 + $0x1e0] sm:$0xff] %vm722_vm2, %v9592_v35  ;;  %v9524_v40 = vmul.f32 %v16915_v51, %v9455_v12  ;;  %v9391_v34 = vadd.f32 %v16903_v56, %v9322_v9  ;;  %v9815_v12 = vrot.slane %v9700_v61, %v17488_v43 }
 0x742   :  { %v9593_v21 = vadd.f32 %v16921_v11, %v9524_v40  ;;  %v9456_v44 = vmax.f32 %v9391_v34, 0.0  ;;  %v8472_v34 = vld [vmem:[#allocation4 + $0x1f8] sm:$0xff] }
 0x744   :  { %9658 = vst.msk [vmem:[#allocation4 + $0x1e8] sm:$0xff] %vm722_vm2, %v9593_v21  ;;  %v9525_v14 = vmul.f32 %v16915_v51, %v9456_v44 }
 0x746   :  { %v9594_v25 = vadd.f32 %v16921_v11, %v9525_v14 }
 0x748   :  { %9659 = vst.msk [vmem:[#allocation4 + $0x1f0] sm:$0xff] %vm722_vm2, %v9594_v25 }
 0x791   :  { %v13147_v24 = vpop.permute.xlu1 %13146 }
 0x792   :  { %v13149_v37 = vunpack.i.h.bf16 %v13147_v24  ;;  %v13148_v23 = vunpack.i.l.bf16 %v13147_v24  ;;  %v9912_v24 = vand.u32 127, %v17489_v58 }
 0x794   :  { %v9698_v52 = vsel %vm722_vm2, %v9668_v7, %v13149_v37  ;;  %v9699_v48 = vsel %vm722_vm2, %v9682_v4, %v13148_v23  ;;  %v10590_v7 = vld [vmem:[%s17482_s8] ss:$0 sm:$0xff]  ;;  %vm9913_vm4 = vcmp.lt.s32.totalorder %v9912_v24, 10 }
 0x795   :  { %v1693_v47 = vpop.permute.xlu1 %1692  ;;  %9801 = vmatprep.mubr.f32.mxu1 %v9699_v48 }
 0x796   :  { %v1723_v10 = vmax.f32 %v17314_v50, %v1693_v47  ;;  %9802 = vmatmul.mubr.f32.vlgmr.msra.gmra.mxu1 %v9698_v52 }
 0x797   :  { %13093 = vmatpush3.msra.mxu1 %v9833_v3  ;;  %13124 = vmatprep.mubr.msk.f32.mxu1 %vm13222_vm1, %v17192_v38 }
 0x798   :  { %1737 = vst.msk [vmem:[#allocation3 + $0x2f8] sm:$0xff] %vm879_vm3, %v1723_v10  ;;  %13094 = vmatprep.subr.mxu1 %v17192_v38 }
 0x799   :  { %v1695_v1 = vpop.permute.xlu1 %1694  ;;  %13095 = vmatpush3.msra.mxu1 %v9832_v18 }
 0x79a   :  { %v1724_v50 = vmax.f32 %v17327_v42, %v1695_v1  ;;  %13096 = vmatprep.subr.mxu1 %v17192_v38  ;;  %v9828_v42 = vld [vmem:[%s17481_s7 + $0x50] sm:$0xff] }
 0x79b   :  { %13097 = vmatpush3.msra.mxu1 %v9831_v6 }
 0x79c   :  { %1738 = vst.msk [vmem:[#allocation3 + $0x300] sm:$0xff] %vm879_vm3, %v1724_v50  ;;  %13098 = vmatprep.subr.mxu1 %v17192_v38 }
 0x79d   :  { %13099 = vmatpush3.msra.mxu1 %v9830_v29 }
 0x79e   :  { %13100 = vmatprep.subr.mxu1 %v17192_v38 }
 0x79f   :  { %v8537_v55 = vld [vmem:[#allocation3 + $0x2f8] sm:$0xff]  ;;  %13101 = vmatpush3.msra.mxu1 %v9829_v31 }
 0x7a0   :  { %13087 = vmatmul.mubr.msk.f32.gmra.mxu0 %vm879_vm3, %v8537_v55  ;;  %13102 = vmatprep.subr.mxu1 %v17192_v38  ;;  %v1641_v31 = vld [vmem:[#allocation2 + $0x1d8] sm:$0xff] }
 0x7a1   :  { %13089 = vmatprep.mubr.msk.f32.mxu0 %vm13222_vm1, %v17192_v38  ;;  %13103 = vmatpush3.msra.mxu1 %v9828_v42  ;;  %v1655_v42 = vmax.f32 %v17317_v2, %v1641_v31 }
 0x7a2   :  { %13104 = vmatprep.subr.mxu1 %v17192_v38 }
 0x7a3   :  { %v8538_v60 = vld [vmem:[#allocation3 + $0x300] sm:$0xff]  ;;  %13105 = vmatpush3.msra.mxu1 %v9827_v28 }
 0x7a4   :  { %13090 = vmatmul.mubr.msk.f32.gmra.mxu0 %vm879_vm3, %v8538_v60  ;;  %13106 = vmatprep.subr.mxu1 %v17192_v38 }
 0x7a5   :  { %13107 = vmatpush3.msra.mxu1 %v9826_v13 }
 0x7a6   :  { %13108 = vmatprep.subr.mxu1 %v17192_v38 }
 0x7a7   :  { %13109 = vmatpush3.msra.mxu1 %v9825_v63 }
 0x7a8   :  { %13110 = vmatprep.subr.mxu1 %v17192_v38 }
 0x7a9   :  { %13111 = vmatpush3.msra.mxu1 %v9824_v27 }
 0x7aa   :  { %13112 = vmatprep.subr.mxu1 %v17192_v38 }
 0x7ab   :  { %13113 = vmatpush3.msra.mxu1 %v9823_v16 }
 0x7ac   :  { %13114 = vmatprep.subr.mxu1 %v17192_v38 }
 0x7ad   :  { %13115 = vmatpush3.msra.mxu1 %v9822_v62 }
 0x7ae   :  { %13116 = vmatprep.subr.mxu1 %v17192_v38  ;;  %v9818_v38 = vld [vmem:[%s17481_s7] sm:$0xff] }
 0x7af   :  { %13117 = vmatpush3.msra.mxu1 %v9821_v32 }
 0x7b0   :  { %13118 = vmatprep.subr.mxu1 %v13170_v59 }
 0x7b1   :  { %13119 = vmatpush3.msra.mxu1 %v9820_v20 }
 0x7b2   :  { %13120 = vmatprep.subr.mxu1 %v13170_v59 }
 0x7b3   :  { %13121 = vmatpush3.msra.mxu1 %v9819_v15 }
 0x7b4   :  { %13122 = vmatprep.subr.mxu1 %v13170_v59 }
 0x7b5   :  { %13123 = vmatpush3.msra.mxu1 %v9818_v38 }
 0x856   :  { %v11245_v30 = vpop.f32.mrf.mxu1 }
 0x858   :  { %v11246_v8 = vpop.f32.mrf.mxu1 }
 0x859   :  { %v11247_v5 = vadd.f32 %v11246_v8, %v11245_v30 }
 0x85b   :  { %v9804_v35 = vadd.f32 %v11247_v5, %v9736_v17 }
 0x85d   :  { %v9811_v9 = vmul.f32 %v9810_v36, %v9804_v35 }
 0x85f   :  { %v9816_v40 = vadd.f32 %v9815_v12, %v9811_v9 }
 0x860   :  { %v9120_v21 = vpop.f32.mrf.mxu0 }
 0x861   :  { %v9817_v44 = vmax.f32 %v9816_v40, 0.0  ;;  %v9192_v14 = vadd.f32 %v9120_v21, %v8472_v34 }
 0x862   :  { %v13088_v25 = vpop.f32.mrf.mxu0 }
 0x863   :  { %9257 = vst.msk [vmem:[#allocation4 + $0x1f8] sm:$0xff] %vm722_vm2, %v9192_v14  ;;  %13125 = vmatmul.mubr.f32.vlgmr.msra.gmra.mxu1 %v9817_v44 }
 0x864   :  { %v9125_v39 = vpop.f32.mrf.mxu0 }
 0x865   :  { %v9193_v41 = vadd.f32 %v9125_v39, %v8473_v26 }
 0x866   :  { %v13091_v53 = vpop.f32.mrf.mxu0 }
 0x867   :  { %9258 = vst.msk [vmem:[#allocation4 + $0x200] sm:$0xff] %vm722_vm2, %v9193_v41 }
 0x86a   :  { %v9323_v45 = vld [vmem:[#allocation4 + $0x1f8] sm:$0xff] }
 0x86b   :  { %v9392_v0 = vadd.f32 %v16903_v56, %v9323_v45 }
 0x86d   :  { %v9457_v43 = vmax.f32 %v9392_v0, 0.0 }
 0x86e   :  { %v9324_v46 = vld [vmem:[#allocation4 + $0x200] sm:$0xff] }
 0x86f   :  { %v9526_v33 = vmul.f32 %v16915_v51, %v9457_v43  ;;  %v9393_v57 = vadd.f32 %v16903_v56, %v9324_v46 }
 0x871   :  { %v9595_v22 = vadd.f32 %v16921_v11, %v9526_v33  ;;  %v9458_v49 = vmax.f32 %v9393_v57, 0.0 }
 0x873   :  { %9660 = vst.msk [vmem:[#allocation4 + $0x1f8] sm:$0xff] %vm722_vm2, %v9595_v22  ;;  %v9527_v19 = vmul.f32 %v16915_v51, %v9458_v49 }
 0x875   :  { %v9596_v54 = vadd.f32 %v16921_v11, %v9527_v19 }
 0x877   :  { %9661 = vst.msk [vmem:[#allocation4 + $0x200] sm:$0xff] %vm722_vm2, %v9596_v54 }
 0x923   :  { %v9907_v37 = vpop.f32.mrf.mxu1 }
 0x924   :  { %v9908_v56 = vadd.f32 %v10590_v7, %v9907_v37 }
 0x925   :  { %v13126_v23 = vpop.f32.mrf.mxu1 }
 0x926   :  { %v9916_v4 = vsel %vm9913_vm4, %v9908_v56, -1e+30 }
 0x927   :  { %9917 = vmax.xlane.f32.xlu0 %v9916_v4 }
 0x9b0   :  { %v9918_v52 = vpop.xlane.xlu0 %9917 }
 0x9b1   :  { %v9919_v48 = vsub.f32 %v9916_v4, %v9918_v52 }
 0x9b3   :  { %v9920_v3 = vmul.f32 1.442695, %v9919_v48 }
 0x9b5   :  { %13150 = vpow2.f32 %v9920_v3 }
 0x9c2   :  { %v13151_v51 = vpop.eup %13150 }
 0x9c3   :  { %9922 = vadd.xlane.f32.xlu1 %v13151_v51 }
 0xa4c   :  { %v9923_v11 = vpop.xlane.xlu1 %9922 }
 0xa4d   :  { %13152 = vrcp.f32 %v9923_v11 }
 0xa5a   :  { %v13153_v47 = vpop.eup %13152 }
 0xa5b   :  { %v9925_v10 = vmul.f32 %v13153_v47, %v13151_v51 }
 0xa5d   :  { %v9927_v18 = vsel %vm9913_vm4, %v9925_v10, -1e+30  ;;  %9926 = vst [vmem:[%s17483_s9] sm:$0xff] %v9925_v10 }
 0xa5e   :  { %9928 = vmax.xlane.f32.xlu0 %v9927_v18 }
 0xae7   :  { %v9929_v6 = vpop.xlane.xlu0 %9928 }
 0xae8   :  { %v9930_v1 = vsub.f32 %v9927_v18, %v9929_v6 }
 0xaea   :  { %v9931_v50 = vmul.f32 1.442695, %v9930_v1 }
 0xaec   :  { %13154 = vpow2.f32 %v9931_v50 }
 0xaf9   :  { %v13155_v29 = vpop.eup %13154 }
 0xafa   :  { %9933 = vadd.xlane.f32.xlu0 %v13155_v29 }
 0xb10   :  { %1696 = vrot.lane.b32.xlu0 %v1655_v42, %s13223_s14 }
 0xb83   :  { %v9934_v55 = vpop.xlane.xlu0 %9933 }
 0xb84   :  { %13156 = vrcp.f32 %v9934_v55 }
 0xb87   :  { %v1697_v28 = vpop.permute.xlu0 %1696 }
 0xb91   :  { %v13157_v13 = vpop.eup %13156 }
 0xb92   :  { %v9936_v60 = vmul.f32 %v13157_v13, %v13155_v29 }
 0xb94   :  { %10591 = vst [vmem:[%s17483_s9 + $0x8] sm:$0xff] %v9936_v60 }
 0xb95   :  { %9943 = vsyncpa [#allocation6], 1 }
 0xb96   :  { %9944 = vsyncpa [#allocation8], 1 }

</bundles_post_ra>
